<compile_context>
chip_gen: v5e
topology: v5e:2x2
jax: 0.10.0
libtpu: 0.0.40
codegen_flags: <defaults>
</compile_context>

<pallas_src>
import functools

import jax
import jax.numpy as jnp
import numpy as np
from jax import lax
from jax.experimental import pallas as pl
from jax.experimental.pallas import tpu as pltpu

F32 = jnp.float32
PREC_LOOP = lax.Precision.DEFAULT   # single-pass bf16 for the serial recurrence
PREC_TAIL = lax.Precision.HIGHEST   # multi-pass f32 for the off-chain tail

H1 = 4          # per-branch LSTM hidden size
H2 = 2 * H1     # fused hidden width (H branch + L branch)
G = 4 * H2      # fused gate width: [i(8) | f(8) | o(8) | g(8)]
NSIG = 3 * H2   # rows 0:24 are the sigmoid gates (i, f, o)


# ------------------------------- kernel --------------------------------------

def encoder_kernel(
    # batch-tiled activations (batch on lanes)
    xh_ref, xl_ref, xflat_ref,
    # layer-0 input projection params (G, 1); sigmoid rows pre-scaled by 0.5
    wih0h_ref, wih0l_ref, b0_ref,
    # fused recurrent weights (gates on rows): (32, 8), (32, 16), (32, 1)
    w0t_ref, w1t_ref, b1l_ref,
    # linearH + linearL folded into one (256, 8T) matrix + (256, 1) bias
    wdt_ref, bhl_ref,
    # dense tail, transposed (out_features, in_features)
    wl1t_ref, bl1_ref, wl2t_ref, bl2_ref,
    wpt_ref, bpt_ref, w3at_ref, w3bt_ref, b3t_ref,
    # output (embedding_dim, B_block)
    out_ref,
    # scratch: staged layer-1 hiddens (8T, B_block)
    hseq_scr,
    *, unroll,
):
    T, BB = xh_ref.shape

    w0t = w0t_ref[...]                                     # (32, 8)
    w1t = w1t_ref[...]                                     # (32, 16)
    # Loop-invariant lane broadcasts, hoisted (JAX does not CSE broadcast_in_dim).
    wih0h = jnp.broadcast_to(wih0h_ref[...], (G, BB))
    wih0l = jnp.broadcast_to(wih0l_ref[...], (G, BB))
    b0 = jnp.broadcast_to(b0_ref[...], (G, BB))
    b1l = jnp.broadcast_to(b1l_ref[...], (G, BB))

    def lstm_cell(g, c):
        # g: (32, BB) fused pre-activations [i(8)|f(8)|o(8)|g(8)].  The i/f/o
        # rows carry a 0.5 pre-scale folded into the packed weights, so a
        # single tanh region covers the whole gate block and
        # sigmoid(v) = 0.5 * tanh(0.5 v) + 0.5.
        th = jnp.tanh(g)
        sig = 0.5 * th[0:NSIG] + 0.5
        gg = th[NSIG:G]
        c_new = sig[H2:2 * H2] * c + sig[0:H2] * gg
        h_new = sig[2 * H2:3 * H2] * jnp.tanh(c_new)
        return h_new, c_new

    def step(t, carry):
        h0, c0, h1, c1 = carry
        # layer-0 input projection: VPU only, independent of the recurrence,
        # so it hides under the serial chain latency.
        xh_t = xh_ref[pl.ds(t, 1), :]                      # (1, BB)
        xl_t = xl_ref[pl.ds(t, 1), :]                      # (1, BB)
        z_t = xh_t * wih0h + xl_t * wih0l + b0             # (32, BB)
        # layer 0 (both branches via block-diagonal recurrent weights)
        g0 = z_t + jnp.dot(w0t, h0, precision=PREC_LOOP,
                           preferred_element_type=F32)
        h0, c0 = lstm_cell(g0, c0)
        # layer 1: one merged K=16 dot over [h0_new ; h1_old]
        h01 = jnp.concatenate([h0, h1], axis=0)            # (16, BB)
        g1 = jnp.dot(w1t, h01, precision=PREC_LOOP,
                     preferred_element_type=F32) + b1l
        h1, c1 = lstm_cell(g1, c1)
        # stage h1 for the post-loop dense projection (no extra MXU in chain)
        row = pl.multiple_of(t * H2, H2)
        hseq_scr[pl.ds(row, H2), :] = h1
        return h0, c0, h1, c1

    zero = jnp.zeros((H2, BB), F32)
    lax.fori_loop(0, T, step, (zero, zero, zero, zero), unroll=unroll)

    # ---- dense tail: one K=8T contraction + small dots, all batch-on-lanes ---
    hlx = jnp.tanh(jnp.dot(wdt_ref[...], hseq_scr[...], precision=PREC_TAIL,
                           preferred_element_type=F32)
                   + bhl_ref[...])                                     # (256, BB)
    y = jnp.tanh(jnp.dot(wl1t_ref[...], hlx, precision=PREC_TAIL,
                         preferred_element_type=F32) + bl1_ref[...])   # (80, BB)
    y = jnp.tanh(jnp.dot(wl2t_ref[...], y, precision=PREC_TAIL,
                         preferred_element_type=F32) + bl2_ref[...])   # (40, BB)
    other = (jnp.dot(wpt_ref[...], xflat_ref[...], precision=PREC_TAIL,
                     preferred_element_type=F32) + bpt_ref[...])       # (40, BB)
    out = jnp.tanh(jnp.dot(w3at_ref[...], y, precision=PREC_TAIL,
                           preferred_element_type=F32)
                   + jnp.dot(w3bt_ref[...], other, precision=PREC_TAIL,
                             preferred_element_type=F32)
                   + b3t_ref[...])                                     # (E, BB)
    out_ref[...] = out.astype(out_ref.dtype)


# ----------------------------- weight packing ---------------------------------

def _gate_combine(wh, wl):
    """(.., 16) per-branch gate blocks [i,f,g,o] -> fused (.., 32)
    [iH,iL,fH,fL,oH,oL,gH,gL]."""
    iH, fH, gH, oH = wh[..., 0:4], wh[..., 4:8], wh[..., 8:12], wh[..., 12:16]
    iL, fL, gL, oL = wl[..., 0:4], wl[..., 4:8], wl[..., 8:12], wl[..., 12:16]
    return jnp.concatenate([iH, iL, fH, fL, oH, oL, gH, gL], axis=-1)


def _block_diag_combine(wh, wl):
    """(4, 16) + (4, 16) -> (8, 32) block-diagonal fused recurrent weight."""
    zh, zl = jnp.zeros_like(wh), jnp.zeros_like(wl)
    return jnp.concatenate([_gate_combine(wh, zl), _gate_combine(zh, wl)], axis=0)


def _fold_sigmoid_prescale(w):
    """Scale sigmoid-gate rows (i, f, o = rows 0:24) by 0.5 so that in-kernel
    sigmoid(v) == 0.5 * tanh(pre-activation row) + 0.5 with one tanh region."""
    return jnp.concatenate([0.5 * w[0:NSIG], w[NSIG:]], axis=0)


def _pick_batch_tile(B):
    if B <= 128:
        return B
    groups = pl.cdiv(B, 128)
    # Wide tiles amortize the serial recurrence; keep >= 2 grid tiles so both
    # v7x TensorCores get work, and cap at 256 lanes to bound vreg pressure.
    per_tile = max(1, min(2, groups // 2))
    return 128 * per_tile


def _padded_tile_bytes(shape, itemsize=4):
    """VMEM footprint of one buffer, honoring (8, 128) tile padding."""
    shape = tuple(int(s) for s in shape)
    if len(shape) < 2:
        shape = (1,) * (2 - len(shape)) + shape
    lead = int(np.prod(shape[:-2])) if len(shape) > 2 else 1
    sub = 8 * ((shape[-2] + 7) // 8)
    lane = 128 * ((shape[-1] + 127) // 128)
    return lead * sub * lane * itemsize


def encoder_forward(x, params, embedding_dim=64):
    B, T, nf = x.shape
    assert nf == 2
    pH, pL = params["H"], params["L"]

    # ---- activations, transposed so batch rides the 128-lane axis -----------
    xh = jnp.transpose(x[:, :, 0]).astype(F32)               # (T, B)
    xl = jnp.transpose(x[:, :, 1]).astype(F32)               # (T, B)
    # torch-style row-major flatten (B,T,2)->(B,2T), then transposed to (2T,B)
    xflat_t = jnp.transpose(x.reshape(B, 2 * T)).astype(F32)

    # ---- fused layer-0 input-projection params (gates on rows) ---------------
    z16 = jnp.zeros((1, 16), F32)
    wih0h = _fold_sigmoid_prescale(_gate_combine(pH["wih0"], z16).reshape(G, 1))
    wih0l = _fold_sigmoid_prescale(_gate_combine(z16, pL["wih0"]).reshape(G, 1))
    b0 = _fold_sigmoid_prescale(_gate_combine(pH["b0"], pL["b0"]).reshape(G, 1))

    # ---- fused recurrent weights, transposed for gT = W^T @ hT ---------------
    w0t = _fold_sigmoid_prescale(
        jnp.transpose(_block_diag_combine(pH["whh0"], pL["whh0"])))       # (32, 8)
    wih1t = jnp.transpose(_block_diag_combine(pH["wih1"], pL["wih1"]))    # (32, 8)
    whh1t = jnp.transpose(_block_diag_combine(pH["whh1"], pL["whh1"]))    # (32, 8)
    w1t = _fold_sigmoid_prescale(jnp.concatenate([wih1t, whh1t], axis=1))  # (32, 16)
    b1l = _fold_sigmoid_prescale(_gate_combine(pH["b1"], pL["b1"]).reshape(G, 1))

    # ---- linearH/linearL folded into one (256, 8T) matrix --------------------
    wd = jnp.zeros((T, H2, 256), F32)
    wd = wd.at[:, 0:H1, 0:128].set(params["wH"].reshape(T, H1, 128))
    wd = wd.at[:, H1:H2, 128:256].set(params["wL"].reshape(T, H1, 128))
    wdt = jnp.transpose(wd.reshape(H2 * T, 256))                          # (256, 8T)
    bhl = jnp.concatenate([params["bH"].reshape(128, 1),
                           params["bL"].reshape(128, 1)], axis=0)         # (256, 1)

    # ---- tail dense weights, transposed; cats folded into split matmuls ------
    wl1t, bl1 = jnp.transpose(params["w1"]), params["b1"].reshape(-1, 1)
    wl2t, bl2 = jnp.transpose(params["w2"]), params["b2"].reshape(-1, 1)
    wpt, bpt = jnp.transpose(params["wp"]), params["bp"].reshape(-1, 1)
    w3at = jnp.transpose(params["w3"][:40])
    w3bt = jnp.transpose(params["w3"][40:])
    b3t = params["b3"].reshape(-1, 1)

    weights = [wih0h, wih0l, b0, w0t, w1t, b1l, wdt, bhl,
               wl1t, bl1, wl2t, bl2, wpt, bpt, w3at, w3bt, b3t]

    # ---- grid: batch tiles on the lane axis ("parallel" => megacore on v7x) --
    BB = _pick_batch_tile(B)
    grid = (pl.cdiv(B, BB),)

    def _full(arr):
        zeros = (0,) * arr.ndim
        return pl.BlockSpec(arr.shape, lambda i, z=zeros: z)

    in_specs = ([pl.BlockSpec((T, BB), lambda i: (0, i)),
                 pl.BlockSpec((T, BB), lambda i: (0, i)),
                 pl.BlockSpec((2 * T, BB), lambda i: (0, i))]
                + [_full(w) for w in weights])
    out_specs = pl.BlockSpec((embedding_dim, BB), lambda i: (0, i))

    scratch_shapes = [pltpu.VMEM((T * H2, BB), F32)]      # staged layer-1 hiddens

    # ---- VMEM budget from padded (8, 128) tile footprints --------------------
    in_bytes = (sum(_padded_tile_bytes(s) for s in [(T, BB), (T, BB), (2 * T, BB)])
                + sum(_padded_tile_bytes(w.shape) for w in weights))
    out_bytes = _padded_tile_bytes((embedding_dim, BB))
    scratch_bytes = _padded_tile_bytes((T * H2, BB))
    # the auto-pipeline double-buffers every block (incl. invariant weights);
    # add a margin for compiler-internal scratch / semaphores.
    needed = 2 * (in_bytes + out_bytes) + scratch_bytes + (2 << 20)

    try:
        phys = int(getattr(pltpu.get_tpu_info(), "vmem_capacity_bytes", 64 << 20))
    except Exception:
        phys = 64 << 20                      # conservative (v7x-sized) fallback
    cap = max(32 << 20, phys - (12 << 20))   # headroom below physical VMEM
    vmem_limit = int(min(cap, max(16 << 20, needed)))

    unroll = True if T <= 32 else 8

    out_t = pl.pallas_call(
        functools.partial(encoder_kernel, unroll=unroll),
        out_shape=jax.ShapeDtypeStruct((embedding_dim, B), F32),
        grid_spec=pltpu.PrefetchScalarGridSpec(
            num_scalar_prefetch=0,
            grid=grid,
            in_specs=in_specs,
            out_specs=out_specs,
            scratch_shapes=scratch_shapes),
        compiler_params=pltpu.CompilerParams(
            dimension_semantics=("parallel",),
            vmem_limit_bytes=vmem_limit),
    )(xh, xl, xflat_t, *weights)

    # kernel output is the lane-dense (E, B) slab; hand back (B, E)
    return jnp.transpose(out_t)


# ----------------------------- pure-JAX reference -----------------------------

def _lstm2_ref(xs, p):
    """2-layer LSTM (input_size=1, hidden=4). xs: (B, T) -> (B, T, 4)."""
    B, T = xs.shape

    def step(carry, x_t):
        h0, c0, h1, c1 = carry
        g0 = x_t[:, None] * p["wih0"] + h0 @ p["whh0"] + p["b0"]
        i0, f0, gg0, o0 = jnp.split(g0, 4, axis=1)
        c0 = jax.nn.sigmoid(f0) * c0 + jax.nn.sigmoid(i0) * jnp.tanh(gg0)
        h0 = jax.nn.sigmoid(o0) * jnp.tanh(c0)
        g1 = h0 @ p["wih1"] + h1 @ p["whh1"] + p["b1"]
        i1, f1, gg1, o1 = jnp.split(g1, 4, axis=1)
        c1 = jax.nn.sigmoid(f1) * c1 + jax.nn.sigmoid(i1) * jnp.tanh(gg1)
        h1 = jax.nn.sigmoid(o1) * jnp.tanh(c1)
        return (h0, c0, h1, c1), h1

    init = tuple(jnp.zeros((B, 4), F32) for _ in range(4))
    _, ys = lax.scan(step, init, jnp.transpose(xs))
    return jnp.transpose(ys, (1, 0, 2))


def encoder_ref(x, params):
    B, T, _ = x.shape
    xflat = x.reshape(B, 2 * T)
    other = xflat @ params["wp"] + params["bp"]
    h_flat = _lstm2_ref(x[:, :, 0], params["H"]).reshape(B, 4 * T)
    l_flat = _lstm2_ref(x[:, :, 1], params["L"]).reshape(B, 4 * T)
    hx = jnp.tanh(h_flat @ params["wH"] + params["bH"])
    lx = jnp.tanh(l_flat @ params["wL"] + params["bL"])
    z = jnp.concatenate([hx, lx], axis=1)
    z = jnp.tanh(z @ params["w1"] + params["b1"])
    z = jnp.tanh(z @ params["w2"] + params["b2"])
    z = jnp.concatenate([z, other], axis=1)
    z = jnp.tanh(z @ params["w3"] + params["b3"])
    return z


# ----------------------------- parameter init ---------------------------------

def init_params(key, seq_len, embedding_dim=64):
    T = seq_len
    keys = iter(jax.random.split(key, 64))

    def mk(shape, fan_in):
        return (jax.random.normal(next(keys), shape, F32) / np.sqrt(fan_in)).astype(F32)

    def lstm_params():
        # weights stored (in_features, 4*hidden); gate column order [i, f, g, o]
        return {
            "wih0": mk((1, 16), 4.0), "whh0": mk((4, 16), 4.0), "b0": mk((1, 16), 4.0),
            "wih1": mk((4, 16), 4.0), "whh1": mk((4, 16), 4.0), "b1": mk((1, 16), 4.0),
        }

    return {
        "H": lstm_params(),
        "L": lstm_params(),
        "wH": mk((4 * T, 128), 4 * T), "bH": mk((1, 128), 4 * T),
        "wL": mk((4 * T, 128), 4 * T), "bL": mk((1, 128), 4 * T),
        "w1": mk((256, 80), 256), "b1": mk((1, 80), 256),
        "w2": mk((80, 40), 80), "b2": mk((1, 40), 80),
        "wp": mk((2 * T, 40), 2 * T), "bp": mk((1, 40), 2 * T),
        "w3": mk((80, embedding_dim), 80), "b3": mk((1, embedding_dim), 80),
    }


if __name__ == "__main__":
    key = jax.random.PRNGKey(0)
    kx, kp = jax.random.split(key)

    batch, seq_len, n_features, embedding_dim = 2, 8, 2, 64
    x = jax.random.normal(kx, (batch, seq_len, n_features), F32)
    params = init_params(kp, seq_len, embedding_dim)

    out = encoder_forward(x, params, embedding_dim)
    out = jax.block_until_ready(out)
    assert out.shape == (batch, embedding_dim)

    # f32-accurate reference under a *scoped* precision context
    with jax.default_matmul_precision("highest"):
        ref = jax.block_until_ready(encoder_ref(x, params))

    np.testing.assert_allclose(np.asarray(out), np.asarray(ref), atol=5e-3, rtol=5e-3)
    print("KERNEL_OK")
</pallas_src>

<mosaic_0001>
module attributes {stable_mosaic.version = 11 : i64} {
  func.func @encoder_kernel(%arg0: i32, %arg1: memref<8x2xf32, #tpu.memory_space<vmem>>, %arg2: memref<8x2xf32, #tpu.memory_space<vmem>>, %arg3: memref<16x2xf32, #tpu.memory_space<vmem>>, %arg4: memref<32x1xf32, #tpu.memory_space<vmem>>, %arg5: memref<32x1xf32, #tpu.memory_space<vmem>>, %arg6: memref<32x1xf32, #tpu.memory_space<vmem>>, %arg7: memref<32x8xf32, #tpu.memory_space<vmem>>, %arg8: memref<32x16xf32, #tpu.memory_space<vmem>>, %arg9: memref<32x1xf32, #tpu.memory_space<vmem>>, %arg10: memref<256x64xf32, #tpu.memory_space<vmem>>, %arg11: memref<256x1xf32, #tpu.memory_space<vmem>>, %arg12: memref<80x256xf32, #tpu.memory_space<vmem>>, %arg13: memref<80x1xf32, #tpu.memory_space<vmem>>, %arg14: memref<40x80xf32, #tpu.memory_space<vmem>>, %arg15: memref<40x1xf32, #tpu.memory_space<vmem>>, %arg16: memref<40x16xf32, #tpu.memory_space<vmem>>, %arg17: memref<40x1xf32, #tpu.memory_space<vmem>>, %arg18: memref<64x40xf32, #tpu.memory_space<vmem>>, %arg19: memref<64x40xf32, #tpu.memory_space<vmem>>, %arg20: memref<64x1xf32, #tpu.memory_space<vmem>>, %arg21: memref<64x2xf32, #tpu.memory_space<vmem>>, %arg22: memref<64x2xf32, #tpu.memory_space<vmem>>) attributes {dimension_semantics = [#tpu.dimension_semantics<parallel>], iteration_bounds = array<i64: 1>, scalar_prefetch = 0 : i64, scratch_operands = 1 : i64, tpu.core_type = #tpu.core_type<tc>, window_params = [{transform_indices = @transform_0, window_bounds = array<i64: 8, 2>}, {transform_indices = @transform_1, window_bounds = array<i64: 8, 2>}, {transform_indices = @transform_2, window_bounds = array<i64: 16, 2>}, {pipeline_mode = #tpu.pipeline_mode<synchronous>, transform_indices = @transform_3, window_bounds = array<i64: 32, 1>}, {pipeline_mode = #tpu.pipeline_mode<synchronous>, transform_indices = @transform_4, window_bounds = array<i64: 32, 1>}, {pipeline_mode = #tpu.pipeline_mode<synchronous>, transform_indices = @transform_5, window_bounds = array<i64: 32, 1>}, {pipeline_mode = #tpu.pipeline_mode<synchronous>, transform_indices = @transform_6, window_bounds = array<i64: 32, 8>}, {pipeline_mode = #tpu.pipeline_mode<synchronous>, transform_indices = @transform_7, window_bounds = array<i64: 32, 16>}, {pipeline_mode = #tpu.pipeline_mode<synchronous>, transform_indices = @transform_8, window_bounds = array<i64: 32, 1>}, {pipeline_mode = #tpu.pipeline_mode<synchronous>, transform_indices = @transform_9, window_bounds = array<i64: 256, 64>}, {pipeline_mode = #tpu.pipeline_mode<synchronous>, transform_indices = @transform_10, window_bounds = array<i64: 256, 1>}, {pipeline_mode = #tpu.pipeline_mode<synchronous>, transform_indices = @transform_11, window_bounds = array<i64: 80, 256>}, {pipeline_mode = #tpu.pipeline_mode<synchronous>, transform_indices = @transform_12, window_bounds = array<i64: 80, 1>}, {pipeline_mode = #tpu.pipeline_mode<synchronous>, transform_indices = @transform_13, window_bounds = array<i64: 40, 80>}, {pipeline_mode = #tpu.pipeline_mode<synchronous>, transform_indices = @transform_14, window_bounds = array<i64: 40, 1>}, {pipeline_mode = #tpu.pipeline_mode<synchronous>, transform_indices = @transform_15, window_bounds = array<i64: 40, 16>}, {pipeline_mode = #tpu.pipeline_mode<synchronous>, transform_indices = @transform_16, window_bounds = array<i64: 40, 1>}, {pipeline_mode = #tpu.pipeline_mode<synchronous>, transform_indices = @transform_17, window_bounds = array<i64: 64, 40>}, {pipeline_mode = #tpu.pipeline_mode<synchronous>, transform_indices = @transform_18, window_bounds = array<i64: 64, 40>}, {pipeline_mode = #tpu.pipeline_mode<synchronous>, transform_indices = @transform_19, window_bounds = array<i64: 64, 1>}, {transform_indices = @transform_20, window_bounds = array<i64: 64, 2>}]} {
    %c0 = arith.constant 0 : index
    %c0_0 = arith.constant 0 : index
    %0 = vector.load %arg7[%c0, %c0_0] : memref<32x8xf32, #tpu.memory_space<vmem>>, vector<32x8xf32>
    %c0_1 = arith.constant 0 : index
    %c0_2 = arith.constant 0 : index
    %1 = vector.load %arg8[%c0_1, %c0_2] : memref<32x16xf32, #tpu.memory_space<vmem>>, vector<32x16xf32>
    %c0_3 = arith.constant 0 : index
    %c0_4 = arith.constant 0 : index
    %2 = vector.load %arg4[%c0_3, %c0_4] : memref<32x1xf32, #tpu.memory_space<vmem>>, vector<32x1xf32>
    %3 = vector.shape_cast %2 : vector<32x1xf32> to vector<32x1xf32>
    %4 = vector.broadcast %3 : vector<32x1xf32> to vector<32x2xf32>
    %c0_5 = arith.constant 0 : index
    %c0_6 = arith.constant 0 : index
    %5 = vector.load %arg5[%c0_5, %c0_6] : memref<32x1xf32, #tpu.memory_space<vmem>>, vector<32x1xf32>
    %6 = vector.shape_cast %5 : vector<32x1xf32> to vector<32x1xf32>
    %7 = vector.broadcast %6 : vector<32x1xf32> to vector<32x2xf32>
    %c0_7 = arith.constant 0 : index
    %c0_8 = arith.constant 0 : index
    %8 = vector.load %arg6[%c0_7, %c0_8] : memref<32x1xf32, #tpu.memory_space<vmem>>, vector<32x1xf32>
    %9 = vector.shape_cast %8 : vector<32x1xf32> to vector<32x1xf32>
    %10 = vector.broadcast %9 : vector<32x1xf32> to vector<32x2xf32>
    %c0_9 = arith.constant 0 : index
    %c0_10 = arith.constant 0 : index
    %11 = vector.load %arg9[%c0_9, %c0_10] : memref<32x1xf32, #tpu.memory_space<vmem>>, vector<32x1xf32>
    %12 = vector.shape_cast %11 : vector<32x1xf32> to vector<32x1xf32>
    %13 = vector.broadcast %12 : vector<32x1xf32> to vector<32x2xf32>
    %cst = arith.constant 0.000000e+00 : f32
    %14 = vector.broadcast %cst : f32 to vector<8x2xf32>
    %c0_i32 = arith.constant 0 : i32
    %15 = arith.index_cast %c0_i32 : i32 to index
    %c0_11 = arith.constant 0 : index
    %16 = vector.load %arg1[%15, %c0_11] : memref<8x2xf32, #tpu.memory_space<vmem>>, vector<1x2xf32>
    %17 = arith.index_cast %c0_i32 : i32 to index
    %c0_12 = arith.constant 0 : index
    %18 = vector.load %arg2[%17, %c0_12] : memref<8x2xf32, #tpu.memory_space<vmem>>, vector<1x2xf32>
    %19 = vector.broadcast %16 : vector<1x2xf32> to vector<32x2xf32>
    %20 = arith.mulf %19, %4 : vector<32x2xf32>
    %21 = vector.broadcast %18 : vector<1x2xf32> to vector<32x2xf32>
    %22 = arith.mulf %21, %7 : vector<32x2xf32>
    %23 = arith.addf %20, %22 : vector<32x2xf32>
    %24 = arith.addf %23, %10 : vector<32x2xf32>
    %cst_13 = arith.constant dense<0.000000e+00> : vector<32x2xf32>
    %25 = tpu.matmul %0, %14, %cst_13 {dimension_numbers = #tpu.dot_dimension_numbers<[1], [0], [0], [1], [0, 0, 1, 1], [], []>} : vector<32x8xf32>, vector<8x2xf32>, vector<32x2xf32> -> vector<32x2xf32>
    %26 = arith.addf %24, %25 : vector<32x2xf32>
    %27 = math.tanh %26 : vector<32x2xf32>
    %28 = vector.extract_strided_slice %27 {offsets = [0, 0], sizes = [24, 2], strides = [1, 1]} : vector<32x2xf32> to vector<24x2xf32>
    %cst_14 = arith.constant 5.000000e-01 : f32
    %29 = vector.broadcast %cst_14 : f32 to vector<24x2xf32>
    %30 = arith.mulf %29, %28 : vector<24x2xf32>
    %cst_15 = arith.constant 5.000000e-01 : f32
    %31 = vector.broadcast %cst_15 : f32 to vector<24x2xf32>
    %32 = arith.addf %30, %31 : vector<24x2xf32>
    %33 = vector.extract_strided_slice %27 {offsets = [24, 0], sizes = [8, 2], strides = [1, 1]} : vector<32x2xf32> to vector<8x2xf32>
    %34 = vector.extract_strided_slice %32 {offsets = [8, 0], sizes = [8, 2], strides = [1, 1]} : vector<24x2xf32> to vector<8x2xf32>
    %35 = arith.mulf %34, %14 : vector<8x2xf32>
    %36 = vector.extract_strided_slice %32 {offsets = [0, 0], sizes = [8, 2], strides = [1, 1]} : vector<24x2xf32> to vector<8x2xf32>
    %37 = arith.mulf %36, %33 : vector<8x2xf32>
    %38 = arith.addf %35, %37 : vector<8x2xf32>
    %39 = vector.extract_strided_slice %32 {offsets = [16, 0], sizes = [8, 2], strides = [1, 1]} : vector<24x2xf32> to vector<8x2xf32>
    %40 = math.tanh %38 : vector<8x2xf32>
    %41 = arith.mulf %39, %40 : vector<8x2xf32>
    %42 = tpu.concatenate %41, %14 in 0 : vector<8x2xf32>, vector<8x2xf32> -> vector<16x2xf32>
    %cst_16 = arith.constant dense<0.000000e+00> : vector<32x2xf32>
    %43 = tpu.matmul %1, %42, %cst_16 {dimension_numbers = #tpu.dot_dimension_numbers<[1], [0], [0], [1], [0, 0, 1, 1], [], []>} : vector<32x16xf32>, vector<16x2xf32>, vector<32x2xf32> -> vector<32x2xf32>
    %44 = arith.addf %43, %13 : vector<32x2xf32>
    %45 = math.tanh %44 : vector<32x2xf32>
    %46 = vector.extract_strided_slice %45 {offsets = [0, 0], sizes = [24, 2], strides = [1, 1]} : vector<32x2xf32> to vector<24x2xf32>
    %cst_17 = arith.constant 5.000000e-01 : f32
    %47 = vector.broadcast %cst_17 : f32 to vector<24x2xf32>
    %48 = arith.mulf %47, %46 : vector<24x2xf32>
    %cst_18 = arith.constant 5.000000e-01 : f32
    %49 = vector.broadcast %cst_18 : f32 to vector<24x2xf32>
    %50 = arith.addf %48, %49 : vector<24x2xf32>
    %51 = vector.extract_strided_slice %45 {offsets = [24, 0], sizes = [8, 2], strides = [1, 1]} : vector<32x2xf32> to vector<8x2xf32>
    %52 = vector.extract_strided_slice %50 {offsets = [8, 0], sizes = [8, 2], strides = [1, 1]} : vector<24x2xf32> to vector<8x2xf32>
    %53 = arith.mulf %52, %14 : vector<8x2xf32>
    %54 = vector.extract_strided_slice %50 {offsets = [0, 0], sizes = [8, 2], strides = [1, 1]} : vector<24x2xf32> to vector<8x2xf32>
    %55 = arith.mulf %54, %51 : vector<8x2xf32>
    %56 = arith.addf %53, %55 : vector<8x2xf32>
    %57 = vector.extract_strided_slice %50 {offsets = [16, 0], sizes = [8, 2], strides = [1, 1]} : vector<24x2xf32> to vector<8x2xf32>
    %58 = math.tanh %56 : vector<8x2xf32>
    %59 = arith.mulf %57, %58 : vector<8x2xf32>
    %c8_i32 = arith.constant 8 : i32
    %60 = arith.muli %c0_i32, %c8_i32 : i32
    %61 = tpu.assume_multiple %60, 8 : i32
    %62 = arith.index_cast %61 : i32 to index
    %c0_19 = arith.constant 0 : index
    %63 = vector.load %arg22[%62, %c0_19] : memref<64x2xf32, #tpu.memory_space<vmem>>, vector<8x2xf32>
    tpu.vector_store %arg22[%62, %c0_19], %59 {strides = array<i32>} : memref<64x2xf32, #tpu.memory_space<vmem>>, vector<8x2xf32>,
    %c1_i32 = arith.constant 1 : i32
    %64 = arith.index_cast %c1_i32 : i32 to index
    %c0_20 = arith.constant 0 : index
    %65 = vector.load %arg1[%64, %c0_20] : memref<8x2xf32, #tpu.memory_space<vmem>>, vector<1x2xf32>
    %66 = arith.index_cast %c1_i32 : i32 to index
    %c0_21 = arith.constant 0 : index
    %67 = vector.load %arg2[%66, %c0_21] : memref<8x2xf32, #tpu.memory_space<vmem>>, vector<1x2xf32>
    %68 = vector.broadcast %65 : vector<1x2xf32> to vector<32x2xf32>
    %69 = arith.mulf %68, %4 : vector<32x2xf32>
    %70 = vector.broadcast %67 : vector<1x2xf32> to vector<32x2xf32>
    %71 = arith.mulf %70, %7 : vector<32x2xf32>
    %72 = arith.addf %69, %71 : vector<32x2xf32>
    %73 = arith.addf %72, %10 : vector<32x2xf32>
    %cst_22 = arith.constant dense<0.000000e+00> : vector<32x2xf32>
    %74 = tpu.matmul %0, %41, %cst_22 {dimension_numbers = #tpu.dot_dimension_numbers<[1], [0], [0], [1], [0, 0, 1, 1], [], []>} : vector<32x8xf32>, vector<8x2xf32>, vector<32x2xf32> -> vector<32x2xf32>
    %75 = arith.addf %73, %74 : vector<32x2xf32>
    %76 = math.tanh %75 : vector<32x2xf32>
    %77 = vector.extract_strided_slice %76 {offsets = [0, 0], sizes = [24, 2], strides = [1, 1]} : vector<32x2xf32> to vector<24x2xf32>
    %cst_23 = arith.constant 5.000000e-01 : f32
    %78 = vector.broadcast %cst_23 : f32 to vector<24x2xf32>
    %79 = arith.mulf %78, %77 : vector<24x2xf32>
    %cst_24 = arith.constant 5.000000e-01 : f32
    %80 = vector.broadcast %cst_24 : f32 to vector<24x2xf32>
    %81 = arith.addf %79, %80 : vector<24x2xf32>
    %82 = vector.extract_strided_slice %76 {offsets = [24, 0], sizes = [8, 2], strides = [1, 1]} : vector<32x2xf32> to vector<8x2xf32>
    %83 = vector.extract_strided_slice %81 {offsets = [8, 0], sizes = [8, 2], strides = [1, 1]} : vector<24x2xf32> to vector<8x2xf32>
    %84 = arith.mulf %83, %38 : vector<8x2xf32>
    %85 = vector.extract_strided_slice %81 {offsets = [0, 0], sizes = [8, 2], strides = [1, 1]} : vector<24x2xf32> to vector<8x2xf32>
    %86 = arith.mulf %85, %82 : vector<8x2xf32>
    %87 = arith.addf %84, %86 : vector<8x2xf32>
    %88 = vector.extract_strided_slice %81 {offsets = [16, 0], sizes = [8, 2], strides = [1, 1]} : vector<24x2xf32> to vector<8x2xf32>
    %89 = math.tanh %87 : vector<8x2xf32>
    %90 = arith.mulf %88, %89 : vector<8x2xf32>
    %91 = tpu.concatenate %90, %59 in 0 : vector<8x2xf32>, vector<8x2xf32> -> vector<16x2xf32>
    %cst_25 = arith.constant dense<0.000000e+00> : vector<32x2xf32>
    %92 = tpu.matmul %1, %91, %cst_25 {dimension_numbers = #tpu.dot_dimension_numbers<[1], [0], [0], [1], [0, 0, 1, 1], [], []>} : vector<32x16xf32>, vector<16x2xf32>, vector<32x2xf32> -> vector<32x2xf32>
    %93 = arith.addf %92, %13 : vector<32x2xf32>
    %94 = math.tanh %93 : vector<32x2xf32>
    %95 = vector.extract_strided_slice %94 {offsets = [0, 0], sizes = [24, 2], strides = [1, 1]} : vector<32x2xf32> to vector<24x2xf32>
    %cst_26 = arith.constant 5.000000e-01 : f32
    %96 = vector.broadcast %cst_26 : f32 to vector<24x2xf32>
    %97 = arith.mulf %96, %95 : vector<24x2xf32>
    %cst_27 = arith.constant 5.000000e-01 : f32
    %98 = vector.broadcast %cst_27 : f32 to vector<24x2xf32>
    %99 = arith.addf %97, %98 : vector<24x2xf32>
    %100 = vector.extract_strided_slice %94 {offsets = [24, 0], sizes = [8, 2], strides = [1, 1]} : vector<32x2xf32> to vector<8x2xf32>
    %101 = vector.extract_strided_slice %99 {offsets = [8, 0], sizes = [8, 2], strides = [1, 1]} : vector<24x2xf32> to vector<8x2xf32>
    %102 = arith.mulf %101, %56 : vector<8x2xf32>
    %103 = vector.extract_strided_slice %99 {offsets = [0, 0], sizes = [8, 2], strides = [1, 1]} : vector<24x2xf32> to vector<8x2xf32>
    %104 = arith.mulf %103, %100 : vector<8x2xf32>
    %105 = arith.addf %102, %104 : vector<8x2xf32>
    %106 = vector.extract_strided_slice %99 {offsets = [16, 0], sizes = [8, 2], strides = [1, 1]} : vector<24x2xf32> to vector<8x2xf32>
    %107 = math.tanh %105 : vector<8x2xf32>
    %108 = arith.mulf %106, %107 : vector<8x2xf32>
    %c8_i32_28 = arith.constant 8 : i32
    %109 = arith.muli %c1_i32, %c8_i32_28 : i32
    %110 = tpu.assume_multiple %109, 8 : i32
    %111 = arith.index_cast %110 : i32 to index
    %c0_29 = arith.constant 0 : index
    %112 = vector.load %arg22[%111, %c0_29] : memref<64x2xf32, #tpu.memory_space<vmem>>, vector<8x2xf32>
    tpu.vector_store %arg22[%111, %c0_29], %108 {strides = array<i32>} : memref<64x2xf32, #tpu.memory_space<vmem>>, vector<8x2xf32>,
    %c2_i32 = arith.constant 2 : i32
    %113 = arith.index_cast %c2_i32 : i32 to index
    %c0_30 = arith.constant 0 : index
    %114 = vector.load %arg1[%113, %c0_30] : memref<8x2xf32, #tpu.memory_space<vmem>>, vector<1x2xf32>
    %115 = arith.index_cast %c2_i32 : i32 to index
    %c0_31 = arith.constant 0 : index
    %116 = vector.load %arg2[%115, %c0_31] : memref<8x2xf32, #tpu.memory_space<vmem>>, vector<1x2xf32>
    %117 = vector.broadcast %114 : vector<1x2xf32> to vector<32x2xf32>
    %118 = arith.mulf %117, %4 : vector<32x2xf32>
    %119 = vector.broadcast %116 : vector<1x2xf32> to vector<32x2xf32>
    %120 = arith.mulf %119, %7 : vector<32x2xf32>
    %121 = arith.addf %118, %120 : vector<32x2xf32>
    %122 = arith.addf %121, %10 : vector<32x2xf32>
    %cst_32 = arith.constant dense<0.000000e+00> : vector<32x2xf32>
    %123 = tpu.matmul %0, %90, %cst_32 {dimension_numbers = #tpu.dot_dimension_numbers<[1], [0], [0], [1], [0, 0, 1, 1], [], []>} : vector<32x8xf32>, vector<8x2xf32>, vector<32x2xf32> -> vector<32x2xf32>
    %124 = arith.addf %122, %123 : vector<32x2xf32>
    %125 = math.tanh %124 : vector<32x2xf32>
    %126 = vector.extract_strided_slice %125 {offsets = [0, 0], sizes = [24, 2], strides = [1, 1]} : vector<32x2xf32> to vector<24x2xf32>
    %cst_33 = arith.constant 5.000000e-01 : f32
    %127 = vector.broadcast %cst_33 : f32 to vector<24x2xf32>
    %128 = arith.mulf %127, %126 : vector<24x2xf32>
    %cst_34 = arith.constant 5.000000e-01 : f32
    %129 = vector.broadcast %cst_34 : f32 to vector<24x2xf32>
    %130 = arith.addf %128, %129 : vector<24x2xf32>
    %131 = vector.extract_strided_slice %125 {offsets = [24, 0], sizes = [8, 2], strides = [1, 1]} : vector<32x2xf32> to vector<8x2xf32>
    %132 = vector.extract_strided_slice %130 {offsets = [8, 0], sizes = [8, 2], strides = [1, 1]} : vector<24x2xf32> to vector<8x2xf32>
    %133 = arith.mulf %132, %87 : vector<8x2xf32>
    %134 = vector.extract_strided_slice %130 {offsets = [0, 0], sizes = [8, 2], strides = [1, 1]} : vector<24x2xf32> to vector<8x2xf32>
    %135 = arith.mulf %134, %131 : vector<8x2xf32>
    %136 = arith.addf %133, %135 : vector<8x2xf32>
    %137 = vector.extract_strided_slice %130 {offsets = [16, 0], sizes = [8, 2], strides = [1, 1]} : vector<24x2xf32> to vector<8x2xf32>
    %138 = math.tanh %136 : vector<8x2xf32>
    %139 = arith.mulf %137, %138 : vector<8x2xf32>
    %140 = tpu.concatenate %139, %108 in 0 : vector<8x2xf32>, vector<8x2xf32> -> vector<16x2xf32>
    %cst_35 = arith.constant dense<0.000000e+00> : vector<32x2xf32>
    %141 = tpu.matmul %1, %140, %cst_35 {dimension_numbers = #tpu.dot_dimension_numbers<[1], [0], [0], [1], [0, 0, 1, 1], [], []>} : vector<32x16xf32>, vector<16x2xf32>, vector<32x2xf32> -> vector<32x2xf32>
    %142 = arith.addf %141, %13 : vector<32x2xf32>
    %143 = math.tanh %142 : vector<32x2xf32>
    %144 = vector.extract_strided_slice %143 {offsets = [0, 0], sizes = [24, 2], strides = [1, 1]} : vector<32x2xf32> to vector<24x2xf32>
    %cst_36 = arith.constant 5.000000e-01 : f32
    %145 = vector.broadcast %cst_36 : f32 to vector<24x2xf32>
    %146 = arith.mulf %145, %144 : vector<24x2xf32>
    %cst_37 = arith.constant 5.000000e-01 : f32
    %147 = vector.broadcast %cst_37 : f32 to vector<24x2xf32>
    %148 = arith.addf %146, %147 : vector<24x2xf32>
    %149 = vector.extract_strided_slice %143 {offsets = [24, 0], sizes = [8, 2], strides = [1, 1]} : vector<32x2xf32> to vector<8x2xf32>
    %150 = vector.extract_strided_slice %148 {offsets = [8, 0], sizes = [8, 2], strides = [1, 1]} : vector<24x2xf32> to vector<8x2xf32>
    %151 = arith.mulf %150, %105 : vector<8x2xf32>
    %152 = vector.extract_strided_slice %148 {offsets = [0, 0], sizes = [8, 2], strides = [1, 1]} : vector<24x2xf32> to vector<8x2xf32>
    %153 = arith.mulf %152, %149 : vector<8x2xf32>
    %154 = arith.addf %151, %153 : vector<8x2xf32>
    %155 = vector.extract_strided_slice %148 {offsets = [16, 0], sizes = [8, 2], strides = [1, 1]} : vector<24x2xf32> to vector<8x2xf32>
    %156 = math.tanh %154 : vector<8x2xf32>
    %157 = arith.mulf %155, %156 : vector<8x2xf32>
    %c8_i32_38 = arith.constant 8 : i32
    %158 = arith.muli %c2_i32, %c8_i32_38 : i32
    %159 = tpu.assume_multiple %158, 8 : i32
    %160 = arith.index_cast %159 : i32 to index
    %c0_39 = arith.constant 0 : index
    %161 = vector.load %arg22[%160, %c0_39] : memref<64x2xf32, #tpu.memory_space<vmem>>, vector<8x2xf32>
    tpu.vector_store %arg22[%160, %c0_39], %157 {strides = array<i32>} : memref<64x2xf32, #tpu.memory_space<vmem>>, vector<8x2xf32>,
    %c3_i32 = arith.constant 3 : i32
    %162 = arith.index_cast %c3_i32 : i32 to index
    %c0_40 = arith.constant 0 : index
    %163 = vector.load %arg1[%162, %c0_40] : memref<8x2xf32, #tpu.memory_space<vmem>>, vector<1x2xf32>
    %164 = arith.index_cast %c3_i32 : i32 to index
    %c0_41 = arith.constant 0 : index
    %165 = vector.load %arg2[%164, %c0_41] : memref<8x2xf32, #tpu.memory_space<vmem>>, vector<1x2xf32>
    %166 = vector.broadcast %163 : vector<1x2xf32> to vector<32x2xf32>
    %167 = arith.mulf %166, %4 : vector<32x2xf32>
    %168 = vector.broadcast %165 : vector<1x2xf32> to vector<32x2xf32>
    %169 = arith.mulf %168, %7 : vector<32x2xf32>
    %170 = arith.addf %167, %169 : vector<32x2xf32>
    %171 = arith.addf %170, %10 : vector<32x2xf32>
    %cst_42 = arith.constant dense<0.000000e+00> : vector<32x2xf32>
    %172 = tpu.matmul %0, %139, %cst_42 {dimension_numbers = #tpu.dot_dimension_numbers<[1], [0], [0], [1], [0, 0, 1, 1], [], []>} : vector<32x8xf32>, vector<8x2xf32>, vector<32x2xf32> -> vector<32x2xf32>
    %173 = arith.addf %171, %172 : vector<32x2xf32>
    %174 = math.tanh %173 : vector<32x2xf32>
    %175 = vector.extract_strided_slice %174 {offsets = [0, 0], sizes = [24, 2], strides = [1, 1]} : vector<32x2xf32> to vector<24x2xf32>
    %cst_43 = arith.constant 5.000000e-01 : f32
    %176 = vector.broadcast %cst_43 : f32 to vector<24x2xf32>
    %177 = arith.mulf %176, %175 : vector<24x2xf32>
    %cst_44 = arith.constant 5.000000e-01 : f32
    %178 = vector.broadcast %cst_44 : f32 to vector<24x2xf32>
    %179 = arith.addf %177, %178 : vector<24x2xf32>
    %180 = vector.extract_strided_slice %174 {offsets = [24, 0], sizes = [8, 2], strides = [1, 1]} : vector<32x2xf32> to vector<8x2xf32>
    %181 = vector.extract_strided_slice %179 {offsets = [8, 0], sizes = [8, 2], strides = [1, 1]} : vector<24x2xf32> to vector<8x2xf32>
    %182 = arith.mulf %181, %136 : vector<8x2xf32>
    %183 = vector.extract_strided_slice %179 {offsets = [0, 0], sizes = [8, 2], strides = [1, 1]} : vector<24x2xf32> to vector<8x2xf32>
    %184 = arith.mulf %183, %180 : vector<8x2xf32>
    %185 = arith.addf %182, %184 : vector<8x2xf32>
    %186 = vector.extract_strided_slice %179 {offsets = [16, 0], sizes = [8, 2], strides = [1, 1]} : vector<24x2xf32> to vector<8x2xf32>
    %187 = math.tanh %185 : vector<8x2xf32>
    %188 = arith.mulf %186, %187 : vector<8x2xf32>
    %189 = tpu.concatenate %188, %157 in 0 : vector<8x2xf32>, vector<8x2xf32> -> vector<16x2xf32>
    %cst_45 = arith.constant dense<0.000000e+00> : vector<32x2xf32>
    %190 = tpu.matmul %1, %189, %cst_45 {dimension_numbers = #tpu.dot_dimension_numbers<[1], [0], [0], [1], [0, 0, 1, 1], [], []>} : vector<32x16xf32>, vector<16x2xf32>, vector<32x2xf32> -> vector<32x2xf32>
    %191 = arith.addf %190, %13 : vector<32x2xf32>
    %192 = math.tanh %191 : vector<32x2xf32>
    %193 = vector.extract_strided_slice %192 {offsets = [0, 0], sizes = [24, 2], strides = [1, 1]} : vector<32x2xf32> to vector<24x2xf32>
    %cst_46 = arith.constant 5.000000e-01 : f32
    %194 = vector.broadcast %cst_46 : f32 to vector<24x2xf32>
    %195 = arith.mulf %194, %193 : vector<24x2xf32>
    %cst_47 = arith.constant 5.000000e-01 : f32
    %196 = vector.broadcast %cst_47 : f32 to vector<24x2xf32>
    %197 = arith.addf %195, %196 : vector<24x2xf32>
    %198 = vector.extract_strided_slice %192 {offsets = [24, 0], sizes = [8, 2], strides = [1, 1]} : vector<32x2xf32> to vector<8x2xf32>
    %199 = vector.extract_strided_slice %197 {offsets = [8, 0], sizes = [8, 2], strides = [1, 1]} : vector<24x2xf32> to vector<8x2xf32>
    %200 = arith.mulf %199, %154 : vector<8x2xf32>
    %201 = vector.extract_strided_slice %197 {offsets = [0, 0], sizes = [8, 2], strides = [1, 1]} : vector<24x2xf32> to vector<8x2xf32>
    %202 = arith.mulf %201, %198 : vector<8x2xf32>
    %203 = arith.addf %200, %202 : vector<8x2xf32>
    %204 = vector.extract_strided_slice %197 {offsets = [16, 0], sizes = [8, 2], strides = [1, 1]} : vector<24x2xf32> to vector<8x2xf32>
    %205 = math.tanh %203 : vector<8x2xf32>
    %206 = arith.mulf %204, %205 : vector<8x2xf32>
    %c8_i32_48 = arith.constant 8 : i32
    %207 = arith.muli %c3_i32, %c8_i32_48 : i32
    %208 = tpu.assume_multiple %207, 8 : i32
    %209 = arith.index_cast %208 : i32 to index
    %c0_49 = arith.constant 0 : index
    %210 = vector.load %arg22[%209, %c0_49] : memref<64x2xf32, #tpu.memory_space<vmem>>, vector<8x2xf32>
    tpu.vector_store %arg22[%209, %c0_49], %206 {strides = array<i32>} : memref<64x2xf32, #tpu.memory_space<vmem>>, vector<8x2xf32>,
    %c4_i32 = arith.constant 4 : i32
    %211 = arith.index_cast %c4_i32 : i32 to index
    %c0_50 = arith.constant 0 : index
    %212 = vector.load %arg1[%211, %c0_50] : memref<8x2xf32, #tpu.memory_space<vmem>>, vector<1x2xf32>
    %213 = arith.index_cast %c4_i32 : i32 to index
    %c0_51 = arith.constant 0 : index
    %214 = vector.load %arg2[%213, %c0_51] : memref<8x2xf32, #tpu.memory_space<vmem>>, vector<1x2xf32>
    %215 = vector.broadcast %212 : vector<1x2xf32> to vector<32x2xf32>
    %216 = arith.mulf %215, %4 : vector<32x2xf32>
    %217 = vector.broadcast %214 : vector<1x2xf32> to vector<32x2xf32>
    %218 = arith.mulf %217, %7 : vector<32x2xf32>
    %219 = arith.addf %216, %218 : vector<32x2xf32>
    %220 = arith.addf %219, %10 : vector<32x2xf32>
    %cst_52 = arith.constant dense<0.000000e+00> : vector<32x2xf32>
    %221 = tpu.matmul %0, %188, %cst_52 {dimension_numbers = #tpu.dot_dimension_numbers<[1], [0], [0], [1], [0, 0, 1, 1], [], []>} : vector<32x8xf32>, vector<8x2xf32>, vector<32x2xf32> -> vector<32x2xf32>
    %222 = arith.addf %220, %221 : vector<32x2xf32>
    %223 = math.tanh %222 : vector<32x2xf32>
    %224 = vector.extract_strided_slice %223 {offsets = [0, 0], sizes = [24, 2], strides = [1, 1]} : vector<32x2xf32> to vector<24x2xf32>
    %cst_53 = arith.constant 5.000000e-01 : f32
    %225 = vector.broadcast %cst_53 : f32 to vector<24x2xf32>
    %226 = arith.mulf %225, %224 : vector<24x2xf32>
    %cst_54 = arith.constant 5.000000e-01 : f32
    %227 = vector.broadcast %cst_54 : f32 to vector<24x2xf32>
    %228 = arith.addf %226, %227 : vector<24x2xf32>
    %229 = vector.extract_strided_slice %223 {offsets = [24, 0], sizes = [8, 2], strides = [1, 1]} : vector<32x2xf32> to vector<8x2xf32>
    %230 = vector.extract_strided_slice %228 {offsets = [8, 0], sizes = [8, 2], strides = [1, 1]} : vector<24x2xf32> to vector<8x2xf32>
    %231 = arith.mulf %230, %185 : vector<8x2xf32>
    %232 = vector.extract_strided_slice %228 {offsets = [0, 0], sizes = [8, 2], strides = [1, 1]} : vector<24x2xf32> to vector<8x2xf32>
    %233 = arith.mulf %232, %229 : vector<8x2xf32>
    %234 = arith.addf %231, %233 : vector<8x2xf32>
    %235 = vector.extract_strided_slice %228 {offsets = [16, 0], sizes = [8, 2], strides = [1, 1]} : vector<24x2xf32> to vector<8x2xf32>
    %236 = math.tanh %234 : vector<8x2xf32>
    %237 = arith.mulf %235, %236 : vector<8x2xf32>
    %238 = tpu.concatenate %237, %206 in 0 : vector<8x2xf32>, vector<8x2xf32> -> vector<16x2xf32>
    %cst_55 = arith.constant dense<0.000000e+00> : vector<32x2xf32>
    %239 = tpu.matmul %1, %238, %cst_55 {dimension_numbers = #tpu.dot_dimension_numbers<[1], [0], [0], [1], [0, 0, 1, 1], [], []>} : vector<32x16xf32>, vector<16x2xf32>, vector<32x2xf32> -> vector<32x2xf32>
    %240 = arith.addf %239, %13 : vector<32x2xf32>
    %241 = math.tanh %240 : vector<32x2xf32>
    %242 = vector.extract_strided_slice %241 {offsets = [0, 0], sizes = [24, 2], strides = [1, 1]} : vector<32x2xf32> to vector<24x2xf32>
    %cst_56 = arith.constant 5.000000e-01 : f32
    %243 = vector.broadcast %cst_56 : f32 to vector<24x2xf32>
    %244 = arith.mulf %243, %242 : vector<24x2xf32>
    %cst_57 = arith.constant 5.000000e-01 : f32
    %245 = vector.broadcast %cst_57 : f32 to vector<24x2xf32>
    %246 = arith.addf %244, %245 : vector<24x2xf32>
    %247 = vector.extract_strided_slice %241 {offsets = [24, 0], sizes = [8, 2], strides = [1, 1]} : vector<32x2xf32> to vector<8x2xf32>
    %248 = vector.extract_strided_slice %246 {offsets = [8, 0], sizes = [8, 2], strides = [1, 1]} : vector<24x2xf32> to vector<8x2xf32>
    %249 = arith.mulf %248, %203 : vector<8x2xf32>
    %250 = vector.extract_strided_slice %246 {offsets = [0, 0], sizes = [8, 2], strides = [1, 1]} : vector<24x2xf32> to vector<8x2xf32>
    %251 = arith.mulf %250, %247 : vector<8x2xf32>
    %252 = arith.addf %249, %251 : vector<8x2xf32>
    %253 = vector.extract_strided_slice %246 {offsets = [16, 0], sizes = [8, 2], strides = [1, 1]} : vector<24x2xf32> to vector<8x2xf32>
    %254 = math.tanh %252 : vector<8x2xf32>
    %255 = arith.mulf %253, %254 : vector<8x2xf32>
    %c8_i32_58 = arith.constant 8 : i32
    %256 = arith.muli %c4_i32, %c8_i32_58 : i32
    %257 = tpu.assume_multiple %256, 8 : i32
    %258 = arith.index_cast %257 : i32 to index
    %c0_59 = arith.constant 0 : index
    %259 = vector.load %arg22[%258, %c0_59] : memref<64x2xf32, #tpu.memory_space<vmem>>, vector<8x2xf32>
    tpu.vector_store %arg22[%258, %c0_59], %255 {strides = array<i32>} : memref<64x2xf32, #tpu.memory_space<vmem>>, vector<8x2xf32>,
    %c5_i32 = arith.constant 5 : i32
    %260 = arith.index_cast %c5_i32 : i32 to index
    %c0_60 = arith.constant 0 : index
    %261 = vector.load %arg1[%260, %c0_60] : memref<8x2xf32, #tpu.memory_space<vmem>>, vector<1x2xf32>
    %262 = arith.index_cast %c5_i32 : i32 to index
    %c0_61 = arith.constant 0 : index
    %263 = vector.load %arg2[%262, %c0_61] : memref<8x2xf32, #tpu.memory_space<vmem>>, vector<1x2xf32>
    %264 = vector.broadcast %261 : vector<1x2xf32> to vector<32x2xf32>
    %265 = arith.mulf %264, %4 : vector<32x2xf32>
    %266 = vector.broadcast %263 : vector<1x2xf32> to vector<32x2xf32>
    %267 = arith.mulf %266, %7 : vector<32x2xf32>
    %268 = arith.addf %265, %267 : vector<32x2xf32>
    %269 = arith.addf %268, %10 : vector<32x2xf32>
    %cst_62 = arith.constant dense<0.000000e+00> : vector<32x2xf32>
    %270 = tpu.matmul %0, %237, %cst_62 {dimension_numbers = #tpu.dot_dimension_numbers<[1], [0], [0], [1], [0, 0, 1, 1], [], []>} : vector<32x8xf32>, vector<8x2xf32>, vector<32x2xf32> -> vector<32x2xf32>
    %271 = arith.addf %269, %270 : vector<32x2xf32>
    %272 = math.tanh %271 : vector<32x2xf32>
    %273 = vector.extract_strided_slice %272 {offsets = [0, 0], sizes = [24, 2], strides = [1, 1]} : vector<32x2xf32> to vector<24x2xf32>
    %cst_63 = arith.constant 5.000000e-01 : f32
    %274 = vector.broadcast %cst_63 : f32 to vector<24x2xf32>
    %275 = arith.mulf %274, %273 : vector<24x2xf32>
    %cst_64 = arith.constant 5.000000e-01 : f32
    %276 = vector.broadcast %cst_64 : f32 to vector<24x2xf32>
    %277 = arith.addf %275, %276 : vector<24x2xf32>
    %278 = vector.extract_strided_slice %272 {offsets = [24, 0], sizes = [8, 2], strides = [1, 1]} : vector<32x2xf32> to vector<8x2xf32>
    %279 = vector.extract_strided_slice %277 {offsets = [8, 0], sizes = [8, 2], strides = [1, 1]} : vector<24x2xf32> to vector<8x2xf32>
    %280 = arith.mulf %279, %234 : vector<8x2xf32>
    %281 = vector.extract_strided_slice %277 {offsets = [0, 0], sizes = [8, 2], strides = [1, 1]} : vector<24x2xf32> to vector<8x2xf32>
    %282 = arith.mulf %281, %278 : vector<8x2xf32>
    %283 = arith.addf %280, %282 : vector<8x2xf32>
    %284 = vector.extract_strided_slice %277 {offsets = [16, 0], sizes = [8, 2], strides = [1, 1]} : vector<24x2xf32> to vector<8x2xf32>
    %285 = math.tanh %283 : vector<8x2xf32>
    %286 = arith.mulf %284, %285 : vector<8x2xf32>
    %287 = tpu.concatenate %286, %255 in 0 : vector<8x2xf32>, vector<8x2xf32> -> vector<16x2xf32>
    %cst_65 = arith.constant dense<0.000000e+00> : vector<32x2xf32>
    %288 = tpu.matmul %1, %287, %cst_65 {dimension_numbers = #tpu.dot_dimension_numbers<[1], [0], [0], [1], [0, 0, 1, 1], [], []>} : vector<32x16xf32>, vector<16x2xf32>, vector<32x2xf32> -> vector<32x2xf32>
    %289 = arith.addf %288, %13 : vector<32x2xf32>
    %290 = math.tanh %289 : vector<32x2xf32>
    %291 = vector.extract_strided_slice %290 {offsets = [0, 0], sizes = [24, 2], strides = [1, 1]} : vector<32x2xf32> to vector<24x2xf32>
    %cst_66 = arith.constant 5.000000e-01 : f32
    %292 = vector.broadcast %cst_66 : f32 to vector<24x2xf32>
    %293 = arith.mulf %292, %291 : vector<24x2xf32>
    %cst_67 = arith.constant 5.000000e-01 : f32
    %294 = vector.broadcast %cst_67 : f32 to vector<24x2xf32>
    %295 = arith.addf %293, %294 : vector<24x2xf32>
    %296 = vector.extract_strided_slice %290 {offsets = [24, 0], sizes = [8, 2], strides = [1, 1]} : vector<32x2xf32> to vector<8x2xf32>
    %297 = vector.extract_strided_slice %295 {offsets = [8, 0], sizes = [8, 2], strides = [1, 1]} : vector<24x2xf32> to vector<8x2xf32>
    %298 = arith.mulf %297, %252 : vector<8x2xf32>
    %299 = vector.extract_strided_slice %295 {offsets = [0, 0], sizes = [8, 2], strides = [1, 1]} : vector<24x2xf32> to vector<8x2xf32>
    %300 = arith.mulf %299, %296 : vector<8x2xf32>
    %301 = arith.addf %298, %300 : vector<8x2xf32>
    %302 = vector.extract_strided_slice %295 {offsets = [16, 0], sizes = [8, 2], strides = [1, 1]} : vector<24x2xf32> to vector<8x2xf32>
    %303 = math.tanh %301 : vector<8x2xf32>
    %304 = arith.mulf %302, %303 : vector<8x2xf32>
    %c8_i32_68 = arith.constant 8 : i32
    %305 = arith.muli %c5_i32, %c8_i32_68 : i32
    %306 = tpu.assume_multiple %305, 8 : i32
    %307 = arith.index_cast %306 : i32 to index
    %c0_69 = arith.constant 0 : index
    %308 = vector.load %arg22[%307, %c0_69] : memref<64x2xf32, #tpu.memory_space<vmem>>, vector<8x2xf32>
    tpu.vector_store %arg22[%307, %c0_69], %304 {strides = array<i32>} : memref<64x2xf32, #tpu.memory_space<vmem>>, vector<8x2xf32>,
    %c6_i32 = arith.constant 6 : i32
    %309 = arith.index_cast %c6_i32 : i32 to index
    %c0_70 = arith.constant 0 : index
    %310 = vector.load %arg1[%309, %c0_70] : memref<8x2xf32, #tpu.memory_space<vmem>>, vector<1x2xf32>
    %311 = arith.index_cast %c6_i32 : i32 to index
    %c0_71 = arith.constant 0 : index
    %312 = vector.load %arg2[%311, %c0_71] : memref<8x2xf32, #tpu.memory_space<vmem>>, vector<1x2xf32>
    %313 = vector.broadcast %310 : vector<1x2xf32> to vector<32x2xf32>
    %314 = arith.mulf %313, %4 : vector<32x2xf32>
    %315 = vector.broadcast %312 : vector<1x2xf32> to vector<32x2xf32>
    %316 = arith.mulf %315, %7 : vector<32x2xf32>
    %317 = arith.addf %314, %316 : vector<32x2xf32>
    %318 = arith.addf %317, %10 : vector<32x2xf32>
    %cst_72 = arith.constant dense<0.000000e+00> : vector<32x2xf32>
    %319 = tpu.matmul %0, %286, %cst_72 {dimension_numbers = #tpu.dot_dimension_numbers<[1], [0], [0], [1], [0, 0, 1, 1], [], []>} : vector<32x8xf32>, vector<8x2xf32>, vector<32x2xf32> -> vector<32x2xf32>
    %320 = arith.addf %318, %319 : vector<32x2xf32>
    %321 = math.tanh %320 : vector<32x2xf32>
    %322 = vector.extract_strided_slice %321 {offsets = [0, 0], sizes = [24, 2], strides = [1, 1]} : vector<32x2xf32> to vector<24x2xf32>
    %cst_73 = arith.constant 5.000000e-01 : f32
    %323 = vector.broadcast %cst_73 : f32 to vector<24x2xf32>
    %324 = arith.mulf %323, %322 : vector<24x2xf32>
    %cst_74 = arith.constant 5.000000e-01 : f32
    %325 = vector.broadcast %cst_74 : f32 to vector<24x2xf32>
    %326 = arith.addf %324, %325 : vector<24x2xf32>
    %327 = vector.extract_strided_slice %321 {offsets = [24, 0], sizes = [8, 2], strides = [1, 1]} : vector<32x2xf32> to vector<8x2xf32>
    %328 = vector.extract_strided_slice %326 {offsets = [8, 0], sizes = [8, 2], strides = [1, 1]} : vector<24x2xf32> to vector<8x2xf32>
    %329 = arith.mulf %328, %283 : vector<8x2xf32>
    %330 = vector.extract_strided_slice %326 {offsets = [0, 0], sizes = [8, 2], strides = [1, 1]} : vector<24x2xf32> to vector<8x2xf32>
    %331 = arith.mulf %330, %327 : vector<8x2xf32>
    %332 = arith.addf %329, %331 : vector<8x2xf32>
    %333 = vector.extract_strided_slice %326 {offsets = [16, 0], sizes = [8, 2], strides = [1, 1]} : vector<24x2xf32> to vector<8x2xf32>
    %334 = math.tanh %332 : vector<8x2xf32>
    %335 = arith.mulf %333, %334 : vector<8x2xf32>
    %336 = tpu.concatenate %335, %304 in 0 : vector<8x2xf32>, vector<8x2xf32> -> vector<16x2xf32>
    %cst_75 = arith.constant dense<0.000000e+00> : vector<32x2xf32>
    %337 = tpu.matmul %1, %336, %cst_75 {dimension_numbers = #tpu.dot_dimension_numbers<[1], [0], [0], [1], [0, 0, 1, 1], [], []>} : vector<32x16xf32>, vector<16x2xf32>, vector<32x2xf32> -> vector<32x2xf32>
    %338 = arith.addf %337, %13 : vector<32x2xf32>
    %339 = math.tanh %338 : vector<32x2xf32>
    %340 = vector.extract_strided_slice %339 {offsets = [0, 0], sizes = [24, 2], strides = [1, 1]} : vector<32x2xf32> to vector<24x2xf32>
    %cst_76 = arith.constant 5.000000e-01 : f32
    %341 = vector.broadcast %cst_76 : f32 to vector<24x2xf32>
    %342 = arith.mulf %341, %340 : vector<24x2xf32>
    %cst_77 = arith.constant 5.000000e-01 : f32
    %343 = vector.broadcast %cst_77 : f32 to vector<24x2xf32>
    %344 = arith.addf %342, %343 : vector<24x2xf32>
    %345 = vector.extract_strided_slice %339 {offsets = [24, 0], sizes = [8, 2], strides = [1, 1]} : vector<32x2xf32> to vector<8x2xf32>
    %346 = vector.extract_strided_slice %344 {offsets = [8, 0], sizes = [8, 2], strides = [1, 1]} : vector<24x2xf32> to vector<8x2xf32>
    %347 = arith.mulf %346, %301 : vector<8x2xf32>
    %348 = vector.extract_strided_slice %344 {offsets = [0, 0], sizes = [8, 2], strides = [1, 1]} : vector<24x2xf32> to vector<8x2xf32>
    %349 = arith.mulf %348, %345 : vector<8x2xf32>
    %350 = arith.addf %347, %349 : vector<8x2xf32>
    %351 = vector.extract_strided_slice %344 {offsets = [16, 0], sizes = [8, 2], strides = [1, 1]} : vector<24x2xf32> to vector<8x2xf32>
    %352 = math.tanh %350 : vector<8x2xf32>
    %353 = arith.mulf %351, %352 : vector<8x2xf32>
    %c8_i32_78 = arith.constant 8 : i32
    %354 = arith.muli %c6_i32, %c8_i32_78 : i32
    %355 = tpu.assume_multiple %354, 8 : i32
    %356 = arith.index_cast %355 : i32 to index
    %c0_79 = arith.constant 0 : index
    %357 = vector.load %arg22[%356, %c0_79] : memref<64x2xf32, #tpu.memory_space<vmem>>, vector<8x2xf32>
    tpu.vector_store %arg22[%356, %c0_79], %353 {strides = array<i32>} : memref<64x2xf32, #tpu.memory_space<vmem>>, vector<8x2xf32>,
    %c7_i32 = arith.constant 7 : i32
    %358 = arith.index_cast %c7_i32 : i32 to index
    %c0_80 = arith.constant 0 : index
    %359 = vector.load %arg1[%358, %c0_80] : memref<8x2xf32, #tpu.memory_space<vmem>>, vector<1x2xf32>
    %360 = arith.index_cast %c7_i32 : i32 to index
    %c0_81 = arith.constant 0 : index
    %361 = vector.load %arg2[%360, %c0_81] : memref<8x2xf32, #tpu.memory_space<vmem>>, vector<1x2xf32>
    %362 = vector.broadcast %359 : vector<1x2xf32> to vector<32x2xf32>
    %363 = arith.mulf %362, %4 : vector<32x2xf32>
    %364 = vector.broadcast %361 : vector<1x2xf32> to vector<32x2xf32>
    %365 = arith.mulf %364, %7 : vector<32x2xf32>
    %366 = arith.addf %363, %365 : vector<32x2xf32>
    %367 = arith.addf %366, %10 : vector<32x2xf32>
    %cst_82 = arith.constant dense<0.000000e+00> : vector<32x2xf32>
    %368 = tpu.matmul %0, %335, %cst_82 {dimension_numbers = #tpu.dot_dimension_numbers<[1], [0], [0], [1], [0, 0, 1, 1], [], []>} : vector<32x8xf32>, vector<8x2xf32>, vector<32x2xf32> -> vector<32x2xf32>
    %369 = arith.addf %367, %368 : vector<32x2xf32>
    %370 = math.tanh %369 : vector<32x2xf32>
    %371 = vector.extract_strided_slice %370 {offsets = [0, 0], sizes = [24, 2], strides = [1, 1]} : vector<32x2xf32> to vector<24x2xf32>
    %cst_83 = arith.constant 5.000000e-01 : f32
    %372 = vector.broadcast %cst_83 : f32 to vector<24x2xf32>
    %373 = arith.mulf %372, %371 : vector<24x2xf32>
    %cst_84 = arith.constant 5.000000e-01 : f32
    %374 = vector.broadcast %cst_84 : f32 to vector<24x2xf32>
    %375 = arith.addf %373, %374 : vector<24x2xf32>
    %376 = vector.extract_strided_slice %370 {offsets = [24, 0], sizes = [8, 2], strides = [1, 1]} : vector<32x2xf32> to vector<8x2xf32>
    %377 = vector.extract_strided_slice %375 {offsets = [8, 0], sizes = [8, 2], strides = [1, 1]} : vector<24x2xf32> to vector<8x2xf32>
    %378 = arith.mulf %377, %332 : vector<8x2xf32>
    %379 = vector.extract_strided_slice %375 {offsets = [0, 0], sizes = [8, 2], strides = [1, 1]} : vector<24x2xf32> to vector<8x2xf32>
    %380 = arith.mulf %379, %376 : vector<8x2xf32>
    %381 = arith.addf %378, %380 : vector<8x2xf32>
    %382 = vector.extract_strided_slice %375 {offsets = [16, 0], sizes = [8, 2], strides = [1, 1]} : vector<24x2xf32> to vector<8x2xf32>
    %383 = math.tanh %381 : vector<8x2xf32>
    %384 = arith.mulf %382, %383 : vector<8x2xf32>
    %385 = tpu.concatenate %384, %353 in 0 : vector<8x2xf32>, vector<8x2xf32> -> vector<16x2xf32>
    %cst_85 = arith.constant dense<0.000000e+00> : vector<32x2xf32>
    %386 = tpu.matmul %1, %385, %cst_85 {dimension_numbers = #tpu.dot_dimension_numbers<[1], [0], [0], [1], [0, 0, 1, 1], [], []>} : vector<32x16xf32>, vector<16x2xf32>, vector<32x2xf32> -> vector<32x2xf32>
    %387 = arith.addf %386, %13 : vector<32x2xf32>
    %388 = math.tanh %387 : vector<32x2xf32>
    %389 = vector.extract_strided_slice %388 {offsets = [0, 0], sizes = [24, 2], strides = [1, 1]} : vector<32x2xf32> to vector<24x2xf32>
    %cst_86 = arith.constant 5.000000e-01 : f32
    %390 = vector.broadcast %cst_86 : f32 to vector<24x2xf32>
    %391 = arith.mulf %390, %389 : vector<24x2xf32>
    %cst_87 = arith.constant 5.000000e-01 : f32
    %392 = vector.broadcast %cst_87 : f32 to vector<24x2xf32>
    %393 = arith.addf %391, %392 : vector<24x2xf32>
    %394 = vector.extract_strided_slice %388 {offsets = [24, 0], sizes = [8, 2], strides = [1, 1]} : vector<32x2xf32> to vector<8x2xf32>
    %395 = vector.extract_strided_slice %393 {offsets = [8, 0], sizes = [8, 2], strides = [1, 1]} : vector<24x2xf32> to vector<8x2xf32>
    %396 = arith.mulf %395, %350 : vector<8x2xf32>
    %397 = vector.extract_strided_slice %393 {offsets = [0, 0], sizes = [8, 2], strides = [1, 1]} : vector<24x2xf32> to vector<8x2xf32>
    %398 = arith.mulf %397, %394 : vector<8x2xf32>
    %399 = arith.addf %396, %398 : vector<8x2xf32>
    %400 = vector.extract_strided_slice %393 {offsets = [16, 0], sizes = [8, 2], strides = [1, 1]} : vector<24x2xf32> to vector<8x2xf32>
    %401 = math.tanh %399 : vector<8x2xf32>
    %402 = arith.mulf %400, %401 : vector<8x2xf32>
    %c8_i32_88 = arith.constant 8 : i32
    %403 = arith.muli %c7_i32, %c8_i32_88 : i32
    %404 = tpu.assume_multiple %403, 8 : i32
    %405 = arith.index_cast %404 : i32 to index
    %c0_89 = arith.constant 0 : index
    %406 = vector.load %arg22[%405, %c0_89] : memref<64x2xf32, #tpu.memory_space<vmem>>, vector<8x2xf32>
    tpu.vector_store %arg22[%405, %c0_89], %402 {strides = array<i32>} : memref<64x2xf32, #tpu.memory_space<vmem>>, vector<8x2xf32>,
    %c8_i32_90 = arith.constant 8 : i32
    %c0_91 = arith.constant 0 : index
    %c0_92 = arith.constant 0 : index
    %407 = vector.load %arg10[%c0_91, %c0_92] : memref<256x64xf32, #tpu.memory_space<vmem>>, vector<256x64xf32>
    %c0_93 = arith.constant 0 : index
    %c0_94 = arith.constant 0 : index
    %408 = vector.load %arg22[%c0_93, %c0_94] : memref<64x2xf32, #tpu.memory_space<vmem>>, vector<64x2xf32>
    %cst_95 = arith.constant dense<0.000000e+00> : vector<256x2xf32>
    %409 = tpu.matmul %407, %408, %cst_95 {dimension_numbers = #tpu.dot_dimension_numbers<[1], [0], [0], [1], [0, 0, 1, 1], [], []>, precision = #tpu.contract_precision<fp32>} : vector<256x64xf32>, vector<64x2xf32>, vector<256x2xf32> -> vector<256x2xf32>
    %c0_96 = arith.constant 0 : index
    %c0_97 = arith.constant 0 : index
    %410 = vector.load %arg11[%c0_96, %c0_97] : memref<256x1xf32, #tpu.memory_space<vmem>>, vector<256x1xf32>
    %411 = vector.broadcast %410 : vector<256x1xf32> to vector<256x2xf32>
    %412 = arith.addf %409, %411 : vector<256x2xf32>
    %413 = math.tanh %412 : vector<256x2xf32>
    %c0_98 = arith.constant 0 : index
    %c0_99 = arith.constant 0 : index
    %414 = vector.load %arg12[%c0_98, %c0_99] : memref<80x256xf32, #tpu.memory_space<vmem>>, vector<80x256xf32>
    %cst_100 = arith.constant dense<0.000000e+00> : vector<80x2xf32>
    %415 = tpu.matmul %414, %413, %cst_100 {dimension_numbers = #tpu.dot_dimension_numbers<[1], [0], [0], [1], [0, 0, 1, 1], [], []>, precision = #tpu.contract_precision<fp32>} : vector<80x256xf32>, vector<256x2xf32>, vector<80x2xf32> -> vector<80x2xf32>
    %c0_101 = arith.constant 0 : index
    %c0_102 = arith.constant 0 : index
    %416 = vector.load %arg13[%c0_101, %c0_102] : memref<80x1xf32, #tpu.memory_space<vmem>>, vector<80x1xf32>
    %417 = vector.broadcast %416 : vector<80x1xf32> to vector<80x2xf32>
    %418 = arith.addf %415, %417 : vector<80x2xf32>
    %419 = math.tanh %418 : vector<80x2xf32>
    %c0_103 = arith.constant 0 : index
    %c0_104 = arith.constant 0 : index
    %420 = vector.load %arg14[%c0_103, %c0_104] : memref<40x80xf32, #tpu.memory_space<vmem>>, vector<40x80xf32>
    %cst_105 = arith.constant dense<0.000000e+00> : vector<40x2xf32>
    %421 = tpu.matmul %420, %419, %cst_105 {dimension_numbers = #tpu.dot_dimension_numbers<[1], [0], [0], [1], [0, 0, 1, 1], [], []>, precision = #tpu.contract_precision<fp32>} : vector<40x80xf32>, vector<80x2xf32>, vector<40x2xf32> -> vector<40x2xf32>
    %c0_106 = arith.constant 0 : index
    %c0_107 = arith.constant 0 : index
    %422 = vector.load %arg15[%c0_106, %c0_107] : memref<40x1xf32, #tpu.memory_space<vmem>>, vector<40x1xf32>
    %423 = vector.broadcast %422 : vector<40x1xf32> to vector<40x2xf32>
    %424 = arith.addf %421, %423 : vector<40x2xf32>
    %425 = math.tanh %424 : vector<40x2xf32>
    %c0_108 = arith.constant 0 : index
    %c0_109 = arith.constant 0 : index
    %426 = vector.load %arg16[%c0_108, %c0_109] : memref<40x16xf32, #tpu.memory_space<vmem>>, vector<40x16xf32>
    %c0_110 = arith.constant 0 : index
    %c0_111 = arith.constant 0 : index
    %427 = vector.load %arg3[%c0_110, %c0_111] : memref<16x2xf32, #tpu.memory_space<vmem>>, vector<16x2xf32>
    %cst_112 = arith.constant dense<0.000000e+00> : vector<40x2xf32>
    %428 = tpu.matmul %426, %427, %cst_112 {dimension_numbers = #tpu.dot_dimension_numbers<[1], [0], [0], [1], [0, 0, 1, 1], [], []>, precision = #tpu.contract_precision<fp32>} : vector<40x16xf32>, vector<16x2xf32>, vector<40x2xf32> -> vector<40x2xf32>
    %c0_113 = arith.constant 0 : index
    %c0_114 = arith.constant 0 : index
    %429 = vector.load %arg17[%c0_113, %c0_114] : memref<40x1xf32, #tpu.memory_space<vmem>>, vector<40x1xf32>
    %430 = vector.broadcast %429 : vector<40x1xf32> to vector<40x2xf32>
    %431 = arith.addf %428, %430 : vector<40x2xf32>
    %c0_115 = arith.constant 0 : index
    %c0_116 = arith.constant 0 : index
    %432 = vector.load %arg18[%c0_115, %c0_116] : memref<64x40xf32, #tpu.memory_space<vmem>>, vector<64x40xf32>
    %cst_117 = arith.constant dense<0.000000e+00> : vector<64x2xf32>
    %433 = tpu.matmul %432, %425, %cst_117 {dimension_numbers = #tpu.dot_dimension_numbers<[1], [0], [0], [1], [0, 0, 1, 1], [], []>, precision = #tpu.contract_precision<fp32>} : vector<64x40xf32>, vector<40x2xf32>, vector<64x2xf32> -> vector<64x2xf32>
    %c0_118 = arith.constant 0 : index
    %c0_119 = arith.constant 0 : index
    %434 = vector.load %arg19[%c0_118, %c0_119] : memref<64x40xf32, #tpu.memory_space<vmem>>, vector<64x40xf32>
    %cst_120 = arith.constant dense<0.000000e+00> : vector<64x2xf32>
    %435 = tpu.matmul %434, %431, %cst_120 {dimension_numbers = #tpu.dot_dimension_numbers<[1], [0], [0], [1], [0, 0, 1, 1], [], []>, precision = #tpu.contract_precision<fp32>} : vector<64x40xf32>, vector<40x2xf32>, vector<64x2xf32> -> vector<64x2xf32>
    %436 = arith.addf %433, %435 : vector<64x2xf32>
    %c0_121 = arith.constant 0 : index
    %c0_122 = arith.constant 0 : index
    %437 = vector.load %arg20[%c0_121, %c0_122] : memref<64x1xf32, #tpu.memory_space<vmem>>, vector<64x1xf32>
    %438 = vector.broadcast %437 : vector<64x1xf32> to vector<64x2xf32>
    %439 = arith.addf %436, %438 : vector<64x2xf32>
    %440 = math.tanh %439 : vector<64x2xf32>
    %c0_123 = arith.constant 0 : index
    %c0_124 = arith.constant 0 : index
    %441 = vector.load %arg21[%c0_123, %c0_124] : memref<64x2xf32, #tpu.memory_space<vmem>>, vector<64x2xf32>
    tpu.vector_store %arg21[%c0_123, %c0_124], %440 {strides = array<i32>} : memref<64x2xf32, #tpu.memory_space<vmem>>, vector<64x2xf32>,
    return
  }
  func.func @transform_0(%arg0: i32) -> (i32, i32) {
    %c0_i32 = arith.constant 0 : i32
    %c0_i32_0 = arith.constant 0 : i32
    return %c0_i32, %arg0 : i32, i32
  }
  func.func @transform_1(%arg0: i32) -> (i32, i32) {
    %c0_i32 = arith.constant 0 : i32
    %c0_i32_0 = arith.constant 0 : i32
    return %c0_i32, %arg0 : i32, i32
  }
  func.func @transform_2(%arg0: i32) -> (i32, i32) {
    %c0_i32 = arith.constant 0 : i32
    %c0_i32_0 = arith.constant 0 : i32
    return %c0_i32, %arg0 : i32, i32
  }
  func.func @transform_3(%arg0: i32) -> (i32, i32) {
    %c0_i32 = arith.constant 0 : i32
    %c0_i32_0 = arith.constant 0 : i32
    %c0_i32_1 = arith.constant 0 : i32
    return %c0_i32, %c0_i32_0 : i32, i32
  }
  func.func @transform_4(%arg0: i32) -> (i32, i32) {
    %c0_i32 = arith.constant 0 : i32
    %c0_i32_0 = arith.constant 0 : i32
    %c0_i32_1 = arith.constant 0 : i32
    return %c0_i32, %c0_i32_0 : i32, i32
  }
  func.func @transform_5(%arg0: i32) -> (i32, i32) {
    %c0_i32 = arith.constant 0 : i32
    %c0_i32_0 = arith.constant 0 : i32
    %c0_i32_1 = arith.constant 0 : i32
    return %c0_i32, %c0_i32_0 : i32, i32
  }
  func.func @transform_6(%arg0: i32) -> (i32, i32) {
    %c0_i32 = arith.constant 0 : i32
    %c0_i32_0 = arith.constant 0 : i32
    %c0_i32_1 = arith.constant 0 : i32
    return %c0_i32, %c0_i32_0 : i32, i32
  }
  func.func @transform_7(%arg0: i32) -> (i32, i32) {
    %c0_i32 = arith.constant 0 : i32
    %c0_i32_0 = arith.constant 0 : i32
    %c0_i32_1 = arith.constant 0 : i32
    return %c0_i32, %c0_i32_0 : i32, i32
  }
  func.func @transform_8(%arg0: i32) -> (i32, i32) {
    %c0_i32 = arith.constant 0 : i32
    %c0_i32_0 = arith.constant 0 : i32
    %c0_i32_1 = arith.constant 0 : i32
    return %c0_i32, %c0_i32_0 : i32, i32
  }
  func.func @transform_9(%arg0: i32) -> (i32, i32) {
    %c0_i32 = arith.constant 0 : i32
    %c0_i32_0 = arith.constant 0 : i32
    %c0_i32_1 = arith.constant 0 : i32
    return %c0_i32, %c0_i32_0 : i32, i32
  }
  func.func @transform_10(%arg0: i32) -> (i32, i32) {
    %c0_i32 = arith.constant 0 : i32
    %c0_i32_0 = arith.constant 0 : i32
    %c0_i32_1 = arith.constant 0 : i32
    return %c0_i32, %c0_i32_0 : i32, i32
  }
  func.func @transform_11(%arg0: i32) -> (i32, i32) {
    %c0_i32 = arith.constant 0 : i32
    %c0_i32_0 = arith.constant 0 : i32
    %c0_i32_1 = arith.constant 0 : i32
    return %c0_i32, %c0_i32_0 : i32, i32
  }
  func.func @transform_12(%arg0: i32) -> (i32, i32) {
    %c0_i32 = arith.constant 0 : i32
    %c0_i32_0 = arith.constant 0 : i32
    %c0_i32_1 = arith.constant 0 : i32
    return %c0_i32, %c0_i32_0 : i32, i32
  }
  func.func @transform_13(%arg0: i32) -> (i32, i32) {
    %c0_i32 = arith.constant 0 : i32
    %c0_i32_0 = arith.constant 0 : i32
    %c0_i32_1 = arith.constant 0 : i32
    return %c0_i32, %c0_i32_0 : i32, i32
  }
  func.func @transform_14(%arg0: i32) -> (i32, i32) {
    %c0_i32 = arith.constant 0 : i32
    %c0_i32_0 = arith.constant 0 : i32
    %c0_i32_1 = arith.constant 0 : i32
    return %c0_i32, %c0_i32_0 : i32, i32
  }
  func.func @transform_15(%arg0: i32) -> (i32, i32) {
    %c0_i32 = arith.constant 0 : i32
    %c0_i32_0 = arith.constant 0 : i32
    %c0_i32_1 = arith.constant 0 : i32
    return %c0_i32, %c0_i32_0 : i32, i32
  }
  func.func @transform_16(%arg0: i32) -> (i32, i32) {
    %c0_i32 = arith.constant 0 : i32
    %c0_i32_0 = arith.constant 0 : i32
    %c0_i32_1 = arith.constant 0 : i32
    return %c0_i32, %c0_i32_0 : i32, i32
  }
  func.func @transform_17(%arg0: i32) -> (i32, i32) {
    %c0_i32 = arith.constant 0 : i32
    %c0_i32_0 = arith.constant 0 : i32
    %c0_i32_1 = arith.constant 0 : i32
    return %c0_i32, %c0_i32_0 : i32, i32
  }
  func.func @transform_18(%arg0: i32) -> (i32, i32) {
    %c0_i32 = arith.constant 0 : i32
    %c0_i32_0 = arith.constant 0 : i32
    %c0_i32_1 = arith.constant 0 : i32
    return %c0_i32, %c0_i32_0 : i32, i32
  }
  func.func @transform_19(%arg0: i32) -> (i32, i32) {
    %c0_i32 = arith.constant 0 : i32
    %c0_i32_0 = arith.constant 0 : i32
    %c0_i32_1 = arith.constant 0 : i32
    return %c0_i32, %c0_i32_0 : i32, i32
  }
  func.func @transform_20(%arg0: i32) -> (i32, i32) {
    %c0_i32 = arith.constant 0 : i32
    %c0_i32_0 = arith.constant 0 : i32
    return %c0_i32, %arg0 : i32, i32
  }
}

</mosaic_0001>

<bundles_post_ra>
// kernel: tpu_custom_call.1
= control target key start
LH: loop header
LB: loop body
LE: loop exit
PB: predicated region body
PF: predicated region fallthrough
CT: control target
= control target key end

     0   :  { %vm189_vm0 = vcmask 64512   ;;  %v6108_v0 = vmov 0.0   ;;  %v6109_v4 = vmov 0   ;;  %vm250_vm1 = vcmask 130048   ;;  %s9624_s6 = inlined_call_operand.vmem [shape: f32[32,8], index: 6, kind: input, shape index: {}]   ;;  %s9625_s4 = inlined_call_operand.vmem [shape: f32[32,1], index: 4, kind: input, shape index: {}]   ;;  %s9626_s3 = inlined_call_operand.vmem [shape: f32[32,1], index: 3, kind: input, shape index: {}]   ;;  %s9627_s0 = inlined_call_operand.vmem [shape: f32[8,2], index: 0, kind: input, shape index: {}]   ;;  %s9628_s1 = inlined_call_operand.vmem [shape: f32[8,2], index: 1, kind: input, shape index: {}]   ;;  %s9629_s5 = inlined_call_operand.vmem [shape: f32[32,1], index: 5, kind: input, shape index: {}]   ;;  %s9630_s8 = inlined_call_operand.vmem [shape: f32[32,1], index: 8, kind: input, shape index: {}]   ;;  %s9631_s10 = inlined_call_operand.vmem [shape: f32[256,1], index: 10, kind: input, shape index: {}]   ;;  %s9632_s12 = inlined_call_operand.vmem [shape: f32[80,1], index: 12, kind: input, shape index: {}]   ;;  %s9633_s16 = inlined_call_operand.vmem [shape: f32[40,1], index: 16, kind: input, shape index: {}]   ;;  %s9634_s7 = inlined_call_operand.vmem [shape: f32[32,16], index: 7, kind: input, shape index: {}]   ;;  %s9635_s14 = inlined_call_operand.vmem [shape: f32[40,1], index: 14, kind: input, shape index: {}]   ;;  %s9636_s19 = inlined_call_operand.vmem [shape: f32[64,1], index: 19, kind: input, shape index: {}]   ;;  %s9637_s9 = inlined_call_operand.vmem [shape: f32[256,64], index: 9, kind: input, shape index: {}]   ;;  %s9638_s11 = inlined_call_operand.vmem [shape: f32[80,256], index: 11, kind: input, shape index: {}]   ;;  %s9639_s13 = inlined_call_operand.vmem [shape: f32[40,80], index: 13, kind: input, shape index: {}]   ;;  %s9640_s15 = inlined_call_operand.vmem [shape: f32[40,16], index: 15, kind: input, shape index: {}]   ;;  %s9641_s2 = inlined_call_operand.vmem [shape: f32[16,2], index: 2, kind: input, shape index: {}]   ;;  %s9642_s18 = inlined_call_operand.vmem [shape: f32[64,40], index: 18, kind: input, shape index: {}]   ;;  %s9643_s17 = inlined_call_operand.vmem [shape: f32[64,40], index: 17, kind: input, shape index: {}]   ;;  %s9644_s20 = inlined_call_operand.vmem [shape: f32[64,2], index: 20, kind: output, shape index: {}]  }
   0x1   :  { %9710 = sst [smem:[#allocation78_spill]] %s9624_s6  ;;  %217 = vmatpush.msra.mxu0 %v6108_v0  ;;  %5809 = vmatpush.msra.mxu2 %v6108_v0  ;;  %v122_v12 = vld [vmem:[%s9629_s5 + $0x8] sm:$0xff]  ;;  %v124_v13 = vld [vmem:[%s9629_s5 + $0x18] sm:$0xff]  ;;  %v121_v14 = vld [vmem:[%s9629_s5] sm:$0xff]  ;;  %vm307_vm2 = vcmask 15360   ;;  %vm1339_vm3 = vcmask 523264  }
   0x2   :  { %9711 = sst [smem:[#allocation79_spill]] %s9625_s4  ;;  %5815 = vset.pattern.permute.xlu2 %v6109_v4  ;;  %5814 = vset.pattern.permute.xlu1 %v6109_v4  ;;  %v123_v16 = vld [vmem:[%s9629_s5 + $0x10] sm:$0xff]  ;;  %v146_v18 = vld [vmem:[%s9630_s8 + $0x8] sm:$0xff]  ;;  %v148_v19 = vld [vmem:[%s9630_s8 + $0x18] sm:$0xff]  ;;  %vm4031_vm4 = vcmask 654336   ;;  %vm4790_vm5 = vcmask 326656  }
   0x3   :  { %9712 = sst [smem:[#allocation80_spill]] %s9626_s3  ;;  %5813 = vset.pattern.permute.xlu0 %v6109_v4  ;;  %v145_v20 = vld [vmem:[%s9630_s8] sm:$0xff]  ;;  %v1162_v21 = vld [vmem:[%s9631_s10 + $0x78] sm:$0xff]  ;;  %v1161_v22 = vld [vmem:[%s9631_s10 + $0x70] sm:$0xff] }
   0x4   :  { %9713 = sst [smem:[#allocation81_spill]] %s9627_s0  ;;  %v147_v23 = vld [vmem:[%s9630_s8 + $0x10] sm:$0xff]  ;;  %v1159_v24 = vld [vmem:[%s9631_s10 + $0x60] sm:$0xff]  ;;  %v1158_v25 = vld [vmem:[%s9631_s10 + $0x58] sm:$0xff] }
   0x5   :  { %9714 = sst [smem:[#allocation82_spill]] %s9628_s1  ;;  %v1160_v26 = vld [vmem:[%s9631_s10 + $0x68] sm:$0xff]  ;;  %v1155_v28 = vld [vmem:[%s9631_s10 + $0x40] sm:$0xff]  ;;  %v1157_v29 = vld [vmem:[%s9631_s10 + $0x50] sm:$0xff] }
   0x6   :  { %s9715_s23 = sld [smem:[#allocation78_spill]]  ;;  %v1156_v27 = vld [vmem:[%s9631_s10 + $0x48] sm:$0xff]  ;;  %v1153_v30 = vld [vmem:[%s9631_s10 + $0x30] sm:$0xff]  ;;  %v1154_v32 = vld [vmem:[%s9631_s10 + $0x38] sm:$0xff] }
   0x7   :  { %s9716_s26 = sld [smem:[#allocation79_spill]]  ;;  %v1152_v31 = vld [vmem:[%s9631_s10 + $0x28] sm:$0xff]  ;;  %v1150_v33 = vld [vmem:[%s9631_s10 + $0x18] sm:$0xff]  ;;  %v1149_v34 = vld [vmem:[%s9631_s10 + $0x10] sm:$0xff] }
   0x8   :  { %s9717_s1 = sld [smem:[#allocation80_spill]]  ;;  %v1151_v35 = vld [vmem:[%s9631_s10 + $0x20] sm:$0xff]  ;;  %v1178_v37 = vld [vmem:[%s9631_s10 + $0xf8] sm:$0xff]  ;;  %v1148_v38 = vld [vmem:[%s9631_s10 + $0x8] sm:$0xff] }
   0x9   :  { %v1147_v36 = vld [vmem:[%s9631_s10] sm:$0xff]  ;;  %v1176_v39 = vld [vmem:[%s9631_s10 + $0xe8] sm:$0xff]  ;;  %v1177_v41 = vld [vmem:[%s9631_s10 + $0xf0] sm:$0xff]  ;;  %s9718_s22 = sld [smem:[#allocation81_spill]] }
   0xa   :  { %v1175_v40 = vld [vmem:[%s9631_s10 + $0xe0] sm:$0xff]  ;;  %v1173_v43 = vld [vmem:[%s9631_s10 + $0xd0] sm:$0xff]  ;;  %v1172_v44 = vld [vmem:[%s9631_s10 + $0xc8] sm:$0xff]  ;;  %s9719_s25 = sld [smem:[#allocation82_spill]] }
   0xb   :  { %v1174_v45 = vld [vmem:[%s9631_s10 + $0xd8] sm:$0xff] }
   0xc   :  { %v6218_v1 = vld [vmem:[%s9715_s23] sm:$0xff]  ;;  %v6223_v2 = vld [vmem:[%s9715_s23 + $0x18] sm:$0xff]  ;;  %v6241_v7 = vld [vmem:[%s9715_s23 + $0x8] sm:$0xff] }
   0xd   :  { %v97_v3 = vld [vmem:[%s9716_s26] sm:$0xff]  ;;  %5745 = vmatmul.msk.f32.vlgmr.msra.gmra.mxu0 %vm189_vm0, %v6218_v1  ;;  %5748 = vmatmul.msk.f32.vlgmr.msra.gmra.mxu2 %vm189_vm0, %v6223_v2  ;;  %v98_v8 = vld [vmem:[%s9716_s26 + $0x8] sm:$0xff]  ;;  %v100_v9 = vld [vmem:[%s9716_s26 + $0x18] sm:$0xff] }
   0xe   :  { %v76_v5 = vld [vmem:[%s9717_s1 + $0x18] sm:$0xff]  ;;  %v73_v6 = vld [vmem:[%s9717_s1] sm:$0xff]  ;;  %103 = vperm.xlu1 %5814, %v97_v3   ;;  %v74_v10 = vld [vmem:[%s9717_s1 + $0x8] sm:$0xff] }
   0xf   :  { %94 = vperm.xlu2 %5815, %v76_v5   ;;  %79 = vperm.xlu0 %5813, %v73_v6   ;;  %v6257_v11 = vld [vmem:[%s9715_s23 + $0x10] sm:$0xff]  ;;  %v6365_v46 = vld [vmem:[%s9718_s22 + $0x1] ss:$0 sm:$0xff]  ;;  %v6375_v48 = vld [vmem:[%s9718_s22 + $0x2] ss:$0 sm:$0xff] }
  0x10   :  { %v99_v15 = vld [vmem:[%s9716_s26 + $0x10] sm:$0xff]  ;;  %v6370_v47 = vld [vmem:[%s9719_s25 + $0x1] ss:$0 sm:$0xff]  ;;  %v6380_v49 = vld [vmem:[%s9718_s22 + $0x3] ss:$0 sm:$0xff] }
  0x11   :  { %v75_v17 = vld [vmem:[%s9717_s1 + $0x10] sm:$0xff]  ;;  %v6385_v50 = vld [vmem:[%s9718_s22 + $0x4] ss:$0 sm:$0xff]  ;;  %v6390_v51 = vld [vmem:[%s9718_s22 + $0x5] ss:$0 sm:$0xff] }
  0x12   :  { %v6395_v52 = vld [vmem:[%s9718_s22 + $0x6] ss:$0 sm:$0xff]  ;;  %v6400_v53 = vld [vmem:[%s9718_s22 + $0x7] ss:$0 sm:$0xff]  ;;  %v6405_v54 = vld [vmem:[%s9719_s25 + $0x2] ss:$0 sm:$0xff] }
  0x13   :  { %v6410_v55 = vld [vmem:[%s9719_s25 + $0x3] ss:$0 sm:$0xff]  ;;  %v6415_v56 = vld [vmem:[%s9719_s25 + $0x4] ss:$0 sm:$0xff]  ;;  %v6420_v57 = vld [vmem:[%s9719_s25 + $0x5] ss:$0 sm:$0xff] }
  0x14   :  { %v6425_v58 = vld [vmem:[%s9719_s25 + $0x6] ss:$0 sm:$0xff]  ;;  %v6430_v59 = vld [vmem:[%s9719_s25 + $0x7] ss:$0 sm:$0xff] }
  0x15   :  { %5746 = vmatmul.msk.f32.gmra.mxu0 %vm189_vm0, %v6241_v7 }
  0x16   :  { %108 = vperm.xlu1 %5814, %v98_v8  }
  0x17   :  { %118 = vperm.xlu2 %5815, %v100_v9   ;;  %84 = vperm.xlu0 %5813, %v74_v10   ;;  %v1170_v10 = vld [vmem:[%s9631_s10 + $0xb8] sm:$0xff] }
  0x1d   :  { %5747 = vmatmul.msk.f32.gmra.mxu0 %vm189_vm0, %v6257_v11 }
  0x1e   :  { %132 = vperm.xlu1 %5814, %v122_v12  }
  0x1f   :  { %142 = vperm.xlu2 %5815, %v124_v13   ;;  %127 = vperm.xlu0 %5813, %v121_v14  }
  0x26   :  { %113 = vperm.xlu1 %5814, %v99_v15  }
  0x27   :  { %137 = vperm.xlu2 %5815, %v123_v16   ;;  %89 = vperm.xlu0 %5813, %v75_v17   ;;  %v1169_v16 = vld [vmem:[%s9631_s10 + $0xb0] sm:$0xff]  ;;  %v1171_v17 = vld [vmem:[%s9631_s10 + $0xc0] sm:$0xff] }
  0x2e   :  { %156 = vperm.xlu1 %5814, %v146_v18  }
  0x2f   :  { %166 = vperm.xlu2 %5815, %v148_v19   ;;  %151 = vperm.xlu0 %5813, %v145_v20  }
  0x36   :  { %1256 = vperm.xlu1 %5814, %v1162_v21  }
  0x37   :  { %1251 = vperm.xlu2 %5815, %v1161_v22   ;;  %161 = vperm.xlu0 %5813, %v147_v23  }
  0x3e   :  { %1241 = vperm.xlu1 %5814, %v1159_v24  }
  0x3f   :  { %1236 = vperm.xlu2 %5815, %v1158_v25   ;;  %1246 = vperm.xlu0 %5813, %v1160_v26  }
  0x46   :  { %1226 = vperm.xlu1 %5814, %v1156_v27  }
  0x47   :  { %1221 = vperm.xlu2 %5815, %v1155_v28   ;;  %1231 = vperm.xlu0 %5813, %v1157_v29   ;;  %v1167_v29 = vld [vmem:[%s9631_s10 + $0xa0] sm:$0xff] }
  0x4e   :  { %1211 = vperm.xlu1 %5814, %v1153_v30  }
  0x4f   :  { %1206 = vperm.xlu2 %5815, %v1152_v31   ;;  %1216 = vperm.xlu0 %5813, %v1154_v32  }
  0x56   :  { %1196 = vperm.xlu1 %5814, %v1150_v33  }
  0x57   :  { %1191 = vperm.xlu2 %5815, %v1149_v34   ;;  %1201 = vperm.xlu0 %5813, %v1151_v35   ;;  %v1166_v34 = vld [vmem:[%s9631_s10 + $0x98] sm:$0xff]  ;;  %v1168_v35 = vld [vmem:[%s9631_s10 + $0xa8] sm:$0xff] }
  0x5e   :  { %1181 = vperm.xlu1 %5814, %v1147_v36   ;;  %v6497_v36 = vld [vmem:[%s9718_s22] ss:$0 sm:$0xff] }
  0x5f   :  { %1336 = vperm.xlu2 %5815, %v1178_v37   ;;  %1186 = vperm.xlu0 %5813, %v1148_v38   ;;  %v6502_v38 = vld [vmem:[%s9719_s25] ss:$0 sm:$0xff] }
  0x66   :  { %1326 = vperm.xlu1 %5814, %v1176_v39  }
  0x67   :  { %1321 = vperm.xlu2 %5815, %v1175_v40   ;;  %1331 = vperm.xlu0 %5813, %v1177_v41  }
  0x69   :  { %v6351_v42 = vpop.permute.xlu2 %94 }
  0x6a   :  { %v315_v60 = vmul.f32 %v6365_v46, %v6351_v42  ;;  %v429_v61 = vmul.f32 %v6375_v48, %v6351_v42  ;;  %v543_v62 = vmul.f32 %v6380_v49, %v6351_v42  ;;  %v657_v0 = vmul.f32 %v6385_v50, %v6351_v42 }
  0x6b   :  { %v771_v3 = vmul.f32 %v6390_v51, %v6351_v42  ;;  %v885_v4 = vmul.f32 %v6395_v52, %v6351_v42  ;;  %v999_v5 = vmul.f32 %v6400_v53, %v6351_v42 }
  0x6e   :  { %1311 = vperm.xlu1 %5814, %v1173_v43  }
  0x6f   :  { %1306 = vperm.xlu2 %5815, %v1172_v44   ;;  %1316 = vperm.xlu0 %5813, %v1174_v45   ;;  %v175_v44 = vmul.f32 %v6497_v36, %v6351_v42  ;;  %v1163_v42 = vld [vmem:[%s9631_s10 + $0x80] sm:$0xff] }
  0x71   :  { %v119_v63 = vpop.permute.xlu2 %118 }
  0x72   :  { %v320_v6 = vmul.f32 %v6370_v47, %v119_v63  ;;  %v434_v8 = vmul.f32 %v6405_v54, %v119_v63  ;;  %v548_v9 = vmul.f32 %v6410_v55, %v119_v63  ;;  %v662_v12 = vmul.f32 %v6415_v56, %v119_v63 }
  0x73   :  { %v776_v13 = vmul.f32 %v6420_v57, %v119_v63  ;;  %v890_v14 = vmul.f32 %v6425_v58, %v119_v63  ;;  %v1004_v15 = vmul.f32 %v6430_v59, %v119_v63 }
  0x74   :  { %v324_v18 = vadd.f32 %v320_v6, %v315_v60  ;;  %v438_v19 = vadd.f32 %v434_v8, %v429_v61  ;;  %v552_v20 = vadd.f32 %v548_v9, %v543_v62  ;;  %v666_v21 = vadd.f32 %v662_v12, %v657_v0  ;;  %v1164_v62 = vld [vmem:[%s9631_s10 + $0x88] sm:$0xff]  ;;  %v1165_v6 = vld [vmem:[%s9631_s10 + $0x90] sm:$0xff] }
  0x75   :  { %v780_v22 = vadd.f32 %v776_v13, %v771_v3  ;;  %v894_v23 = vadd.f32 %v890_v14, %v885_v4  ;;  %v1008_v24 = vadd.f32 %v1004_v15, %v999_v5  ;;  %v180_v8 = vmul.f32 %v6502_v38, %v119_v63 }
  0x76   :  { %1296 = vperm.xlu1 %5814, %v1170_v10  }
  0x77   :  { %1291 = vperm.xlu2 %5815, %v1169_v16   ;;  %1301 = vperm.xlu0 %5813, %v1171_v17  }
  0x79   :  { %v6462_v25 = vpop.permute.xlu2 %142 }
  0x7a   :  { %v6465_v26 = vadd.f32 %v324_v18, %v6462_v25  ;;  %v6468_v27 = vadd.f32 %v438_v19, %v6462_v25  ;;  %v6471_v28 = vadd.f32 %v552_v20, %v6462_v25  ;;  %v6477_v30 = vadd.f32 %v666_v21, %v6462_v25 }
  0x7b   :  { %v6480_v31 = vadd.f32 %v780_v22, %v6462_v25  ;;  %v6483_v32 = vadd.f32 %v894_v23, %v6462_v25  ;;  %v6486_v33 = vadd.f32 %v1008_v24, %v6462_v25  ;;  %v184_v20 = vadd.f32 %v180_v8, %v175_v44 }
  0x7c   :  { %9720 = vst [vmem:[#allocation3_spill] sm:$0xff] %v6471_v28 }
  0x7d   :  { %9721 = vst [vmem:[#allocation4_spill] sm:$0xff] %v6477_v30 }
  0x7e   :  { %9722 = vst [vmem:[#allocation5_spill] sm:$0xff] %v6480_v31  ;;  %1281 = vperm.xlu1 %5814, %v1167_v29  }
  0x7f   :  { %9723 = vst [vmem:[#allocation6_spill] sm:$0xff] %v6483_v32  ;;  %1276 = vperm.xlu2 %5815, %v1166_v34   ;;  %1286 = vperm.xlu0 %5813, %v1168_v35  }
  0x80   :  { %9724 = vst [vmem:[#allocation7_spill] sm:$0xff] %v6486_v33  ;;  %v104_v37 = vpop.permute.xlu1 %103 }
  0x81   :  { %v80_v39 = vpop.permute.xlu0 %79  ;;  %v317_v40 = vmul.f32 %v6370_v47, %v104_v37  ;;  %v431_v41 = vmul.f32 %v6405_v54, %v104_v37  ;;  %v545_v43 = vmul.f32 %v6410_v55, %v104_v37  ;;  %v659_v3 = vmul.f32 %v6415_v56, %v104_v37 }
  0x82   :  { %v312_v45 = vmul.f32 %v6365_v46, %v80_v39  ;;  %v426_v60 = vmul.f32 %v6375_v48, %v80_v39  ;;  %v540_v61 = vmul.f32 %v6380_v49, %v80_v39  ;;  %v654_v0 = vmul.f32 %v6385_v50, %v80_v39 }
  0x83   :  { %v768_v4 = vmul.f32 %v6390_v51, %v80_v39  ;;  %v773_v5 = vmul.f32 %v6420_v57, %v104_v37  ;;  %v882_v15 = vmul.f32 %v6395_v52, %v80_v39  ;;  %v887_v16 = vmul.f32 %v6425_v58, %v104_v37 }
  0x84   :  { %v321_v9 = vadd.f32 %v317_v40, %v312_v45  ;;  %v435_v10 = vadd.f32 %v431_v41, %v426_v60  ;;  %v549_v12 = vadd.f32 %v545_v43, %v540_v61  ;;  %v6526_v13 = vadd.f32 %v659_v3, %v654_v0  ;;  %v2693_v3 = vld [vmem:[%s9632_s12 + $0x38] sm:$0xff] }
  0x85   :  { %v6528_v14 = vadd.f32 %v773_v5, %v768_v4  ;;  %v996_v17 = vmul.f32 %v6400_v53, %v80_v39  ;;  %v1001_v18 = vmul.f32 %v6430_v59, %v104_v37  ;;  %v6534_v19 = vadd.f32 %v887_v16, %v882_v15  ;;  %v2695_v4 = vld [vmem:[%s9632_s12 + $0x48] sm:$0xff] }
  0x86   :  { %1266 = vperm.xlu1 %5814, %v1164_v62   ;;  %v177_v21 = vmul.f32 %v6502_v38, %v104_v37  ;;  %v2694_v37 = vld [vmem:[%s9632_s12 + $0x40] sm:$0xff]  ;;  %v172_v5 = vmul.f32 %v6497_v36, %v80_v39 }
  0x87   :  { %1261 = vperm.xlu2 %5815, %v1163_v42   ;;  %1271 = vperm.xlu0 %5813, %v1165_v6   ;;  %v1005_v22 = vadd.f32 %v1001_v18, %v996_v17 }
  0x88   :  { %v109_v63 = vpop.permute.xlu1 %108  ;;  %v181_v39 = vadd.f32 %v177_v21, %v172_v5 }
  0x89   :  { %v85_v23 = vpop.permute.xlu0 %84  ;;  %v178_v24 = vmul.f32 %v6502_v38, %v109_v63  ;;  %v318_v29 = vmul.f32 %v6370_v47, %v109_v63  ;;  %v432_v34 = vmul.f32 %v6405_v54, %v109_v63  ;;  %v546_v35 = vmul.f32 %v6410_v55, %v109_v63 }
  0x8a   :  { %v219_v40 = vpop.f32.mrf.mxu0  ;;  %v173_v41 = vmul.f32 %v6497_v36, %v85_v23  ;;  %v313_v43 = vmul.f32 %v6365_v46, %v85_v23  ;;  %v427_v45 = vmul.f32 %v6375_v48, %v85_v23  ;;  %v541_v44 = vmul.f32 %v6380_v49, %v85_v23 }
  0x8b   :  { %v655_v60 = vmul.f32 %v6385_v50, %v85_v23  ;;  %v660_v61 = vmul.f32 %v6415_v56, %v109_v63  ;;  %v769_v62 = vmul.f32 %v6390_v51, %v85_v23  ;;  %v774_v0 = vmul.f32 %v6420_v57, %v109_v63 }
  0x8c   :  { %v322_v42 = vadd.f32 %v318_v29, %v313_v43  ;;  %v436_v6 = vadd.f32 %v432_v34, %v427_v45  ;;  %v550_v8 = vadd.f32 %v546_v35, %v541_v44  ;;  %v883_v17 = vmul.f32 %v6395_v52, %v85_v23 }
  0x8d   :  { %v664_v15 = vadd.f32 %v660_v61, %v655_v60  ;;  %v778_v16 = vadd.f32 %v774_v0, %v769_v62  ;;  %v888_v18 = vmul.f32 %v6425_v58, %v109_v63  ;;  %v997_v33 = vmul.f32 %v6400_v53, %v85_v23 }
  0x8e   :  { %2738 = vperm.xlu1 %5814, %v2694_v37   ;;  %v1002_v32 = vmul.f32 %v6430_v59, %v109_v63  ;;  %v182_v31 = vadd.f32 %v178_v24, %v173_v41  ;;  %v188_v35 = vadd.f32 %v184_v20, %v6462_v25  ;;  %v2691_v25 = vld [vmem:[%s9632_s12 + $0x28] sm:$0xff] }
  0x8f   :  { %2733 = vperm.xlu2 %5815, %v2693_v3   ;;  %2743 = vperm.xlu0 %5813, %v2695_v4   ;;  %v892_v30 = vadd.f32 %v888_v18, %v883_v17 }
  0x90   :  { %v133_v28 = vpop.permute.xlu1 %132  ;;  %v1006_v29 = vadd.f32 %v1002_v32, %v997_v33  ;;  %v228_v37 = vpop.f32.mrf.mxu2 }
  0x91   :  { %v128_v34 = vpop.permute.xlu0 %127  ;;  %v186_v43 = vadd.f32 %v182_v31, %v133_v28  ;;  %v6564_v45 = vadd.f32 %v322_v42, %v133_v28  ;;  %v6566_v44 = vadd.f32 %v436_v6, %v133_v28  ;;  %v234_v41 = vadd.f32 %v228_v37, %v188_v35 }
  0x92   :  { %v185_v60 = vadd.f32 %v181_v39, %v128_v34  ;;  %v222_v23 = vpop.f32.mrf.mxu0  ;;  %v6568_v61 = vadd.f32 %v321_v9, %v128_v34  ;;  %v6570_v63 = vadd.f32 %v435_v10, %v128_v34  ;;  %v6572_v24 = vadd.f32 %v549_v12, %v128_v34  ;;  %v2690_v9 = vld [vmem:[%s9632_s12 + $0x20] sm:$0xff]  ;;  %v2692_v10 = vld [vmem:[%s9632_s12 + $0x30] sm:$0xff]  ;;  %v138_v39 = vpop.permute.xlu2 %137 }
  0x93   :  { %v232_v21 = vadd.f32 %v222_v23, %v186_v43  ;;  %v6577_v31 = vadd.f32 %v550_v8, %v133_v28  ;;  %v6580_v32 = vadd.f32 %v6526_v13, %v128_v34  ;;  %v6588_v12 = vadd.f32 %v664_v15, %v133_v28  ;;  %v2688_v15 = vld [vmem:[%s9632_s12 + $0x10] sm:$0xff] }
  0x94   :  { %v231_v33 = vadd.f32 %v219_v40, %v185_v60  ;;  %v6591_v20 = vadd.f32 %v6528_v14, %v128_v34  ;;  %v6593_v62 = vadd.f32 %v778_v16, %v133_v28  ;;  %v6596_v0 = vadd.f32 %v6534_v19, %v128_v34 }
  0x95   :  { %v6598_v13 = vadd.f32 %v892_v30, %v133_v28  ;;  %v6600_v40 = vadd.f32 %v1005_v22, %v128_v34  ;;  %v6602_v3 = vadd.f32 %v1006_v29, %v133_v28 }
  0x96   :  { %5832 = vtanh.f32 %v231_v33  ;;  %2723 = vperm.xlu1 %5814, %v2691_v25  }
  0x97   :  { %5834 = vtanh.f32 %v232_v21  ;;  %2718 = vperm.xlu2 %5815, %v2690_v9   ;;  %2728 = vperm.xlu0 %5813, %v2692_v10  }
  0x98   :  { %5836 = vtanh.f32 %v234_v41  ;;  %v114_v4 = vpop.permute.xlu1 %113 }
  0x99   :  { %v90_v14 = vpop.permute.xlu0 %89  ;;  %v179_v5 = vmul.f32 %v6502_v38, %v114_v4  ;;  %v319_v42 = vmul.f32 %v6370_v47, %v114_v4  ;;  %v433_v19 = vmul.f32 %v6405_v54, %v114_v4  ;;  %v547_v30 = vmul.f32 %v6410_v55, %v114_v4 }
  0x9a   :  { %v174_v22 = vmul.f32 %v6497_v36, %v90_v14  ;;  %v314_v6 = vmul.f32 %v6365_v46, %v90_v14  ;;  %v428_v28 = vmul.f32 %v6375_v48, %v90_v14  ;;  %v542_v8 = vmul.f32 %v6380_v49, %v90_v14  ;;  %v2687_v46 = vld [vmem:[%s9632_s12 + $0x8] sm:$0xff]  ;;  %v2689_v48 = vld [vmem:[%s9632_s12 + $0x18] sm:$0xff]  ;;  %v225_v29 = vpop.f32.mrf.mxu0 }
  0x9b   :  { %v656_v38 = vmul.f32 %v6385_v50, %v90_v14  ;;  %v661_v47 = vmul.f32 %v6415_v56, %v114_v4  ;;  %v770_v54 = vmul.f32 %v6390_v51, %v90_v14  ;;  %v775_v55 = vmul.f32 %v6420_v57, %v114_v4 }
  0x9c   :  { %v5833_v16 = vpop.eup %5832  ;;  %v183_v36 = vadd.f32 %v179_v5, %v174_v22  ;;  %v323_v49 = vadd.f32 %v319_v42, %v314_v6  ;;  %v437_v17 = vadd.f32 %v433_v19, %v428_v28  ;;  %v551_v18 = vadd.f32 %v547_v30, %v542_v8  ;;  %v4450_v6 = vld [vmem:[%s9633_s16 + $0x20] sm:$0xff] }
  0x9d   :  { %v5835_v50 = vpop.eup %5834  ;;  %v239_v56 = vmul.f32 0.5, %v5833_v16  ;;  %v665_v51 = vadd.f32 %v661_v47, %v656_v38  ;;  %v779_v34 = vadd.f32 %v775_v55, %v770_v54  ;;  %v884_v57 = vmul.f32 %v6395_v52, %v90_v14  ;;  %v4447_v47 = vld [vmem:[%s9633_s16 + $0x8] sm:$0xff]  ;;  %v4446_v55 = vld [vmem:[%s9633_s16] sm:$0xff]  ;;  %v4448_v16 = vld [vmem:[%s9633_s16 + $0x10] sm:$0xff] }
  0x9e   :  { %v5837_v35 = vpop.eup %5836  ;;  %v240_v43 = vmul.f32 0.5, %v5835_v50  ;;  %v187_v37 = vadd.f32 %v183_v36, %v138_v39  ;;  %2708 = vperm.xlu1 %5814, %v2688_v15   ;;  %v6626_v60 = vadd.f32 %v323_v49, %v138_v39  ;;  %v6628_v23 = vadd.f32 %v437_v17, %v138_v39  ;;  %v4449_v15 = vld [vmem:[%s9633_s16 + $0x18] sm:$0xff]  ;;  %v4003_v17 = vld [vmem:[%s9635_s14 + $0x10] sm:$0xff]  ;;  %v6692_v50 = vld [vmem:[%s9634_s7 + $0x8] sm:$0xff] }
  0x9f   :  { %v242_v41 = vadd.f32 0.5, %v239_v56  ;;  %2703 = vperm.xlu2 %5815, %v2687_v46   ;;  %2713 = vperm.xlu0 %5813, %v2689_v48   ;;  %v6630_v21 = vadd.f32 %v551_v18, %v138_v39  ;;  %v6632_v25 = vadd.f32 %v665_v51, %v138_v39  ;;  %v6634_v33 = vadd.f32 %v779_v34, %v138_v39  ;;  %v6667_v46 = vld [vmem:[%s9634_s7] sm:$0xff]  ;;  %v6672_v48 = vld [vmem:[%s9634_s7 + $0x18] sm:$0xff]  ;;  %v6710_v51 = vld [vmem:[%s9634_s7 + $0x10] sm:$0xff] }
  0xa0   :  { %v243_v9 = vadd.f32 0.5, %v240_v43  ;;  %v233_v10 = vadd.f32 %v225_v29, %v187_v37  ;;  %v889_v52 = vmul.f32 %v6425_v58, %v114_v4  ;;  %v998_v5 = vmul.f32 %v6400_v53, %v90_v14  ;;  %v2686_v53 = vld [vmem:[%s9632_s12] sm:$0xff]  ;;  %v4004_v49 = vld [vmem:[%s9635_s14 + $0x18] sm:$0xff]  ;;  %v4002_v29 = vld [vmem:[%s9635_s14 + $0x8] sm:$0xff] }
  0xa1   :  { %v246_v42 = vmul.f32 %v5837_v35, %v242_v41  ;;  %v1003_v19 = vmul.f32 %v6430_v59, %v114_v4  ;;  %v4005_v18 = vld [vmem:[%s9635_s14 + $0x20] sm:$0xff]  ;;  %v5671_v34 = vld [vmem:[%s9636_s19 + $0x10] sm:$0xff]  ;;  %v5670_v35 = vld [vmem:[%s9636_s19 + $0x8] sm:$0xff] }
  0xa2   :  { %v245_v30 = vmul.f32 0.0, %v243_v9  ;;  %5838 = vtanh.f32 %v233_v10  ;;  %v893_v22 = vadd.f32 %v889_v52, %v884_v57  ;;  %v5669_v56 = vld [vmem:[%s9636_s19] sm:$0xff]  ;;  %v5672_v57 = vld [vmem:[%s9636_s19 + $0x18] sm:$0xff]  ;;  %v5674_v43 = vld [vmem:[%s9636_s19 + $0x28] sm:$0xff]  ;;  %v6739_v52 = vpop.permute.xlu0 %151 }
  0xa3   :  { %v1007_v28 = vadd.f32 %v1003_v19, %v998_v5  ;;  %v5675_v37 = vld [vmem:[%s9636_s19 + $0x30] sm:$0xff]  ;;  %v5673_v41 = vld [vmem:[%s9636_s19 + $0x20] sm:$0xff]  ;;  %v5676_v9 = vld [vmem:[%s9636_s19 + $0x38] sm:$0xff] }
  0xa4   :  { %v6642_v8 = vadd.f32 %v246_v42, %v245_v30  ;;  %v6650_v58 = vadd.f32 %v893_v22, %v138_v39  ;;  %v6742_v30 = vpop.permute.xlu1 %156 }
  0xa5   :  { %v6652_v59 = vadd.f32 %v1007_v28, %v138_v39  ;;  %v4001_v39 = vld [vmem:[%s9635_s14] sm:$0xff] }
  0xa6   :  { %5840 = vtanh.f32 %v6642_v8  ;;  %4473 = vperm.xlu1 %5814, %v4450_v6   ;;  %v6744_v6 = vpop.permute.xlu2 %166 }
  0xa7   :  { %4468 = vperm.xlu2 %5815, %v4449_v15   ;;  %2698 = vperm.xlu0 %5813, %v2686_v53  }
  0xa8   :  { %v5839_v4 = vpop.eup %5838 }
  0xa9   :  { %v241_v14 = vmul.f32 0.5, %v5839_v4 }
  0xab   :  { %v244_v38 = vadd.f32 0.5, %v241_v14  ;;  %v6748_v14 = vpop.permute.xlu0 %161 }
  0xac   :  { %v5841_v54 = vpop.eup %5840 }
  0xad   :  { %v249_v36 = vmul.f32 %v5841_v54, %v244_v38 }
  0xae   :  { %4458 = vperm.xlu1 %5814, %v4447_v47  }
  0xaf   :  { %4453 = vperm.xlu2 %5815, %v4446_v55   ;;  %4463 = vperm.xlu0 %5813, %v4448_v16  }
  0xb0   :  { %278 = vmatpush.msra.mxu1 %v249_v36  ;;  %5810 = vmatpush.msra.mxu3 %v249_v36 }
  0xb1   :  { %344 = vmatpush.msrb.mxu2 %v249_v36  ;;  %5749 = vmatmul.msk.f32.vlgmr.msra.gmra.mxu1 %vm250_vm1, %v6667_v46 }
  0xb2   :  { %5752 = vmatmul.msk.f32.vlgmr.msra.gmra.mxu3 %vm250_vm1, %v6672_v48  ;;  %5753 = vmatmul.msk.f32.vlgmr.msrb.gmra.mxu2 %vm189_vm0, %v6218_v1 }
  0xb6   :  { %4023 = vperm.xlu1 %5814, %v4004_v49  }
  0xb7   :  { %4018 = vperm.xlu2 %5815, %v4003_v17   ;;  %4028 = vperm.xlu0 %5813, %v4005_v18  }
  0xb9   :  { %5750 = vmatmul.msk.f32.gmra.mxu1 %vm250_vm1, %v6692_v50 }
  0xba   :  { %5754 = vmatmul.msk.f32.gmra.mxu2 %vm189_vm0, %v6241_v7 }
  0xbe   :  { %4008 = vperm.xlu1 %5814, %v4001_v39  }
  0xbf   :  { %5679 = vperm.xlu2 %5815, %v5669_v56   ;;  %4013 = vperm.xlu0 %5813, %v4002_v29  }
  0xc1   :  { %5751 = vmatmul.msk.f32.gmra.mxu1 %vm250_vm1, %v6710_v51 }
  0xc2   :  { %5755 = vmatmul.msk.f32.gmra.mxu2 %vm189_vm0, %v6257_v11 }
  0xc6   :  { %5689 = vperm.xlu1 %5814, %v5671_v34  }
  0xc7   :  { %5694 = vperm.xlu2 %5815, %v5672_v57   ;;  %5684 = vperm.xlu0 %5813, %v5670_v35  }
  0xca   :  { %5756 = vmatmul.msk.f32.gmra.mxu2 %vm189_vm0, %v6223_v2 }
  0xce   :  { %5704 = vperm.xlu1 %5814, %v5674_v43  }
  0xcf   :  { %5709 = vperm.xlu2 %5815, %v5675_v37   ;;  %5699 = vperm.xlu0 %5813, %v5673_v41  }
  0xd7   :  { %5714 = vperm.xlu0 %5813, %v5676_v9  }
 0x12e   :  { %v280_v10 = vpop.f32.mrf.mxu1 }
 0x12f   :  { %v281_v5 = vadd.f32 %v280_v10, %v6739_v52 }
 0x131   :  { %5842 = vtanh.f32 %v281_v5 }
 0x135   :  { %v289_v42 = vpop.f32.mrf.mxu3  ;;  %v346_v19 = vpop.f32.mrf.mxu2 }
 0x136   :  { %v283_v22 = vpop.f32.mrf.mxu1  ;;  %v290_v15 = vadd.f32 %v289_v42, %v6744_v6  ;;  %v358_v39 = vadd.f32 %v346_v19, %v6568_v61 }
 0x137   :  { %v284_v28 = vadd.f32 %v283_v22, %v6742_v30  ;;  %v5843_v53 = vpop.eup %5842 }
 0x138   :  { %v296_v47 = vmul.f32 0.5, %v5843_v53 }
 0x139   :  { %5844 = vtanh.f32 %v284_v28 }
 0x13a   :  { %5846 = vtanh.f32 %v290_v15  ;;  %v299_v17 = vadd.f32 0.5, %v296_v47 }
 0x13d   :  { %v349_v4 = vpop.f32.mrf.mxu2 }
 0x13e   :  { %v286_v38 = vpop.f32.mrf.mxu1  ;;  %v359_v49 = vadd.f32 %v349_v4, %v6564_v45 }
 0x13f   :  { %v287_v54 = vadd.f32 %v286_v38, %v6748_v14  ;;  %v5845_v55 = vpop.eup %5844 }
 0x140   :  { %v297_v16 = vmul.f32 0.5, %v5845_v55  ;;  %v5847_v36 = vpop.eup %5846 }
 0x141   :  { %5848 = vtanh.f32 %v287_v54  ;;  %v303_v29 = vmul.f32 %v5847_v36, %v299_v17 }
 0x142   :  { %v300_v18 = vadd.f32 0.5, %v297_v16  ;;  %5850 = vtanh.f32 %v359_v49 }
 0x143   :  { %5852 = vtanh.f32 %v358_v39 }
 0x144   :  { %v302_v56 = vmul.f32 0.0, %v300_v18 }
 0x145   :  { %v352_v34 = vpop.f32.mrf.mxu2 }
 0x146   :  { %v6753_v35 = vadd.f32 %v303_v29, %v302_v56  ;;  %v360_v61 = vadd.f32 %v352_v34, %v6626_v60 }
 0x147   :  { %v5849_v57 = vpop.eup %5848 }
 0x148   :  { %5854 = vtanh.f32 %v6753_v35  ;;  %v298_v43 = vmul.f32 0.5, %v5849_v57  ;;  %v5851_v37 = vpop.eup %5850 }
 0x149   :  { %v5853_v9 = vpop.eup %5852  ;;  %v367_v42 = vmul.f32 0.5, %v5851_v37 }
 0x14a   :  { %v301_v10 = vadd.f32 0.5, %v298_v43  ;;  %v366_v22 = vmul.f32 0.5, %v5853_v9 }
 0x14b   :  { %v370_v28 = vadd.f32 0.5, %v367_v42 }
 0x14c   :  { %v369_v15 = vadd.f32 0.5, %v366_v22 }
 0x14d   :  { %v355_v41 = vpop.f32.mrf.mxu2  ;;  %v372_v4 = vmul.f32 %v370_v28, %v6642_v8 }
 0x14e   :  { %v361_v45 = vadd.f32 %v355_v41, %v6465_v26  ;;  %v5855_v5 = vpop.eup %5854 }
 0x14f   :  { %v306_v19 = vmul.f32 %v5855_v5, %v301_v10 }
 0x150   :  { %5856 = vtanh.f32 %v361_v45 }
 0x151   :  { %308 = vst.msk [vmem:[#allocation2] sm:$0xff] %vm307_vm2, %v306_v19  ;;  %391 = vmatpush.msrb.mxu3 %v306_v19  ;;  %5858 = vtanh.f32 %v360_v61 }
 0x156   :  { %v5857_v53 = vpop.eup %5856 }
 0x157   :  { %v373_v38 = vmul.f32 %v5857_v53, %v369_v15  ;;  %v5859_v26 = vpop.eup %5858 }
 0x158   :  { %v368_v54 = vmul.f32 0.5, %v5859_v26 }
 0x159   :  { %v374_v47 = vadd.f32 %v373_v38, %v372_v4 }
 0x15a   :  { %v371_v55 = vadd.f32 0.5, %v368_v54 }
 0x15b   :  { %5860 = vtanh.f32 %v374_v47 }
 0x161   :  { %v5861_v60 = vpop.eup %5860 }
 0x162   :  { %v376_v16 = vmul.f32 %v5861_v60, %v371_v55 }
 0x164   :  { %392 = vmatpush.msrb.mxu3 %v376_v16  ;;  %458 = vmatpush.msrb.mxu0 %v376_v16 }
 0x165   :  { %5757 = vmatmul.msk.f32.vlgmr.msrb.gmra.mxu3 %vm250_vm1, %v6667_v46  ;;  %5761 = vmatmul.msk.f32.vlgmr.msrb.gmra.mxu0 %vm189_vm0, %v6218_v1 }
 0x16d   :  { %5758 = vmatmul.msk.f32.gmra.mxu3 %vm250_vm1, %v6692_v50  ;;  %5762 = vmatmul.msk.f32.gmra.mxu0 %vm189_vm0, %v6241_v7 }
 0x175   :  { %5759 = vmatmul.msk.f32.gmra.mxu3 %vm250_vm1, %v6710_v51  ;;  %5763 = vmatmul.msk.f32.gmra.mxu0 %vm189_vm0, %v6257_v11 }
 0x17d   :  { %5760 = vmatmul.msk.f32.gmra.mxu3 %vm250_vm1, %v6672_v48  ;;  %5764 = vmatmul.msk.f32.gmra.mxu0 %vm189_vm0, %v6223_v2 }
 0x1e2   :  { %v460_v8 = vpop.f32.mrf.mxu0 }
 0x1e3   :  { %v472_v18 = vadd.f32 %v460_v8, %v6570_v63 }
 0x1e8   :  { %v394_v1 = vpop.f32.mrf.mxu3 }
 0x1e9   :  { %v395_v29 = vadd.f32 %v394_v1, %v6739_v52 }
 0x1ea   :  { %v463_v36 = vpop.f32.mrf.mxu0 }
 0x1eb   :  { %v473_v49 = vadd.f32 %v463_v36, %v6566_v44 }
 0x1ed   :  { %5862 = vtanh.f32 %v473_v49 }
 0x1ee   :  { %5864 = vtanh.f32 %v472_v18  ;;  %v6794_v18 = vld [vmem:[%s9715_s23] sm:$0xff] }
 0x1f0   :  { %v397_v17 = vpop.f32.mrf.mxu3 }
 0x1f1   :  { %v398_v56 = vadd.f32 %v397_v17, %v6742_v30 }
 0x1f2   :  { %v466_v39 = vpop.f32.mrf.mxu0 }
 0x1f3   :  { %v5863_v57 = vpop.eup %5862  ;;  %5866 = vtanh.f32 %v398_v56  ;;  %v474_v44 = vadd.f32 %v466_v39, %v6628_v23 }
 0x1f4   :  { %v5865_v2 = vpop.eup %5864  ;;  %5868 = vtanh.f32 %v395_v29  ;;  %v481_v41 = vmul.f32 0.5, %v5863_v57  ;;  %v6812_v29 = vld [vmem:[%s9715_s23 + $0x18] sm:$0xff] }
 0x1f5   :  { %v480_v63 = vmul.f32 0.5, %v5865_v2 }
 0x1f6   :  { %v484_v45 = vadd.f32 0.5, %v481_v41 }
 0x1f7   :  { %v483_v61 = vadd.f32 0.5, %v480_v63 }
 0x1f8   :  { %v400_v34 = vpop.f32.mrf.mxu3 }
 0x1f9   :  { %v5867_v9 = vpop.eup %5866  ;;  %v401_v22 = vadd.f32 %v400_v34, %v6748_v14 }
 0x1fa   :  { %v469_v43 = vpop.f32.mrf.mxu0  ;;  %v5869_v5 = vpop.eup %5868  ;;  %v411_v19 = vmul.f32 0.5, %v5867_v9 }
 0x1fb   :  { %v475_v37 = vadd.f32 %v469_v43, %v6468_v27  ;;  %v410_v15 = vmul.f32 0.5, %v5869_v5  ;;  %v486_v27 = vmul.f32 %v484_v45, %v374_v47 }
 0x1fc   :  { %v414_v23 = vadd.f32 0.5, %v411_v19 }
 0x1fd   :  { %5870 = vtanh.f32 %v475_v37  ;;  %v413_v26 = vadd.f32 0.5, %v410_v15 }
 0x1fe   :  { %5872 = vtanh.f32 %v474_v44  ;;  %v416_v60 = vmul.f32 %v414_v23, %v6753_v35 }
 0x200   :  { %v403_v10 = vpop.f32.mrf.mxu3 }
 0x201   :  { %v404_v42 = vadd.f32 %v403_v10, %v6744_v6 }
 0x203   :  { %v5871_v28 = vpop.eup %5870  ;;  %5874 = vtanh.f32 %v404_v42  ;;  %v9725_v42 = vld [vmem:[#allocation3_spill] sm:$0xff] }
 0x204   :  { %v487_v53 = vmul.f32 %v5871_v28, %v483_v61  ;;  %v5873_v4 = vpop.eup %5872  ;;  %5876 = vtanh.f32 %v401_v22 }
 0x205   :  { %v482_v55 = vmul.f32 0.5, %v5873_v4 }
 0x206   :  { %v6784_v38 = vadd.f32 %v487_v53, %v486_v27 }
 0x207   :  { %v485_v36 = vadd.f32 0.5, %v482_v55 }
 0x208   :  { %5878 = vtanh.f32 %v6784_v38 }
 0x209   :  { %v5875_v54 = vpop.eup %5874 }
 0x20a   :  { %v417_v16 = vmul.f32 %v5875_v54, %v413_v26  ;;  %v5877_v8 = vpop.eup %5876 }
 0x20b   :  { %v412_v17 = vmul.f32 0.5, %v5877_v8 }
 0x20c   :  { %v6788_v1 = vadd.f32 %v417_v16, %v416_v60 }
 0x20d   :  { %v415_v35 = vadd.f32 0.5, %v412_v17 }
 0x20e   :  { %v5879_v49 = vpop.eup %5878  ;;  %5880 = vtanh.f32 %v6788_v1 }
 0x20f   :  { %v490_v47 = vmul.f32 %v5879_v49, %v485_v36 }
 0x211   :  { %572 = vmatpush.msra.mxu2 %v490_v47 }
 0x212   :  { %5769 = vmatmul.msk.f32.vlgmr.msra.gmra.mxu2 %vm189_vm0, %v6794_v18 }
 0x214   :  { %v5881_v39 = vpop.eup %5880 }
 0x215   :  { %v420_v56 = vmul.f32 %v5881_v39, %v415_v35 }
 0x217   :  { %422 = vst.msk [vmem:[#allocation2 + $0x8] sm:$0xff] %vm307_vm2, %v420_v56  ;;  %505 = vmatpush.msrb.mxu1 %v420_v56 }
 0x219   :  { %506 = vmatpush.msrb.mxu1 %v490_v47 }
 0x21a   :  { %5765 = vmatmul.msk.f32.vlgmr.msrb.gmra.mxu1 %vm250_vm1, %v6667_v46  ;;  %5770 = vmatmul.msk.f32.gmra.mxu2 %vm189_vm0, %v6241_v7 }
 0x222   :  { %5766 = vmatmul.msk.f32.gmra.mxu1 %vm250_vm1, %v6692_v50  ;;  %5771 = vmatmul.msk.f32.gmra.mxu2 %vm189_vm0, %v6257_v11 }
 0x22a   :  { %5767 = vmatmul.msk.f32.gmra.mxu1 %vm250_vm1, %v6710_v51  ;;  %5772 = vmatmul.msk.f32.gmra.mxu2 %vm189_vm0, %v6812_v29 }
 0x232   :  { %5768 = vmatmul.msk.f32.gmra.mxu1 %vm250_vm1, %v6672_v48 }
 0x295   :  { %v574_v7 = vpop.f32.mrf.mxu2 }
 0x296   :  { %v586_v2 = vadd.f32 %v574_v7, %v6572_v24 }
 0x297   :  { %v508_v34 = vpop.f32.mrf.mxu1 }
 0x298   :  { %v509_v44 = vadd.f32 %v508_v34, %v6739_v52 }
 0x29d   :  { %v577_v57 = vpop.f32.mrf.mxu2 }
 0x29e   :  { %v587_v11 = vadd.f32 %v577_v57, %v6577_v31 }
 0x29f   :  { %v511_v43 = vpop.f32.mrf.mxu1 }
 0x2a0   :  { %v512_v37 = vadd.f32 %v511_v43, %v6742_v30  ;;  %5882 = vtanh.f32 %v587_v11 }
 0x2a1   :  { %5884 = vtanh.f32 %v586_v2 }
 0x2a2   :  { %5886 = vtanh.f32 %v512_v37  ;;  %v6848_v37 = vld [vmem:[%s9715_s23 + $0x10] sm:$0xff] }
 0x2a3   :  { %5888 = vtanh.f32 %v509_v44 }
 0x2a5   :  { %v580_v41 = vpop.f32.mrf.mxu2 }
 0x2a6   :  { %v5883_v9 = vpop.eup %5882  ;;  %v588_v31 = vadd.f32 %v580_v41, %v6630_v21 }
 0x2a7   :  { %v514_v63 = vpop.f32.mrf.mxu1  ;;  %v5885_v45 = vpop.eup %5884  ;;  %v595_v19 = vmul.f32 0.5, %v5883_v9 }
 0x2a8   :  { %v5887_v5 = vpop.eup %5886  ;;  %v594_v15 = vmul.f32 0.5, %v5885_v45  ;;  %v515_v53 = vadd.f32 %v514_v63, %v6748_v14 }
 0x2a9   :  { %v5889_v22 = vpop.eup %5888  ;;  %v525_v27 = vmul.f32 0.5, %v5887_v5  ;;  %v598_v23 = vadd.f32 0.5, %v595_v19 }
 0x2aa   :  { %v524_v4 = vmul.f32 0.5, %v5889_v22  ;;  %v597_v26 = vadd.f32 0.5, %v594_v15  ;;  %v9726_v22 = vld [vmem:[#allocation4_spill] sm:$0xff] }
 0x2ab   :  { %v528_v54 = vadd.f32 0.5, %v525_v27  ;;  %v600_v21 = vmul.f32 %v598_v23, %v6784_v38 }
 0x2ac   :  { %v527_v60 = vadd.f32 0.5, %v524_v4 }
 0x2ad   :  { %v583_v10 = vpop.f32.mrf.mxu2  ;;  %v530_v49 = vmul.f32 %v528_v54, %v6788_v1  ;;  %v6839_v1 = vld [vmem:[%s9715_s23 + $0x8] sm:$0xff] }
 0x2ae   :  { %v589_v61 = vadd.f32 %v583_v10, %v9725_v42 }
 0x2af   :  { %v517_v24 = vpop.f32.mrf.mxu1 }
 0x2b0   :  { %5890 = vtanh.f32 %v589_v61  ;;  %v518_v28 = vadd.f32 %v517_v24, %v6744_v6 }
 0x2b2   :  { %5892 = vtanh.f32 %v518_v28 }
 0x2b3   :  { %5894 = vtanh.f32 %v588_v31 }
 0x2b4   :  { %5896 = vtanh.f32 %v515_v53 }
 0x2b6   :  { %v5891_v55 = vpop.eup %5890 }
 0x2b7   :  { %v601_v16 = vmul.f32 %v5891_v55, %v597_v26 }
 0x2b8   :  { %v5893_v8 = vpop.eup %5892 }
 0x2b9   :  { %v5895_v36 = vpop.eup %5894  ;;  %v602_v47 = vadd.f32 %v601_v16, %v600_v21  ;;  %v531_v17 = vmul.f32 %v5893_v8, %v527_v60 }
 0x2ba   :  { %v5897_v35 = vpop.eup %5896  ;;  %v596_v56 = vmul.f32 0.5, %v5895_v36 }
 0x2bb   :  { %5898 = vtanh.f32 %v602_v47  ;;  %v6828_v39 = vadd.f32 %v531_v17, %v530_v49  ;;  %v526_v7 = vmul.f32 0.5, %v5897_v35 }
 0x2bc   :  { %v599_v34 = vadd.f32 0.5, %v596_v56 }
 0x2bd   :  { %5900 = vtanh.f32 %v6828_v39  ;;  %v529_v43 = vadd.f32 0.5, %v526_v7 }
 0x2c1   :  { %v5899_v57 = vpop.eup %5898 }
 0x2c2   :  { %v604_v11 = vmul.f32 %v5899_v57, %v599_v34 }
 0x2c3   :  { %v5901_v38 = vpop.eup %5900 }
 0x2c4   :  { %686 = vmatpush.msra.mxu0 %v604_v11  ;;  %v534_v2 = vmul.f32 %v5901_v38, %v529_v43 }
 0x2c5   :  { %5777 = vmatmul.msk.f32.vlgmr.msra.gmra.mxu0 %vm189_vm0, %v6794_v18 }
 0x2c6   :  { %536 = vst.msk [vmem:[#allocation2 + $0x10] sm:$0xff] %vm307_vm2, %v534_v2  ;;  %619 = vmatpush.msra.mxu3 %v534_v2 }
 0x2c8   :  { %620 = vmatpush.msra.mxu3 %v604_v11 }
 0x2c9   :  { %5773 = vmatmul.msk.f32.vlgmr.msra.gmra.mxu3 %vm250_vm1, %v6667_v46 }
 0x2cd   :  { %5778 = vmatmul.msk.f32.gmra.mxu0 %vm189_vm0, %v6839_v1 }
 0x2d1   :  { %5774 = vmatmul.msk.f32.gmra.mxu3 %vm250_vm1, %v6692_v50 }
 0x2d5   :  { %5779 = vmatmul.msk.f32.gmra.mxu0 %vm189_vm0, %v6848_v37 }
 0x2d9   :  { %5775 = vmatmul.msk.f32.gmra.mxu3 %vm250_vm1, %v6710_v51 }
 0x2dd   :  { %5780 = vmatmul.msk.f32.gmra.mxu0 %vm189_vm0, %v6812_v29 }
 0x2e1   :  { %5776 = vmatmul.msk.f32.gmra.mxu3 %vm250_vm1, %v6672_v48 }
 0x342   :  { %v688_v41 = vpop.f32.mrf.mxu0 }
 0x343   :  { %v700_v45 = vadd.f32 %v688_v41, %v6580_v32 }
 0x34a   :  { %v691_v44 = vpop.f32.mrf.mxu0 }
 0x34b   :  { %v701_v9 = vadd.f32 %v691_v44, %v6588_v12 }
 0x34c   :  { %v622_v63 = vpop.f32.mrf.mxu3 }
 0x34d   :  { %5902 = vtanh.f32 %v701_v9  ;;  %v623_v24 = vadd.f32 %v622_v63, %v6739_v52 }
 0x34e   :  { %5904 = vtanh.f32 %v700_v45 }
 0x352   :  { %v694_v10 = vpop.f32.mrf.mxu0 }
 0x353   :  { %v5903_v61 = vpop.eup %5902  ;;  %v702_v27 = vadd.f32 %v694_v10, %v6632_v25 }
 0x354   :  { %v625_v5 = vpop.f32.mrf.mxu3  ;;  %v5905_v31 = vpop.eup %5904  ;;  %v709_v15 = vmul.f32 0.5, %v5903_v61 }
 0x355   :  { %v626_v42 = vadd.f32 %v625_v5, %v6742_v30  ;;  %v708_v32 = vmul.f32 0.5, %v5905_v31 }
 0x356   :  { %v712_v53 = vadd.f32 0.5, %v709_v15 }
 0x357   :  { %5906 = vtanh.f32 %v626_v42  ;;  %v711_v23 = vadd.f32 0.5, %v708_v32  ;;  %v9727_v32 = vld [vmem:[#allocation5_spill] sm:$0xff] }
 0x358   :  { %v714_v54 = vmul.f32 %v712_v53, %v602_v47 }
 0x35a   :  { %v697_v19 = vpop.f32.mrf.mxu0 }
 0x35b   :  { %v703_v28 = vadd.f32 %v697_v19, %v9726_v22 }
 0x35c   :  { %v628_v12 = vpop.f32.mrf.mxu3 }
 0x35d   :  { %5908 = vtanh.f32 %v703_v28  ;;  %v5907_v4 = vpop.eup %5906  ;;  %v629_v25 = vadd.f32 %v628_v12, %v6748_v14 }
 0x35e   :  { %5910 = vtanh.f32 %v623_v24  ;;  %v639_v36 = vmul.f32 0.5, %v5907_v4 }
 0x35f   :  { %5912 = vtanh.f32 %v702_v27 }
 0x360   :  { %v642_v56 = vadd.f32 0.5, %v639_v36 }
 0x362   :  { %v644_v43 = vmul.f32 %v642_v56, %v6828_v39 }
 0x363   :  { %v5909_v26 = vpop.eup %5908 }
 0x364   :  { %v715_v55 = vmul.f32 %v5909_v26, %v711_v23  ;;  %v631_v60 = vpop.f32.mrf.mxu3  ;;  %v5911_v21 = vpop.eup %5910 }
 0x365   :  { %v632_v16 = vadd.f32 %v631_v60, %v6744_v6  ;;  %v5913_v8 = vpop.eup %5912  ;;  %v638_v17 = vmul.f32 0.5, %v5911_v21 }
 0x366   :  { %v6865_v49 = vadd.f32 %v715_v55, %v714_v54  ;;  %v710_v35 = vmul.f32 0.5, %v5913_v8 }
 0x367   :  { %5914 = vtanh.f32 %v632_v16  ;;  %v641_v7 = vadd.f32 0.5, %v638_v17 }
 0x368   :  { %5916 = vtanh.f32 %v6865_v49  ;;  %v713_v34 = vadd.f32 0.5, %v710_v35 }
 0x369   :  { %5918 = vtanh.f32 %v629_v25 }
 0x36d   :  { %v5915_v47 = vpop.eup %5914 }
 0x36e   :  { %v5917_v57 = vpop.eup %5916  ;;  %v645_v11 = vmul.f32 %v5915_v47, %v641_v7 }
 0x36f   :  { %v718_v38 = vmul.f32 %v5917_v57, %v713_v34  ;;  %v5919_v2 = vpop.eup %5918 }
 0x370   :  { %v646_v41 = vadd.f32 %v645_v11, %v644_v43  ;;  %v640_v44 = vmul.f32 0.5, %v5919_v2 }
 0x371   :  { %800 = vmatpush.msrb.mxu2 %v718_v38 }
 0x372   :  { %5920 = vtanh.f32 %v646_v41  ;;  %5785 = vmatmul.msk.f32.vlgmr.msrb.gmra.mxu2 %vm189_vm0, %v6794_v18  ;;  %v643_v63 = vadd.f32 0.5, %v640_v44 }
 0x378   :  { %v5921_v9 = vpop.eup %5920 }
 0x379   :  { %v648_v45 = vmul.f32 %v5921_v9, %v643_v63 }
 0x37a   :  { %5786 = vmatmul.msk.f32.gmra.mxu2 %vm189_vm0, %v6839_v1 }
 0x37b   :  { %650 = vst.msk [vmem:[#allocation2 + $0x18] sm:$0xff] %vm307_vm2, %v648_v45  ;;  %733 = vmatpush.msra.mxu1 %v648_v45 }
 0x37d   :  { %734 = vmatpush.msra.mxu1 %v718_v38 }
 0x37e   :  { %5781 = vmatmul.msk.f32.vlgmr.msra.gmra.mxu1 %vm250_vm1, %v6667_v46 }
 0x382   :  { %5787 = vmatmul.msk.f32.gmra.mxu2 %vm189_vm0, %v6848_v37 }
 0x386   :  { %5782 = vmatmul.msk.f32.gmra.mxu1 %vm250_vm1, %v6692_v50 }
 0x38a   :  { %5788 = vmatmul.msk.f32.gmra.mxu2 %vm189_vm0, %v6812_v29 }
 0x38e   :  { %5783 = vmatmul.msk.f32.gmra.mxu1 %vm250_vm1, %v6710_v51 }
 0x396   :  { %5784 = vmatmul.msk.f32.gmra.mxu1 %vm250_vm1, %v6672_v48 }
 0x3f5   :  { %v802_v39 = vpop.f32.mrf.mxu2 }
 0x3f6   :  { %v814_v19 = vadd.f32 %v802_v39, %v6591_v20 }
 0x3fb   :  { %v736_v10 = vpop.f32.mrf.mxu1 }
 0x3fc   :  { %v737_v22 = vadd.f32 %v736_v10, %v6739_v52 }
 0x3fd   :  { %v805_v5 = vpop.f32.mrf.mxu2 }
 0x3fe   :  { %v815_v42 = vadd.f32 %v805_v5, %v6593_v62 }
 0x400   :  { %5922 = vtanh.f32 %v815_v42 }
 0x401   :  { %5924 = vtanh.f32 %v814_v19 }
 0x403   :  { %v739_v61 = vpop.f32.mrf.mxu1 }
 0x404   :  { %v740_v24 = vadd.f32 %v739_v61, %v6742_v30 }
 0x405   :  { %v808_v31 = vpop.f32.mrf.mxu2 }
 0x406   :  { %v5923_v15 = vpop.eup %5922  ;;  %5926 = vtanh.f32 %v740_v24  ;;  %v816_v62 = vadd.f32 %v808_v31, %v6634_v33 }
 0x407   :  { %v5925_v12 = vpop.eup %5924  ;;  %5928 = vtanh.f32 %v737_v22  ;;  %v823_v4 = vmul.f32 0.5, %v5923_v15 }
 0x408   :  { %v822_v20 = vmul.f32 0.5, %v5925_v12 }
 0x409   :  { %v826_v26 = vadd.f32 0.5, %v823_v4 }
 0x40a   :  { %v825_v21 = vadd.f32 0.5, %v822_v20 }
 0x40b   :  { %v742_v28 = vpop.f32.mrf.mxu1  ;;  %v828_v17 = vmul.f32 %v826_v26, %v6865_v49 }
 0x40c   :  { %v5927_v23 = vpop.eup %5926  ;;  %v743_v8 = vadd.f32 %v742_v28, %v6748_v14 }
 0x40d   :  { %v811_v27 = vpop.f32.mrf.mxu2  ;;  %v5929_v55 = vpop.eup %5928  ;;  %v753_v16 = vmul.f32 0.5, %v5927_v23 }
 0x40e   :  { %v817_v53 = vadd.f32 %v811_v27, %v9727_v32  ;;  %v752_v25 = vmul.f32 0.5, %v5929_v55  ;;  %v9728_v27 = vld [vmem:[#allocation6_spill] sm:$0xff] }
 0x40f   :  { %v756_v56 = vadd.f32 0.5, %v753_v16 }
 0x410   :  { %5930 = vtanh.f32 %v817_v53  ;;  %v755_v47 = vadd.f32 0.5, %v752_v25 }
 0x411   :  { %5932 = vtanh.f32 %v816_v62  ;;  %v758_v43 = vmul.f32 %v756_v56, %v646_v41 }
 0x413   :  { %v745_v54 = vpop.f32.mrf.mxu1 }
 0x414   :  { %v746_v60 = vadd.f32 %v745_v54, %v6744_v6 }
 0x416   :  { %v5931_v36 = vpop.eup %5930  ;;  %5934 = vtanh.f32 %v746_v60 }
 0x417   :  { %v829_v35 = vmul.f32 %v5931_v36, %v825_v21  ;;  %v5933_v33 = vpop.eup %5932  ;;  %5936 = vtanh.f32 %v743_v8 }
 0x418   :  { %v824_v57 = vmul.f32 0.5, %v5933_v33 }
 0x419   :  { %v830_v7 = vadd.f32 %v829_v35, %v828_v17 }
 0x41a   :  { %v827_v44 = vadd.f32 0.5, %v824_v57 }
 0x41b   :  { %5938 = vtanh.f32 %v830_v7 }
 0x41c   :  { %v5935_v34 = vpop.eup %5934 }
 0x41d   :  { %v759_v11 = vmul.f32 %v5935_v34, %v755_v47  ;;  %v5937_v38 = vpop.eup %5936 }
 0x41e   :  { %v754_v9 = vmul.f32 0.5, %v5937_v38 }
 0x41f   :  { %v6896_v2 = vadd.f32 %v759_v11, %v758_v43 }
 0x420   :  { %v757_v45 = vadd.f32 0.5, %v754_v9 }
 0x421   :  { %v5939_v63 = vpop.eup %5938  ;;  %5940 = vtanh.f32 %v6896_v2 }
 0x422   :  { %v832_v49 = vmul.f32 %v5939_v63, %v827_v44 }
 0x424   :  { %914 = vmatpush.msrb.mxu0 %v832_v49 }
 0x425   :  { %5793 = vmatmul.msk.f32.vlgmr.msrb.gmra.mxu0 %vm189_vm0, %v6794_v18 }
 0x427   :  { %v5941_v39 = vpop.eup %5940 }
 0x428   :  { %v762_v10 = vmul.f32 %v5941_v39, %v757_v45 }
 0x42a   :  { %764 = vst.msk [vmem:[#allocation2 + $0x20] sm:$0xff] %vm307_vm2, %v762_v10  ;;  %847 = vmatpush.msrb.mxu3 %v762_v10 }
 0x42c   :  { %848 = vmatpush.msrb.mxu3 %v832_v49 }
 0x42d   :  { %5789 = vmatmul.msk.f32.vlgmr.msrb.gmra.mxu3 %vm250_vm1, %v6667_v46  ;;  %5794 = vmatmul.msk.f32.gmra.mxu0 %vm189_vm0, %v6839_v1 }
 0x435   :  { %5790 = vmatmul.msk.f32.gmra.mxu3 %vm250_vm1, %v6692_v50  ;;  %5795 = vmatmul.msk.f32.gmra.mxu0 %vm189_vm0, %v6848_v37 }
 0x43d   :  { %5791 = vmatmul.msk.f32.gmra.mxu3 %vm250_vm1, %v6710_v51  ;;  %5796 = vmatmul.msk.f32.gmra.mxu0 %vm189_vm0, %v6812_v29 }
 0x445   :  { %5792 = vmatmul.msk.f32.gmra.mxu3 %vm250_vm1, %v6672_v48 }
 0x4a2   :  { %v916_v41 = vpop.f32.mrf.mxu0 }
 0x4a3   :  { %v928_v19 = vadd.f32 %v916_v41, %v6596_v0 }
 0x4aa   :  { %v919_v5 = vpop.f32.mrf.mxu0 }
 0x4ab   :  { %v929_v42 = vadd.f32 %v919_v5, %v6598_v13 }
 0x4ad   :  { %5942 = vtanh.f32 %v929_v42 }
 0x4ae   :  { %5944 = vtanh.f32 %v928_v19 }
 0x4b0   :  { %v850_v61 = vpop.f32.mrf.mxu3 }
 0x4b1   :  { %v851_v13 = vadd.f32 %v850_v61, %v6739_v52 }
 0x4b2   :  { %v922_v31 = vpop.f32.mrf.mxu0 }
 0x4b3   :  { %v5943_v22 = vpop.eup %5942  ;;  %v930_v53 = vadd.f32 %v922_v31, %v6650_v58  ;;  %v9729_v31 = vld [vmem:[#allocation7_spill] sm:$0xff] }
 0x4b4   :  { %v5945_v15 = vpop.eup %5944  ;;  %v937_v32 = vmul.f32 0.5, %v5943_v22 }
 0x4b5   :  { %v936_v62 = vmul.f32 0.5, %v5945_v15 }
 0x4b6   :  { %v940_v20 = vadd.f32 0.5, %v937_v32 }
 0x4b7   :  { %v939_v23 = vadd.f32 0.5, %v936_v62 }
 0x4b8   :  { %v853_v24 = vpop.f32.mrf.mxu3  ;;  %v942_v54 = vmul.f32 %v940_v20, %v830_v7 }
 0x4b9   :  { %v854_v4 = vadd.f32 %v853_v24, %v6742_v30 }
 0x4ba   :  { %v925_v28 = vpop.f32.mrf.mxu0 }
 0x4bb   :  { %v931_v12 = vadd.f32 %v925_v28, %v9728_v27 }
 0x4bd   :  { %5946 = vtanh.f32 %v931_v12 }
 0x4be   :  { %5948 = vtanh.f32 %v930_v53 }
 0x4bf   :  { %5950 = vtanh.f32 %v854_v4 }
 0x4c0   :  { %v856_v0 = vpop.f32.mrf.mxu3  ;;  %5952 = vtanh.f32 %v851_v13 }
 0x4c1   :  { %v857_v35 = vadd.f32 %v856_v0, %v6748_v14 }
 0x4c3   :  { %v5947_v26 = vpop.eup %5946 }
 0x4c4   :  { %v943_v55 = vmul.f32 %v5947_v26, %v939_v23  ;;  %v5949_v60 = vpop.eup %5948 }
 0x4c5   :  { %v5951_v16 = vpop.eup %5950  ;;  %v938_v36 = vmul.f32 0.5, %v5949_v60 }
 0x4c6   :  { %v6922_v21 = vadd.f32 %v943_v55, %v942_v54  ;;  %v5953_v8 = vpop.eup %5952  ;;  %v867_v17 = vmul.f32 0.5, %v5951_v16 }
 0x4c7   :  { %v866_v33 = vmul.f32 0.5, %v5953_v8  ;;  %v941_v56 = vadd.f32 0.5, %v938_v36 }
 0x4c8   :  { %5954 = vtanh.f32 %v6922_v21  ;;  %v859_v58 = vpop.f32.mrf.mxu3  ;;  %v870_v7 = vadd.f32 0.5, %v867_v17 }
 0x4c9   :  { %v860_v25 = vadd.f32 %v859_v58, %v6744_v6  ;;  %v869_v57 = vadd.f32 0.5, %v866_v33 }
 0x4ca   :  { %v872_v11 = vmul.f32 %v870_v7, %v6896_v2 }
 0x4cb   :  { %5956 = vtanh.f32 %v860_v25 }
 0x4cc   :  { %5958 = vtanh.f32 %v857_v35 }
 0x4ce   :  { %v5955_v47 = vpop.eup %5954 }
 0x4cf   :  { %v946_v34 = vmul.f32 %v5955_v47, %v941_v56 }
 0x4d1   :  { %v5957_v43 = vpop.eup %5956  ;;  %1028 = vmatpush.msra.mxu2 %v946_v34 }
 0x4d2   :  { %v873_v38 = vmul.f32 %v5957_v43, %v869_v57  ;;  %5801 = vmatmul.msk.f32.vlgmr.msra.gmra.mxu2 %vm189_vm0, %v6794_v18  ;;  %v5959_v44 = vpop.eup %5958  ;;  %v6107_v57 = vld [vmem:[%s9634_s7 + $0x18] sm:$0xff] }
 0x4d3   :  { %v868_v9 = vmul.f32 0.5, %v5959_v44 }
 0x4d4   :  { %v874_v63 = vadd.f32 %v873_v38, %v872_v11 }
 0x4d5   :  { %v871_v49 = vadd.f32 0.5, %v868_v9 }
 0x4d6   :  { %5960 = vtanh.f32 %v874_v63 }
 0x4da   :  { %5802 = vmatmul.msk.f32.gmra.mxu2 %vm189_vm0, %v6839_v1 }
 0x4dc   :  { %v5961_v45 = vpop.eup %5960 }
 0x4dd   :  { %v876_v39 = vmul.f32 %v5961_v45, %v871_v49 }
 0x4df   :  { %878 = vst.msk [vmem:[#allocation2 + $0x28] sm:$0xff] %vm307_vm2, %v876_v39  ;;  %961 = vmatpush.msrb.mxu1 %v876_v39 }
 0x4e1   :  { %962 = vmatpush.msrb.mxu1 %v946_v34  ;;  %v6106_v34 = vld [vmem:[%s9634_s7] sm:$0xff] }
 0x4e2   :  { %5797 = vmatmul.msk.f32.vlgmr.msrb.gmra.mxu1 %vm250_vm1, %v6667_v46  ;;  %5803 = vmatmul.msk.f32.gmra.mxu2 %vm189_vm0, %v6848_v37 }
 0x4ea   :  { %5798 = vmatmul.msk.f32.gmra.mxu1 %vm250_vm1, %v6692_v50  ;;  %5804 = vmatmul.msk.f32.gmra.mxu2 %vm189_vm0, %v6812_v29 }
 0x4f2   :  { %5799 = vmatmul.msk.f32.gmra.mxu1 %vm250_vm1, %v6710_v51 }
 0x4fa   :  { %5800 = vmatmul.msk.f32.gmra.mxu1 %vm250_vm1, %v6672_v48 }
 0x555   :  { %v1030_v18 = vpop.f32.mrf.mxu2 }
 0x556   :  { %v1042_v10 = vadd.f32 %v1030_v18, %v6600_v40 }
 0x55d   :  { %v1033_v1 = vpop.f32.mrf.mxu2 }
 0x55e   :  { %v1043_v46 = vadd.f32 %v1033_v1, %v6602_v3 }
 0x55f   :  { %v964_v2 = vpop.f32.mrf.mxu1 }
 0x560   :  { %5962 = vtanh.f32 %v1043_v46  ;;  %v965_v19 = vadd.f32 %v964_v2, %v6739_v52 }
 0x561   :  { %5964 = vtanh.f32 %v1042_v10 }
 0x565   :  { %v1036_v37 = vpop.f32.mrf.mxu2 }
 0x566   :  { %v5963_v29 = vpop.eup %5962  ;;  %v1044_v22 = vadd.f32 %v1036_v37, %v6652_v59 }
 0x567   :  { %v967_v41 = vpop.f32.mrf.mxu1  ;;  %v5965_v61 = vpop.eup %5964  ;;  %v1051_v24 = vmul.f32 0.5, %v5963_v29 }
 0x568   :  { %v968_v5 = vadd.f32 %v967_v41, %v6742_v30  ;;  %v1050_v40 = vmul.f32 0.5, %v5965_v61 }
 0x569   :  { %v1054_v28 = vadd.f32 0.5, %v1051_v24 }
 0x56a   :  { %5966 = vtanh.f32 %v968_v5  ;;  %v1053_v27 = vadd.f32 0.5, %v1050_v40 }
 0x56b   :  { %v1056_v32 = vmul.f32 %v1054_v28, %v6922_v21  ;;  %v1141_v28 = vld [vmem:[#allocation2 + $0x10] sm:$0xff] }
 0x56d   :  { %v1039_v42 = vpop.f32.mrf.mxu2 }
 0x56e   :  { %v1045_v48 = vadd.f32 %v1039_v42, %v9729_v31  ;;  %v1143_v31 = vld [vmem:[#allocation2 + $0x20] sm:$0xff] }
 0x56f   :  { %v970_v3 = vpop.f32.mrf.mxu1 }
 0x570   :  { %5968 = vtanh.f32 %v1045_v48  ;;  %v5967_v15 = vpop.eup %5966  ;;  %v971_v23 = vadd.f32 %v970_v3, %v6748_v14  ;;  %v1142_v3 = vld [vmem:[#allocation2 + $0x18] sm:$0xff] }
 0x571   :  { %5970 = vtanh.f32 %v965_v19  ;;  %v981_v0 = vmul.f32 0.5, %v5967_v15 }
 0x572   :  { %5972 = vtanh.f32 %v1044_v22  ;;  %v6980_v22 = vand.u32 4294901760, %v1143_v31 }
 0x573   :  { %v984_v55 = vadd.f32 0.5, %v981_v0 }
 0x575   :  { %v986_v8 = vmul.f32 %v984_v55, %v874_v63 }
 0x576   :  { %v5969_v12 = vpop.eup %5968 }
 0x577   :  { %v1057_v53 = vmul.f32 %v5969_v12, %v1053_v27  ;;  %v973_v4 = vpop.f32.mrf.mxu1  ;;  %v5971_v62 = vpop.eup %5970 }
 0x578   :  { %v974_v13 = vadd.f32 %v973_v4, %v6744_v6  ;;  %v5973_v20 = vpop.eup %5972  ;;  %v980_v26 = vmul.f32 0.5, %v5971_v62  ;;  %v1108_v4 = vld [vmem:[%s9637_s9 + $0x8] sm:$0xff]  ;;  %v6998_v62 = vsub.f32 %v1143_v31, %v6980_v22 }
 0x579   :  { %v1058_v59 = vadd.f32 %v1057_v53, %v1056_v32  ;;  %v1052_v54 = vmul.f32 0.5, %v5973_v20  ;;  %v6992_v53 = vand.u32 4294901760, %v1142_v3  ;;  %v1140_v20 = vld [vmem:[#allocation2 + $0x8] sm:$0xff] }
 0x57a   :  { %5974 = vtanh.f32 %v974_v13  ;;  %v983_v60 = vadd.f32 0.5, %v980_v26  ;;  %v7000_v13 = vand.u32 4294901760, %v1141_v28 }
 0x57b   :  { %5976 = vtanh.f32 %v1058_v59  ;;  %v1055_v58 = vadd.f32 0.5, %v1052_v54  ;;  %v1344_v54 = vsel %vm1339_vm3, %v1108_v4, 0 }
 0x57c   :  { %5978 = vtanh.f32 %v971_v23  ;;  %v1139_v23 = vld [vmem:[#allocation2] sm:$0xff] }
 0x580   :  { %v5975_v16 = vpop.eup %5974 }
 0x581   :  { %v5977_v21 = vpop.eup %5976  ;;  %v987_v36 = vmul.f32 %v5975_v16, %v983_v60  ;;  %v7016_v60 = vsub.f32 %v1142_v3, %v6992_v53  ;;  %v7018_v16 = vand.u32 4294901760, %v1140_v20 }
 0x582   :  { %v1060_v25 = vmul.f32 %v5977_v21, %v1055_v58  ;;  %v5979_v17 = vpop.eup %5978  ;;  %v7023_v21 = vsub.f32 %v1141_v28, %v7000_v13  ;;  %v1111_v28 = vld [vmem:[%s9637_s9 + $0x20] sm:$0xff] }
 0x583   :  { %v988_v35 = vadd.f32 %v987_v36, %v986_v8  ;;  %v982_v33 = vmul.f32 0.5, %v5979_v17  ;;  %v7025_v8 = vand.u32 4294901760, %v1139_v23  ;;  %v1745_v36 = vand.u32 4294901760, %v6998_v62 }
 0x585   :  { %5980 = vtanh.f32 %v988_v35  ;;  %v985_v56 = vadd.f32 0.5, %v982_v33  ;;  %v7037_v33 = vand.u32 4294901760, %v1344_v54 }
 0x58b   :  { %v5981_v47 = vpop.eup %5980 }
 0x58c   :  { %v990_v7 = vmul.f32 %v5981_v47, %v985_v56 }
 0x58e   :  { %992 = vst.msk [vmem:[#allocation2 + $0x30] sm:$0xff] %vm307_vm2, %v990_v7  ;;  %1075 = vmatpush.msra.mxu3 %v990_v7  ;;  %v7046_v7 = vsub.f32 %v1140_v20, %v7018_v16  ;;  %v1112_v20 = vld [vmem:[%s9637_s9 + $0x28] sm:$0xff] }
 0x590   :  { %1076 = vmatpush.msra.mxu3 %v1060_v25 }
 0x591   :  { %5805 = vmatmul.msk.f32.vlgmr.msra.gmra.mxu3 %vm250_vm1, %v6106_v34  ;;  %v1751_v34 = vand.u32 4294901760, %v7016_v60 }
 0x595   :  { %v1145_v61 = vld [vmem:[#allocation2 + $0x30] sm:$0xff] }
 0x596   :  { %v6975_v19 = vand.u32 4294901760, %v1145_v61 }
 0x598   :  { %v6983_v40 = vsub.f32 %v1145_v61, %v6975_v19 }
 0x599   :  { %5806 = vmatmul.msk.f32.gmra.mxu3 %vm250_vm1, %v6692_v50 }
 0x59a   :  { %v1733_v59 = vand.u32 4294901760, %v6983_v40 }
 0x59c   :  { %v1734_v17 = vsub.f32 %v6983_v40, %v1733_v59 }
 0x5a1   :  { %5807 = vmatmul.msk.f32.gmra.mxu3 %vm250_vm1, %v6710_v51 }
 0x5a9   :  { %5808 = vmatmul.msk.f32.gmra.mxu3 %vm250_vm1, %v6107_v57  ;;  %v1109_v57 = vld [vmem:[%s9637_s9 + $0x10] sm:$0xff] }
 0x614   :  { %v1078_v43 = vpop.f32.mrf.mxu3 }
 0x615   :  { %v1079_v44 = vadd.f32 %v1078_v43, %v6739_v52  ;;  %v7054_v43 = vsub.f32 %v1139_v23, %v7025_v8 }
 0x61c   :  { %v1081_v11 = vpop.f32.mrf.mxu3 }
 0x61d   :  { %v1082_v38 = vadd.f32 %v1081_v11, %v6742_v30  ;;  %v1757_v11 = vand.u32 4294901760, %v7023_v21 }
 0x61f   :  { %5982 = vtanh.f32 %v1082_v38  ;;  %v1735_v38 = vand.u32 4294901760, %v1734_v17 }
 0x620   :  { %5984 = vtanh.f32 %v1079_v44  ;;  %v1746_v44 = vsub.f32 %v6998_v62, %v1745_v36 }
 0x624   :  { %v1084_v63 = vpop.f32.mrf.mxu3 }
 0x625   :  { %v5983_v9 = vpop.eup %5982  ;;  %v1085_v39 = vadd.f32 %v1084_v63, %v6748_v14  ;;  %v1144_v14 = vld [vmem:[#allocation2 + $0x28] sm:$0xff] }
 0x626   :  { %v5985_v49 = vpop.eup %5984  ;;  %v1095_v45 = vmul.f32 0.5, %v5983_v9  ;;  %v6978_v24 = vand.u32 4294901760, %v1144_v14  ;;  %v1469_v9 = vsub.f32 %v1344_v54, %v7037_v33 }
 0x627   :  { %v1094_v18 = vmul.f32 0.5, %v5985_v49 }
 0x628   :  { %v1098_v1 = vadd.f32 0.5, %v1095_v45  ;;  %v6990_v32 = vsub.f32 %v1144_v14, %v6978_v24  ;;  %v1763_v45 = vand.u32 4294901760, %v7046_v7 }
 0x629   :  { %v1097_v2 = vadd.f32 0.5, %v1094_v18  ;;  %v1769_v18 = vand.u32 4294901760, %v7054_v43 }
 0x62a   :  { %v1100_v30 = vmul.f32 %v1098_v1, %v988_v35  ;;  %v1739_v58 = vand.u32 4294901760, %v6990_v32  ;;  %v1747_v1 = vand.u32 4294901760, %v1746_v44 }
 0x62c   :  { %v1087_v50 = vpop.f32.mrf.mxu3  ;;  %v1740_v47 = vsub.f32 %v6990_v32, %v1739_v58 }
 0x62d   :  { %v1088_v51 = vadd.f32 %v1087_v50, %v6744_v6  ;;  %v1107_v6 = vld [vmem:[%s9637_s9] sm:$0xff]  ;;  %v1347_v50 = vsel %vm1339_vm3, %v1109_v57, 0 }
 0x62e   :  { %v1341_v48 = vsel %vm1339_vm3, %v1107_v6, 0  ;;  %v1741_v49 = vand.u32 4294901760, %v1740_v47 }
 0x62f   :  { %5986 = vtanh.f32 %v1088_v51  ;;  %v6985_v15 = vand.u32 4294901760, %v1341_v48  ;;  %v1752_v51 = vsub.f32 %v7016_v60, %v1751_v34 }
 0x630   :  { %5988 = vtanh.f32 %v1085_v39  ;;  %v1758_v39 = vsub.f32 %v7023_v21, %v1757_v11 }
 0x631   :  { %v7009_v26 = vsub.f32 %v1341_v48, %v6985_v15 }
 0x633   :  { %v1462_v35 = vand.u32 4294901760, %v7009_v26 }
 0x635   :  { %v5987_v46 = vpop.eup %5986  ;;  %v1463_v63 = vsub.f32 %v7009_v26, %v1462_v35 }
 0x636   :  { %v1101_v10 = vmul.f32 %v5987_v46, %v1097_v2  ;;  %v5989_v52 = vpop.eup %5988  ;;  %v1470_v46 = vand.u32 4294901760, %v1469_v9 }
 0x637   :  { %v1096_v41 = vmul.f32 0.5, %v5989_v52  ;;  %v1464_v2 = vand.u32 4294901760, %v1463_v63  ;;  %v1764_v52 = vsub.f32 %v7046_v7, %v1763_v45 }
 0x638   :  { %v1102_v37 = vadd.f32 %v1101_v10, %v1100_v30  ;;  %v7078_v30 = vand.u32 4294901760, %v1347_v50  ;;  %v1753_v10 = vand.u32 4294901760, %v1752_v51 }
 0x639   :  { %v1099_v5 = vadd.f32 0.5, %v1096_v41  ;;  %v1759_v41 = vand.u32 4294901760, %v1758_v39  ;;  %v1765_v6 = vand.u32 4294901760, %v1764_v52  ;;  %v1118_v52 = vld [vmem:[%s9637_s9 + $0x58] sm:$0xff] }
 0x63a   :  { %5990 = vtanh.f32 %v1102_v37  ;;  %v1110_v37 = vld [vmem:[%s9637_s9 + $0x18] sm:$0xff] }
 0x63b   :  { %v1350_v61 = vsel %vm1339_vm3, %v1110_v37, 0 }
 0x63c   :  { %v7098_v3 = vand.u32 4294901760, %v1350_v61 }
 0x640   :  { %v5991_v29 = vpop.eup %5990 }
 0x641   :  { %v1104_v42 = vmul.f32 %v5991_v29, %v1099_v5  ;;  %v1770_v5 = vsub.f32 %v7054_v43, %v1769_v18  ;;  %v1471_v29 = vsub.f32 %v1469_v9, %v1470_v46 }
 0x643   :  { %1106 = vst.msk [vmem:[#allocation2 + $0x38] sm:$0xff] %vm307_vm2, %v1104_v42  ;;  %v1477_v42 = vsub.f32 %v1347_v50, %v7078_v30  ;;  %v1771_v14 = vand.u32 4294901760, %v1770_v5  ;;  %v1472_v31 = vand.u32 4294901760, %v1471_v29  ;;  %v1374_v5 = vsel %vm1339_vm3, %v1118_v52, 0 }
 0x645   :  { %v1478_v48 = vand.u32 4294901760, %v1477_v42 }
 0x64a   :  { %v1146_v27 = vld [vmem:[#allocation2 + $0x38] sm:$0xff] }
 0x64b   :  { %v6987_v12 = vand.u32 4294901760, %v1146_v27 }
 0x64d   :  { %1445 = vmatpush.msra.mxu0 %v6987_v12  ;;  %2104 = vmatpush.msrb.mxu3 %v6987_v12  ;;  %v7005_v0 = vsub.f32 %v1146_v27, %v6987_v12  ;;  %v1485_v27 = vsub.f32 %v1350_v61, %v7098_v3  ;;  %v7178_v61 = vand.u32 4294901760, %v1374_v5 }
 0x64f   :  { %1447 = vmatpush.msra.mxu0 %v6975_v19  ;;  %1912 = vmatpush.msrb.mxu2 %v7005_v0  ;;  %v1727_v55 = vand.u32 4294901760, %v7005_v0 }
 0x650   :  { %2106 = vmatpush.msrb.mxu3 %v6975_v19 }
 0x651   :  { %1449 = vmatpush.msra.mxu0 %v6978_v24  ;;  %1915 = vmatpush.msrb.mxu2 %v6983_v40  ;;  %v1728_v25 = vsub.f32 %v7005_v0, %v1727_v55  ;;  %v1479_v40 = vsub.f32 %v1477_v42, %v1478_v48  ;;  %v1356_v0 = vsel %vm1339_vm3, %v1112_v20, 0 }
 0x652   :  { %2108 = vmatpush.msrb.mxu3 %v6978_v24  ;;  %v7129_v23 = vand.u32 4294901760, %v1356_v0 }
 0x653   :  { %1451 = vmatpush.msra.mxu0 %v6980_v22  ;;  %1918 = vmatpush.msrb.mxu2 %v6990_v32  ;;  %v1729_v56 = vand.u32 4294901760, %v1728_v25  ;;  %v1353_v32 = vsel %vm1339_vm3, %v1111_v28, 0  ;;  %v1480_v4 = vand.u32 4294901760, %v1479_v40 }
 0x654   :  { %2110 = vmatpush.msrb.mxu3 %v6980_v22 }
 0x655   :  { %1453 = vmatpush.msra.mxu0 %v6992_v53  ;;  %1730 = vmatpush.msra.mxu1 %v1729_v56  ;;  %v1115_v56 = vld [vmem:[%s9637_s9 + $0x40] sm:$0xff] }
 0x656   :  { %1921 = vmatpush.msrb.mxu2 %v6998_v62  ;;  %2112 = vmatpush.msrb.mxu3 %v6992_v53  ;;  %v1486_v62 = vand.u32 4294901760, %v1485_v27 }
 0x657   :  { %1455 = vmatpush.msra.mxu0 %v7000_v13  ;;  %1736 = vmatpush.msra.mxu1 %v1735_v38  ;;  %v1116_v38 = vld [vmem:[%s9637_s9 + $0x48] sm:$0xff] }
 0x658   :  { %1924 = vmatpush.msrb.mxu2 %v7016_v60  ;;  %2114 = vmatpush.msrb.mxu3 %v7000_v13 }
 0x659   :  { %1457 = vmatpush.msra.mxu0 %v7018_v16  ;;  %1742 = vmatpush.msra.mxu1 %v1741_v49 }
 0x65a   :  { %1927 = vmatpush.msrb.mxu2 %v7023_v21  ;;  %2116 = vmatpush.msrb.mxu3 %v7018_v16 }
 0x65b   :  { %1459 = vmatpush.msra.mxu0 %v7025_v8  ;;  %1748 = vmatpush.msra.mxu1 %v1747_v1 }
 0x65c   :  { %1930 = vmatpush.msrb.mxu2 %v7046_v7  ;;  %2118 = vmatpush.msrb.mxu3 %v7025_v8 }
 0x65d   :  { %1465 = vmatmul.f32.vlgmr.msra.gmra.mxu0 %v1464_v2  ;;  %1754 = vmatpush.msra.mxu1 %v1753_v10 }
 0x65e   :  { %2323 = vmatpush.msrb.mxu0 %v1727_v55  ;;  %1933 = vmatpush.msrb.mxu2 %v7054_v43 }
 0x65f   :  { %1760 = vmatpush.msra.mxu1 %v1759_v41  ;;  %1936 = vmatmul.f32.vlgmr.msrb.gmra.mxu2 %v7009_v26 }
 0x660   :  { %2327 = vmatpush.msrb.mxu0 %v1733_v59  ;;  %2122 = vmatmul.f32.vlgmr.msrb.gmra.mxu3 %v1462_v35 }
 0x661   :  { %1766 = vmatpush.msra.mxu1 %v1765_v6  ;;  %v1119_v6 = vld [vmem:[%s9637_s9 + $0x60] sm:$0xff] }
 0x662   :  { %2331 = vmatpush.msrb.mxu0 %v1739_v58  ;;  %v1114_v58 = vld [vmem:[%s9637_s9 + $0x38] sm:$0xff] }
 0x663   :  { %1772 = vmatpush.msra.mxu1 %v1771_v14 }
 0x664   :  { %2335 = vmatpush.msrb.mxu0 %v1745_v36  ;;  %1774 = vmatmul.f32.vlgmr.msra.gmra.mxu1 %v6985_v15  ;;  %v1362_v36 = vsel %vm1339_vm3, %v1114_v58, 0 }
 0x665   :  { %1473 = vmatmul.f32.gmra.mxu0 %v1472_v31  ;;  %2490 = vmatpush.msrb.mxu1 %v6987_v12  ;;  %v7117_v12 = vand.u32 4294901760, %v1353_v32  ;;  %v7146_v35 = vand.u32 4294901760, %v1362_v36  ;;  %v1549_v31 = vsub.f32 %v1374_v5, %v7178_v61 }
 0x666   :  { %2339 = vmatpush.msrb.mxu0 %v1751_v34  ;;  %v1365_v34 = vsel %vm1339_vm3, %v1115_v56, 0 }
 0x667   :  { %2492 = vmatpush.msrb.mxu1 %v6975_v19  ;;  %1941 = vmatmul.f32.gmra.mxu2 %v1469_v9  ;;  %v1487_v19 = vsub.f32 %v1485_v27, %v1486_v62  ;;  %v1517_v7 = vsub.f32 %v1362_v36, %v7146_v35  ;;  %v1368_v9 = vsel %vm1339_vm3, %v1116_v38, 0  ;;  %v1550_v40 = vand.u32 4294901760, %v1549_v31 }
 0x668   :  { %2343 = vmatpush.msrb.mxu0 %v1757_v11  ;;  %2128 = vmatmul.f32.gmra.mxu3 %v1470_v46  ;;  %v7154_v11 = vand.u32 4294901760, %v1365_v34  ;;  %v7162_v51 = vand.u32 4294901760, %v1368_v9 }
 0x669   :  { %2494 = vmatpush.msrb.mxu1 %v6978_v24  ;;  %v1493_v24 = vsub.f32 %v1353_v32, %v7117_v12  ;;  %v1518_v43 = vand.u32 4294901760, %v1517_v7  ;;  %v1120_v32 = vld [vmem:[%s9637_s9 + $0x68] sm:$0xff] }
 0x66a   :  { %2347 = vmatpush.msrb.mxu0 %v1763_v45  ;;  %v1525_v63 = vsub.f32 %v1365_v34, %v7154_v11  ;;  %v1117_v45 = vld [vmem:[%s9637_s9 + $0x50] sm:$0xff] }
 0x66b   :  { %2496 = vmatpush.msrb.mxu1 %v6980_v22  ;;  %v1488_v22 = vand.u32 4294901760, %v1487_v19  ;;  %v1494_v59 = vand.u32 4294901760, %v1493_v24  ;;  %v1519_v44 = vsub.f32 %v1517_v7, %v1518_v43  ;;  %v1371_v1 = vsel %vm1339_vm3, %v1117_v45, 0 }
 0x66c   :  { %2351 = vmatpush.msrb.mxu0 %v1769_v18  ;;  %1778 = vmatmul.f32.gmra.mxu1 %v7037_v33  ;;  %v1526_v49 = vand.u32 4294901760, %v1525_v63  ;;  %v1533_v18 = vsub.f32 %v1368_v9, %v7162_v51  ;;  %v7170_v10 = vand.u32 4294901760, %v1371_v1  ;;  %v1380_v19 = vsel %vm1339_vm3, %v1120_v32, 0 }
 0x66d   :  { %1481 = vmatmul.f32.gmra.mxu0 %v1480_v4  ;;  %2498 = vmatpush.msrb.mxu1 %v6992_v53  ;;  %v1113_v53 = vld [vmem:[%s9637_s9 + $0x30] sm:$0xff]  ;;  %v1495_v26 = vsub.f32 %v1493_v24, %v1494_v59  ;;  %v1520_v50 = vand.u32 4294901760, %v1519_v44  ;;  %v7192_v4 = vpop.permute.xlu1 %1256 }
 0x66e   :  { %v1359_v54 = vsel %vm1339_vm3, %v1113_v53, 0  ;;  %v1527_v39 = vsub.f32 %v1525_v63, %v1526_v49  ;;  %v1534_v46 = vand.u32 4294901760, %v1533_v18  ;;  %v1541_v41 = vsub.f32 %v1371_v1, %v7170_v10 }
 0x66f   :  { %2500 = vmatpush.msrb.mxu1 %v7000_v13  ;;  %1946 = vmatmul.f32.gmra.mxu2 %v1477_v42  ;;  %v1501_v13 = vsub.f32 %v1356_v0, %v7129_v23  ;;  %v1496_v55 = vand.u32 4294901760, %v1495_v26 }
 0x670   :  { %2134 = vmatmul.f32.gmra.mxu3 %v1478_v48  ;;  %v1528_v2 = vand.u32 4294901760, %v1527_v39  ;;  %v1535_v37 = vsub.f32 %v1533_v18, %v1534_v46  ;;  %v1542_v42 = vand.u32 4294901760, %v1541_v41  ;;  %v1377_v48 = vsel %vm1339_vm3, %v1119_v6, 0 }
 0x671   :  { %2502 = vmatpush.msrb.mxu1 %v7018_v16  ;;  %v1502_v60 = vand.u32 4294901760, %v1501_v13  ;;  %v7138_v16 = vand.u32 4294901760, %v1359_v54 }
 0x672   :  { %v1536_v29 = vand.u32 4294901760, %v1535_v37  ;;  %v1543_v14 = vsub.f32 %v1541_v41, %v1542_v42 }
 0x673   :  { %2504 = vmatpush.msrb.mxu1 %v7025_v8  ;;  %v1503_v21 = vsub.f32 %v1501_v13, %v1502_v60  ;;  %v1509_v8 = vsub.f32 %v1359_v54, %v7138_v16 }
 0x674   :  { %1782 = vmatmul.f32.gmra.mxu1 %v7078_v30  ;;  %v1544_v28 = vand.u32 4294901760, %v1543_v14 }
 0x675   :  { %1489 = vmatmul.f32.gmra.mxu0 %v1488_v22  ;;  %v1504_v25 = vand.u32 4294901760, %v1503_v21  ;;  %v1510_v17 = vand.u32 4294901760, %v1509_v8  ;;  %v7196_v22 = vand.u32 4294901760, %v1380_v19  ;;  %v7204_v54 = vpop.permute.xlu1 %1241  ;;  %v1122_v21 = vld [vmem:[%s9637_s9 + $0x78] sm:$0xff] }
 0x677   :  { %1951 = vmatmul.f32.gmra.mxu2 %v1485_v27  ;;  %v1511_v47 = vsub.f32 %v1509_v8, %v1510_v17  ;;  %v7186_v27 = vand.u32 4294901760, %v1377_v48  ;;  %v1565_v26 = vsub.f32 %v1380_v19, %v7196_v22  ;;  %v1126_v19 = vld [vmem:[%s9637_s9 + $0x98] sm:$0xff] }
 0x678   :  { %2140 = vmatmul.f32.gmra.mxu3 %v1486_v62  ;;  %v1551_v62 = vsub.f32 %v1549_v31, %v1550_v40 }
 0x679   :  { %v1512_v57 = vand.u32 4294901760, %v1511_v47  ;;  %v1557_v20 = vsub.f32 %v1377_v48, %v7186_v27 }
 0x67b   :  { %v1558_v0 = vand.u32 4294901760, %v1557_v20 }
 0x67c   :  { %1786 = vmatmul.f32.gmra.mxu1 %v7098_v3 }
 0x67d   :  { %1497 = vmatmul.f32.gmra.mxu0 %v1496_v55  ;;  %v1559_v53 = vsub.f32 %v1557_v20, %v1558_v0  ;;  %v7216_v56 = vpop.permute.xlu1 %1226 }
 0x67f   :  { %1956 = vmatmul.f32.gmra.mxu2 %v1493_v24  ;;  %v1552_v24 = vand.u32 4294901760, %v1551_v62  ;;  %v1560_v55 = vand.u32 4294901760, %v1559_v53  ;;  %v1398_v53 = vsel %vm1339_vm3, %v1126_v19, 0  ;;  %v1128_v19 = vld [vmem:[%s9637_s9 + $0xa8] sm:$0xff] }
 0x680   :  { %2146 = vmatmul.f32.gmra.mxu3 %v1494_v59  ;;  %v1121_v59 = vld [vmem:[%s9637_s9 + $0x70] sm:$0xff] }
 0x684   :  { %1790 = vmatmul.f32.gmra.mxu1 %v7117_v12 }
 0x685   :  { %1505 = vmatmul.f32.gmra.mxu0 %v1504_v25  ;;  %v1386_v25 = vsel %vm1339_vm3, %v1122_v21, 0  ;;  %v7232_v39 = vpop.permute.xlu1 %1211 }
 0x686   :  { %v7218_v34 = vand.u32 4294901760, %v1386_v25 }
 0x687   :  { %1961 = vmatmul.f32.gmra.mxu2 %v1501_v13  ;;  %v1383_v13 = vsel %vm1339_vm3, %v1121_v59, 0 }
 0x688   :  { %2152 = vmatmul.f32.gmra.mxu3 %v1502_v60  ;;  %v1566_v60 = vand.u32 4294901760, %v1565_v26  ;;  %v7206_v58 = vand.u32 4294901760, %v1383_v13  ;;  %v1581_v38 = vsub.f32 %v1386_v25, %v7218_v34 }
 0x68a   :  { %v1573_v36 = vsub.f32 %v1383_v13, %v7206_v58 }
 0x68c   :  { %1794 = vmatmul.f32.gmra.mxu1 %v7129_v23 }
 0x68d   :  { %1513 = vmatmul.f32.gmra.mxu0 %v1512_v57  ;;  %v1123_v57 = vld [vmem:[%s9637_s9 + $0x80] sm:$0xff]  ;;  %v7250_v6 = vpop.permute.xlu1 %1196 }
 0x68e   :  { %v1389_v44 = vsel %vm1339_vm3, %v1123_v57, 0  ;;  %v1127_v57 = vld [vmem:[%s9637_s9 + $0xa0] sm:$0xff] }
 0x68f   :  { %1966 = vmatmul.f32.gmra.mxu2 %v1509_v8  ;;  %v1567_v8 = vsub.f32 %v1565_v26, %v1566_v60  ;;  %v7230_v45 = vand.u32 4294901760, %v1389_v44 }
 0x690   :  { %2158 = vmatmul.f32.gmra.mxu3 %v1510_v17  ;;  %v7214_v17 = vpop.permute.xlu0 %1246 }
 0x691   :  { %v1568_v47 = vand.u32 4294901760, %v1567_v8  ;;  %v7266_v8 = vand.u32 4294901760, %v1398_v53 }
 0x694   :  { %1798 = vmatmul.f32.gmra.mxu1 %v7138_v16 }
 0x695   :  { %1521 = vmatmul.f32.gmra.mxu0 %v1520_v50 }
 0x697   :  { %1971 = vmatmul.f32.gmra.mxu2 %v1517_v7  ;;  %v1574_v7 = vand.u32 4294901760, %v1573_v36 }
 0x698   :  { %2164 = vmatmul.f32.gmra.mxu3 %v1518_v43  ;;  %v7228_v9 = vpop.permute.xlu0 %1231 }
 0x699   :  { %v1575_v43 = vsub.f32 %v1573_v36, %v1574_v7 }
 0x69b   :  { %v1576_v50 = vand.u32 4294901760, %v1575_v43 }
 0x69c   :  { %1802 = vmatmul.f32.gmra.mxu1 %v7146_v35 }
 0x69d   :  { %1529 = vmatmul.f32.gmra.mxu0 %v1528_v2  ;;  %v1589_v2 = vsub.f32 %v1389_v44, %v7230_v45 }
 0x69f   :  { %1976 = vmatmul.f32.gmra.mxu2 %v1525_v63  ;;  %v7226_v63 = vpop.permute.xlu2 %1251 }
 0x6a0   :  { %2170 = vmatmul.f32.gmra.mxu3 %v1526_v49  ;;  %v1582_v49 = vand.u32 4294901760, %v1581_v38 }
 0x6a2   :  { %v1583_v1 = vsub.f32 %v1581_v38, %v1582_v49 }
 0x6a4   :  { %1806 = vmatmul.f32.gmra.mxu1 %v7154_v11  ;;  %v1584_v37 = vand.u32 4294901760, %v1583_v1 }
 0x6a5   :  { %1537 = vmatmul.f32.gmra.mxu0 %v1536_v29  ;;  %v7244_v29 = vpop.permute.xlu0 %1216 }
 0x6a7   :  { %1981 = vmatmul.f32.gmra.mxu2 %v1533_v18  ;;  %v1124_v18 = vld [vmem:[%s9637_s9 + $0x88] sm:$0xff]  ;;  %v7240_v52 = vpop.permute.xlu2 %1236 }
 0x6a8   :  { %2176 = vmatmul.f32.gmra.mxu3 %v1534_v46  ;;  %v1392_v46 = vsel %vm1339_vm3, %v1124_v18, 0  ;;  %v1401_v18 = vsel %vm1339_vm3, %v1127_v57, 0 }
 0x6a9   :  { %v7242_v5 = vand.u32 4294901760, %v1392_v46 }
 0x6ac   :  { %1810 = vmatmul.f32.gmra.mxu1 %v7162_v51 }
 0x6ad   :  { %1545 = vmatmul.f32.gmra.mxu0 %v1544_v28 }
 0x6af   :  { %1986 = vmatmul.f32.gmra.mxu2 %v1541_v41  ;;  %v1590_v41 = vand.u32 4294901760, %v1589_v2 }
 0x6b0   :  { %2182 = vmatmul.f32.gmra.mxu3 %v1542_v42  ;;  %v1125_v42 = vld [vmem:[%s9637_s9 + $0x90] sm:$0xff] }
 0x6b1   :  { %v1591_v14 = vsub.f32 %v1589_v2, %v1590_v41  ;;  %v1395_v48 = vsel %vm1339_vm3, %v1125_v42, 0  ;;  %v7278_v42 = vand.u32 4294901760, %v1401_v18 }
 0x6b2   :  { %v7254_v32 = vand.u32 4294901760, %v1395_v48 }
 0x6b3   :  { %v1592_v28 = vand.u32 4294901760, %v1591_v14 }
 0x6b4   :  { %1814 = vmatmul.f32.gmra.mxu1 %v7170_v10  ;;  %v1605_v59 = vsub.f32 %v1395_v48, %v7254_v32 }
 0x6b5   :  { %1553 = vmatmul.f32.gmra.mxu0 %v1552_v24  ;;  %v7262_v24 = vpop.permute.xlu0 %1201 }
 0x6b6   :  { %v1606_v21 = vand.u32 4294901760, %v1605_v59 }
 0x6b7   :  { %1991 = vmatmul.f32.gmra.mxu2 %v1549_v31  ;;  %v1597_v31 = vsub.f32 %v1392_v46, %v7242_v5 }
 0x6b8   :  { %2188 = vmatmul.f32.gmra.mxu3 %v1550_v40  ;;  %v1607_v44 = vsub.f32 %v1605_v59, %v1606_v21 }
 0x6b9   :  { %v1598_v40 = vand.u32 4294901760, %v1597_v31 }
 0x6bc   :  { %1818 = vmatmul.f32.gmra.mxu1 %v7178_v61 }
 0x6bd   :  { %1561 = vmatmul.f32.gmra.mxu0 %v1560_v55  ;;  %v1187_v1 = vpop.permute.xlu0 %1186 }
 0x6bf   :  { %1996 = vmatmul.f32.gmra.mxu2 %v1557_v20  ;;  %v7256_v20 = vpop.permute.xlu2 %1221 }
 0x6c0   :  { %2194 = vmatmul.f32.gmra.mxu3 %v1558_v0  ;;  %v1599_v0 = vsub.f32 %v1597_v31, %v1598_v40 }
 0x6c4   :  { %1822 = vmatmul.f32.gmra.mxu1 %v7186_v27 }
 0x6c5   :  { %1569 = vmatmul.f32.gmra.mxu0 %v1568_v47 }
 0x6c7   :  { %2001 = vmatmul.f32.gmra.mxu2 %v1565_v26  ;;  %v1182_v26 = vpop.permute.xlu1 %1181 }
 0x6c8   :  { %2200 = vmatmul.f32.gmra.mxu3 %v1566_v60  ;;  %v1600_v60 = vand.u32 4294901760, %v1599_v0 }
 0x6cc   :  { %1826 = vmatmul.f32.gmra.mxu1 %v7196_v22 }
 0x6cd   :  { %1577 = vmatmul.f32.gmra.mxu0 %v1576_v50  ;;  %v1613_v50 = vsub.f32 %v1398_v53, %v7266_v8 }
 0x6cf   :  { %2006 = vmatmul.f32.gmra.mxu2 %v1573_v36 }
 0x6d0   :  { %2206 = vmatmul.f32.gmra.mxu3 %v1574_v7 }
 0x6d4   :  { %1830 = vmatmul.f32.gmra.mxu1 %v7206_v58 }
 0x6d5   :  { %1585 = vmatmul.f32.gmra.mxu0 %v1584_v37  ;;  %v1608_v37 = vand.u32 4294901760, %v1607_v44 }
 0x6d7   :  { %2011 = vmatmul.f32.gmra.mxu2 %v1581_v38  ;;  %v7272_v38 = vpop.permute.xlu2 %1206 }
 0x6d8   :  { %2212 = vmatmul.f32.gmra.mxu3 %v1582_v49 }
 0x6da   :  { %v1466_v62 = vpop.f32.mrf.mxu0 }
 0x6db   :  { %v1467_v13 = vadd.f32 %v1466_v62, %v1182_v26  ;;  %v1404_v26 = vsel %vm1339_vm3, %v1128_v19, 0 }
 0x6dc   :  { %1834 = vmatmul.f32.gmra.mxu1 %v7218_v34 }
 0x6dd   :  { %1593 = vmatmul.f32.gmra.mxu0 %v1592_v28 }
 0x6df   :  { %2016 = vmatmul.f32.gmra.mxu2 %v1589_v2 }
 0x6e0   :  { %2218 = vmatmul.f32.gmra.mxu3 %v1590_v41  ;;  %v1614_v41 = vand.u32 4294901760, %v1613_v50 }
 0x6e1   :  { %v1775_v55 = vpop.f32.mrf.mxu1 }
 0x6e2   :  { %v1474_v36 = vpop.f32.mrf.mxu0  ;;  %v1776_v25 = vadd.f32 %v1775_v55, %v1467_v13  ;;  %v1937_v47 = vpop.f32.mrf.mxu2 }
 0x6e3   :  { %v2123_v7 = vpop.f32.mrf.mxu3  ;;  %v1475_v2 = vadd.f32 %v1474_v36, %v1187_v1  ;;  %v1192_v13 = vpop.permute.xlu2 %1191 }
 0x6e4   :  { %v1938_v43 = vadd.f32 %v1937_v47, %v1776_v25  ;;  %1838 = vmatmul.f32.gmra.mxu1 %v7230_v45  ;;  %v7288_v47 = vand.u32 4294901760, %v1404_v26 }
 0x6e5   :  { %1601 = vmatmul.f32.gmra.mxu0 %v1600_v60 }
 0x6e6   :  { %v7275_v49 = vadd.f32 %v2123_v7, %v1938_v43 }
 0x6e7   :  { %2021 = vmatmul.f32.gmra.mxu2 %v1597_v31  ;;  %v1615_v31 = vsub.f32 %v1613_v50, %v1614_v41 }
 0x6e8   :  { %9730 = vst [vmem:[#allocation3_spill] sm:$0xff] %v7275_v49  ;;  %2224 = vmatmul.f32.gmra.mxu3 %v1598_v40  ;;  %v1621_v40 = vsub.f32 %v1401_v18, %v7278_v42  ;;  %v1129_v18 = vld [vmem:[%s9637_s9 + $0xb0] sm:$0xff] }
 0x6e9   :  { %v1779_v46 = vpop.f32.mrf.mxu1  ;;  %v1616_v36 = vand.u32 4294901760, %v1615_v31 }
 0x6ea   :  { %v1482_v14 = vpop.f32.mrf.mxu0  ;;  %v1780_v48 = vadd.f32 %v1779_v46, %v1475_v2  ;;  %v1942_v28 = vpop.f32.mrf.mxu2  ;;  %v1622_v25 = vand.u32 4294901760, %v1621_v40  ;;  %v1407_v46 = vsel %vm1339_vm3, %v1129_v18, 0 }
 0x6eb   :  { %v2129_v62 = vpop.f32.mrf.mxu3  ;;  %v1483_v55 = vadd.f32 %v1482_v14, %v1192_v13 }
 0x6ec   :  { %v1943_v0 = vadd.f32 %v1942_v28, %v1780_v48  ;;  %1842 = vmatmul.f32.gmra.mxu1 %v7242_v5 }
 0x6ed   :  { %1609 = vmatmul.f32.gmra.mxu0 %v1608_v37 }
 0x6ee   :  { %v7285_v53 = vadd.f32 %v2129_v62, %v1943_v0  ;;  %v7299_v62 = vand.u32 4294901760, %v1407_v46 }
 0x6ef   :  { %2026 = vmatmul.f32.gmra.mxu2 %v1605_v59  ;;  %v1623_v59 = vsub.f32 %v1621_v40, %v1622_v25 }
 0x6f0   :  { %9731 = vst [vmem:[#allocation4_spill] sm:$0xff] %v7285_v53  ;;  %2230 = vmatmul.f32.gmra.mxu3 %v1606_v21  ;;  %v1629_v21 = vsub.f32 %v1404_v26, %v7288_v47  ;;  %v1130_v26 = vld [vmem:[%s9637_s9 + $0xb8] sm:$0xff]  ;;  %v1137_v53 = vld [vmem:[%s9637_s9 + $0xf0] sm:$0xff] }
 0x6f1   :  { %v1783_v60 = vpop.f32.mrf.mxu1  ;;  %v1624_v48 = vand.u32 4294901760, %v1623_v59 }
 0x6f2   :  { %v1490_v7 = vpop.f32.mrf.mxu0  ;;  %v1784_v57 = vadd.f32 %v1783_v60, %v1483_v55  ;;  %v1947_v43 = vpop.f32.mrf.mxu2  ;;  %v1630_v28 = vand.u32 4294901760, %v1629_v21  ;;  %v1410_v60 = vsel %vm1339_vm3, %v1130_v26, 0 }
 0x6f3   :  { %v2135_v44 = vpop.f32.mrf.mxu3  ;;  %v1491_v37 = vadd.f32 %v1490_v7, %v7250_v6  ;;  %v1637_v6 = vsub.f32 %v1407_v46, %v7299_v62  ;;  %v1131_v46 = vld [vmem:[%s9637_s9 + $0xc0] sm:$0xff] }
 0x6f4   :  { %v1948_v1 = vadd.f32 %v1947_v43, %v1784_v57  ;;  %1846 = vmatmul.f32.gmra.mxu1 %v7254_v32 }
 0x6f5   :  { %1617 = vmatmul.f32.gmra.mxu0 %v1616_v36  ;;  %v1638_v43 = vand.u32 4294901760, %v1637_v6 }
 0x6f6   :  { %v7295_v2 = vadd.f32 %v2135_v44, %v1948_v1  ;;  %v7310_v44 = vand.u32 4294901760, %v1410_v60 }
 0x6f7   :  { %2031 = vmatmul.f32.gmra.mxu2 %v1613_v50  ;;  %v1631_v50 = vsub.f32 %v1629_v21, %v1630_v28 }
 0x6f8   :  { %9732 = vst [vmem:[#allocation5_spill] sm:$0xff] %v7295_v2  ;;  %2236 = vmatmul.f32.gmra.mxu3 %v1614_v41 }
 0x6f9   :  { %v1787_v14 = vpop.f32.mrf.mxu1  ;;  %v1632_v57 = vand.u32 4294901760, %v1631_v50 }
 0x6fa   :  { %v1498_v19 = vpop.f32.mrf.mxu0  ;;  %v1788_v0 = vadd.f32 %v1787_v14, %v1491_v37  ;;  %v1952_v31 = vpop.f32.mrf.mxu2 }
 0x6fb   :  { %v2141_v13 = vpop.f32.mrf.mxu3  ;;  %v1499_v36 = vadd.f32 %v1498_v19, %v7262_v24  ;;  %v1645_v24 = vsub.f32 %v1410_v60, %v7310_v44  ;;  %v1132_v60 = vld [vmem:[%s9637_s9 + $0xc8] sm:$0xff] }
 0x6fc   :  { %v1953_v55 = vadd.f32 %v1952_v31, %v1788_v0  ;;  %1850 = vmatmul.f32.gmra.mxu1 %v7266_v8 }
 0x6fd   :  { %1625 = vmatmul.f32.gmra.mxu0 %v1624_v48  ;;  %v1413_v48 = vsel %vm1339_vm3, %v1131_v46, 0 }
 0x6fe   :  { %v7306_v41 = vadd.f32 %v2141_v13, %v1953_v55  ;;  %v1646_v13 = vand.u32 4294901760, %v1645_v24  ;;  %v7321_v26 = vand.u32 4294901760, %v1413_v48 }
 0x6ff   :  { %2036 = vmatmul.f32.gmra.mxu2 %v1621_v40  ;;  %v1639_v40 = vsub.f32 %v1637_v6, %v1638_v43 }
 0x700   :  { %9733 = vst [vmem:[#allocation6_spill] sm:$0xff] %v7306_v41  ;;  %2242 = vmatmul.f32.gmra.mxu3 %v1622_v25 }
 0x701   :  { %v1791_v7 = vpop.f32.mrf.mxu1  ;;  %v1640_v31 = vand.u32 4294901760, %v1639_v40 }
 0x702   :  { %v1506_v18 = vpop.f32.mrf.mxu0  ;;  %v1792_v1 = vadd.f32 %v1791_v7, %v1499_v36  ;;  %v1957_v59 = vpop.f32.mrf.mxu2 }
 0x703   :  { %v2147_v37 = vpop.f32.mrf.mxu3  ;;  %v1507_v19 = vadd.f32 %v1506_v18, %v7272_v38  ;;  %v1653_v38 = vsub.f32 %v1413_v48, %v7321_v26  ;;  %v1416_v18 = vsel %vm1339_vm3, %v1132_v60, 0  ;;  %v1133_v48 = vld [vmem:[%s9637_s9 + $0xd0] sm:$0xff] }
 0x704   :  { %v1958_v14 = vadd.f32 %v1957_v59, %v1792_v1  ;;  %1854 = vmatmul.f32.gmra.mxu1 %v7278_v42 }
 0x705   :  { %1633 = vmatmul.f32.gmra.mxu0 %v1632_v57  ;;  %v1654_v46 = vand.u32 4294901760, %v1653_v38 }
 0x706   :  { %v7317_v25 = vadd.f32 %v2147_v37, %v1958_v14  ;;  %v7332_v14 = vand.u32 4294901760, %v1416_v18 }
 0x707   :  { %2041 = vmatmul.f32.gmra.mxu2 %v1629_v21  ;;  %v1647_v21 = vsub.f32 %v1645_v24, %v1646_v13 }
 0x708   :  { %9734 = vst [vmem:[#allocation7_spill] sm:$0xff] %v7317_v25  ;;  %2248 = vmatmul.f32.gmra.mxu3 %v1630_v28  ;;  %v1138_v25 = vld [vmem:[%s9637_s9 + $0xf8] sm:$0xff] }
 0x709   :  { %v1795_v0 = vpop.f32.mrf.mxu1  ;;  %v1648_v37 = vand.u32 4294901760, %v1647_v21 }
 0x70a   :  { %v1514_v55 = vpop.f32.mrf.mxu0  ;;  %v1796_v50 = vadd.f32 %v1795_v0, %v1507_v19  ;;  %v1962_v36 = vpop.f32.mrf.mxu2 }
 0x70b   :  { %v2153_v7 = vpop.f32.mrf.mxu3  ;;  %v1515_v1 = vadd.f32 %v1514_v55, %v7232_v39  ;;  %v1661_v39 = vsub.f32 %v1416_v18, %v7332_v14  ;;  %v1419_v55 = vsel %vm1339_vm3, %v1133_v48, 0  ;;  %v1134_v18 = vld [vmem:[%s9637_s9 + $0xd8] sm:$0xff] }
 0x70c   :  { %v1963_v57 = vadd.f32 %v1962_v36, %v1796_v50  ;;  %1858 = vmatmul.f32.gmra.mxu1 %v7288_v47  ;;  %v7343_v21 = vand.u32 4294901760, %v1419_v55 }
 0x70d   :  { %1641 = vmatmul.f32.gmra.mxu0 %v1640_v31 }
 0x70e   :  { %v7328_v28 = vadd.f32 %v2153_v7, %v1963_v57  ;;  %v1662_v57 = vand.u32 4294901760, %v1661_v39 }
 0x70f   :  { %2046 = vmatmul.f32.gmra.mxu2 %v1637_v6  ;;  %v1655_v6 = vsub.f32 %v1653_v38, %v1654_v46 }
 0x710   :  { %9735 = vst [vmem:[#allocation8_spill] sm:$0xff] %v7328_v28  ;;  %2254 = vmatmul.f32.gmra.mxu3 %v1638_v43 }
 0x711   :  { %v1799_v59 = vpop.f32.mrf.mxu1  ;;  %v1656_v60 = vand.u32 4294901760, %v1655_v6 }
 0x712   :  { %v1522_v40 = vpop.f32.mrf.mxu0  ;;  %v1800_v19 = vadd.f32 %v1799_v59, %v1515_v1  ;;  %v1967_v0 = vpop.f32.mrf.mxu2 }
 0x713   :  { %v2159_v31 = vpop.f32.mrf.mxu3  ;;  %v1523_v36 = vadd.f32 %v1522_v40, %v7244_v29  ;;  %v1663_v29 = vsub.f32 %v1661_v39, %v1662_v57  ;;  %v1422_v40 = vsel %vm1339_vm3, %v1134_v18, 0 }
 0x714   :  { %v1968_v50 = vadd.f32 %v1967_v0, %v1800_v19  ;;  %1862 = vmatmul.f32.gmra.mxu1 %v7299_v62  ;;  %v7357_v6 = vand.u32 4294901760, %v1422_v40 }
 0x715   :  { %1649 = vmatmul.f32.gmra.mxu0 %v1648_v37  ;;  %v1664_v48 = vand.u32 4294901760, %v1663_v29 }
 0x716   :  { %v7339_v43 = vadd.f32 %v2159_v31, %v1968_v50 }
 0x717   :  { %2051 = vmatmul.f32.gmra.mxu2 %v1645_v24  ;;  %v1669_v24 = vsub.f32 %v1419_v55, %v7343_v21 }
 0x718   :  { %9736 = vst [vmem:[#allocation9_spill] sm:$0xff] %v7339_v43  ;;  %2260 = vmatmul.f32.gmra.mxu3 %v1646_v13 }
 0x719   :  { %v1803_v7 = vpop.f32.mrf.mxu1  ;;  %v1670_v50 = vand.u32 4294901760, %v1669_v24 }
 0x71a   :  { %v7345_v1 = vpop.f32.mrf.mxu0  ;;  %v1804_v59 = vadd.f32 %v1803_v7, %v1523_v36  ;;  %v1972_v37 = vpop.f32.mrf.mxu2  ;;  %v1135_v7 = vld [vmem:[%s9637_s9 + $0xe0] sm:$0xff] }
 0x71b   :  { %v2165_v19 = vpop.f32.mrf.mxu3  ;;  %v1671_v55 = vsub.f32 %v1669_v24, %v1670_v50 }
 0x71c   :  { %v1973_v0 = vadd.f32 %v1972_v37, %v1804_v59  ;;  %1866 = vmatmul.f32.gmra.mxu1 %v7310_v44 }
 0x71d   :  { %1657 = vmatmul.f32.gmra.mxu0 %v1656_v60  ;;  %v1677_v60 = vsub.f32 %v1422_v40, %v7357_v6  ;;  %v1672_v59 = vand.u32 4294901760, %v1671_v55 }
 0x71e   :  { %v7352_v13 = vadd.f32 %v2165_v19, %v1973_v0  ;;  %v1136_v0 = vld [vmem:[%s9637_s9 + $0xe8] sm:$0xff] }
 0x71f   :  { %2056 = vmatmul.f32.gmra.mxu2 %v1653_v38  ;;  %v1425_v38 = vsel %vm1339_vm3, %v1135_v7, 0  ;;  %v1678_v37 = vand.u32 4294901760, %v1677_v60 }
 0x720   :  { %9737 = vst [vmem:[#allocation10_spill] sm:$0xff] %v7352_v13  ;;  %2266 = vmatmul.f32.gmra.mxu3 %v1654_v46  ;;  %v7369_v19 = vand.u32 4294901760, %v1425_v38 }
 0x721   :  { %v7355_v31 = vpop.f32.mrf.mxu1  ;;  %v1679_v29 = vsub.f32 %v1677_v60, %v1678_v37 }
 0x722   :  { %9738 = vst [vmem:[#allocation11_spill] sm:$0xff] %v7355_v31  ;;  %v7359_v36 = vpop.f32.mrf.mxu0  ;;  %v1685_v40 = vsub.f32 %v1425_v38, %v7369_v19 }
 0x724   :  { %1870 = vmatmul.f32.gmra.mxu1 %v7321_v26  ;;  %v1686_v7 = vand.u32 4294901760, %v1685_v40 }
 0x725   :  { %1665 = vmatmul.f32.gmra.mxu0 %v1664_v48  ;;  %v1680_v48 = vand.u32 4294901760, %v1679_v29 }
 0x726   :  { %v1687_v38 = vsub.f32 %v1685_v40, %v1686_v7 }
 0x727   :  { %2061 = vmatmul.f32.gmra.mxu2 %v1661_v39  ;;  %v1428_v39 = vsel %vm1339_vm3, %v1136_v0, 0 }
 0x728   :  { %2272 = vmatmul.f32.gmra.mxu3 %v1662_v57  ;;  %v7381_v55 = vand.u32 4294901760, %v1428_v39  ;;  %v1688_v0 = vand.u32 4294901760, %v1687_v38 }
 0x729   :  { %v7367_v46 = vpop.f32.mrf.mxu1 }
 0x72a   :  { %9739 = vst [vmem:[#allocation12_spill] sm:$0xff] %v7367_v46  ;;  %v7371_v18 = vpop.f32.mrf.mxu0 }
 0x72c   :  { %1874 = vmatmul.f32.gmra.mxu1 %v7332_v14 }
 0x72d   :  { %1673 = vmatmul.f32.gmra.mxu0 %v1672_v59  ;;  %v1693_v59 = vsub.f32 %v1428_v39, %v7381_v55 }
 0x72f   :  { %2066 = vmatmul.f32.gmra.mxu2 %v1669_v24  ;;  %v1431_v24 = vsel %vm1339_vm3, %v1137_v53, 0  ;;  %v1694_v29 = vand.u32 4294901760, %v1693_v59 }
 0x730   :  { %2278 = vmatmul.f32.gmra.mxu3 %v1670_v50  ;;  %v7393_v2 = vand.u32 4294901760, %v1431_v24 }
 0x731   :  { %v7379_v57 = vpop.f32.mrf.mxu1  ;;  %v1695_v39 = vsub.f32 %v1693_v59, %v1694_v29 }
 0x732   :  { %v7383_v49 = vpop.f32.mrf.mxu0  ;;  %v1701_v53 = vsub.f32 %v1431_v24, %v7393_v2 }
 0x734   :  { %1878 = vmatmul.f32.gmra.mxu1 %v7343_v21  ;;  %v1702_v38 = vand.u32 4294901760, %v1701_v53 }
 0x735   :  { %1681 = vmatmul.f32.gmra.mxu0 %v1680_v48  ;;  %v1696_v48 = vand.u32 4294901760, %v1695_v39 }
 0x736   :  { %v1703_v13 = vsub.f32 %v1701_v53, %v1702_v38 }
 0x737   :  { %2071 = vmatmul.f32.gmra.mxu2 %v1677_v60  ;;  %v1434_v60 = vsel %vm1339_vm3, %v1138_v25, 0 }
 0x738   :  { %2284 = vmatmul.f32.gmra.mxu3 %v1678_v37  ;;  %v7405_v28 = vand.u32 4294901760, %v1434_v60  ;;  %v1704_v25 = vand.u32 4294901760, %v1703_v13 }
 0x739   :  { %v7391_v50 = vpop.f32.mrf.mxu1 }
 0x73a   :  { %v7395_v41 = vpop.f32.mrf.mxu0 }
 0x73c   :  { %1882 = vmatmul.f32.gmra.mxu1 %v7357_v6 }
 0x73d   :  { %1689 = vmatmul.f32.gmra.mxu0 %v1688_v0  ;;  %v1709_v0 = vsub.f32 %v1434_v60, %v7405_v28 }
 0x73f   :  { %2076 = vmatmul.f32.gmra.mxu2 %v1685_v40  ;;  %v1710_v40 = vand.u32 4294901760, %v1709_v0 }
 0x740   :  { %2290 = vmatmul.f32.gmra.mxu3 %v1686_v7 }
 0x741   :  { %v7403_v37 = vpop.f32.mrf.mxu1  ;;  %v1711_v39 = vsub.f32 %v1709_v0, %v1710_v40 }
 0x742   :  { %v7407_v43 = vpop.f32.mrf.mxu0 }
 0x744   :  { %1886 = vmatmul.f32.gmra.mxu1 %v7369_v19 }
 0x745   :  { %1697 = vmatmul.f32.gmra.mxu0 %v1696_v48  ;;  %v1712_v48 = vand.u32 4294901760, %v1711_v39 }
 0x747   :  { %2081 = vmatmul.f32.gmra.mxu2 %v1693_v59 }
 0x748   :  { %2296 = vmatmul.f32.gmra.mxu3 %v1694_v29 }
 0x749   :  { %v7411_v24 = vpop.f32.mrf.mxu1 }
 0x74a   :  { %v7413_v7 = vpop.f32.mrf.mxu0 }
 0x74c   :  { %1890 = vmatmul.f32.gmra.mxu1 %v7381_v55 }
 0x74d   :  { %1705 = vmatmul.f32.gmra.mxu0 %v1704_v25 }
 0x74f   :  { %2086 = vmatmul.f32.gmra.mxu2 %v1701_v53 }
 0x750   :  { %2302 = vmatmul.f32.gmra.mxu3 %v1702_v38 }
 0x751   :  { %v7416_v31 = vpop.f32.mrf.mxu1 }
 0x752   :  { %v7418_v46 = vpop.f32.mrf.mxu0 }
 0x754   :  { %1894 = vmatmul.f32.gmra.mxu1 %v7393_v2 }
 0x755   :  { %1713 = vmatmul.f32.gmra.mxu0 %v1712_v48 }
 0x757   :  { %2091 = vmatmul.f32.gmra.mxu2 %v1709_v0 }
 0x758   :  { %2308 = vmatmul.f32.gmra.mxu3 %v1710_v40 }
 0x759   :  { %v7421_v13 = vpop.f32.mrf.mxu1 }
 0x75a   :  { %v7423_v59 = vpop.f32.mrf.mxu0 }
 0x75b   :  { %9740 = vst [vmem:[#allocation13_spill] sm:$0xff] %v7423_v59 }
 0x75c   :  { %1898 = vmatmul.f32.gmra.mxu1 %v7405_v28 }
 0x75d   :  { %2353 = vmatmul.f32.vlgmr.msrb.gmra.mxu0 %v6985_v15 }
 0x761   :  { %v7427_v29 = vpop.f32.mrf.mxu1 }
 0x762   :  { %9741 = vst [vmem:[#allocation14_spill] sm:$0xff] %v7427_v29  ;;  %v7429_v53 = vpop.f32.mrf.mxu0  ;;  %v7536_v29 = vpop.f32.mrf.mxu3 }
 0x763   :  { %9742 = vst [vmem:[#allocation15_spill] sm:$0xff] %v7429_v53 }
 0x764   :  { %2506 = vmatmul.f32.vlgmr.msrb.gmra.mxu1 %v6985_v15 }
 0x765   :  { %2357 = vmatmul.f32.gmra.mxu0 %v7037_v33 }
 0x769   :  { %v7433_v60 = vpop.f32.mrf.mxu1 }
 0x76a   :  { %9743 = vst [vmem:[#allocation16_spill] sm:$0xff] %v7433_v60  ;;  %v7435_v38 = vpop.f32.mrf.mxu0 }
 0x76b   :  { %9744 = vst [vmem:[#allocation17_spill] sm:$0xff] %v7435_v38 }
 0x76c   :  { %2510 = vmatmul.f32.gmra.mxu1 %v7037_v33 }
 0x76d   :  { %2361 = vmatmul.f32.gmra.mxu0 %v7078_v30 }
 0x771   :  { %v7439_v0 = vpop.f32.mrf.mxu1 }
 0x772   :  { %9745 = vst [vmem:[#allocation18_spill] sm:$0xff] %v7439_v0  ;;  %v7441_v25 = vpop.f32.mrf.mxu0 }
 0x773   :  { %9746 = vst [vmem:[#allocation19_spill] sm:$0xff] %v7441_v25 }
 0x774   :  { %2514 = vmatmul.f32.gmra.mxu1 %v7078_v30 }
 0x775   :  { %2365 = vmatmul.f32.gmra.mxu0 %v7098_v3 }
 0x779   :  { %v7445_v40 = vpop.f32.mrf.mxu1 }
 0x77a   :  { %9747 = vst [vmem:[#allocation20_spill] sm:$0xff] %v7445_v40  ;;  %v7447_v15 = vpop.f32.mrf.mxu0 }
 0x77b   :  { %9748 = vst [vmem:[#allocation21_spill] sm:$0xff] %v7447_v15 }
 0x77c   :  { %2518 = vmatmul.f32.gmra.mxu1 %v7098_v3 }
 0x77d   :  { %2369 = vmatmul.f32.gmra.mxu0 %v7117_v12 }
 0x781   :  { %v7451_v39 = vpop.f32.mrf.mxu1 }
 0x782   :  { %9749 = vst [vmem:[#allocation22_spill] sm:$0xff] %v7451_v39  ;;  %v7453_v33 = vpop.f32.mrf.mxu0 }
 0x783   :  { %9750 = vst [vmem:[#allocation23_spill] sm:$0xff] %v7453_v33 }
 0x784   :  { %2522 = vmatmul.f32.gmra.mxu1 %v7117_v12 }
 0x785   :  { %2373 = vmatmul.f32.gmra.mxu0 %v7129_v23 }
 0x789   :  { %v7457_v48 = vpop.f32.mrf.mxu1 }
 0x78a   :  { %9751 = vst [vmem:[#allocation24_spill] sm:$0xff] %v7457_v48  ;;  %v7459_v30 = vpop.f32.mrf.mxu0 }
 0x78b   :  { %9752 = vst [vmem:[#allocation25_spill] sm:$0xff] %v7459_v30 }
 0x78c   :  { %2526 = vmatmul.f32.gmra.mxu1 %v7129_v23 }
 0x78d   :  { %2377 = vmatmul.f32.gmra.mxu0 %v7138_v16 }
 0x791   :  { %v7463_v0 = vpop.f32.mrf.mxu1 }
 0x792   :  { %9753 = vst [vmem:[#allocation26_spill] sm:$0xff] %v7463_v0  ;;  %v7465_v3 = vpop.f32.mrf.mxu0 }
 0x793   :  { %9754 = vst [vmem:[#allocation27_spill] sm:$0xff] %v7465_v3 }
 0x794   :  { %2530 = vmatmul.f32.gmra.mxu1 %v7138_v16 }
 0x795   :  { %2381 = vmatmul.f32.gmra.mxu0 %v7146_v35 }
 0x799   :  { %v7469_v40 = vpop.f32.mrf.mxu1 }
 0x79a   :  { %9755 = vst [vmem:[#allocation28_spill] sm:$0xff] %v7469_v40  ;;  %v7471_v12 = vpop.f32.mrf.mxu0  ;;  %v7529_v40 = vpop.f32.mrf.mxu2 }
 0x79b   :  { %9756 = vst [vmem:[#allocation29_spill] sm:$0xff] %v7471_v12 }
 0x79c   :  { %2534 = vmatmul.f32.gmra.mxu1 %v7146_v35 }
 0x79d   :  { %2385 = vmatmul.f32.gmra.mxu0 %v7154_v11 }
 0x7a1   :  { %v7475_v38 = vpop.f32.mrf.mxu1 }
 0x7a2   :  { %9757 = vst [vmem:[#allocation30_spill] sm:$0xff] %v7475_v38  ;;  %v7477_v23 = vpop.f32.mrf.mxu0  ;;  %v7543_v38 = vpop.f32.mrf.mxu2 }
 0x7a3   :  { %9758 = vst [vmem:[#allocation31_spill] sm:$0xff] %v7477_v23 }
 0x7a4   :  { %2538 = vmatmul.f32.gmra.mxu1 %v7154_v11 }
 0x7a5   :  { %2389 = vmatmul.f32.gmra.mxu0 %v7162_v51 }
 0x7a9   :  { %v7481_v25 = vpop.f32.mrf.mxu1 }
 0x7aa   :  { %9759 = vst [vmem:[#allocation32_spill] sm:$0xff] %v7481_v25  ;;  %v7483_v16 = vpop.f32.mrf.mxu0 }
 0x7ab   :  { %9760 = vst [vmem:[#allocation33_spill] sm:$0xff] %v7483_v16 }
 0x7ac   :  { %2542 = vmatmul.f32.gmra.mxu1 %v7162_v51 }
 0x7ad   :  { %2393 = vmatmul.f32.gmra.mxu0 %v7170_v10 }
 0x7b1   :  { %v7487_v60 = vpop.f32.mrf.mxu1 }
 0x7b2   :  { %9761 = vst [vmem:[#allocation34_spill] sm:$0xff] %v7487_v60  ;;  %v7489_v35 = vpop.f32.mrf.mxu0 }
 0x7b3   :  { %9762 = vst [vmem:[#allocation35_spill] sm:$0xff] %v7489_v35 }
 0x7b4   :  { %2546 = vmatmul.f32.gmra.mxu1 %v7170_v10 }
 0x7b5   :  { %2397 = vmatmul.f32.gmra.mxu0 %v7178_v61 }
 0x7b9   :  { %v7493_v48 = vpop.f32.mrf.mxu1 }
 0x7ba   :  { %9763 = vst [vmem:[#allocation36_spill] sm:$0xff] %v7493_v48  ;;  %v7495_v11 = vpop.f32.mrf.mxu0 }
 0x7bb   :  { %9764 = vst [vmem:[#allocation37_spill] sm:$0xff] %v7495_v11 }
 0x7bc   :  { %2550 = vmatmul.f32.gmra.mxu1 %v7178_v61 }
 0x7bd   :  { %2401 = vmatmul.f32.gmra.mxu0 %v7186_v27 }
 0x7c1   :  { %v7499_v39 = vpop.f32.mrf.mxu1 }
 0x7c2   :  { %9765 = vst [vmem:[#allocation38_spill] sm:$0xff] %v7499_v39  ;;  %v7501_v51 = vpop.f32.mrf.mxu0 }
 0x7c3   :  { %9766 = vst [vmem:[#allocation39_spill] sm:$0xff] %v7501_v51 }
 0x7c4   :  { %2554 = vmatmul.f32.gmra.mxu1 %v7186_v27 }
 0x7c5   :  { %2405 = vmatmul.f32.gmra.mxu0 %v7196_v22 }
 0x7c9   :  { %v7505_v53 = vpop.f32.mrf.mxu1 }
 0x7ca   :  { %9767 = vst [vmem:[#allocation40_spill] sm:$0xff] %v7505_v53  ;;  %v7507_v10 = vpop.f32.mrf.mxu0 }
 0x7cb   :  { %9768 = vst [vmem:[#allocation41_spill] sm:$0xff] %v7507_v10 }
 0x7cc   :  { %2558 = vmatmul.f32.gmra.mxu1 %v7196_v22 }
 0x7cd   :  { %2409 = vmatmul.f32.gmra.mxu0 %v7206_v58 }
 0x7d1   :  { %v7511_v0 = vpop.f32.mrf.mxu1 }
 0x7d2   :  { %9769 = vst [vmem:[#allocation42_spill] sm:$0xff] %v7511_v0  ;;  %v7513_v61 = vpop.f32.mrf.mxu0 }
 0x7d3   :  { %9770 = vst [vmem:[#allocation43_spill] sm:$0xff] %v7513_v61 }
 0x7d4   :  { %2562 = vmatmul.f32.gmra.mxu1 %v7206_v58 }
 0x7d5   :  { %2413 = vmatmul.f32.gmra.mxu0 %v7218_v34 }
 0x7d9   :  { %v7517_v33 = vpop.f32.mrf.mxu1 }
 0x7da   :  { %9771 = vst [vmem:[#allocation44_spill] sm:$0xff] %v7517_v33  ;;  %v7519_v27 = vpop.f32.mrf.mxu0 }
 0x7db   :  { %9772 = vst [vmem:[#allocation45_spill] sm:$0xff] %v7519_v27 }
 0x7dc   :  { %2566 = vmatmul.f32.gmra.mxu1 %v7218_v34 }
 0x7dd   :  { %2417 = vmatmul.f32.gmra.mxu0 %v7230_v45 }
 0x7e1   :  { %v7523_v15 = vpop.f32.mrf.mxu1 }
 0x7e2   :  { %9773 = vst [vmem:[#allocation46_spill] sm:$0xff] %v7523_v15  ;;  %v7525_v22 = vpop.f32.mrf.mxu0 }
 0x7e3   :  { %9774 = vst [vmem:[#allocation47_spill] sm:$0xff] %v7525_v22 }
 0x7e4   :  { %2570 = vmatmul.f32.gmra.mxu1 %v7230_v45  ;;  %v7547_v45 = vpop.f32.mrf.mxu3 }
 0x7e5   :  { %2421 = vmatmul.f32.gmra.mxu0 %v7242_v5 }
 0x7e9   :  { %v7531_v58 = vpop.f32.mrf.mxu1 }
 0x7ea   :  { %9775 = vst [vmem:[#allocation48_spill] sm:$0xff] %v7531_v58  ;;  %v7533_v30 = vpop.f32.mrf.mxu0 }
 0x7eb   :  { %9776 = vst [vmem:[#allocation49_spill] sm:$0xff] %v7533_v30 }
 0x7ec   :  { %2574 = vmatmul.f32.gmra.mxu1 %v7242_v5  ;;  %v7554_v5 = vpop.f32.mrf.mxu2  ;;  %v7557_v12 = vpop.f32.mrf.mxu3 }
 0x7ed   :  { %2425 = vmatmul.f32.gmra.mxu0 %v7254_v32 }
 0x7f1   :  { %v7539_v34 = vpop.f32.mrf.mxu1 }
 0x7f2   :  { %9777 = vst [vmem:[#allocation50_spill] sm:$0xff] %v7539_v34  ;;  %v7541_v3 = vpop.f32.mrf.mxu0 }
 0x7f3   :  { %9778 = vst [vmem:[#allocation51_spill] sm:$0xff] %v7541_v3 }
 0x7f4   :  { %2578 = vmatmul.f32.gmra.mxu1 %v7254_v32  ;;  %v7565_v32 = vpop.f32.mrf.mxu2 }
 0x7f5   :  { %2429 = vmatmul.f32.gmra.mxu0 %v7266_v8 }
 0x7f9   :  { %v7549_v59 = vpop.f32.mrf.mxu1 }
 0x7fa   :  { %9779 = vst [vmem:[#allocation52_spill] sm:$0xff] %v7549_v59  ;;  %v7551_v25 = vpop.f32.mrf.mxu0 }
 0x7fb   :  { %9780 = vst [vmem:[#allocation53_spill] sm:$0xff] %v7551_v25  ;;  %v1571_v25 = vadd.f32 %v7407_v43, %v7214_v17 }
 0x7fc   :  { %2582 = vmatmul.f32.gmra.mxu1 %v7266_v8  ;;  %v7571_v8 = vpop.f32.mrf.mxu3  ;;  %v1997_v16 = vpop.f32.mrf.mxu2 }
 0x7fd   :  { %2433 = vmatmul.f32.gmra.mxu0 %v7278_v42 }
 0x801   :  { %v7559_v33 = vpop.f32.mrf.mxu1 }
 0x802   :  { %9781 = vst [vmem:[#allocation54_spill] sm:$0xff] %v7559_v33  ;;  %v7561_v60 = vpop.f32.mrf.mxu0 }
 0x803   :  { %9782 = vst [vmem:[#allocation55_spill] sm:$0xff] %v7561_v60 }
 0x804   :  { %2586 = vmatmul.f32.gmra.mxu1 %v7278_v42  ;;  %v7580_v42 = vpop.f32.mrf.mxu3  ;;  %v2002_v11 = vpop.f32.mrf.mxu2 }
 0x805   :  { %2437 = vmatmul.f32.gmra.mxu0 %v7288_v47 }
 0x809   :  { %v7567_v23 = vpop.f32.mrf.mxu1 }
 0x80a   :  { %9783 = vst [vmem:[#allocation56_spill] sm:$0xff] %v7567_v23  ;;  %v7569_v61 = vpop.f32.mrf.mxu0 }
 0x80c   :  { %2590 = vmatmul.f32.gmra.mxu1 %v7288_v47  ;;  %v2201_v47 = vpop.f32.mrf.mxu3 }
 0x80d   :  { %2441 = vmatmul.f32.gmra.mxu0 %v7299_v62 }
 0x811   :  { %v7575_v48 = vpop.f32.mrf.mxu1 }
 0x812   :  { %9784 = vst [vmem:[#allocation57_spill] sm:$0xff] %v7575_v48  ;;  %v7577_v39 = vpop.f32.mrf.mxu0 }
 0x814   :  { %2594 = vmatmul.f32.gmra.mxu1 %v7299_v62  ;;  %v2007_v62 = vpop.f32.mrf.mxu2  ;;  %v2207_v10 = vpop.f32.mrf.mxu3 }
 0x815   :  { %2445 = vmatmul.f32.gmra.mxu0 %v7310_v44 }
 0x819   :  { %v7583_v35 = vpop.f32.mrf.mxu1 }
 0x81a   :  { %v7585_v53 = vpop.f32.mrf.mxu0 }
 0x81c   :  { %2598 = vmatmul.f32.gmra.mxu1 %v7310_v44  ;;  %v2012_v44 = vpop.f32.mrf.mxu2  ;;  %v7603_v22 = vpop.f32.mrf.mxu3 }
 0x81d   :  { %2449 = vmatmul.f32.gmra.mxu0 %v7321_v26 }
 0x821   :  { %v7589_v0 = vpop.f32.mrf.mxu1 }
 0x822   :  { %v7591_v51 = vpop.f32.mrf.mxu0 }
 0x824   :  { %2602 = vmatmul.f32.gmra.mxu1 %v7321_v26  ;;  %v7607_v26 = vpop.f32.mrf.mxu2  ;;  %v7610_v33 = vpop.f32.mrf.mxu3 }
 0x825   :  { %2453 = vmatmul.f32.gmra.mxu0 %v7332_v14  ;;  %9785 = vst [vmem:[#allocation58_spill] sm:$0xff] %v7607_v26 }
 0x826   :  { %9786 = vst [vmem:[#allocation59_spill] sm:$0xff] %v7610_v33  ;;  %v1828_v33 = vadd.f32 %v7411_v24, %v1571_v25  ;;  %v9791_v25 = vld [vmem:[#allocation11_spill] sm:$0xff] }
 0x829   :  { %v7595_v15 = vpop.f32.mrf.mxu1 }
 0x82a   :  { %v7597_v58 = vpop.f32.mrf.mxu0 }
 0x82c   :  { %2606 = vmatmul.f32.gmra.mxu1 %v7332_v14  ;;  %v7613_v23 = vpop.f32.mrf.mxu2  ;;  %v7627_v48 = vpop.f32.mrf.mxu3 }
 0x82d   :  { %2457 = vmatmul.f32.gmra.mxu0 %v7343_v21  ;;  %9787 = vst [vmem:[#allocation60_spill] sm:$0xff] %v7613_v23  ;;  %v1555_v23 = vadd.f32 %v7383_v49, %v7240_v52  ;;  %v1587_v52 = vadd.f32 %v7418_v46, %v7192_v4  ;;  %v9789_v49 = vld [vmem:[#allocation12_spill] sm:$0xff] }
 0x82e   :  { %9788 = vst [vmem:[#allocation61_spill] sm:$0xff] %v7627_v48 }
 0x82f   :  { %v1820_v43 = vadd.f32 %v7391_v50, %v1555_v23 }
 0x831   :  { %v7601_v27 = vpop.f32.mrf.mxu1  ;;  %v1993_v50 = vadd.f32 %v7565_v32, %v1820_v43 }
 0x832   :  { %v2398_v34 = vpop.f32.mrf.mxu0 }
 0x833   :  { %v2190_v23 = vadd.f32 %v7571_v8, %v1993_v50 }
 0x834   :  { %2610 = vmatmul.f32.gmra.mxu1 %v7343_v21  ;;  %v1579_v21 = vadd.f32 %v7413_v7, %v7226_v63  ;;  %v1547_v63 = vadd.f32 %v7371_v18, %v7228_v9  ;;  %v2003_v7 = vadd.f32 %v2002_v11, %v1828_v33  ;;  %v1531_v9 = vadd.f32 %v7345_v1, %v7256_v20 }
 0x835   :  { %2461 = vmatmul.f32.gmra.mxu0 %v7357_v6 }
 0x836   :  { %v1832_v26 = vadd.f32 %v7416_v31, %v1579_v21  ;;  %v1816_v31 = vadd.f32 %v7379_v57, %v1547_v63  ;;  %v1836_v57 = vadd.f32 %v7421_v13, %v1587_v52  ;;  %v1808_v33 = vadd.f32 %v9791_v25, %v1531_v9  ;;  %v9801_v52 = vld [vmem:[#allocation7_spill] sm:$0xff]  ;;  %v9805_v25 = vld [vmem:[#allocation6_spill] sm:$0xff] }
 0x838   :  { %v2008_v60 = vadd.f32 %v2007_v62, %v1832_v26  ;;  %v1988_v4 = vadd.f32 %v7554_v5, %v1816_v31  ;;  %v2013_v32 = vadd.f32 %v2012_v44, %v1836_v57  ;;  %v1978_v62 = vadd.f32 %v7529_v40, %v1808_v33  ;;  %v9806_v33 = vld [vmem:[#allocation51_spill] sm:$0xff] }
 0x839   :  { %v2551_v59 = vpop.f32.mrf.mxu1  ;;  %v2399_v26 = vadd.f32 %v2398_v34, %v2190_v23 }
 0x83a   :  { %v2402_v30 = vpop.f32.mrf.mxu0  ;;  %v2184_v5 = vadd.f32 %v7557_v12, %v1988_v4  ;;  %v2172_v44 = vadd.f32 %v7536_v29, %v1978_v62  ;;  %v9796_v29 = vld [vmem:[#allocation10_spill] sm:$0xff]  ;;  %v2367_v4 = vadd.f32 %v9806_v33, %v9805_v25 }
 0x83b   :  { %v2552_v8 = vadd.f32 %v2551_v59, %v2399_v26 }
 0x83c   :  { %2614 = vmatmul.f32.gmra.mxu1 %v7357_v6  ;;  %v1563_v6 = vadd.f32 %v7395_v41, %v7204_v54  ;;  %v1539_v41 = vadd.f32 %v7359_v36, %v7216_v56  ;;  %v2202_v56 = vadd.f32 %v2201_v47, %v2003_v7  ;;  %v2208_v36 = vadd.f32 %v2207_v10, %v2008_v60  ;;  %v9798_v7 = vld [vmem:[#allocation8_spill] sm:$0xff] }
 0x83d   :  { %2465 = vmatmul.f32.gmra.mxu0 %v7369_v19 }
 0x83e   :  { %v1824_v17 = vadd.f32 %v7403_v37, %v1563_v6  ;;  %v1812_v18 = vadd.f32 %v9789_v49, %v1539_v41  ;;  %v7643_v37 = vpop.f32.mrf.mxu2  ;;  %v9803_v49 = vld [vmem:[#allocation56_spill] sm:$0xff] }
 0x83f   :  { %9790 = vst [vmem:[#allocation12_spill] sm:$0xff] %v7643_v37 }
 0x840   :  { %v1998_v24 = vadd.f32 %v1997_v16, %v1824_v17  ;;  %v1983_v1 = vadd.f32 %v7543_v38, %v1812_v18  ;;  %v7652_v16 = vpop.f32.mrf.mxu3  ;;  %v2395_v38 = vadd.f32 %v7597_v58, %v2184_v5  ;;  %v2387_v58 = vadd.f32 %v7585_v53, %v2172_v44  ;;  %v9797_v53 = vld [vmem:[#allocation9_spill] sm:$0xff]  ;;  %v9814_v44 = vld [vmem:[#allocation47_spill] sm:$0xff] }
 0x841   :  { %v2555_v14 = vpop.f32.mrf.mxu1  ;;  %9792 = vst [vmem:[#allocation11_spill] sm:$0xff] %v7652_v16  ;;  %v2383_v17 = vadd.f32 %v7577_v39, %v9796_v29  ;;  %v2379_v63 = vadd.f32 %v7569_v61, %v9797_v53  ;;  %v9800_v39 = vld [vmem:[#allocation57_spill] sm:$0xff]  ;;  %v9816_v29 = vld [vmem:[#allocation3_spill] sm:$0xff] }
 0x842   :  { %v2406_v3 = vpop.f32.mrf.mxu0  ;;  %v2196_v46 = vadd.f32 %v7580_v42, %v1998_v24  ;;  %v2548_v12 = vadd.f32 %v7601_v27, %v2395_v38  ;;  %v2540_v27 = vadd.f32 %v7589_v0, %v2387_v58 }
 0x843   :  { %v2532_v31 = vadd.f32 %v9800_v39, %v2379_v63 }
 0x844   :  { %2618 = vmatmul.f32.gmra.mxu1 %v7369_v19  ;;  %v2403_v47 = vadd.f32 %v2402_v30, %v2196_v46  ;;  %v2214_v30 = vadd.f32 %v7603_v22, %v2013_v32  ;;  %v9807_v46 = vld [vmem:[#allocation54_spill] sm:$0xff] }
 0x845   :  { %2469 = vmatmul.f32.gmra.mxu0 %v7381_v55 }
 0x846   :  { %v2556_v42 = vadd.f32 %v2555_v14, %v2403_v47  ;;  %v7662_v40 = vpop.f32.mrf.mxu2  ;;  %v9809_v47 = vld [vmem:[#allocation5_spill] sm:$0xff] }
 0x847   :  { %9793 = vst [vmem:[#allocation62_spill] sm:$0xff] %v7662_v40 }
 0x848   :  { %v7670_v6 = vpop.f32.mrf.mxu3 }
 0x849   :  { %v2559_v19 = vpop.f32.mrf.mxu1  ;;  %9795 = vst [vmem:[#allocation64_spill] sm:$0xff] %v7670_v6 }
 0x84a   :  { %v2410_v54 = vpop.f32.mrf.mxu0 }
 0x84b   :  { %v2411_v20 = vadd.f32 %v2410_v54, %v2208_v36  ;;  %v9799_v54 = vld [vmem:[#allocation55_spill] sm:$0xff] }
 0x84c   :  { %2622 = vmatmul.f32.gmra.mxu1 %v7381_v55  ;;  %v2407_v55 = vadd.f32 %v2406_v3, %v2202_v56  ;;  %v2178_v3 = vadd.f32 %v7547_v45, %v1983_v1  ;;  %v2375_v41 = vadd.f32 %v9799_v54, %v9798_v7 }
 0x84d   :  { %2473 = vmatmul.f32.gmra.mxu0 %v7393_v2 }
 0x84e   :  { %v2560_v60 = vadd.f32 %v2559_v19, %v2407_v55  ;;  %v2391_v34 = vadd.f32 %v7591_v51, %v2178_v3  ;;  %v2528_v61 = vadd.f32 %v9803_v49, %v2375_v41 }
 0x850   :  { %v2544_v45 = vadd.f32 %v7595_v15, %v2391_v34  ;;  %v2536_v15 = vadd.f32 %v7583_v35, %v2383_v17  ;;  %v7689_v35 = vpop.f32.mrf.mxu2  ;;  %v7713_v26 = vpop.f32.mrf.mxu3  ;;  %v9815_v34 = vld [vmem:[#allocation50_spill] sm:$0xff]  ;;  %v9817_v17 = vld [vmem:[#allocation45_spill] sm:$0xff] }
 0x851   :  { %v2563_v11 = vpop.f32.mrf.mxu1  ;;  %9812 = vst [vmem:[#allocation8_spill] sm:$0xff] %v7713_v26 }
 0x852   :  { %v2414_v10 = vpop.f32.mrf.mxu0  ;;  %v2564_v13 = vadd.f32 %v2563_v11, %v2411_v20 }
 0x854   :  { %5992 = vtanh.f32 %v2564_v13  ;;  %2626 = vmatmul.f32.gmra.mxu1 %v7393_v2  ;;  %v2415_v2 = vadd.f32 %v2414_v10, %v2214_v30  ;;  %v9811_v13 = vld [vmem:[#allocation52_spill] sm:$0xff] }
 0x855   :  { %2477 = vmatmul.f32.gmra.mxu0 %v7405_v28  ;;  %5994 = vtanh.f32 %v2560_v60  ;;  %v9810_v60 = vld [vmem:[#allocation49_spill] sm:$0xff]  ;;  %v2520_v62 = vadd.f32 %v9811_v13, %v2367_v4 }
 0x856   :  { %5996 = vtanh.f32 %v2556_v42  ;;  %v2363_v10 = vadd.f32 %v9810_v60, %v9809_v47 }
 0x857   :  { %5998 = vtanh.f32 %v2552_v8  ;;  %v9813_v8 = vld [vmem:[#allocation4_spill] sm:$0xff] }
 0x858   :  { %6000 = vtanh.f32 %v2548_v12  ;;  %v2359_v12 = vadd.f32 %v9814_v44, %v9813_v8  ;;  %v7759_v49 = vpop.f32.mrf.mxu2 }
 0x859   :  { %v2567_v14 = vpop.f32.mrf.mxu1 }
 0x85a   :  { %v5993_v21 = vpop.eup %5992  ;;  %v7668_v22 = vpop.f32.mrf.mxu0  ;;  %v2568_v59 = vadd.f32 %v2567_v14, %v2415_v2  ;;  %v2516_v2 = vadd.f32 %v9815_v34, %v2363_v10 }
 0x85b   :  { %9794 = vst [vmem:[#allocation63_spill] sm:$0xff] %v7668_v22  ;;  %v5995_v51 = vpop.eup %5994  ;;  %v7679_v43 = vand.u32 4294901760, %v5993_v21 }
 0x85c   :  { %6002 = vtanh.f32 %v2568_v59  ;;  %2630 = vmatmul.f32.gmra.mxu1 %v7405_v28  ;;  %v5997_v19 = vpop.eup %5996  ;;  %v7684_v0 = vand.u32 4294901760, %v5995_v51  ;;  %v9802_v28 = vld [vmem:[#allocation53_spill] sm:$0xff] }
 0x85d   :  { %6004 = vtanh.f32 %v2544_v45  ;;  %v5999_v24 = vpop.eup %5998  ;;  %v2371_v9 = vadd.f32 %v9802_v28, %v9801_v52  ;;  %v7693_v56 = vand.u32 4294901760, %v5997_v19  ;;  %v7696_v36 = vsub.f32 %v5993_v21, %v7679_v43 }
 0x85e   :  { %6006 = vtanh.f32 %v2540_v27  ;;  %v6001_v18 = vpop.eup %6000  ;;  %v7705_v23 = vand.u32 4294901760, %v5999_v24  ;;  %v7708_v11 = vsub.f32 %v5995_v51, %v7684_v0  ;;  %v2355_v27 = vadd.f32 %v9817_v17, %v9816_v29  ;;  %v9818_v51 = vld [vmem:[#allocation48_spill] sm:$0xff] }
 0x85f   :  { %6008 = vtanh.f32 %v2536_v15  ;;  %v2524_v55 = vadd.f32 %v9807_v46, %v2371_v9  ;;  %v7719_v38 = vand.u32 4294901760, %v6001_v18  ;;  %v9656_v3 = vand.u32 4294901760, %v7696_v36 }
 0x860   :  { %6010 = vtanh.f32 %v2532_v31  ;;  %v7723_v30 = vsub.f32 %v5997_v19, %v7693_v56  ;;  %v9655_v45 = vand.u32 4294901760, %v7708_v11  ;;  %v7734_v59 = vsub.f32 %v5999_v24, %v7705_v23  ;;  %v9820_v24 = vld [vmem:[#allocation46_spill] sm:$0xff] }
 0x861   :  { %v7691_v50 = vpop.f32.mrf.mxu1  ;;  %6012 = vtanh.f32 %v2528_v61  ;;  %v2512_v53 = vadd.f32 %v9818_v51, %v2359_v12  ;;  %v2868_v54 = vsub.f32 %v7696_v36, %v9656_v3  ;;  %v7752_v39 = vsub.f32 %v6001_v18, %v7719_v38 }
 0x862   :  { %9804 = vst [vmem:[#allocation10_spill] sm:$0xff] %v7691_v50  ;;  %v6003_v57 = vpop.eup %6002  ;;  %v7701_v20 = vpop.f32.mrf.mxu0  ;;  %6014 = vtanh.f32 %v2524_v55  ;;  %v9654_v41 = vand.u32 4294901760, %v7723_v30  ;;  %v2508_v52 = vadd.f32 %v9820_v24, %v2355_v27  ;;  %v9652_v18 = vand.u32 4294901760, %v7734_v59 }
 0x863   :  { %9808 = vst [vmem:[#allocation9_spill] sm:$0xff] %v7701_v20  ;;  %v7703_v1 = vand.u32 4294901760, %v6003_v57  ;;  %v6005_v32 = vpop.eup %6004  ;;  %6016 = vtanh.f32 %v2520_v62  ;;  %v2869_v46 = vand.u32 4294901760, %v2868_v54  ;;  %v9650_v47 = vand.u32 4294901760, %v7752_v39  ;;  %v7784_v62 = vpop.f32.mrf.mxu3 }
 0x864   :  { %v6007_v5 = vpop.eup %6006  ;;  %v7730_v21 = vand.u32 4294901760, %v6005_v32  ;;  %6018 = vtanh.f32 %v2516_v2  ;;  %v2880_v55 = vsub.f32 %v7723_v30, %v9654_v41  ;;  %9822 = vst [vmem:[#allocation7_spill] sm:$0xff] %v7784_v62  ;;  %v2886_v44 = vsub.f32 %v7734_v59, %v9652_v18 }
 0x865   :  { %2747 = vmatpush.msra.mxu2 %v7703_v1  ;;  %v7717_v42 = vsub.f32 %v6003_v57, %v7703_v1  ;;  %v6009_v58 = vpop.eup %6008  ;;  %v7739_v63 = vand.u32 4294901760, %v6007_v5  ;;  %v2874_v57 = vsub.f32 %v7708_v11, %v9655_v45  ;;  %6020 = vtanh.f32 %v2512_v53 }
 0x866   :  { %v6011_v15 = vpop.eup %6010  ;;  %v7757_v9 = vand.u32 4294901760, %v6009_v58  ;;  %v7767_v25 = vsub.f32 %v6005_v32, %v7730_v21  ;;  %v2666_v32 = vld [vmem:[%s9638_s11] sm:$0xff]  ;;  %6022 = vtanh.f32 %v2508_v52  ;;  %v2881_v27 = vand.u32 4294901760, %v2880_v55 }
 0x867   :  { %2749 = vmatpush.msra.mxu2 %v7679_v43  ;;  %v9657_v14 = vand.u32 4294901760, %v7717_v42  ;;  %v6013_v31 = vpop.eup %6012  ;;  %v7769_v4 = vand.u32 4294901760, %v6011_v15  ;;  %v7777_v60 = vsub.f32 %v6007_v5, %v7739_v63  ;;  %v2875_v8 = vand.u32 4294901760, %v2874_v57 }
 0x868   :  { %v6015_v33 = vpop.eup %6014  ;;  %v7782_v13 = vand.u32 4294901760, %v6013_v31  ;;  %v9651_v5 = vand.u32 4294901760, %v7767_v25  ;;  %v7792_v12 = vsub.f32 %v6009_v58, %v7757_v9  ;;  %v7796_v29 = vand.u32 4294901760, %v2666_v32 }
 0x869   :  { %v7741_v19 = vpop.f32.mrf.mxu1  ;;  %2751 = vmatpush.msra.mxu2 %v7684_v0  ;;  %v2862_v7 = vsub.f32 %v7717_v42, %v9657_v14  ;;  %v6017_v10 = vpop.eup %6016  ;;  %v7794_v2 = vand.u32 4294901760, %v6015_v33  ;;  %v2892_v51 = vsub.f32 %v7752_v39, %v9650_v47  ;;  %v9653_v53 = vand.u32 4294901760, %v7777_v60 }
 0x86a   :  { %9819 = vst [vmem:[#allocation55_spill] sm:$0xff] %v7741_v19  ;;  %v7755_v28 = vpop.f32.mrf.mxu0  ;;  %v6019_v34 = vpop.eup %6018  ;;  %v7806_v58 = vsub.f32 %v6011_v15, %v7769_v4  ;;  %v7810_v24 = vand.u32 4294901760, %v6017_v10  ;;  %v2887_v52 = vand.u32 4294901760, %v2886_v44  ;;  %v9658_v57 = vand.u32 4294901760, %v7792_v12 }
 0x86b   :  { %9821 = vst [vmem:[#allocation57_spill] sm:$0xff] %v7755_v28  ;;  %2753 = vmatpush.msra.mxu2 %v7693_v56  ;;  %v2863_v61 = vand.u32 4294901760, %v2862_v7  ;;  %v6021_v7 = vpop.eup %6020  ;;  %v7820_v55 = vand.u32 4294901760, %v6019_v34  ;;  %v7825_v47 = vpop.f32.mrf.mxu2  ;;  %v2893_v44 = vand.u32 4294901760, %v2892_v51  ;;  %v9857_v62 = vand.u32 4294901760, %v7696_v36 }
 0x86c   :  { %9823 = vst [vmem:[#allocation53_spill] sm:$0xff] %v7796_v29  ;;  %v6023_v15 = vpop.eup %6022  ;;  %v7838_v18 = vand.u32 4294901760, %v6021_v7  ;;  %v2910_v51 = vsub.f32 %v7792_v12, %v9658_v57  ;;  %v7846_v41 = vsub.f32 %v6017_v10, %v7810_v24  ;;  %v7853_v14 = vpop.f32.mrf.mxu3  ;;  %v9860_v40 = vand.u32 4294901760, %v7723_v30 }
 0x86d   :  { %2755 = vmatpush.msra.mxu2 %v7705_v23  ;;  %2864 = vmatpush.msra.mxu3 %v2863_v61  ;;  %v2898_v61 = vsub.f32 %v7767_v25, %v9651_v5  ;;  %9827 = vst [vmem:[#allocation54_spill] sm:$0xff] %v7853_v14  ;;  %v9884_v14 = vld [vmem:[#allocation33_spill] sm:$0xff] }
 0x86e   :  { %v2911_v50 = vand.u32 4294901760, %v2910_v51  ;;  %v7873_v22 = vsub.f32 %v6021_v7, %v7838_v18 }
 0x86f   :  { %2757 = vmatpush.msra.mxu2 %v7719_v38  ;;  %2870 = vmatpush.msra.mxu3 %v2869_v46  ;;  %v7818_v46 = vsub.f32 %v6013_v31, %v7782_v13  ;;  %v7833_v31 = vsub.f32 %v6015_v33, %v7794_v2  ;;  %v7848_v33 = vand.u32 4294901760, %v6023_v15 }
 0x871   :  { %v7798_v17 = vpop.f32.mrf.mxu1  ;;  %2759 = vmatpush.msra.mxu2 %v7730_v21  ;;  %2876 = vmatpush.msra.mxu3 %v2875_v8  ;;  %v7823_v8 = vsub.f32 %v2666_v32, %v7796_v29  ;;  %v2668_v32 = vld [vmem:[%s9638_s11 + $0x10] sm:$0xff]  ;;  %v9831_v19 = vand.u32 4294901760, %v7818_v46  ;;  %v7887_v7 = vsub.f32 %v6023_v15, %v7848_v33  ;;  %v9839_v15 = vand.u32 4294901760, %v7873_v22 }
 0x872   :  { %9824 = vst [vmem:[#allocation56_spill] sm:$0xff] %v7798_v17  ;;  %v7808_v54 = vpop.f32.mrf.mxu0  ;;  %v7851_v3 = vand.u32 4294901760, %v2668_v32 }
 0x873   :  { %9825 = vst [vmem:[#allocation6_spill] sm:$0xff] %v7808_v54  ;;  %2761 = vmatpush.msra.mxu2 %v7739_v63  ;;  %2882 = vmatpush.msra.mxu3 %v2881_v27  ;;  %v2904_v27 = vsub.f32 %v7777_v60, %v9653_v53  ;;  %v7863_v53 = vsub.f32 %v6019_v34, %v7820_v55  ;;  %v7892_v17 = vpop.f32.mrf.mxu2 }
 0x874   :  { %9826 = vst [vmem:[#allocation51_spill] sm:$0xff] %v7851_v3  ;;  %v7879_v10 = vsub.f32 %v2668_v32, %v7851_v3  ;;  %v2946_v16 = vsub.f32 %v7873_v22, %v9839_v15 }
 0x875   :  { %2763 = vmatpush.msra.mxu2 %v7757_v9  ;;  %2888 = vmatpush.msra.mxu3 %v2887_v52  ;;  %v2899_v52 = vand.u32 4294901760, %v2898_v61  ;;  %v2905_v61 = vand.u32 4294901760, %v2904_v27 }
 0x877   :  { %2765 = vmatpush.msra.mxu2 %v7769_v4  ;;  %2894 = vmatpush.msra.mxu3 %v2893_v44  ;;  %v9829_v44 = vand.u32 4294901760, %v7806_v58 }
 0x879   :  { %v7855_v5 = vpop.f32.mrf.mxu1  ;;  %2767 = vmatpush.msra.mxu2 %v7782_v13  ;;  %2900 = vmatpush.msra.mxu3 %v2899_v52  ;;  %v2916_v57 = vsub.f32 %v7806_v58, %v9829_v44  ;;  %v2922_v52 = vsub.f32 %v7818_v46, %v9831_v19  ;;  %v9832_v44 = vand.u32 4294901760, %v7823_v8 }
 0x87a   :  { %9828 = vst [vmem:[#allocation5_spill] sm:$0xff] %v7855_v5  ;;  %v7865_v45 = vpop.f32.mrf.mxu0 }
 0x87b   :  { %9830 = vst [vmem:[#allocation49_spill] sm:$0xff] %v7865_v45  ;;  %2769 = vmatpush.msra.mxu2 %v7794_v2  ;;  %2906 = vmatpush.msra.mxu3 %v2905_v61  ;;  %v2781_v34 = vsub.f32 %v7823_v8, %v9832_v44  ;;  %v2917_v51 = vand.u32 4294901760, %v2916_v57  ;;  %v9833_v61 = vand.u32 4294901760, %v7833_v31  ;;  %v2670_v44 = vld [vmem:[%s9638_s11 + $0x20] sm:$0xff]  ;;  %v9834_v57 = vand.u32 4294901760, %v7846_v41  ;;  %v7934_v6 = vpop.f32.mrf.mxu2 }
 0x87c   :  { %v7900_v5 = vand.u32 4294901760, %v2670_v44 }
 0x87d   :  { %2771 = vmatpush.msra.mxu2 %v7810_v24  ;;  %2912 = vmatpush.msra.mxu3 %v2911_v50  ;;  %v2928_v19 = vsub.f32 %v7833_v31, %v9833_v61  ;;  %v2923_v50 = vand.u32 4294901760, %v2922_v52  ;;  %v2934_v32 = vsub.f32 %v7846_v41, %v9834_v57  ;;  %v2782_v27 = vand.u32 4294901760, %v2781_v34  ;;  %v7911_v61 = vpop.f32.mrf.mxu3 }
 0x87e   :  { %9835 = vst [vmem:[#allocation52_spill] sm:$0xff] %v7900_v5 }
 0x87f   :  { %2773 = vmatpush.msra.mxu2 %v7820_v55  ;;  %2918 = vmatpush.msra.mxu3 %v2917_v51  ;;  %v2929_v54 = vand.u32 4294901760, %v2928_v19  ;;  %v9837_v51 = vand.u32 4294901760, %v7863_v53  ;;  %v2935_v34 = vand.u32 4294901760, %v2934_v32  ;;  %v9840_v19 = vand.u32 4294901760, %v7879_v10  ;;  %v2672_v32 = vld [vmem:[%s9638_s11 + $0x30] sm:$0xff] }
 0x881   :  { %v7902_v28 = vpop.f32.mrf.mxu1  ;;  %2775 = vmatpush.msra.mxu2 %v7838_v18  ;;  %2924 = vmatpush.msra.mxu3 %v2923_v50  ;;  %v2940_v52 = vsub.f32 %v7863_v53, %v9837_v51  ;;  %v2789_v50 = vsub.f32 %v7879_v10, %v9840_v19  ;;  %v7921_v51 = vsub.f32 %v2670_v44, %v7900_v5  ;;  %v7932_v19 = vand.u32 4294901760, %v2672_v32 }
 0x882   :  { %9836 = vst [vmem:[#allocation4_spill] sm:$0xff] %v7902_v28  ;;  %v7909_v57 = vpop.f32.mrf.mxu0  ;;  %v9842_v28 = vand.u32 4294901760, %v7887_v7 }
 0x883   :  { %9838 = vst [vmem:[#allocation47_spill] sm:$0xff] %v7909_v57  ;;  %2777 = vmatpush.msra.mxu2 %v7848_v33  ;;  %2930 = vmatpush.msra.mxu3 %v2929_v54  ;;  %v2941_v20 = vand.u32 4294901760, %v2940_v52  ;;  %v2790_v15 = vand.u32 4294901760, %v2789_v50  ;;  %v9659_v44 = vand.u32 4294901760, %v7921_v51 }
 0x884   :  { %2783 = vmatmul.f32.vlgmr.msra.gmra.mxu2 %v2782_v27  ;;  %9841 = vst [vmem:[#allocation50_spill] sm:$0xff] %v7921_v51  ;;  %v2952_v54 = vsub.f32 %v7887_v7, %v9842_v28  ;;  %v2947_v27 = vand.u32 4294901760, %v2946_v16 }
 0x885   :  { %2998 = vmatpush.msrb.mxu2 %v7717_v42  ;;  %2936 = vmatpush.msra.mxu3 %v2935_v34  ;;  %9843 = vst [vmem:[#allocation3_spill] sm:$0xff] %v7932_v19  ;;  %v2797_v16 = vsub.f32 %v7921_v51, %v9659_v44  ;;  %v7949_v50 = vpop.f32.mrf.mxu3  ;;  %v2676_v51 = vld [vmem:[%s9638_s11 + $0x50] sm:$0xff] }
 0x886   :  { %v2953_v28 = vand.u32 4294901760, %v2952_v54  ;;  %v2674_v54 = vld [vmem:[%s9638_s11 + $0x40] sm:$0xff] }
 0x887   :  { %3001 = vmatpush.msrb.mxu2 %v7696_v36  ;;  %2942 = vmatpush.msra.mxu3 %v2941_v20  ;;  %v7947_v20 = vsub.f32 %v2672_v32, %v7932_v19 }
 0x889   :  { %3004 = vmatpush.msrb.mxu2 %v7708_v11  ;;  %v7937_v52 = vpop.f32.mrf.mxu1  ;;  %2948 = vmatpush.msra.mxu3 %v2947_v27  ;;  %9846 = vst [vmem:[#allocation46_spill] sm:$0xff] %v7947_v20  ;;  %v2798_v27 = vand.u32 4294901760, %v2797_v16 }
 0x88a   :  { %9844 = vst [vmem:[#allocation45_spill] sm:$0xff] %v7937_v52  ;;  %v7939_v34 = vpop.f32.mrf.mxu0 }
 0x88b   :  { %9845 = vst [vmem:[#allocation48_spill] sm:$0xff] %v7939_v34  ;;  %3007 = vmatpush.msrb.mxu2 %v7723_v30  ;;  %2954 = vmatpush.msra.mxu3 %v2953_v28  ;;  %v7963_v28 = vand.u32 4294901760, %v2674_v54  ;;  %v2682_v30 = vld [vmem:[%s9638_s11 + $0x80] sm:$0xff] }
 0x88c   :  { %2791 = vmatmul.f32.gmra.mxu2 %v2790_v15  ;;  %2956 = vmatmul.f32.vlgmr.msra.gmra.mxu3 %v7796_v29  ;;  %v9664_v15 = vand.u32 4294901760, %v7947_v20  ;;  %v7967_v29 = vpop.f32.mrf.mxu2 }
 0x88d   :  { %3010 = vmatpush.msrb.mxu2 %v7734_v59  ;;  %3096 = vmatpush.msrb.mxu3 %v7703_v1  ;;  %9848 = vst [vmem:[#allocation66_spill] sm:$0xff] %v7963_v28  ;;  %v7978_v48 = vsub.f32 %v2674_v54, %v7963_v28  ;;  %v7983_v52 = vpop.f32.mrf.mxu3 }
 0x88e   :  { %v2805_v16 = vsub.f32 %v7947_v20, %v9664_v15 }
 0x88f   :  { %3013 = vmatpush.msrb.mxu2 %v7752_v39  ;;  %3098 = vmatpush.msrb.mxu3 %v7679_v43  ;;  %9850 = vst [vmem:[#allocation68_spill] sm:$0xff] %v7978_v48  ;;  %v9671_v54 = vand.u32 4294901760, %v7978_v48 }
 0x891   :  { %3016 = vmatpush.msrb.mxu2 %v7767_v25  ;;  %3100 = vmatpush.msrb.mxu3 %v7684_v0  ;;  %v7961_v32 = vpop.f32.mrf.mxu1  ;;  %v2813_v45 = vsub.f32 %v7978_v48, %v9671_v54 }
 0x892   :  { %9847 = vst [vmem:[#allocation65_spill] sm:$0xff] %v7961_v32  ;;  %v7965_v44 = vpop.f32.mrf.mxu0  ;;  %v8009_v32 = vpop.permute.xlu2 %1336 }
 0x893   :  { %9849 = vst [vmem:[#allocation67_spill] sm:$0xff] %v7965_v44  ;;  %3019 = vmatpush.msrb.mxu2 %v7777_v60  ;;  %3102 = vmatpush.msrb.mxu3 %v7693_v56 }
 0x894   :  { %2799 = vmatmul.f32.gmra.mxu2 %v2798_v27  ;;  %2960 = vmatmul.f32.gmra.mxu3 %v7851_v3  ;;  %v2806_v27 = vand.u32 4294901760, %v2805_v16  ;;  %v7992_v3 = vand.u32 4294901760, %v2676_v51  ;;  %v7999_v16 = vpop.f32.mrf.mxu2 }
 0x895   :  { %3022 = vmatpush.msrb.mxu2 %v7792_v12  ;;  %3104 = vmatpush.msrb.mxu3 %v7705_v23 }
 0x896   :  { %9852 = vst [vmem:[#allocation70_spill] sm:$0xff] %v7992_v3  ;;  %v8007_v37 = vsub.f32 %v2676_v51, %v7992_v3  ;;  %v2814_v51 = vand.u32 4294901760, %v2813_v45 }
 0x897   :  { %3025 = vmatpush.msrb.mxu2 %v7806_v58  ;;  %3106 = vmatpush.msrb.mxu3 %v7719_v38 }
 0x898   :  { %9853 = vst [vmem:[#allocation71_spill] sm:$0xff] %v8007_v37  ;;  %v9676_v48 = vand.u32 4294901760, %v8007_v37 }
 0x899   :  { %3028 = vmatpush.msrb.mxu2 %v7818_v46  ;;  %3108 = vmatpush.msrb.mxu3 %v7730_v21  ;;  %v7989_v15 = vpop.f32.mrf.mxu1 }
 0x89a   :  { %9851 = vst [vmem:[#allocation69_spill] sm:$0xff] %v7989_v15  ;;  %v7994_v20 = vpop.f32.mrf.mxu0  ;;  %v9855_v15 = vand.u32 4294901760, %v7717_v42  ;;  %v2821_v45 = vsub.f32 %v8007_v37, %v9676_v48  ;;  %v2680_v42 = vld [vmem:[%s9638_s11 + $0x70] sm:$0xff] }
 0x89b   :  { %3031 = vmatpush.msrb.mxu2 %v7833_v31  ;;  %3110 = vmatpush.msrb.mxu3 %v7739_v63 }
 0x89c   :  { %2807 = vmatmul.f32.gmra.mxu2 %v2806_v27  ;;  %2964 = vmatmul.f32.gmra.mxu3 %v7900_v5  ;;  %v2678_v27 = vld [vmem:[%s9638_s11 + $0x60] sm:$0xff]  ;;  %v8016_v5 = vpop.f32.mrf.mxu3  ;;  %v2822_v48 = vand.u32 4294901760, %v2821_v45 }
 0x89d   :  { %3034 = vmatpush.msrb.mxu2 %v7846_v41  ;;  %3112 = vmatpush.msrb.mxu3 %v7757_v9  ;;  %v8023_v57 = vand.u32 4294901760, %v2678_v27 }
 0x89f   :  { %3037 = vmatpush.msrb.mxu2 %v7863_v53  ;;  %3114 = vmatpush.msrb.mxu3 %v7769_v4  ;;  %9854 = vst [vmem:[#allocation72_spill] sm:$0xff] %v8023_v57  ;;  %v8037_v34 = vsub.f32 %v2678_v27, %v8023_v57 }
 0x8a1   :  { %3040 = vmatpush.msrb.mxu2 %v7873_v22  ;;  %3116 = vmatpush.msrb.mxu3 %v7782_v13  ;;  %v8020_v54 = vpop.f32.mrf.mxu1  ;;  %9856 = vst [vmem:[#allocation73_spill] sm:$0xff] %v8037_v34  ;;  %v9679_v36 = vand.u32 4294901760, %v8037_v34 }
 0x8a2   :  { %v8025_v26 = vpop.f32.mrf.mxu0 }
 0x8a3   :  { %3043 = vmatpush.msrb.mxu2 %v7887_v7  ;;  %3118 = vmatpush.msrb.mxu3 %v7794_v2 }
 0x8a4   :  { %2968 = vmatmul.f32.gmra.mxu3 %v7932_v19  ;;  %2815 = vmatmul.f32.gmra.mxu2 %v2814_v51  ;;  %v8047_v51 = vpop.permute.xlu2 %1321  ;;  %v9858_v19 = vand.u32 4294901760, %v7708_v11  ;;  %v8061_v44 = vpop.f32.mrf.mxu3  ;;  %v9861_v11 = vand.u32 4294901760, %v7734_v59 }
 0x8a5   :  { %3191 = vmatpush.msra.mxu2 %v9855_v15  ;;  %3120 = vmatpush.msrb.mxu3 %v7810_v24  ;;  %v8044_v15 = vpop.f32.mrf.mxu2 }
 0x8a7   :  { %3195 = vmatpush.msra.mxu2 %v9857_v62  ;;  %3122 = vmatpush.msrb.mxu3 %v7820_v55  ;;  %v8055_v62 = vand.u32 4294901760, %v2680_v42 }
 0x8a9   :  { %3199 = vmatpush.msra.mxu2 %v9858_v19  ;;  %3124 = vmatpush.msrb.mxu3 %v7838_v18  ;;  %v8052_v27 = vpop.f32.mrf.mxu1  ;;  %9859 = vst [vmem:[#allocation74_spill] sm:$0xff] %v8055_v62  ;;  %v2829_v19 = vsub.f32 %v8037_v34, %v9679_v36  ;;  %v8072_v45 = vsub.f32 %v2680_v42, %v8055_v62 }
 0x8aa   :  { %v8057_v37 = vpop.f32.mrf.mxu0 }
 0x8ab   :  { %3203 = vmatpush.msra.mxu2 %v9860_v40  ;;  %3126 = vmatpush.msrb.mxu3 %v7848_v33  ;;  %9862 = vst [vmem:[#allocation75_spill] sm:$0xff] %v8072_v45  ;;  %v9863_v40 = vand.u32 4294901760, %v7752_v39  ;;  %v2830_v42 = vand.u32 4294901760, %v2829_v19  ;;  %v9682_v39 = vand.u32 4294901760, %v8072_v45 }
 0x8ac   :  { %2823 = vmatmul.f32.gmra.mxu2 %v2822_v48  ;;  %2972 = vmatmul.f32.gmra.mxu3 %v7963_v28  ;;  %v9864_v48 = vand.u32 4294901760, %v7767_v25  ;;  %v9865_v28 = vand.u32 4294901760, %v7777_v60  ;;  %v1332_v25 = vpop.permute.xlu0 %1331  ;;  %v8100_v19 = vpop.f32.mrf.mxu3 }
 0x8ad   :  { %3207 = vmatpush.msra.mxu2 %v9861_v11  ;;  %3294 = vmatpush.msra.mxu3 %v7703_v1  ;;  %v1327_v1 = vpop.permute.xlu1 %1326  ;;  %v8083_v59 = vpop.f32.mrf.mxu2 }
 0x8af   :  { %3211 = vmatpush.msra.mxu2 %v9863_v40  ;;  %3296 = vmatpush.msra.mxu3 %v7679_v43  ;;  %v8088_v40 = vand.u32 4294901760, %v2682_v30  ;;  %v8090_v43 = vpop.permute.xlu2 %1306 }
 0x8b1   :  { %3215 = vmatpush.msra.mxu2 %v9864_v48  ;;  %3298 = vmatpush.msra.mxu3 %v7684_v0  ;;  %v8085_v11 = vpop.f32.mrf.mxu1  ;;  %v9866_v0 = vand.u32 4294901760, %v7792_v12  ;;  %v2837_v48 = vsub.f32 %v8072_v45, %v9682_v39  ;;  %v8107_v60 = vsub.f32 %v2682_v30, %v8088_v40  ;;  %v9869_v12 = vand.u32 4294901760, %v7818_v46 }
 0x8b2   :  { %v8092_v36 = vpop.f32.mrf.mxu0 }
 0x8b3   :  { %3219 = vmatpush.msra.mxu2 %v9865_v28  ;;  %3300 = vmatpush.msra.mxu3 %v7693_v56  ;;  %9867 = vst [vmem:[#allocation76_spill] sm:$0xff] %v8107_v60  ;;  %v9868_v56 = vand.u32 4294901760, %v7806_v58  ;;  %v9683_v30 = vand.u32 4294901760, %v8107_v60 }
 0x8b4   :  { %2831 = vmatmul.f32.gmra.mxu2 %v2830_v42  ;;  %2976 = vmatmul.f32.gmra.mxu3 %v7992_v3 }
 0x8b5   :  { %3223 = vmatpush.msra.mxu2 %v9866_v0  ;;  %3302 = vmatpush.msra.mxu3 %v7705_v23  ;;  %v2684_v23 = vld [vmem:[%s9638_s11 + $0x90] sm:$0xff]  ;;  %v1312_v28 = vpop.permute.xlu1 %1311  ;;  %v2838_v0 = vand.u32 4294901760, %v2837_v48  ;;  %v1317_v48 = vpop.permute.xlu0 %1316 }
 0x8b6   :  { %v8121_v39 = vand.u32 4294901760, %v2684_v23 }
 0x8b7   :  { %3227 = vmatpush.msra.mxu2 %v9868_v56  ;;  %3304 = vmatpush.msra.mxu3 %v7719_v38  ;;  %v9870_v38 = vand.u32 4294901760, %v7833_v31  ;;  %v2082_v56 = vpop.f32.mrf.mxu2  ;;  %v8128_v46 = vpop.permute.xlu2 %1291 }
 0x8b8   :  { %v8138_v31 = vsub.f32 %v2684_v23, %v8121_v39  ;;  %v9875_v23 = vand.u32 4294901760, %v7887_v7  ;;  %v9878_v7 = vld [vmem:[#allocation42_spill] sm:$0xff] }
 0x8b9   :  { %3231 = vmatpush.msra.mxu2 %v9869_v12  ;;  %3306 = vmatpush.msra.mxu3 %v7730_v21  ;;  %v8118_v42 = vpop.f32.mrf.mxu1  ;;  %v9871_v21 = vand.u32 4294901760, %v7846_v41  ;;  %v2845_v12 = vsub.f32 %v8107_v60, %v9683_v30  ;;  %v2297_v41 = vpop.f32.mrf.mxu3 }
 0x8ba   :  { %v8123_v58 = vpop.f32.mrf.mxu0  ;;  %9872 = vst [vmem:[#allocation77_spill] sm:$0xff] %v8138_v31 }
 0x8bb   :  { %3235 = vmatpush.msra.mxu2 %v9870_v38  ;;  %3308 = vmatpush.msra.mxu3 %v7739_v63  ;;  %v9873_v63 = vand.u32 4294901760, %v7863_v53  ;;  %v9874_v38 = vand.u32 4294901760, %v7873_v22  ;;  %v9877_v22 = vld [vmem:[#allocation39_spill] sm:$0xff] }
 0x8bc   :  { %2839 = vmatmul.f32.gmra.mxu2 %v2838_v0  ;;  %2980 = vmatmul.f32.gmra.mxu3 %v8023_v57  ;;  %v2846_v0 = vand.u32 4294901760, %v2845_v12 }
 0x8bd   :  { %3239 = vmatpush.msra.mxu2 %v9871_v21  ;;  %3310 = vmatpush.msra.mxu3 %v7757_v9  ;;  %v9692_v21 = vand.u32 4294901760, %v8138_v31  ;;  %v1297_v53 = vpop.permute.xlu1 %1296 }
 0x8bf   :  { %3243 = vmatpush.msra.mxu2 %v9873_v63  ;;  %3312 = vmatpush.msra.mxu3 %v7769_v4  ;;  %v9876_v63 = vld [vmem:[#allocation41_spill] sm:$0xff]  ;;  %v2087_v57 = vpop.f32.mrf.mxu2  ;;  %v8159_v12 = vpop.permute.xlu2 %1276 }
 0x8c0   :  { %v1707_v4 = vadd.f32 %v9876_v63, %v1332_v25  ;;  %v9879_v25 = vld [vmem:[#allocation37_spill] sm:$0xff]  ;;  %v9880_v63 = vld [vmem:[#allocation40_spill] sm:$0xff] }
 0x8c1   :  { %3247 = vmatpush.msra.mxu2 %v9874_v38  ;;  %3314 = vmatpush.msra.mxu3 %v7782_v13  ;;  %v8146_v9 = vpop.f32.mrf.mxu1  ;;  %v1699_v38 = vadd.f32 %v9877_v22, %v1327_v1  ;;  %v2853_v13 = vsub.f32 %v8138_v31, %v9692_v21  ;;  %v2303_v60 = vpop.f32.mrf.mxu3 }
 0x8c2   :  { %v2470_v30 = vpop.f32.mrf.mxu0 }
 0x8c3   :  { %3251 = vmatpush.msra.mxu2 %v9875_v23  ;;  %3316 = vmatpush.msra.mxu3 %v7794_v2  ;;  %v1896_v23 = vadd.f32 %v9878_v7, %v1707_v4  ;;  %v1302_v2 = vpop.permute.xlu0 %1301  ;;  %v1892_v1 = vadd.f32 %v9880_v63, %v1699_v38  ;;  %v2854_v31 = vand.u32 4294901760, %v2853_v13  ;;  %v9883_v4 = vld [vmem:[#allocation36_spill] sm:$0xff]  ;;  %v9885_v38 = vld [vmem:[#allocation43_spill] sm:$0xff]  ;;  %v9887_v13 = vld [vmem:[#allocation34_spill] sm:$0xff] }
 0x8c4   :  { %2847 = vmatmul.f32.gmra.mxu2 %v2846_v0  ;;  %2984 = vmatmul.f32.gmra.mxu3 %v8055_v62  ;;  %v9881_v0 = vld [vmem:[#allocation35_spill] sm:$0xff]  ;;  %v9882_v62 = vld [vmem:[#allocation38_spill] sm:$0xff] }
 0x8c5   :  { %3318 = vmatpush.msra.mxu3 %v7810_v24  ;;  %v1691_v24 = vadd.f32 %v9879_v25, %v8047_v51  ;;  %v1683_v22 = vadd.f32 %v9881_v0, %v1317_v48  ;;  %v2088_v45 = vadd.f32 %v2087_v57, %v1896_v23  ;;  %v2083_v7 = vadd.f32 %v2082_v56, %v1892_v1 }
 0x8c6   :  { %v1675_v51 = vadd.f32 %v9884_v14, %v1312_v28  ;;  %v1715_v25 = vadd.f32 %v9885_v38, %v8009_v32  ;;  %v9889_v32 = vld [vmem:[#allocation29_spill] sm:$0xff] }
 0x8c7   :  { %3320 = vmatpush.msra.mxu3 %v7820_v55  ;;  %v1888_v3 = vadd.f32 %v9882_v62, %v1691_v24  ;;  %v1884_v55 = vadd.f32 %v9883_v4, %v1683_v22  ;;  %v9886_v62 = vld [vmem:[#allocation31_spill] sm:$0xff]  ;;  %v2304_v23 = vadd.f32 %v2303_v60, %v2088_v45  ;;  %v9888_v24 = vld [vmem:[#allocation44_spill] sm:$0xff]  ;;  %v2298_v14 = vadd.f32 %v2297_v41, %v2083_v7  ;;  %v2092_v28 = vpop.f32.mrf.mxu2  ;;  %v1262_v1 = vpop.permute.xlu2 %1261  ;;  %v9891_v4 = vld [vmem:[#allocation13_spill] sm:$0xff] }
 0x8c8   :  { %v1667_v57 = vadd.f32 %v9886_v62, %v8090_v43  ;;  %v1900_v56 = vadd.f32 %v9888_v24, %v1715_v25  ;;  %v1659_v0 = vadd.f32 %v9889_v32, %v1302_v2  ;;  %v9890_v22 = vld [vmem:[#allocation32_spill] sm:$0xff]  ;;  %v1595_v38 = vadd.f32 %v9891_v4, %v1262_v1  ;;  %v9892_v45 = vld [vmem:[#allocation30_spill] sm:$0xff] }
 0x8c9   :  { %3322 = vmatpush.msra.mxu3 %v7838_v18  ;;  %v2623_v21 = vpop.f32.mrf.mxu1  ;;  %v1282_v18 = vpop.permute.xlu1 %1281  ;;  %v2078_v48 = vadd.f32 %v8083_v59, %v1888_v3  ;;  %v2073_v63 = vadd.f32 %v8044_v15, %v1884_v55  ;;  %v2471_v62 = vadd.f32 %v2470_v30, %v2298_v14  ;;  %v9893_v55 = vld [vmem:[#allocation27_spill] sm:$0xff]  ;;  %v9896_v14 = vld [vmem:[#allocation28_spill] sm:$0xff]  ;;  %v9899_v32 = vld [vmem:[#allocation26_spill] sm:$0xff] }
 0x8ca   :  { %v2474_v34 = vpop.f32.mrf.mxu0  ;;  %v1876_v3 = vadd.f32 %v9890_v22, %v1667_v57  ;;  %v1872_v60 = vadd.f32 %v9892_v45, %v1659_v0  ;;  %v2093_v15 = vadd.f32 %v2092_v28, %v1900_v56  ;;  %v1651_v7 = vadd.f32 %v9893_v55, %v1297_v53  ;;  %v9900_v0 = vld [vmem:[#allocation15_spill] sm:$0xff]  ;;  %v9901_v4 = vld [vmem:[#allocation22_spill] sm:$0xff] }
 0x8cb   :  { %3324 = vmatpush.msra.mxu3 %v7848_v33  ;;  %v1880_v33 = vadd.f32 %v9887_v13, %v1675_v51  ;;  %v2475_v59 = vadd.f32 %v2474_v34, %v2304_v23  ;;  %v2292_v43 = vadd.f32 %v8100_v19, %v2078_v48  ;;  %v2286_v2 = vadd.f32 %v8061_v44, %v2073_v63  ;;  %v2309_v13 = vpop.f32.mrf.mxu3  ;;  %v9894_v23 = vld [vmem:[#allocation14_spill] sm:$0xff]  ;;  %v9895_v19 = vld [vmem:[#allocation25_spill] sm:$0xff]  ;;  %v9898_v63 = vld [vmem:[#allocation23_spill] sm:$0xff] }
 0x8cc   :  { %2855 = vmatmul.f32.gmra.mxu2 %v2854_v31  ;;  %2988 = vmatmul.f32.gmra.mxu3 %v8088_v40  ;;  %v1287_v31 = vpop.permute.xlu0 %1286  ;;  %v2624_v57 = vadd.f32 %v2623_v21, %v2471_v62  ;;  %v1840_v24 = vadd.f32 %v9894_v23, %v1595_v38  ;;  %v1643_v30 = vadd.f32 %v9895_v19, %v8128_v46  ;;  %v9897_v44 = vld [vmem:[#allocation21_spill] sm:$0xff]  ;;  %v9902_v38 = vld [vmem:[#allocation24_spill] sm:$0xff]  ;;  %v9908_v19 = vld [vmem:[#allocation58_spill] sm:$0xff] }
 0x8cd   :  { %v2068_v25 = vadd.f32 %v7999_v16, %v1880_v33  ;;  %v2467_v34 = vadd.f32 %v8123_v58, %v2292_v43  ;;  %v2063_v48 = vadd.f32 %v7967_v29, %v1876_v3  ;;  %v1868_v1 = vadd.f32 %v9896_v14, %v1651_v7 }
 0x8ce   :  { %v2463_v16 = vadd.f32 %v8092_v36, %v2286_v2  ;;  %v1627_v58 = vadd.f32 %v9897_v44, %v1282_v18  ;;  %v2058_v21 = vadd.f32 %v7934_v6, %v1872_v60  ;;  %v2310_v56 = vadd.f32 %v2309_v13, %v2093_v15  ;;  %v9904_v15 = vld [vmem:[#allocation19_spill] sm:$0xff]  ;;  %v9913_v44 = vld [vmem:[#allocation62_spill] sm:$0xff] }
 0x8cf   :  { %v2620_v33 = vadd.f32 %v8146_v9, %v2467_v34  ;;  %v2280_v46 = vadd.f32 %v8016_v5, %v2068_v25  ;;  %v1635_v28 = vadd.f32 %v9898_v63, %v1287_v31  ;;  %v1864_v36 = vadd.f32 %v9899_v32, %v1643_v30  ;;  %v9903_v25 = vld [vmem:[#allocation16_spill] sm:$0xff] }
 0x8d0   :  { %v2616_v9 = vadd.f32 %v8118_v42, %v2463_v16  ;;  %v2274_v3 = vadd.f32 %v7983_v52, %v2063_v48  ;;  %v1856_v6 = vadd.f32 %v9901_v4, %v1627_v58  ;;  %v2053_v43 = vadd.f32 %v7892_v17, %v1868_v1  ;;  %v9905_v17 = vld [vmem:[#allocation17_spill] sm:$0xff]  ;;  %v9909_v48 = vld [vmem:[#allocation54_spill] sm:$0xff]  ;;  %v9914_v58 = vld [vmem:[#allocation7_spill] sm:$0xff] }
 0x8d1   :  { %v2627_v51 = vpop.f32.mrf.mxu1  ;;  %v1267_v29 = vpop.permute.xlu1 %1266  ;;  %v1860_v5 = vadd.f32 %v9902_v38, %v1635_v28  ;;  %v2268_v62 = vadd.f32 %v7949_v50, %v2058_v21  ;;  %v2048_v55 = vadd.f32 %v7825_v47, %v1864_v36  ;;  %v2018_v30 = vadd.f32 %v9908_v19, %v1840_v24  ;;  %v9917_v28 = vld [vmem:[#allocation8_spill] sm:$0xff]  ;;  %v9931_v19 = vld [vmem:[#allocation6_spill] sm:$0xff] }
 0x8d2   :  { %v2628_v41 = vadd.f32 %v2627_v51, %v2475_v59  ;;  %v2478_v53 = vpop.f32.mrf.mxu0  ;;  %v1603_v22 = vadd.f32 %v9900_v0, %v1267_v29  ;;  %v2459_v59 = vadd.f32 %v8057_v37, %v2280_v46  ;;  %v2455_v42 = vadd.f32 %v8025_v26, %v2274_v3  ;;  %v9915_v46 = vld [vmem:[#allocation48_spill] sm:$0xff]  ;;  %v9916_v29 = vld [vmem:[#allocation69_spill] sm:$0xff]  ;;  %v9918_v0 = vld [vmem:[#allocation47_spill] sm:$0xff] }
 0x8d3   :  { %v2479_v18 = vadd.f32 %v2478_v53, %v2310_v56  ;;  %v2451_v2 = vadd.f32 %v7994_v20, %v2268_v62  ;;  %v2043_v34 = vadd.f32 %v7759_v49, %v1860_v5  ;;  %v2038_v47 = vadd.f32 %v7689_v35, %v1856_v6  ;;  %v9910_v49 = vld [vmem:[#allocation67_spill] sm:$0xff]  ;;  %v9919_v3 = vld [vmem:[#allocation65_spill] sm:$0xff]  ;;  %v9921_v5 = vld [vmem:[#allocation12_spill] sm:$0xff] }
 0x8d4   :  { %6024 = vtanh.f32 %v2628_v41  ;;  %2992 = vmatmul.f32.gmra.mxu3 %v8121_v39  ;;  %3046 = vmatmul.f32.vlgmr.msrb.gmra.mxu2 %v7823_v8  ;;  %v2612_v51 = vadd.f32 %v8085_v11, %v2459_v59  ;;  %v1272_v52 = vpop.permute.xlu0 %1271  ;;  %v1844_v37 = vadd.f32 %v9903_v25, %v1603_v22  ;;  %v1619_v41 = vadd.f32 %v9904_v15, %v8159_v12  ;;  %v9906_v11 = vld [vmem:[#allocation20_spill] sm:$0xff]  ;;  %v9920_v6 = vld [vmem:[#allocation59_spill] sm:$0xff] }
 0x8d5   :  { %6026 = vtanh.f32 %v2624_v57  ;;  %v1611_v7 = vadd.f32 %v9905_v17, %v1272_v52  ;;  %v2608_v50 = vadd.f32 %v8052_v27, %v2455_v42  ;;  %v2262_v57 = vadd.f32 %v7911_v61, %v2053_v43  ;;  %v9911_v61 = vld [vmem:[#allocation60_spill] sm:$0xff] }
 0x8d6   :  { %6028 = vtanh.f32 %v2620_v33  ;;  %v1852_v13 = vadd.f32 %v9906_v11, %v1619_v41  ;;  %v9907_v12 = vand.u32 4294901760, %v7823_v8  ;;  %v2604_v23 = vadd.f32 %v8020_v54, %v2451_v2  ;;  %v9912_v33 = vld [vmem:[#allocation18_spill] sm:$0xff]  ;;  %v9926_v41 = vld [vmem:[#allocation61_spill] sm:$0xff]  ;;  %v9927_v17 = vld [vmem:[#allocation64_spill] sm:$0xff] }
 0x8d7   :  { %6030 = vtanh.f32 %v2616_v9  ;;  %v2256_v14 = vadd.f32 %v9909_v48, %v2048_v55  ;;  %v2447_v1 = vadd.f32 %v9910_v49, %v2262_v57  ;;  %v2023_v16 = vadd.f32 %v9911_v61, %v1844_v37  ;;  %v9929_v57 = vld [vmem:[#allocation11_spill] sm:$0xff] }
 0x8d8   :  { %v1848_v53 = vadd.f32 %v9912_v33, %v1611_v7  ;;  %v2033_v54 = vadd.f32 %v9913_v44, %v1852_v13  ;;  %v2250_v21 = vadd.f32 %v9914_v58, %v2043_v34  ;;  %v2244_v32 = vadd.f32 %v9917_v28, %v2038_v47  ;;  %v9930_v47 = vld [vmem:[#allocation9_spill] sm:$0xff] }
 0x8d9   :  { %v2631_v31 = vpop.f32.mrf.mxu1  ;;  %v2443_v56 = vadd.f32 %v9915_v46, %v2256_v14  ;;  %v2600_v24 = vadd.f32 %v9916_v29, %v2447_v1  ;;  %v2220_v38 = vadd.f32 %v9920_v6, %v2018_v30  ;;  %v9925_v52 = vand.u32 4294901760, %v7879_v10  ;;  %v9932_v1 = vld [vmem:[#allocation57_spill] sm:$0xff]  ;;  %v9934_v46 = vld [vmem:[#allocation56_spill] sm:$0xff] }
 0x8da   :  { %v2632_v45 = vadd.f32 %v2631_v31, %v2479_v18  ;;  %v6025_v60 = vpop.eup %6024  ;;  %v2439_v22 = vadd.f32 %v9918_v0, %v2250_v21  ;;  %v2028_v43 = vadd.f32 %v9921_v5, %v1848_v53  ;;  %v9922_v31 = vld [vmem:[#allocation49_spill] sm:$0xff]  ;;  %v2226_v55 = vadd.f32 %v9926_v41, %v2023_v16 }
 0x8db   :  { %v6027_v26 = vpop.eup %6026  ;;  %v8229_v20 = vand.u32 4294901760, %v6025_v60  ;;  %v2596_v59 = vadd.f32 %v9919_v3, %v2443_v56  ;;  %v2435_v62 = vadd.f32 %v9922_v31, %v2244_v32  ;;  %v2238_v7 = vadd.f32 %v9927_v17, %v2033_v54  ;;  %v9933_v16 = vld [vmem:[#allocation5_spill] sm:$0xff]  ;;  %v9936_v32 = vld [vmem:[#allocation55_spill] sm:$0xff] }
 0x8dc   :  { %6032 = vtanh.f32 %v2632_v45  ;;  %3051 = vmatmul.f32.gmra.mxu2 %v7879_v10  ;;  %3130 = vmatmul.f32.vlgmr.msrb.gmra.mxu3 %v9907_v12  ;;  %v6029_v27 = vpop.eup %6028  ;;  %v8236_v8 = vand.u32 4294901760, %v6027_v26  ;;  %v2232_v12 = vadd.f32 %v9929_v57, %v2028_v43  ;;  %v8330_v31 = vpop.permute.xlu0 %2743 }
 0x8dd   :  { %6034 = vtanh.f32 %v2612_v51  ;;  %v6031_v35 = vpop.eup %6030  ;;  %v8244_v36 = vsub.f32 %v6025_v60, %v8229_v20  ;;  %v8246_v9 = vand.u32 4294901760, %v6029_v27  ;;  %v9923_v51 = vld [vmem:[#allocation45_spill] sm:$0xff]  ;;  %v9924_v60 = vld [vmem:[#allocation50_spill] sm:$0xff]  ;;  %v2431_v30 = vadd.f32 %v9931_v19, %v2238_v7 }
 0x8de   :  { %6036 = vtanh.f32 %v2608_v50  ;;  %v8256_v42 = vsub.f32 %v6027_v26, %v8236_v8  ;;  %v2592_v45 = vadd.f32 %v9923_v51, %v2439_v22  ;;  %v8265_v37 = vand.u32 4294901760, %v6031_v35  ;;  %v9928_v50 = vld [vmem:[#allocation4_spill] sm:$0xff]  ;;  %v9937_v22 = vld [vmem:[#allocation46_spill] sm:$0xff] }
 0x8df   :  { %6038 = vtanh.f32 %v2604_v23  ;;  %v8272_v2 = vsub.f32 %v6029_v27, %v8246_v9  ;;  %v3487_v10 = vand.u32 4294901760, %v8244_v36  ;;  %v2588_v26 = vadd.f32 %v9928_v50, %v2435_v62 }
 0x8e0   :  { %6040 = vtanh.f32 %v2600_v24  ;;  %v2423_v23 = vadd.f32 %v9930_v47, %v2226_v55  ;;  %v3493_v27 = vand.u32 4294901760, %v8256_v42  ;;  %v8291_v14 = vsub.f32 %v6031_v35, %v8265_v37 }
 0x8e1   :  { %6042 = vtanh.f32 %v2596_v59  ;;  %v2427_v61 = vadd.f32 %v9932_v1, %v2232_v12  ;;  %v2584_v33 = vadd.f32 %v9933_v16, %v2431_v30  ;;  %v3488_v53 = vsub.f32 %v8244_v36, %v3487_v10  ;;  %v9940_v1 = vld [vmem:[#allocation68_spill] sm:$0xff] }
 0x8e2   :  { %v6033_v63 = vpop.eup %6032  ;;  %6044 = vtanh.f32 %v2592_v45  ;;  %v3499_v44 = vand.u32 4294901760, %v8272_v2  ;;  %v3494_v29 = vsub.f32 %v8256_v42, %v3493_v27  ;;  %v2576_v0 = vadd.f32 %v9936_v32, %v2423_v23  ;;  %v9939_v45 = vld [vmem:[#allocation10_spill] sm:$0xff] }
 0x8e3   :  { %v8250_v18 = vand.u32 4294901760, %v6033_v63  ;;  %v6035_v4 = vpop.eup %6034  ;;  %6046 = vtanh.f32 %v2588_v26  ;;  %v2580_v56 = vadd.f32 %v9934_v46, %v2427_v61  ;;  %v9938_v3 = vand.u32 4294901760, %v9924_v60 }
 0x8e4   :  { %3056 = vmatmul.f32.gmra.mxu2 %v9924_v60  ;;  %3136 = vmatmul.f32.gmra.mxu3 %v9925_v52  ;;  %v6037_v15 = vpop.eup %6036  ;;  %v8278_v13 = vand.u32 4294901760, %v6035_v4  ;;  %6048 = vtanh.f32 %v2584_v33  ;;  %v3489_v6 = vand.u32 4294901760, %v3488_v53  ;;  %v3495_v52 = vand.u32 4294901760, %v3494_v29 }
 0x8e5   :  { %v8263_v25 = vsub.f32 %v6033_v63, %v8250_v18  ;;  %3367 = vmatpush.msrb.mxu2 %v8250_v18  ;;  %3716 = vmatpush.msra.mxu1 %v8250_v18  ;;  %v6039_v34 = vpop.eup %6038  ;;  %v8293_v49 = vand.u32 4294901760, %v6037_v15  ;;  %v9935_v63 = vld [vmem:[#allocation63_spill] sm:$0xff]  ;;  %6050 = vtanh.f32 %v2580_v56  ;;  %v9941_v61 = vand.u32 4294901760, %v9937_v22 }
 0x8e6   :  { %v6041_v54 = vpop.eup %6040  ;;  %v8305_v58 = vsub.f32 %v6035_v4, %v8278_v13  ;;  %v8307_v21 = vand.u32 4294901760, %v6039_v34  ;;  %v2419_v28 = vadd.f32 %v9935_v63, %v2220_v38  ;;  %v3505_v4 = vand.u32 4294901760, %v8291_v14 }
 0x8e7   :  { %3618 = vmatpush.msra.mxu0 %v8263_v25  ;;  %v3481_v11 = vand.u32 4294901760, %v8263_v25  ;;  %3369 = vmatpush.msrb.mxu2 %v8229_v20  ;;  %v6043_v24 = vpop.eup %6042  ;;  %v8321_v59 = vsub.f32 %v6037_v15, %v8293_v49  ;;  %v3500_v38 = vsub.f32 %v8272_v2, %v3499_v44  ;;  %v8328_v5 = vand.u32 4294901760, %v6041_v54 }
 0x8e8   :  { %3718 = vmatpush.msra.mxu1 %v8229_v20  ;;  %v6045_v43 = vpop.eup %6044  ;;  %v8335_v62 = vsub.f32 %v6039_v34, %v8307_v21  ;;  %v9709_v51 = vand.u32 4294901760, %v8305_v58  ;;  %v2572_v60 = vadd.f32 %v9939_v45, %v2419_v28  ;;  %v8340_v15 = vand.u32 4294901760, %v6043_v24 }
 0x8e9   :  { %3621 = vmatpush.msra.mxu0 %v8244_v36  ;;  %v3482_v48 = vsub.f32 %v8263_v25, %v3481_v11  ;;  %3371 = vmatpush.msrb.mxu2 %v8236_v8  ;;  %v6047_v41 = vpop.eup %6046  ;;  %v3506_v55 = vsub.f32 %v8291_v14, %v3505_v4  ;;  %v9708_v17 = vand.u32 4294901760, %v8321_v59  ;;  %6052 = vtanh.f32 %v2576_v0 }
 0x8ea   :  { %3720 = vmatpush.msra.mxu1 %v8236_v8  ;;  %v3501_v7 = vand.u32 4294901760, %v3500_v38  ;;  %v8350_v50 = vsub.f32 %v6041_v54, %v8328_v5  ;;  %v8352_v26 = vand.u32 4294901760, %v6045_v43  ;;  %v3512_v34 = vsub.f32 %v8305_v58, %v9709_v51  ;;  %v6049_v12 = vpop.eup %6048 }
 0x8eb   :  { %3624 = vmatpush.msra.mxu0 %v8256_v42  ;;  %v3483_v35 = vand.u32 4294901760, %v3482_v48  ;;  %3373 = vmatpush.msrb.mxu2 %v8246_v9  ;;  %v9706_v57 = vand.u32 4294901760, %v8335_v62  ;;  %6054 = vtanh.f32 %v2572_v60  ;;  %v8362_v47 = vsub.f32 %v6043_v24, %v8340_v15  ;;  %v6051_v48 = vpop.eup %6050  ;;  %v8390_v24 = vpop.permute.xlu0 %2728 }
 0x8ec   :  { %3722 = vmatpush.msra.mxu1 %v8246_v9  ;;  %3061 = vmatmul.f32.gmra.mxu2 %v9937_v22  ;;  %v8364_v23 = vand.u32 4294901760, %v6047_v41  ;;  %v3507_v19 = vand.u32 4294901760, %v3506_v55  ;;  %v3518_v30 = vsub.f32 %v8321_v59, %v9708_v17  ;;  %v8375_v16 = vsub.f32 %v6045_v43, %v8352_v26 }
 0x8ed   :  { %3142 = vmatmul.f32.gmra.mxu3 %v9938_v3  ;;  %3375 = vmatpush.msrb.mxu2 %v8265_v37  ;;  %v9705_v33 = vand.u32 4294901760, %v8350_v50  ;;  %v3513_v53 = vand.u32 4294901760, %v3512_v34  ;;  %v3524_v54 = vsub.f32 %v8335_v62, %v9706_v57  ;;  %v9704_v29 = vand.u32 4294901760, %v8362_v47 }
 0x8ee   :  { %3484 = vmatpush.msrb.mxu3 %v3483_v35  ;;  %3627 = vmatpush.msra.mxu0 %v8272_v2  ;;  %v8382_v35 = vand.u32 4294901760, %v6049_v12  ;;  %v8387_v56 = vsub.f32 %v6047_v41, %v8364_v23  ;;  %v3519_v63 = vand.u32 4294901760, %v3518_v30  ;;  %v8393_v28 = vand.u32 4294901760, %v6051_v48 }
 0x8ef   :  { %3724 = vmatpush.msra.mxu1 %v8265_v37  ;;  %3377 = vmatpush.msrb.mxu2 %v8278_v13  ;;  %v6053_v46 = vpop.eup %6052  ;;  %v3530_v0 = vsub.f32 %v8350_v50, %v9705_v33  ;;  %v9703_v22 = vand.u32 4294901760, %v8375_v16  ;;  %v3525_v3 = vand.u32 4294901760, %v3524_v54  ;;  %v3536_v43 = vsub.f32 %v8362_v47, %v9704_v29  ;;  %v9946_v29 = vld [vmem:[#allocation75_spill] sm:$0xff] }
 0x8f0   :  { %3490 = vmatpush.msrb.mxu3 %v3489_v6  ;;  %3630 = vmatpush.msra.mxu0 %v8291_v14  ;;  %v8403_v6 = vsub.f32 %v6049_v12, %v8382_v35  ;;  %v8405_v38 = vand.u32 4294901760, %v6053_v46  ;;  %v9701_v45 = vand.u32 4294901760, %v8387_v56  ;;  %v8415_v60 = vsub.f32 %v6051_v48, %v8393_v28 }
 0x8f1   :  { %3726 = vmatpush.msra.mxu1 %v8278_v13  ;;  %3379 = vmatpush.msrb.mxu2 %v8293_v49  ;;  %v6055_v32 = vpop.eup %6054  ;;  %v3531_v41 = vand.u32 4294901760, %v3530_v0  ;;  %v3542_v55 = vsub.f32 %v8375_v16, %v9703_v22  ;;  %v9943_v34 = vand.u32 4294901760, %v9940_v1  ;;  %v3537_v30 = vand.u32 4294901760, %v3536_v43 }
 0x8f2   :  { %3496 = vmatpush.msrb.mxu3 %v3495_v52  ;;  %3633 = vmatpush.msra.mxu0 %v8305_v58  ;;  %v8417_v52 = vand.u32 4294901760, %v6055_v32  ;;  %v8428_v12 = vsub.f32 %v6053_v46, %v8405_v38  ;;  %v3548_v48 = vsub.f32 %v8387_v56, %v9701_v45  ;;  %v9955_v42 = vand.u32 4294901760, %v8305_v58 }
 0x8f3   :  { %3728 = vmatpush.msra.mxu1 %v8293_v49  ;;  %3381 = vmatpush.msrb.mxu2 %v8307_v21  ;;  %v3543_v54 = vand.u32 4294901760, %v3542_v55  ;;  %v2714_v46 = vpop.permute.xlu0 %2713  ;;  %v9956_v25 = vand.u32 4294901760, %v8321_v59  ;;  %v9959_v14 = vand.u32 4294901760, %v8350_v50  ;;  %v9962_v58 = vand.u32 4294901760, %v8387_v56 }
 0x8f4   :  { %3502 = vmatpush.msrb.mxu3 %v3501_v7  ;;  %3636 = vmatpush.msra.mxu0 %v8321_v59  ;;  %v9942_v7 = vld [vmem:[#allocation71_spill] sm:$0xff]  ;;  %v9702_v0 = vand.u32 4294901760, %v8428_v12 }
 0x8f5   :  { %3730 = vmatpush.msra.mxu1 %v8307_v21  ;;  %3066 = vmatmul.f32.gmra.mxu2 %v9940_v1  ;;  %v8440_v1 = vsub.f32 %v6055_v32, %v8417_v52  ;;  %v3549_v32 = vand.u32 4294901760, %v3548_v48  ;;  %v9945_v48 = vand.u32 4294901760, %v9942_v7 }
 0x8f6   :  { %3148 = vmatmul.f32.gmra.mxu3 %v9941_v61  ;;  %3383 = vmatpush.msrb.mxu2 %v8328_v5  ;;  %v8435_v61 = vpop.permute.xlu2 %2733 }
 0x8f7   :  { %3508 = vmatpush.msrb.mxu3 %v3507_v19  ;;  %3639 = vmatpush.msra.mxu0 %v8335_v62  ;;  %v9700_v19 = vand.u32 4294901760, %v8403_v6  ;;  %v9707_v43 = vand.u32 4294901760, %v8440_v1 }
 0x8f8   :  { %3732 = vmatpush.msra.mxu1 %v8328_v5  ;;  %3385 = vmatpush.msrb.mxu2 %v8340_v15 }
 0x8f9   :  { %3514 = vmatpush.msrb.mxu3 %v3513_v53  ;;  %3642 = vmatpush.msra.mxu0 %v8350_v50  ;;  %v9699_v53 = vand.u32 4294901760, %v8415_v60 }
 0x8fa   :  { %3734 = vmatpush.msra.mxu1 %v8340_v15  ;;  %3387 = vmatpush.msrb.mxu2 %v8352_v26 }
 0x8fb   :  { %3520 = vmatpush.msrb.mxu3 %v3519_v63  ;;  %3645 = vmatpush.msra.mxu0 %v8362_v47  ;;  %v3554_v63 = vsub.f32 %v8403_v6, %v9700_v19  ;;  %v2699_v45 = vpop.permute.xlu0 %2698 }
 0x8fc   :  { %3736 = vmatpush.msra.mxu1 %v8352_v26  ;;  %3389 = vmatpush.msrb.mxu2 %v8364_v23 }
 0x8fd   :  { %3526 = vmatpush.msrb.mxu3 %v3525_v3  ;;  %3648 = vmatpush.msra.mxu0 %v8375_v16  ;;  %v3560_v3 = vsub.f32 %v8415_v60, %v9699_v53 }
 0x8fe   :  { %3738 = vmatpush.msra.mxu1 %v8364_v23  ;;  %3071 = vmatmul.f32.gmra.mxu2 %v9942_v7  ;;  %v2719_v53 = vpop.permute.xlu2 %2718 }
 0x8ff   :  { %3154 = vmatmul.f32.gmra.mxu3 %v9943_v34  ;;  %3391 = vmatpush.msrb.mxu2 %v8382_v35  ;;  %v3566_v34 = vsub.f32 %v8428_v12, %v9702_v0 }
 0x900   :  { %3532 = vmatpush.msrb.mxu3 %v3531_v41  ;;  %3651 = vmatpush.msra.mxu0 %v8387_v56  ;;  %v3555_v41 = vand.u32 4294901760, %v3554_v63  ;;  %v3572_v63 = vsub.f32 %v8440_v1, %v9707_v43 }
 0x901   :  { %3740 = vmatpush.msra.mxu1 %v8382_v35  ;;  %3393 = vmatpush.msrb.mxu2 %v8393_v28  ;;  %v3567_v19 = vand.u32 4294901760, %v3566_v34  ;;  %v9948_v34 = vld [vmem:[#allocation76_spill] sm:$0xff] }
 0x902   :  { %3538 = vmatpush.msrb.mxu3 %v3537_v30  ;;  %3654 = vmatpush.msra.mxu0 %v8403_v6  ;;  %v9944_v30 = vld [vmem:[#allocation73_spill] sm:$0xff]  ;;  %v3573_v0 = vand.u32 4294901760, %v3572_v63 }
 0x903   :  { %3742 = vmatpush.msra.mxu1 %v8393_v28  ;;  %3395 = vmatpush.msrb.mxu2 %v8405_v38 }
 0x904   :  { %3544 = vmatpush.msrb.mxu3 %v3543_v54  ;;  %3657 = vmatpush.msra.mxu0 %v8415_v60  ;;  %v8466_v54 = vpop.permute.xlu1 %2738 }
 0x905   :  { %3744 = vmatpush.msra.mxu1 %v8405_v38  ;;  %3397 = vmatpush.msrb.mxu2 %v8417_v52 }
 0x906   :  { %3550 = vmatpush.msrb.mxu3 %v3549_v32  ;;  %3660 = vmatpush.msra.mxu0 %v8428_v12  ;;  %v3561_v32 = vand.u32 4294901760, %v3560_v3  ;;  %v2704_v57 = vpop.permute.xlu2 %2703 }
 0x907   :  { %3746 = vmatpush.msra.mxu1 %v8417_v52  ;;  %v2784_v55 = vpop.f32.mrf.mxu2  ;;  %3076 = vmatmul.f32.gmra.mxu2 %v9944_v30 }
 0x908   :  { %3160 = vmatmul.f32.gmra.mxu3 %v9945_v48  ;;  %3663 = vmatpush.msra.mxu0 %v8440_v1  ;;  %v2785_v22 = vadd.f32 %v2784_v55, %v2699_v45 }
 0x909   :  { %3556 = vmatpush.msrb.mxu3 %v3555_v41  ;;  %v9947_v41 = vand.u32 4294901760, %v9944_v30  ;;  %v9950_v30 = vld [vmem:[#allocation77_spill] sm:$0xff] }
 0x90b   :  { %3562 = vmatpush.msrb.mxu3 %v3561_v32 }
 0x90c   :  { %v2724_v33 = vpop.permute.xlu1 %2723 }
 0x90d   :  { %3568 = vmatpush.msrb.mxu3 %v3567_v19  ;;  %v9949_v19 = vand.u32 4294901760, %v9946_v29 }
 0x90f   :  { %3574 = vmatpush.msrb.mxu3 %v3573_v0  ;;  %v2792_v7 = vpop.f32.mrf.mxu2  ;;  %v2957_v48 = vpop.f32.mrf.mxu3  ;;  %3081 = vmatmul.f32.gmra.mxu2 %v9946_v29  ;;  %v9953_v29 = vld [vmem:[#allocation53_spill] sm:$0xff] }
 0x910   :  { %3166 = vmatmul.f32.gmra.mxu3 %v9947_v41  ;;  %v8475_v3 = vadd.f32 %v2957_v48, %v2785_v22  ;;  %v2793_v43 = vadd.f32 %v2792_v7, %v2704_v57  ;;  %v9951_v22 = vand.u32 4294901760, %v9948_v34  ;;  %v9952_v41 = vand.u32 4294901760, %v9950_v30 }
 0x914   :  { %v2709_v0 = vpop.permute.xlu1 %2708 }
 0x917   :  { %v2800_v17 = vpop.f32.mrf.mxu2  ;;  %v2961_v32 = vpop.f32.mrf.mxu3  ;;  %3086 = vmatmul.f32.gmra.mxu2 %v9948_v34 }
 0x918   :  { %3172 = vmatmul.f32.gmra.mxu3 %v9949_v19  ;;  %v8480_v45 = vadd.f32 %v2961_v32, %v2793_v43  ;;  %v2801_v55 = vadd.f32 %v2800_v17, %v2709_v0  ;;  %v9954_v17 = vld [vmem:[#allocation51_spill] sm:$0xff] }
 0x91f   :  { %v2808_v63 = vpop.f32.mrf.mxu2  ;;  %v2965_v51 = vpop.f32.mrf.mxu3  ;;  %3091 = vmatmul.f32.gmra.mxu2 %v9950_v30 }
 0x920   :  { %3178 = vmatmul.f32.gmra.mxu3 %v9951_v22  ;;  %v8485_v48 = vadd.f32 %v2965_v51, %v2801_v55  ;;  %v2809_v57 = vadd.f32 %v2808_v63, %v2714_v46  ;;  %v9971_v22 = vld [vmem:[#allocation74_spill] sm:$0xff] }
 0x927   :  { %v2969_v7 = vpop.f32.mrf.mxu3  ;;  %3253 = vmatmul.f32.vlgmr.msra.gmra.mxu2 %v9953_v29  ;;  %v2816_v43 = vpop.f32.mrf.mxu2 }
 0x928   :  { %3184 = vmatmul.f32.gmra.mxu3 %v9952_v41  ;;  %v8490_v32 = vadd.f32 %v2969_v7, %v2809_v57  ;;  %3811 = vmatpush.msra.mxu2 %v3481_v11  ;;  %v2817_v51 = vadd.f32 %v2816_v43, %v2719_v53  ;;  %v9958_v11 = vld [vmem:[#allocation52_spill] sm:$0xff] }
 0x92a   :  { %3815 = vmatpush.msra.mxu2 %v3487_v10  ;;  %v9957_v10 = vand.u32 4294901760, %v8335_v62 }
 0x92c   :  { %3819 = vmatpush.msra.mxu2 %v3493_v27 }
 0x92e   :  { %3823 = vmatpush.msra.mxu2 %v3499_v44 }
 0x92f   :  { %3257 = vmatmul.f32.gmra.mxu2 %v9954_v17  ;;  %v2824_v46 = vpop.f32.mrf.mxu2  ;;  %v2973_v34 = vpop.f32.mrf.mxu3 }
 0x930   :  { %3326 = vmatmul.f32.vlgmr.msra.gmra.mxu3 %v9953_v29  ;;  %3827 = vmatpush.msra.mxu2 %v3505_v4  ;;  %v8505_v36 = vadd.f32 %v2973_v34, %v2817_v51  ;;  %v2825_v2 = vadd.f32 %v2824_v46, %v2724_v33  ;;  %v2673_v51 = vld [vmem:[%s9638_s11 + $0x38] sm:$0xff] }
 0x931   :  { %3914 = vmatpush.msra.mxu3 %v8250_v18 }
 0x932   :  { %3831 = vmatpush.msra.mxu2 %v9955_v42 }
 0x933   :  { %3916 = vmatpush.msra.mxu3 %v8229_v20 }
 0x934   :  { %3835 = vmatpush.msra.mxu2 %v9956_v25 }
 0x935   :  { %3918 = vmatpush.msra.mxu3 %v8236_v8  ;;  %v9960_v8 = vand.u32 4294901760, %v8362_v47  ;;  %v9967_v47 = vand.u32 4294901760, %v8440_v1  ;;  %v9970_v1 = vld [vmem:[#allocation72_spill] sm:$0xff] }
 0x936   :  { %3839 = vmatpush.msra.mxu2 %v9957_v10  ;;  %v2675_v10 = vld [vmem:[%s9638_s11 + $0x48] sm:$0xff] }
 0x937   :  { %3920 = vmatpush.msra.mxu3 %v8246_v9  ;;  %3261 = vmatmul.f32.gmra.mxu2 %v9958_v11  ;;  %v2832_v18 = vpop.f32.mrf.mxu2  ;;  %v2977_v27 = vpop.f32.mrf.mxu3  ;;  %v9961_v9 = vand.u32 4294901760, %v8375_v16 }
 0x938   :  { %3330 = vmatmul.f32.gmra.mxu3 %v9954_v17  ;;  %3843 = vmatpush.msra.mxu2 %v9959_v14  ;;  %v8521_v20 = vadd.f32 %v2977_v27, %v2825_v2  ;;  %v2833_v44 = vadd.f32 %v2832_v18, %v8390_v24  ;;  %v9969_v24 = vld [vmem:[#allocation70_spill] sm:$0xff]  ;;  %v8595_v17 = vand.u32 4294901760, %v2673_v51 }
 0x939   :  { %3922 = vmatpush.msra.mxu3 %v8265_v37  ;;  %v9963_v37 = vld [vmem:[#allocation3_spill] sm:$0xff] }
 0x93a   :  { %3847 = vmatpush.msra.mxu2 %v9960_v8  ;;  %v3423_v25 = vsub.f32 %v2673_v51, %v8595_v17 }
 0x93b   :  { %3924 = vmatpush.msra.mxu3 %v8278_v13  ;;  %v9964_v13 = vand.u32 4294901760, %v8403_v6 }
 0x93c   :  { %3851 = vmatpush.msra.mxu2 %v9961_v9  ;;  %v3424_v2 = vand.u32 4294901760, %v3423_v25 }
 0x93d   :  { %3926 = vmatpush.msra.mxu3 %v8293_v49  ;;  %v9965_v49 = vand.u32 4294901760, %v8415_v60 }
 0x93e   :  { %3855 = vmatpush.msra.mxu2 %v9962_v58 }
 0x93f   :  { %3928 = vmatpush.msra.mxu3 %v8307_v21  ;;  %3265 = vmatmul.f32.gmra.mxu2 %v9963_v37  ;;  %v2840_v59 = vpop.f32.mrf.mxu2  ;;  %v2981_v4 = vpop.f32.mrf.mxu3  ;;  %v9966_v21 = vand.u32 4294901760, %v8428_v12  ;;  %v2669_v12 = vld [vmem:[%s9638_s11 + $0x18] sm:$0xff] }
 0x940   :  { %3334 = vmatmul.f32.gmra.mxu3 %v9958_v11  ;;  %3859 = vmatpush.msra.mxu2 %v9964_v13  ;;  %v8538_v62 = vadd.f32 %v2981_v4, %v2833_v44  ;;  %v2841_v50 = vadd.f32 %v2840_v59, %v8435_v61  ;;  %v8573_v61 = vand.u32 4294901760, %v2669_v12  ;;  %v8606_v11 = vand.u32 4294901760, %v2675_v10 }
 0x941   :  { %3930 = vmatpush.msra.mxu3 %v8328_v5  ;;  %v9968_v5 = vld [vmem:[#allocation66_spill] sm:$0xff] }
 0x942   :  { %3863 = vmatpush.msra.mxu2 %v9965_v49  ;;  %v3407_v55 = vsub.f32 %v2669_v12, %v8573_v61  ;;  %v3431_v9 = vsub.f32 %v2675_v10, %v8606_v11  ;;  %v3425_v12 = vsub.f32 %v3423_v25, %v3424_v2 }
 0x943   :  { %3932 = vmatpush.msra.mxu3 %v8340_v15 }
 0x944   :  { %3867 = vmatpush.msra.mxu2 %v9966_v21  ;;  %v3408_v63 = vand.u32 4294901760, %v3407_v55  ;;  %v3432_v44 = vand.u32 4294901760, %v3431_v9 }
 0x945   :  { %3934 = vmatpush.msra.mxu3 %v8352_v26  ;;  %v2667_v26 = vld [vmem:[%s9638_s11 + $0x8] sm:$0xff] }
 0x946   :  { %3871 = vmatpush.msra.mxu2 %v9967_v47  ;;  %v8562_v56 = vand.u32 4294901760, %v2667_v26 }
 0x947   :  { %3936 = vmatpush.msra.mxu3 %v8364_v23  ;;  %3269 = vmatmul.f32.gmra.mxu2 %v9968_v5  ;;  %v2848_v16 = vpop.f32.mrf.mxu2  ;;  %v2985_v33 = vpop.f32.mrf.mxu3 }
 0x948   :  { %3338 = vmatmul.f32.gmra.mxu3 %v9963_v37  ;;  %v8553_v15 = vadd.f32 %v2985_v33, %v2841_v50  ;;  %v2849_v23 = vadd.f32 %v2848_v16, %v8466_v54  ;;  %v2677_v37 = vld [vmem:[%s9638_s11 + $0x58] sm:$0xff] }
 0x949   :  { %3938 = vmatpush.msra.mxu3 %v8382_v35  ;;  %v8617_v59 = vand.u32 4294901760, %v2677_v37 }
 0x94b   :  { %3940 = vmatpush.msra.mxu3 %v8393_v28  ;;  %v3399_v28 = vsub.f32 %v2667_v26, %v8562_v56  ;;  %v3439_v13 = vsub.f32 %v2677_v37, %v8617_v59 }
 0x94d   :  { %3942 = vmatpush.msra.mxu3 %v8405_v38  ;;  %v3400_v38 = vand.u32 4294901760, %v3399_v28  ;;  %3666 = vmatmul.f32.vlgmr.msra.gmra.mxu0 %v3399_v28  ;;  %v3440_v50 = vand.u32 4294901760, %v3439_v13 }
 0x94f   :  { %3944 = vmatpush.msra.mxu3 %v8417_v52  ;;  %3273 = vmatmul.f32.gmra.mxu2 %v9969_v24  ;;  %v2856_v35 = vpop.f32.mrf.mxu2  ;;  %v2989_v6 = vpop.f32.mrf.mxu3 }
 0x950   :  { %3342 = vmatmul.f32.gmra.mxu3 %v9968_v5  ;;  %v8566_v60 = vadd.f32 %v2989_v6, %v2849_v23  ;;  %3750 = vmatmul.f32.vlgmr.msra.gmra.mxu1 %v3400_v38  ;;  %v2857_v52 = vadd.f32 %v2856_v35, %v8330_v31  ;;  %v2671_v31 = vld [vmem:[%s9638_s11 + $0x28] sm:$0xff] }
 0x951   :  { %v8584_v30 = vand.u32 4294901760, %v2671_v31  ;;  %v2679_v5 = vld [vmem:[%s9638_s11 + $0x68] sm:$0xff] }
 0x952   :  { %v8627_v16 = vand.u32 4294901760, %v2679_v5 }
 0x953   :  { %v3415_v29 = vsub.f32 %v2671_v31, %v8584_v30 }
 0x954   :  { %v3447_v33 = vsub.f32 %v2679_v5, %v8627_v16 }
 0x955   :  { %3671 = vmatmul.f32.gmra.mxu0 %v3407_v55  ;;  %v3416_v43 = vand.u32 4294901760, %v3415_v29 }
 0x956   :  { %v3448_v35 = vand.u32 4294901760, %v3447_v33 }
 0x957   :  { %3277 = vmatmul.f32.gmra.mxu2 %v9970_v1  ;;  %v2993_v53 = vpop.f32.mrf.mxu3  ;;  %v3047_v54 = vpop.f32.mrf.mxu2 }
 0x958   :  { %3346 = vmatmul.f32.gmra.mxu3 %v9969_v24  ;;  %v8577_v19 = vadd.f32 %v2993_v53, %v2857_v52  ;;  %v3048_v0 = vadd.f32 %v3047_v54, %v8475_v3  ;;  %3756 = vmatmul.f32.gmra.mxu1 %v3408_v63 }
 0x95d   :  { %3676 = vmatmul.f32.gmra.mxu0 %v3415_v29 }
 0x95f   :  { %3281 = vmatmul.f32.gmra.mxu2 %v9971_v22  ;;  %v3052_v57 = vpop.f32.mrf.mxu2  ;;  %v3131_v7 = vpop.f32.mrf.mxu3 }
 0x960   :  { %3350 = vmatmul.f32.gmra.mxu3 %v9970_v1  ;;  %v3053_v41 = vadd.f32 %v3052_v57, %v8480_v45  ;;  %v8589_v3 = vadd.f32 %v3131_v7, %v3048_v0  ;;  %3762 = vmatmul.f32.gmra.mxu1 %v3416_v43 }
 0x965   :  { %3681 = vmatmul.f32.gmra.mxu0 %v3423_v25 }
 0x967   :  { %3285 = vmatmul.f32.gmra.mxu2 %v8088_v40  ;;  %v3057_v46 = vpop.f32.mrf.mxu2  ;;  %v3137_v34 = vpop.f32.mrf.mxu3 }
 0x968   :  { %3354 = vmatmul.f32.gmra.mxu3 %v9971_v22  ;;  %v3058_v45 = vadd.f32 %v3057_v46, %v8485_v48  ;;  %v8600_v42 = vadd.f32 %v3137_v34, %v3053_v41  ;;  %3768 = vmatmul.f32.gmra.mxu1 %v3424_v2  ;;  %v3401_v48 = vsub.f32 %v3399_v28, %v3400_v38  ;;  %v2681_v28 = vld [vmem:[%s9638_s11 + $0x78] sm:$0xff] }
 0x969   :  { %v8637_v38 = vand.u32 4294901760, %v2681_v28  ;;  %v3433_v22 = vsub.f32 %v3431_v9, %v3432_v44  ;;  %v2685_v46 = vld [vmem:[%s9638_s11 + $0x98] sm:$0xff] }
 0x96a   :  { %v3402_v58 = vand.u32 4294901760, %v3401_v48  ;;  %v8657_v34 = vand.u32 4294901760, %v2685_v46 }
 0x96b   :  { %v3455_v52 = vsub.f32 %v2681_v28, %v8637_v38  ;;  %v3434_v51 = vand.u32 4294901760, %v3433_v22 }
 0x96c   :  { %v3471_v25 = vsub.f32 %v2685_v46, %v8657_v34 }
 0x96d   :  { %3686 = vmatmul.f32.gmra.mxu0 %v3431_v9  ;;  %v3456_v53 = vand.u32 4294901760, %v3455_v52 }
 0x96f   :  { %3289 = vmatmul.f32.gmra.mxu2 %v8121_v39  ;;  %v3062_v18 = vpop.f32.mrf.mxu2 }
 0x970   :  { %3358 = vmatmul.f32.gmra.mxu3 %v8088_v40  ;;  %v3143_v27 = vpop.f32.mrf.mxu3  ;;  %v3063_v14 = vadd.f32 %v3062_v18, %v8490_v32  ;;  %3774 = vmatmul.f32.gmra.mxu1 %v3432_v44  ;;  %v3409_v40 = vsub.f32 %v3407_v55, %v3408_v63  ;;  %v3426_v55 = vand.u32 4294901760, %v3425_v12  ;;  %v2683_v63 = vld [vmem:[%s9638_s11 + $0x88] sm:$0xff]  ;;  %v3472_v18 = vand.u32 4294901760, %v3471_v25 }
 0x971   :  { %v8611_v8 = vadd.f32 %v3143_v27, %v3058_v45  ;;  %v8647_v31 = vand.u32 4294901760, %v2683_v63  ;;  %v3441_v45 = vsub.f32 %v3439_v13, %v3440_v50 }
 0x972   :  { %v3410_v47 = vand.u32 4294901760, %v3409_v40 }
 0x973   :  { %v3463_v57 = vsub.f32 %v2683_v63, %v8647_v31  ;;  %v3442_v48 = vand.u32 4294901760, %v3441_v45 }
 0x975   :  { %3691 = vmatmul.f32.gmra.mxu0 %v3439_v13 }
 0x977   :  { %3403 = vmatmul.f32.vlgmr.msrb.gmra.mxu2 %v3402_v58 }
 0x978   :  { %3362 = vmatmul.f32.gmra.mxu3 %v8121_v39  ;;  %v3067_v4 = vpop.f32.mrf.mxu2  ;;  %3780 = vmatmul.f32.gmra.mxu1 %v3440_v50  ;;  %v3417_v39 = vsub.f32 %v3415_v29, %v3416_v43  ;;  %v3464_v29 = vand.u32 4294901760, %v3463_v57 }
 0x979   :  { %v3149_v32 = vpop.f32.mrf.mxu3  ;;  %v3068_v49 = vadd.f32 %v3067_v4, %v8505_v36  ;;  %v3457_v4 = vsub.f32 %v3455_v52, %v3456_v53 }
 0x97a   :  { %v8622_v21 = vadd.f32 %v3149_v32, %v3063_v14  ;;  %v3418_v6 = vand.u32 4294901760, %v3417_v39  ;;  %v3449_v14 = vsub.f32 %v3447_v33, %v3448_v35 }
 0x97b   :  { %v3458_v50 = vand.u32 4294901760, %v3457_v4 }
 0x97c   :  { %v3450_v40 = vand.u32 4294901760, %v3449_v14 }
 0x97d   :  { %3696 = vmatmul.f32.gmra.mxu0 %v3447_v33 }
 0x97f   :  { %3411 = vmatmul.f32.gmra.mxu2 %v3410_v47  ;;  %v3465_v47 = vsub.f32 %v3463_v57, %v3464_v29 }
 0x980   :  { %3576 = vmatmul.f32.vlgmr.msrb.gmra.mxu3 %v8562_v56  ;;  %3786 = vmatmul.f32.gmra.mxu1 %v3448_v35 }
 0x981   :  { %v3072_v26 = vpop.f32.mrf.mxu2 }
 0x982   :  { %v3155_v36 = vpop.f32.mrf.mxu3  ;;  %v3073_v23 = vadd.f32 %v3072_v26, %v8521_v20  ;;  %v3466_v26 = vand.u32 4294901760, %v3465_v47 }
 0x983   :  { %v8632_v24 = vadd.f32 %v3155_v36, %v3068_v49  ;;  %v3473_v36 = vsub.f32 %v3471_v25, %v3472_v18 }
 0x985   :  { %3701 = vmatmul.f32.gmra.mxu0 %v3455_v52  ;;  %v3474_v28 = vand.u32 4294901760, %v3473_v36 }
 0x987   :  { %3419 = vmatmul.f32.gmra.mxu2 %v3418_v6 }
 0x988   :  { %3580 = vmatmul.f32.gmra.mxu3 %v8573_v61  ;;  %3792 = vmatmul.f32.gmra.mxu1 %v3456_v53 }
 0x98a   :  { %v3077_v1 = vpop.f32.mrf.mxu2 }
 0x98b   :  { %v3161_v20 = vpop.f32.mrf.mxu3  ;;  %v3078_v54 = vadd.f32 %v3077_v1, %v8538_v62 }
 0x98c   :  { %v8642_v0 = vadd.f32 %v3161_v20, %v3073_v23 }
 0x98d   :  { %3706 = vmatmul.f32.gmra.mxu0 %v3463_v57 }
 0x98f   :  { %3427 = vmatmul.f32.gmra.mxu2 %v3426_v55 }
 0x990   :  { %3584 = vmatmul.f32.gmra.mxu3 %v8584_v30  ;;  %3798 = vmatmul.f32.gmra.mxu1 %v3464_v29 }
 0x992   :  { %v3082_v7 = vpop.f32.mrf.mxu2 }
 0x993   :  { %v3167_v41 = vpop.f32.mrf.mxu3  ;;  %v3083_v62 = vadd.f32 %v3082_v7, %v8553_v15 }
 0x994   :  { %v8652_v43 = vadd.f32 %v3167_v41, %v3078_v54 }
 0x995   :  { %3711 = vmatmul.f32.gmra.mxu0 %v3471_v25 }
 0x997   :  { %3435 = vmatmul.f32.gmra.mxu2 %v3434_v51 }
 0x998   :  { %3588 = vmatmul.f32.gmra.mxu3 %v8595_v17  ;;  %3804 = vmatmul.f32.gmra.mxu1 %v3472_v18 }
 0x99a   :  { %v3087_v2 = vpop.f32.mrf.mxu2 }
 0x99b   :  { %v3173_v10 = vpop.f32.mrf.mxu3  ;;  %v3088_v15 = vadd.f32 %v3087_v2, %v8566_v60 }
 0x99c   :  { %v8662_v27 = vadd.f32 %v3173_v10, %v3083_v62 }
 0x99f   :  { %3443 = vmatmul.f32.gmra.mxu2 %v3442_v48 }
 0x9a0   :  { %3592 = vmatmul.f32.gmra.mxu3 %v8606_v11 }
 0x9a2   :  { %v3092_v9 = vpop.f32.mrf.mxu2 }
 0x9a3   :  { %v3179_v44 = vpop.f32.mrf.mxu3  ;;  %v3093_v58 = vadd.f32 %v3092_v9, %v8577_v19 }
 0x9a4   :  { %v8666_v37 = vadd.f32 %v3179_v44, %v3088_v15 }
 0x9a7   :  { %3451 = vmatmul.f32.gmra.mxu2 %v3450_v40 }
 0x9a8   :  { %3596 = vmatmul.f32.gmra.mxu3 %v8617_v59 }
 0x9aa   :  { %v3254_v32 = vpop.f32.mrf.mxu2 }
 0x9ab   :  { %v3185_v60 = vpop.f32.mrf.mxu3  ;;  %v3255_v49 = vadd.f32 %v3254_v32, %v8589_v3 }
 0x9ac   :  { %v8669_v13 = vadd.f32 %v3185_v60, %v3093_v58 }
 0x9af   :  { %3459 = vmatmul.f32.gmra.mxu2 %v3458_v50 }
 0x9b0   :  { %3600 = vmatmul.f32.gmra.mxu3 %v8627_v16 }
 0x9b2   :  { %v3258_v5 = vpop.f32.mrf.mxu2 }
 0x9b3   :  { %v3327_v19 = vpop.f32.mrf.mxu3  ;;  %v3259_v39 = vadd.f32 %v3258_v5, %v8600_v42 }
 0x9b4   :  { %v8674_v33 = vadd.f32 %v3327_v19, %v3255_v49 }
 0x9b7   :  { %3467 = vmatmul.f32.gmra.mxu2 %v3466_v26 }
 0x9b8   :  { %3604 = vmatmul.f32.gmra.mxu3 %v8637_v38 }
 0x9ba   :  { %v3262_v23 = vpop.f32.mrf.mxu2 }
 0x9bb   :  { %v3331_v35 = vpop.f32.mrf.mxu3  ;;  %v3263_v3 = vadd.f32 %v3262_v23, %v8611_v8 }
 0x9bc   :  { %v8678_v6 = vadd.f32 %v3331_v35, %v3259_v39 }
 0x9bf   :  { %3475 = vmatmul.f32.gmra.mxu2 %v3474_v28 }
 0x9c0   :  { %3608 = vmatmul.f32.gmra.mxu3 %v8647_v31 }
 0x9c2   :  { %v3266_v12 = vpop.f32.mrf.mxu2 }
 0x9c3   :  { %v3335_v52 = vpop.f32.mrf.mxu3  ;;  %v3267_v42 = vadd.f32 %v3266_v12, %v8622_v21 }
 0x9c4   :  { %v8682_v1 = vadd.f32 %v3335_v52, %v3263_v3 }
 0x9c7   :  { %3873 = vmatmul.f32.vlgmr.msra.gmra.mxu2 %v8562_v56 }
 0x9c8   :  { %3612 = vmatmul.f32.gmra.mxu3 %v8657_v34 }
 0x9ca   :  { %v3270_v20 = vpop.f32.mrf.mxu2  ;;  %v8747_v9 = vpop.f32.mrf.mxu0 }
 0x9cb   :  { %v3339_v53 = vpop.f32.mrf.mxu3  ;;  %v3271_v8 = vadd.f32 %v3270_v20, %v8632_v24  ;;  %9972 = vst [vmem:[#allocation41_spill] sm:$0xff] %v8747_v9 }
 0x9cc   :  { %v8687_v54 = vadd.f32 %v3339_v53, %v3267_v42 }
 0x9cd   :  { %v8749_v44 = vpop.f32.mrf.mxu1 }
 0x9ce   :  { %9973 = vst [vmem:[#allocation39_spill] sm:$0xff] %v8749_v44 }
 0x9cf   :  { %3877 = vmatmul.f32.gmra.mxu2 %v8573_v61 }
 0x9d0   :  { %3946 = vmatmul.f32.vlgmr.msra.gmra.mxu3 %v8562_v56 }
 0x9d2   :  { %v3274_v55 = vpop.f32.mrf.mxu2  ;;  %v8751_v40 = vpop.f32.mrf.mxu0 }
 0x9d3   :  { %v3343_v63 = vpop.f32.mrf.mxu3  ;;  %v3275_v21 = vadd.f32 %v3274_v55, %v8642_v0 }
 0x9d4   :  { %v8692_v22 = vadd.f32 %v3343_v63, %v3271_v8 }
 0x9d5   :  { %v8753_v60 = vpop.f32.mrf.mxu1 }
 0x9d6   :  { %9974 = vst [vmem:[#allocation42_spill] sm:$0xff] %v8753_v60 }
 0x9d7   :  { %3881 = vmatmul.f32.gmra.mxu2 %v8584_v30 }
 0x9d8   :  { %3950 = vmatmul.f32.gmra.mxu3 %v8573_v61 }
 0x9da   :  { %v8696_v57 = vpop.f32.mrf.mxu2  ;;  %v8755_v32 = vpop.f32.mrf.mxu0 }
 0x9db   :  { %v3347_v7 = vpop.f32.mrf.mxu3 }
 0x9dc   :  { %v8698_v24 = vadd.f32 %v3347_v7, %v3275_v21 }
 0x9dd   :  { %v8759_v47 = vpop.f32.mrf.mxu1 }
 0x9de   :  { %9976 = vst [vmem:[#allocation40_spill] sm:$0xff] %v8759_v47 }
 0x9df   :  { %3885 = vmatmul.f32.gmra.mxu2 %v8595_v17 }
 0x9e0   :  { %3954 = vmatmul.f32.gmra.mxu3 %v8584_v30 }
 0x9e2   :  { %v8702_v56 = vpop.f32.mrf.mxu2  ;;  %v8765_v39 = vpop.f32.mrf.mxu0 }
 0x9e3   :  { %v8704_v41 = vpop.f32.mrf.mxu3 }
 0x9e5   :  { %v8767_v26 = vpop.f32.mrf.mxu1 }
 0x9e6   :  { %9979 = vst [vmem:[#allocation36_spill] sm:$0xff] %v8767_v26 }
 0x9e7   :  { %3889 = vmatmul.f32.gmra.mxu2 %v8606_v11 }
 0x9e8   :  { %3958 = vmatmul.f32.gmra.mxu3 %v8595_v17 }
 0x9ea   :  { %v8708_v0 = vpop.f32.mrf.mxu2  ;;  %v3687_v35 = vpop.f32.mrf.mxu0 }
 0x9eb   :  { %v8710_v61 = vpop.f32.mrf.mxu3 }
 0x9ed   :  { %v8773_v3 = vpop.f32.mrf.mxu1 }
 0x9ef   :  { %3893 = vmatmul.f32.gmra.mxu2 %v8617_v59 }
 0x9f0   :  { %3962 = vmatmul.f32.gmra.mxu3 %v8606_v11 }
 0x9f2   :  { %v8714_v29 = vpop.f32.mrf.mxu2  ;;  %v3692_v52 = vpop.f32.mrf.mxu0 }
 0x9f3   :  { %v8716_v62 = vpop.f32.mrf.mxu3 }
 0x9f5   :  { %v3781_v53 = vpop.f32.mrf.mxu1 }
 0x9f7   :  { %3897 = vmatmul.f32.gmra.mxu2 %v8627_v16 }
 0x9f8   :  { %3966 = vmatmul.f32.gmra.mxu3 %v8617_v59 }
 0x9fa   :  { %v8722_v51 = vpop.f32.mrf.mxu2  ;;  %v3697_v8 = vpop.f32.mrf.mxu0 }
 0x9fb   :  { %v8720_v30 = vpop.f32.mrf.mxu3 }
 0x9fd   :  { %v3787_v21 = vpop.f32.mrf.mxu1 }
 0x9ff   :  { %3901 = vmatmul.f32.gmra.mxu2 %v8637_v38 }
 0xa00   :  { %3970 = vmatmul.f32.gmra.mxu3 %v8627_v16 }
 0xa02   :  { %v8726_v17 = vpop.f32.mrf.mxu2 }
 0xa03   :  { %v8728_v46 = vpop.f32.mrf.mxu3 }
 0xa07   :  { %3905 = vmatmul.f32.gmra.mxu2 %v8647_v31 }
 0xa08   :  { %3974 = vmatmul.f32.gmra.mxu3 %v8637_v38 }
 0xa0a   :  { %v8732_v11 = vpop.f32.mrf.mxu2 }
 0xa0b   :  { %v8734_v45 = vpop.f32.mrf.mxu3 }
 0xa0f   :  { %3909 = vmatmul.f32.gmra.mxu2 %v8657_v34 }
 0xa10   :  { %3978 = vmatmul.f32.gmra.mxu3 %v8647_v31 }
 0xa12   :  { %v8738_v59 = vpop.f32.mrf.mxu2 }
 0xa13   :  { %v8740_v25 = vpop.f32.mrf.mxu3 }
 0xa18   :  { %3982 = vmatmul.f32.gmra.mxu3 %v8657_v34 }
 0xa1a   :  { %v3436_v16 = vpop.f32.mrf.mxu2 }
 0xa1b   :  { %v8743_v2 = vpop.f32.mrf.mxu3 }
 0xa22   :  { %v3444_v10 = vpop.f32.mrf.mxu2 }
 0xa23   :  { %v8745_v18 = vpop.f32.mrf.mxu3 }
 0xa2a   :  { %v3452_v38 = vpop.f32.mrf.mxu2 }
 0xa2b   :  { %v3597_v15 = vpop.f32.mrf.mxu3 }
 0xa32   :  { %v3460_v48 = vpop.f32.mrf.mxu2 }
 0xa33   :  { %v3601_v14 = vpop.f32.mrf.mxu3 }
 0xa3a   :  { %v3468_v31 = vpop.f32.mrf.mxu2 }
 0xa3b   :  { %v3605_v58 = vpop.f32.mrf.mxu3 }
 0xa42   :  { %v3476_v4 = vpop.f32.mrf.mxu2 }
 0xa43   :  { %v3609_v34 = vpop.f32.mrf.mxu3 }
 0xa4a   :  { %v8757_v50 = vpop.f32.mrf.mxu2 }
 0xa4b   :  { %v3613_v49 = vpop.f32.mrf.mxu3  ;;  %9975 = vst [vmem:[#allocation37_spill] sm:$0xff] %v8757_v50  ;;  %v3793_v50 = vpop.f32.mrf.mxu1 }
 0xa52   :  { %v8761_v5 = vpop.f32.mrf.mxu2 }
 0xa53   :  { %9977 = vst [vmem:[#allocation35_spill] sm:$0xff] %v8761_v5  ;;  %v8763_v19 = vpop.f32.mrf.mxu3  ;;  %v3283_v5 = vadd.f32 %v8702_v56, %v8662_v27  ;;  %v3445_v56 = vadd.f32 %v3444_v10, %v8698_v24 }
 0xa54   :  { %9978 = vst [vmem:[#allocation38_spill] sm:$0xff] %v8763_v19 }
 0xa55   :  { %v3356_v60 = vadd.f32 %v8710_v61, %v3283_v5  ;;  %v3799_v61 = vpop.f32.mrf.mxu1 }
 0xa57   :  { %v3461_v47 = vadd.f32 %v3460_v48, %v3356_v60 }
 0xa5a   :  { %v8769_v36 = vpop.f32.mrf.mxu2 }
 0xa5b   :  { %9980 = vst [vmem:[#allocation33_spill] sm:$0xff] %v8769_v36  ;;  %v8771_v23 = vpop.f32.mrf.mxu3 }
 0xa5c   :  { %9981 = vst [vmem:[#allocation43_spill] sm:$0xff] %v8771_v23  ;;  %v3702_v23 = vpop.f32.mrf.mxu0 }
 0xa62   :  { %v8775_v28 = vpop.f32.mrf.mxu2 }
 0xa63   :  { %9982 = vst [vmem:[#allocation31_spill] sm:$0xff] %v8775_v28  ;;  %v8777_v12 = vpop.f32.mrf.mxu3 }
 0xa64   :  { %9983 = vst [vmem:[#allocation34_spill] sm:$0xff] %v8777_v12  ;;  %v3287_v12 = vadd.f32 %v8708_v0, %v8666_v37  ;;  %v3291_v37 = vadd.f32 %v8714_v29, %v8669_v13  ;;  %v3421_v13 = vadd.f32 %v8732_v11, %v8682_v1 }
 0xa66   :  { %v3360_v28 = vadd.f32 %v8716_v62, %v3287_v12  ;;  %v3364_v62 = vadd.f32 %v8720_v30, %v3291_v37  ;;  %v3413_v30 = vadd.f32 %v8726_v17, %v8678_v6 }
 0xa68   :  { %v3469_v9 = vadd.f32 %v3468_v31, %v3360_v28  ;;  %v3477_v10 = vadd.f32 %v3476_v4, %v3364_v62  ;;  %v3405_v4 = vadd.f32 %v8722_v51, %v8674_v33  ;;  %v3582_v1 = vadd.f32 %v8734_v45, %v3413_v30  ;;  %v9989_v28 = vld [vmem:[#allocation36_spill] sm:$0xff] }
 0xa6a   :  { %v8779_v42 = vpop.f32.mrf.mxu2  ;;  %v3610_v27 = vadd.f32 %v3609_v34, %v3469_v9  ;;  %v3578_v17 = vadd.f32 %v8728_v46, %v3405_v4  ;;  %v3673_v33 = vadd.f32 %v8751_v40, %v3582_v1  ;;  %v9991_v46 = vld [vmem:[#allocation41_spill] sm:$0xff]  ;;  %v9995_v40 = vld [vmem:[#allocation42_spill] sm:$0xff] }
 0xa6b   :  { %9984 = vst [vmem:[#allocation44_spill] sm:$0xff] %v8779_v42  ;;  %v8781_v20 = vpop.f32.mrf.mxu3  ;;  %v3606_v42 = vadd.f32 %v3605_v58, %v3461_v47  ;;  %v3586_v58 = vadd.f32 %v8740_v25, %v3421_v13  ;;  %v10002_v13 = vld [vmem:[#allocation43_spill] sm:$0xff] }
 0xa6c   :  { %9985 = vst [vmem:[#allocation29_spill] sm:$0xff] %v8781_v20  ;;  %v3279_v20 = vadd.f32 %v8696_v57, %v8652_v43  ;;  %v3437_v43 = vadd.f32 %v3436_v16, %v8692_v22  ;;  %v3598_v57 = vadd.f32 %v3597_v15, %v3445_v56 }
 0xa6d   :  { %v3678_v25 = vadd.f32 %v8755_v32, %v3586_v58  ;;  %v9992_v32 = vld [vmem:[#allocation40_spill] sm:$0xff]  ;;  %v3996_v58 = vld [vmem:[%s9639_s13] sm:$0xff] }
 0xa6e   :  { %v3594_v9 = vadd.f32 %v8745_v18, %v3437_v43  ;;  %v3693_v29 = vadd.f32 %v3692_v52, %v3598_v57  ;;  %v4033_v4 = vsel %vm4031_vm4, %v3996_v58, 0 }
 0xa72   :  { %v3894_v55 = vpop.f32.mrf.mxu2  ;;  %v9988_v51 = vld [vmem:[#allocation44_spill] sm:$0xff] }
 0xa73   :  { %v8783_v63 = vpop.f32.mrf.mxu3  ;;  %v9997_v43 = vld [vmem:[#allocation29_spill] sm:$0xff] }
 0xa74   :  { %9986 = vst [vmem:[#allocation32_spill] sm:$0xff] %v8783_v63  ;;  %v3352_v63 = vadd.f32 %v8704_v41, %v3279_v20  ;;  %v3703_v41 = vadd.f32 %v3702_v23, %v3606_v42 }
 0xa76   :  { %v3453_v26 = vadd.f32 %v3452_v38, %v3352_v63  ;;  %v3429_v38 = vadd.f32 %v8738_v59, %v8687_v54  ;;  %v3794_v16 = vadd.f32 %v3793_v50, %v3703_v41  ;;  %v3688_v54 = vadd.f32 %v3687_v35, %v3594_v9  ;;  %v9999_v41 = vld [vmem:[#allocation35_spill] sm:$0xff] }
 0xa78   :  { %v3602_v0 = vadd.f32 %v3601_v14, %v3453_v26  ;;  %v3590_v22 = vadd.f32 %v8743_v2, %v3429_v38  ;;  %v3614_v14 = vadd.f32 %v3613_v49, %v3477_v10  ;;  %v3782_v2 = vadd.f32 %v3781_v53, %v3693_v29  ;;  %v3805_v26 = vpop.f32.mrf.mxu1  ;;  %v10000_v38 = vld [vmem:[#allocation34_spill] sm:$0xff] }
 0xa79   :  { %v3668_v53 = vadd.f32 %v9991_v46, %v3578_v17 }
 0xa7a   :  { %v3898_v7 = vpop.f32.mrf.mxu2  ;;  %v3698_v24 = vadd.f32 %v3697_v8, %v3602_v0  ;;  %v3683_v11 = vadd.f32 %v8765_v39, %v3590_v22  ;;  %v3895_v23 = vadd.f32 %v3894_v55, %v3782_v2  ;;  %v3764_v8 = vadd.f32 %v9992_v32, %v3678_v25  ;;  %v9994_v55 = vld [vmem:[#allocation31_spill] sm:$0xff] }
 0xa7b   :  { %v8785_v19 = vpop.f32.mrf.mxu3  ;;  %v8865_v25 = vand.u32 4294901760, %v4033_v4 }
 0xa7c   :  { %9987 = vst [vmem:[#allocation13_spill] sm:$0xff] %v8785_v19  ;;  %v3707_v19 = vpop.f32.mrf.mxu0  ;;  %v3788_v18 = vadd.f32 %v3787_v21, %v3698_v24  ;;  %v3770_v12 = vadd.f32 %v9989_v28, %v3683_v11  ;;  %v10001_v24 = vld [vmem:[#allocation37_spill] sm:$0xff] }
 0xa7d   :  { %v3708_v48 = vadd.f32 %v3707_v19, %v3610_v27  ;;  %v9996_v27 = vld [vmem:[#allocation33_spill] sm:$0xff] }
 0xa7e   :  { %v3899_v47 = vadd.f32 %v3898_v7, %v3788_v18  ;;  %v3758_v7 = vadd.f32 %v9995_v40, %v3673_v33  ;;  %v3883_v56 = vadd.f32 %v9996_v27, %v3764_v8 }
 0xa7f   :  { %v3800_v15 = vadd.f32 %v3799_v61, %v3708_v48 }
 0xa80   :  { %v3879_v48 = vadd.f32 %v9999_v41, %v3758_v7  ;;  %v3956_v9 = vadd.f32 %v10000_v38, %v3883_v56 }
 0xa82   :  { %v3902_v44 = vpop.f32.mrf.mxu2  ;;  %v3952_v22 = vadd.f32 %v10002_v13, %v3879_v48 }
 0xa83   :  { %v3971_v36 = vpop.f32.mrf.mxu3  ;;  %v3903_v34 = vadd.f32 %v3902_v44, %v3794_v16  ;;  %v3776_v44 = vadd.f32 %v8773_v3, %v3688_v54  ;;  %v9990_v42 = vld [vmem:[#allocation13_spill] sm:$0xff]  ;;  %v9993_v3 = vld [vmem:[#allocation32_spill] sm:$0xff] }
 0xa84   :  { %v3712_v59 = vpop.f32.mrf.mxu0  ;;  %v3972_v35 = vadd.f32 %v3971_v36, %v3899_v47  ;;  %v3968_v20 = vadd.f32 %v9990_v42, %v3895_v23  ;;  %v3887_v36 = vadd.f32 %v9994_v55, %v3770_v12 }
 0xa85   :  { %v3713_v49 = vadd.f32 %v3712_v59, %v3614_v14  ;;  %v3891_v45 = vadd.f32 %v9988_v51, %v3776_v44  ;;  %v3997_v51 = vld [vmem:[%s9639_s13 + $0x8] sm:$0xff] }
 0xa86   :  { %v3960_v57 = vadd.f32 %v9997_v43, %v3887_v36 }
 0xa87   :  { %v3806_v52 = vadd.f32 %v3805_v26, %v3713_v49  ;;  %v3964_v63 = vadd.f32 %v9993_v3, %v3891_v45 }
 0xa8a   :  { %v3906_v31 = vpop.f32.mrf.mxu2 }
 0xa8b   :  { %v3975_v5 = vpop.f32.mrf.mxu3  ;;  %v3907_v60 = vadd.f32 %v3906_v31, %v3800_v15  ;;  %v10003_v15 = vld [vmem:[#allocation38_spill] sm:$0xff] }
 0xa8c   :  { %v3976_v19 = vadd.f32 %v3975_v5, %v3903_v34  ;;  %v9998_v5 = vld [vmem:[#allocation39_spill] sm:$0xff] }
 0xa8d   :  { %v3752_v62 = vadd.f32 %v9998_v5, %v3668_v53  ;;  %v4036_v53 = vsel %vm4031_vm4, %v3997_v51, 0 }
 0xa8e   :  { %v8911_v56 = vand.u32 4294901760, %v4036_v53 }
 0xa8f   :  { %v3875_v10 = vadd.f32 %v10001_v24, %v3752_v62 }
 0xa91   :  { %v3948_v14 = vadd.f32 %v10003_v15, %v3875_v10 }
 0xa92   :  { %v3910_v39 = vpop.f32.mrf.mxu2 }
 0xa93   :  { %v3979_v50 = vpop.f32.mrf.mxu3  ;;  %v3911_v21 = vadd.f32 %v3910_v39, %v3806_v52 }
 0xa94   :  { %v3980_v6 = vadd.f32 %v3979_v50, %v3907_v60 }
 0xa96   :  { %6056 = vtanh.f32 %v3980_v6 }
 0xa97   :  { %6058 = vtanh.f32 %v3976_v19 }
 0xa98   :  { %6060 = vtanh.f32 %v3972_v35 }
 0xa99   :  { %6062 = vtanh.f32 %v3968_v20  ;;  %v8889_v20 = vsub.f32 %v4033_v4, %v8865_v25  ;;  %v3999_v4 = vld [vmem:[%s9639_s13 + $0x18] sm:$0xff] }
 0xa9a   :  { %6064 = vtanh.f32 %v3964_v63 }
 0xa9b   :  { %v3983_v37 = vpop.f32.mrf.mxu3  ;;  %v4075_v27 = vand.u32 4294901760, %v8889_v20 }
 0xa9c   :  { %v6057_v0 = vpop.eup %6056  ;;  %v3984_v61 = vadd.f32 %v3983_v37, %v3911_v21 }
 0xa9d   :  { %v6059_v31 = vpop.eup %6058  ;;  %v8833_v29 = vand.u32 4294901760, %v6057_v0  ;;  %v4076_v38 = vsub.f32 %v8889_v20, %v4075_v27 }
 0xa9e   :  { %6066 = vtanh.f32 %v3984_v61  ;;  %v6061_v16 = vpop.eup %6060  ;;  %v8836_v30 = vand.u32 4294901760, %v6059_v31  ;;  %v3998_v61 = vld [vmem:[%s9639_s13 + $0x10] sm:$0xff] }
 0xa9f   :  { %6068 = vtanh.f32 %v3960_v57  ;;  %v6063_v54 = vpop.eup %6062  ;;  %v8841_v18 = vand.u32 4294901760, %v6061_v16  ;;  %v8844_v34 = vsub.f32 %v6057_v0, %v8833_v29 }
 0xaa0   :  { %6070 = vtanh.f32 %v3956_v9  ;;  %v6065_v59 = vpop.eup %6064  ;;  %v8849_v11 = vand.u32 4294901760, %v6063_v54  ;;  %v8852_v2 = vsub.f32 %v6059_v31, %v8836_v30  ;;  %v8934_v9 = vsub.f32 %v4036_v53, %v8911_v56  ;;  %v4444_v53 = vld [vmem:[%s9641_s2] sm:$0xff] }
 0xaa1   :  { %6072 = vtanh.f32 %v3952_v22  ;;  %v8854_v49 = vand.u32 4294901760, %v6065_v59  ;;  %v4128_v6 = vand.u32 4294901760, %v8844_v34  ;;  %v8863_v17 = vsub.f32 %v6061_v16, %v8841_v18 }
 0xaa2   :  { %6074 = vtanh.f32 %v3948_v14  ;;  %v4134_v23 = vand.u32 4294901760, %v8852_v2  ;;  %v8874_v33 = vsub.f32 %v6063_v54, %v8849_v11  ;;  %v4039_v31 = vsel %vm4031_vm4, %v3998_v61, 0 }
 0xaa3   :  { %v8882_v39 = vsub.f32 %v6065_v59, %v8854_v49  ;;  %v4129_v52 = vsub.f32 %v8844_v34, %v4128_v6  ;;  %v4140_v42 = vand.u32 4294901760, %v8863_v17  ;;  %v4077_v14 = vand.u32 4294901760, %v4076_v38 }
 0xaa4   :  { %v6067_v60 = vpop.eup %6066  ;;  %v4135_v8 = vsub.f32 %v8852_v2, %v4134_v23  ;;  %v4146_v3 = vand.u32 4294901760, %v8874_v33  ;;  %v4083_v58 = vand.u32 4294901760, %v8934_v9  ;;  %v8946_v54 = vand.u32 4294901760, %v4039_v31 }
 0xaa5   :  { %v8847_v1 = vand.u32 4294901760, %v6067_v60  ;;  %v6069_v50 = vpop.eup %6068  ;;  %v4152_v55 = vand.u32 4294901760, %v8882_v39  ;;  %v4130_v40 = vand.u32 4294901760, %v4129_v52  ;;  %v4141_v7 = vsub.f32 %v8863_v17, %v4140_v42 }
 0xaa6   :  { %v6071_v47 = vpop.eup %6070  ;;  %v8871_v35 = vand.u32 4294901760, %v6069_v50  ;;  %v4136_v37 = vand.u32 4294901760, %v4135_v8  ;;  %v4147_v0 = vsub.f32 %v8874_v33, %v4146_v3  ;;  %v4507_v8 = vand.u32 4294901760, %v4444_v53 }
 0xaa7   :  { %4054 = vmatpush.msrb.mxu0 %v8847_v1  ;;  %4394 = vmatpush.msrb.mxu3 %v8847_v1  ;;  %v8859_v19 = vsub.f32 %v6067_v60, %v8847_v1  ;;  %v6073_v44 = vpop.eup %6072  ;;  %v8879_v45 = vand.u32 4294901760, %v6071_v47  ;;  %v4142_v41 = vand.u32 4294901760, %v4141_v7  ;;  %v4153_v48 = vsub.f32 %v8882_v39, %v4152_v55 }
 0xaa8   :  { %v6075_v28 = vpop.eup %6074  ;;  %v8892_v46 = vand.u32 4294901760, %v6073_v44  ;;  %v8899_v63 = vsub.f32 %v6069_v50, %v8871_v35  ;;  %v4148_v24 = vand.u32 4294901760, %v4147_v0  ;;  %v4571_v7 = vsub.f32 %v4444_v53, %v4507_v8 }
 0xaa9   :  { %4056 = vmatpush.msrb.mxu0 %v8833_v29  ;;  %4396 = vmatpush.msrb.mxu3 %v8833_v29  ;;  %v4122_v26 = vand.u32 4294901760, %v8859_v19  ;;  %v8903_v36 = vand.u32 4294901760, %v6075_v28  ;;  %v8906_v21 = vsub.f32 %v6071_v47, %v8879_v45  ;;  %v4154_v15 = vand.u32 4294901760, %v4153_v48 }
 0xaaa   :  { %v4158_v43 = vand.u32 4294901760, %v8899_v63  ;;  %v8918_v57 = vsub.f32 %v6073_v44, %v8892_v46  ;;  %v8960_v44 = vsub.f32 %v4039_v31, %v8946_v54  ;;  %v4442_v31 = vld [vmem:[%s9640_s15 + $0x18] sm:$0xff] }
 0xaab   :  { %4058 = vmatpush.msrb.mxu0 %v8836_v30  ;;  %4329 = vmatpush.msrb.mxu2 %v4122_v26  ;;  %v4123_v12 = vsub.f32 %v8859_v19, %v4122_v26  ;;  %v4164_v5 = vand.u32 4294901760, %v8906_v21  ;;  %v8926_v62 = vsub.f32 %v6075_v28, %v8903_v36  ;;  %v4042_v26 = vsel %vm4031_vm4, %v3999_v4, 0 }
 0xaac   :  { %4398 = vmatpush.msrb.mxu3 %v8836_v30  ;;  %v4159_v10 = vsub.f32 %v8899_v63, %v4158_v43  ;;  %v4170_v13 = vand.u32 4294901760, %v8918_v57  ;;  %v4097_v52 = vand.u32 4294901760, %v4042_v26 }
 0xaad   :  { %4060 = vmatpush.msrb.mxu0 %v8841_v18  ;;  %4333 = vmatpush.msrb.mxu2 %v4128_v6  ;;  %v4124_v32 = vand.u32 4294901760, %v4123_v12  ;;  %v4165_v22 = vsub.f32 %v8906_v21, %v4164_v5  ;;  %v4176_v16 = vand.u32 4294901760, %v8926_v62  ;;  %v4084_v6 = vsub.f32 %v8934_v9, %v4083_v58 }
 0xaae   :  { %4400 = vmatpush.msrb.mxu3 %v8841_v18  ;;  %v4160_v59 = vand.u32 4294901760, %v4159_v10  ;;  %v4171_v60 = vsub.f32 %v8918_v57, %v4170_v13  ;;  %v4091_v12 = vand.u32 4294901760, %v8960_v44 }
 0xaaf   :  { %4062 = vmatpush.msrb.mxu0 %v8849_v11  ;;  %4125 = vmatpush.msrb.mxu1 %v4124_v32  ;;  %v4166_v50 = vand.u32 4294901760, %v4165_v22  ;;  %v4177_v47 = vsub.f32 %v8926_v62, %v4176_v16  ;;  %v4085_v28 = vand.u32 4294901760, %v4084_v6  ;;  %v4443_v22 = vld [vmem:[%s9640_s15 + $0x20] sm:$0xff] }
 0xab0   :  { %4337 = vmatpush.msrb.mxu2 %v4134_v23  ;;  %4402 = vmatpush.msrb.mxu3 %v8849_v11  ;;  %v4172_v23 = vand.u32 4294901760, %v4171_v60 }
 0xab1   :  { %4064 = vmatpush.msrb.mxu0 %v8854_v49  ;;  %4131 = vmatpush.msrb.mxu1 %v4130_v40  ;;  %v4178_v51 = vand.u32 4294901760, %v4177_v47 }
 0xab2   :  { %4341 = vmatpush.msrb.mxu2 %v4140_v42  ;;  %4404 = vmatpush.msrb.mxu3 %v8854_v49  ;;  %v8978_v42 = vsub.f32 %v4042_v26, %v4097_v52 }
 0xab3   :  { %4066 = vmatpush.msrb.mxu0 %v8871_v35  ;;  %4137 = vmatpush.msrb.mxu1 %v4136_v37 }
 0xab4   :  { %4345 = vmatpush.msrb.mxu2 %v4146_v3  ;;  %4406 = vmatpush.msrb.mxu3 %v8871_v35 }
 0xab5   :  { %4068 = vmatpush.msrb.mxu0 %v8879_v45  ;;  %4143 = vmatpush.msrb.mxu1 %v4142_v41 }
 0xab6   :  { %4349 = vmatpush.msrb.mxu2 %v4152_v55  ;;  %4408 = vmatpush.msrb.mxu3 %v8879_v45  ;;  %v4440_v55 = vld [vmem:[%s9640_s15 + $0x8] sm:$0xff] }
 0xab7   :  { %4070 = vmatpush.msrb.mxu0 %v8892_v46  ;;  %4149 = vmatpush.msrb.mxu1 %v4148_v24  ;;  %v4486_v24 = vsel %vm250_vm1, %v4442_v31, 0 }
 0xab8   :  { %4353 = vmatpush.msrb.mxu2 %v4158_v43  ;;  %4410 = vmatpush.msrb.mxu3 %v8892_v46  ;;  %v4572_v43 = vand.u32 4294901760, %v4571_v7 }
 0xab9   :  { %4072 = vmatpush.msrb.mxu0 %v8903_v36  ;;  %4155 = vmatpush.msrb.mxu1 %v4154_v15 }
 0xaba   :  { %4357 = vmatpush.msrb.mxu2 %v4164_v5  ;;  %4412 = vmatpush.msrb.mxu3 %v8903_v36  ;;  %v4573_v61 = vsub.f32 %v4571_v7, %v4572_v43 }
 0xabb   :  { %4078 = vmatmul.f32.vlgmr.msrb.gmra.mxu0 %v4077_v14  ;;  %4161 = vmatpush.msrb.mxu1 %v4160_v59 }
 0xabc   :  { %4209 = vmatpush.msra.mxu0 %v8859_v19  ;;  %4361 = vmatpush.msrb.mxu2 %v4170_v13  ;;  %v4000_v19 = vld [vmem:[%s9639_s13 + $0x20] sm:$0xff] }
 0xabd   :  { %4167 = vmatpush.msrb.mxu1 %v4166_v50  ;;  %4414 = vmatmul.f32.vlgmr.msrb.gmra.mxu3 %v8865_v25 }
 0xabe   :  { %4212 = vmatpush.msra.mxu0 %v8844_v34  ;;  %4365 = vmatpush.msrb.mxu2 %v4176_v16  ;;  %v4092_v34 = vsub.f32 %v8960_v44, %v4091_v12  ;;  %v4489_v16 = vsel %vm250_vm1, %v4443_v22, 0 }
 0xabf   :  { %4173 = vmatpush.msrb.mxu1 %v4172_v23  ;;  %4367 = vmatmul.f32.vlgmr.msrb.gmra.mxu2 %v8865_v25  ;;  %v4541_v15 = vand.u32 4294901760, %v4489_v16 }
 0xac0   :  { %4215 = vmatpush.msra.mxu0 %v8852_v2  ;;  %v4045_v2 = vsel %vm4031_vm4, %v4000_v19, 0 }
 0xac1   :  { %4179 = vmatpush.msrb.mxu1 %v4178_v51 }
 0xac2   :  { %4218 = vmatpush.msra.mxu0 %v8863_v17  ;;  %4181 = vmatmul.f32.vlgmr.msrb.gmra.mxu1 %v8865_v25  ;;  %v4093_v17 = vand.u32 4294901760, %v4092_v34  ;;  %v4105_v25 = vand.u32 4294901760, %v4045_v2 }
 0xac3   :  { %4086 = vmatmul.f32.gmra.mxu0 %v4085_v28  ;;  %4270 = vmatpush.msra.mxu1 %v8847_v1  ;;  %v4099_v1 = vand.u32 4294901760, %v8978_v42 }
 0xac4   :  { %4221 = vmatpush.msra.mxu0 %v8874_v33 }
 0xac5   :  { %4272 = vmatpush.msra.mxu1 %v8833_v29  ;;  %4418 = vmatmul.f32.gmra.mxu3 %v8911_v56  ;;  %v4100_v29 = vsub.f32 %v8978_v42, %v4099_v1 }
 0xac6   :  { %4224 = vmatpush.msra.mxu0 %v8882_v39 }
 0xac7   :  { %4274 = vmatpush.msra.mxu1 %v8836_v30  ;;  %4371 = vmatmul.f32.gmra.mxu2 %v8911_v56  ;;  %v8996_v30 = vsub.f32 %v4045_v2, %v4105_v25 }
 0xac8   :  { %4227 = vmatpush.msra.mxu0 %v8899_v63 }
 0xac9   :  { %4276 = vmatpush.msra.mxu1 %v8841_v18  ;;  %v4101_v18 = vand.u32 4294901760, %v4100_v29  ;;  %v4107_v33 = vand.u32 4294901760, %v8996_v30 }
 0xaca   :  { %4230 = vmatpush.msra.mxu0 %v8906_v21  ;;  %4185 = vmatmul.f32.gmra.mxu1 %v8911_v56  ;;  %v4480_v21 = vsel %vm250_vm1, %v4440_v55, 0 }
 0xacb   :  { %4094 = vmatmul.f32.gmra.mxu0 %v4093_v17  ;;  %4278 = vmatpush.msra.mxu1 %v8849_v11  ;;  %v4108_v11 = vsub.f32 %v8996_v30, %v4107_v33  ;;  %v9032_v40 = vand.u32 4294901760, %v4480_v21 }
 0xacc   :  { %4233 = vmatpush.msra.mxu0 %v8918_v57 }
 0xacd   :  { %4280 = vmatpush.msra.mxu1 %v8854_v49  ;;  %4422 = vmatmul.f32.gmra.mxu3 %v8946_v54  ;;  %v4109_v49 = vand.u32 4294901760, %v4108_v11  ;;  %v4518_v37 = vsub.f32 %v4480_v21, %v9032_v40 }
 0xace   :  { %4236 = vmatpush.msra.mxu0 %v8926_v62 }
 0xacf   :  { %4282 = vmatpush.msra.mxu1 %v8871_v35  ;;  %4375 = vmatmul.f32.gmra.mxu2 %v8946_v54  ;;  %v4439_v35 = vld [vmem:[%s9640_s15] sm:$0xff]  ;;  %v4519_v5 = vand.u32 4294901760, %v4518_v37 }
 0xad1   :  { %4284 = vmatpush.msra.mxu1 %v8879_v45  ;;  %v4477_v45 = vsel %vm250_vm1, %v4439_v35, 0  ;;  %v4520_v60 = vsub.f32 %v4518_v37, %v4519_v5 }
 0xad2   :  { %4189 = vmatmul.f32.gmra.mxu1 %v8946_v54  ;;  %v9016_v39 = vand.u32 4294901760, %v4477_v45 }
 0xad3   :  { %4102 = vmatmul.f32.gmra.mxu0 %v4101_v18  ;;  %4286 = vmatpush.msra.mxu1 %v8892_v46  ;;  %v4445_v46 = vld [vmem:[%s9641_s2 + $0x8] sm:$0xff]  ;;  %v4521_v4 = vand.u32 4294901760, %v4520_v60 }
 0xad4   :  { %v4505_v32 = vand.u32 4294901760, %v4445_v46  ;;  %v4510_v3 = vsub.f32 %v4477_v45, %v9016_v39 }
 0xad5   :  { %4288 = vmatpush.msra.mxu1 %v8903_v36  ;;  %4426 = vmatmul.f32.gmra.mxu3 %v4097_v52 }
 0xad6   :  { %4506 = vmatpush.msrb.mxu0 %v4505_v32  ;;  %4658 = vmatpush.msra.mxu3 %v4505_v32  ;;  %v4511_v63 = vand.u32 4294901760, %v4510_v3  ;;  %v4565_v36 = vsub.f32 %v4445_v46, %v4505_v32 }
 0xad7   :  { %4379 = vmatmul.f32.gmra.mxu2 %v4097_v52 }
 0xad8   :  { %4508 = vmatpush.msrb.mxu0 %v4507_v8  ;;  %4660 = vmatpush.msra.mxu3 %v4507_v8  ;;  %v4566_v56 = vand.u32 4294901760, %v4565_v36  ;;  %v4512_v14 = vsub.f32 %v4510_v3, %v4511_v63 }
 0xad9   :  { %4613 = vmatpush.msra.mxu2 %v4565_v36 }
 0xada   :  { %4193 = vmatmul.f32.gmra.mxu1 %v4097_v52  ;;  %v4567_v0 = vsub.f32 %v4565_v36, %v4566_v56  ;;  %v4513_v54 = vand.u32 4294901760, %v4512_v14 }
 0xadb   :  { %4110 = vmatmul.f32.gmra.mxu0 %v4109_v49  ;;  %4616 = vmatpush.msra.mxu2 %v4571_v7 }
 0xadc   :  { %v4568_v57 = vand.u32 4294901760, %v4567_v0 }
 0xadd   :  { %4430 = vmatmul.f32.gmra.mxu3 %v4105_v25 }
 0xade   :  { %4569 = vmatpush.msrb.mxu1 %v4568_v57 }
 0xadf   :  { %4383 = vmatmul.f32.gmra.mxu2 %v4105_v25 }
 0xae2   :  { %4197 = vmatmul.f32.gmra.mxu1 %v4105_v25 }
 0xae3   :  { %4239 = vmatmul.f32.vlgmr.msra.gmra.mxu0 %v8889_v20  ;;  %v4441_v20 = vld [vmem:[%s9640_s15 + $0x10] sm:$0xff] }
 0xae4   :  { %4709 = vmatpush.msra.mxu0 %v4566_v56  ;;  %v4483_v62 = vsel %vm250_vm1, %v4441_v20, 0 }
 0xae5   :  { %4664 = vmatmul.f32.vlgmr.msra.gmra.mxu3 %v4511_v63  ;;  %v4525_v41 = vand.u32 4294901760, %v4483_v62 }
 0xae6   :  { %4713 = vmatpush.msra.mxu0 %v4572_v43 }
 0xae7   :  { %4619 = vmatmul.f32.vlgmr.msra.gmra.mxu2 %v4510_v3  ;;  %v4526_v48 = vsub.f32 %v4483_v62, %v4525_v41 }
 0xae9   :  { %v4527_v38 = vand.u32 4294901760, %v4526_v48 }
 0xaea   :  { %4292 = vmatmul.f32.vlgmr.msra.gmra.mxu1 %v4075_v27  ;;  %v4574_v27 = vand.u32 4294901760, %v4573_v61 }
 0xaeb   :  { %4244 = vmatmul.f32.gmra.mxu0 %v8934_v9  ;;  %v4533_v9 = vand.u32 4294901760, %v4486_v24  ;;  %v4528_v50 = vsub.f32 %v4526_v48, %v4527_v38 }
 0xaec   :  { %4575 = vmatpush.msrb.mxu1 %v4574_v27 }
 0xaed   :  { %4670 = vmatmul.f32.gmra.mxu3 %v4519_v5  ;;  %v4534_v10 = vsub.f32 %v4486_v24, %v4533_v9  ;;  %v4529_v47 = vand.u32 4294901760, %v4528_v50  ;;  %v9105_v5 = vpop.permute.xlu1 %4473 }
 0xaee   :  { %4750 = vmatpush.msra.mxu1 %v4505_v32 }
 0xaef   :  { %4624 = vmatmul.f32.gmra.mxu2 %v4518_v37  ;;  %v4535_v13 = vand.u32 4294901760, %v4534_v10 }
 0xaf0   :  { %4752 = vmatpush.msra.mxu1 %v4507_v8 }
 0xaf1   :  { %v4536_v6 = vsub.f32 %v4534_v10, %v4535_v13 }
 0xaf2   :  { %4298 = vmatmul.f32.gmra.mxu1 %v4083_v58  ;;  %v4542_v58 = vsub.f32 %v4489_v16, %v4541_v15 }
 0xaf3   :  { %4249 = vmatmul.f32.gmra.mxu0 %v8960_v44  ;;  %v4537_v44 = vand.u32 4294901760, %v4536_v6 }
 0xaf4   :  { %v4543_v59 = vand.u32 4294901760, %v4542_v58 }
 0xaf5   :  { %4676 = vmatmul.f32.gmra.mxu3 %v4527_v38  ;;  %v4464_v38 = vpop.permute.xlu0 %4463  ;;  %v4459_v31 = vpop.permute.xlu1 %4458 }
 0xaf6   :  { %v4544_v26 = vsub.f32 %v4542_v58, %v4543_v59 }
 0xaf7   :  { %4629 = vmatmul.f32.gmra.mxu2 %v4526_v48 }
 0xaf8   :  { %v4545_v23 = vand.u32 4294901760, %v4544_v26 }
 0xafa   :  { %4304 = vmatmul.f32.gmra.mxu1 %v4091_v12 }
 0xafb   :  { %4254 = vmatmul.f32.gmra.mxu0 %v8978_v42 }
 0xafd   :  { %4682 = vmatmul.f32.gmra.mxu3 %v4535_v13  ;;  %v4029_v16 = vpop.permute.xlu0 %4028  ;;  %v4024_v14 = vpop.permute.xlu1 %4023 }
 0xaff   :  { %4634 = vmatmul.f32.gmra.mxu2 %v4534_v10 }
 0xb02   :  { %4310 = vmatmul.f32.gmra.mxu1 %v4099_v1 }
 0xb03   :  { %4259 = vmatmul.f32.gmra.mxu0 %v8996_v30 }
 0xb05   :  { %4688 = vmatmul.f32.gmra.mxu3 %v4543_v59 }
 0xb07   :  { %4639 = vmatmul.f32.gmra.mxu2 %v4542_v58 }
 0xb0a   :  { %4316 = vmatmul.f32.gmra.mxu1 %v4107_v33 }
 0xb0b   :  { %4514 = vmatmul.f32.vlgmr.msrb.gmra.mxu0 %v4513_v54 }
 0xb12   :  { %4577 = vmatmul.f32.vlgmr.msrb.gmra.mxu1 %v9016_v39 }
 0xb13   :  { %4522 = vmatmul.f32.gmra.mxu0 %v4521_v4 }
 0xb1a   :  { %4581 = vmatmul.f32.gmra.mxu1 %v9032_v40 }
 0xb1b   :  { %4530 = vmatmul.f32.gmra.mxu0 %v4529_v47 }
 0xb22   :  { %4585 = vmatmul.f32.gmra.mxu1 %v4525_v41 }
 0xb23   :  { %4538 = vmatmul.f32.gmra.mxu0 %v4537_v44  ;;  %v4014_v44 = vpop.permute.xlu0 %4013 }
 0xb2a   :  { %4589 = vmatmul.f32.gmra.mxu1 %v4533_v9 }
 0xb2b   :  { %4546 = vmatmul.f32.gmra.mxu0 %v4545_v23 }
 0xb32   :  { %4593 = vmatmul.f32.gmra.mxu1 %v4541_v15 }
 0xb33   :  { %4715 = vmatmul.f32.vlgmr.msra.gmra.mxu0 %v9016_v39 }
 0xb38   :  { %v9062_v51 = vpop.f32.mrf.mxu0 }
 0xb3a   :  { %4754 = vmatmul.f32.vlgmr.msra.gmra.mxu1 %v9016_v39 }
 0xb3b   :  { %4719 = vmatmul.f32.gmra.mxu0 %v9032_v40 }
 0xb3f   :  { %v9066_v28 = vpop.f32.mrf.mxu1 }
 0xb40   :  { %v9068_v12 = vpop.f32.mrf.mxu0  ;;  %v9087_v49 = vpop.f32.mrf.mxu3 }
 0xb42   :  { %4758 = vmatmul.f32.gmra.mxu1 %v9032_v40  ;;  %v9085_v11 = vpop.f32.mrf.mxu2 }
 0xb43   :  { %4723 = vmatmul.f32.gmra.mxu0 %v4525_v41 }
 0xb47   :  { %v9071_v52 = vpop.f32.mrf.mxu1 }
 0xb48   :  { %v9073_v19 = vpop.f32.mrf.mxu0  ;;  %v9091_v32 = vpop.f32.mrf.mxu3 }
 0xb4a   :  { %4762 = vmatmul.f32.gmra.mxu1 %v4525_v41  ;;  %v9089_v39 = vpop.f32.mrf.mxu2  ;;  %v4469_v41 = vpop.permute.xlu2 %4468 }
 0xb4b   :  { %4727 = vmatmul.f32.gmra.mxu0 %v4533_v9 }
 0xb4f   :  { %v9075_v34 = vpop.f32.mrf.mxu1 }
 0xb50   :  { %v4103_v42 = vpop.f32.mrf.mxu0  ;;  %v9097_v55 = vpop.f32.mrf.mxu3 }
 0xb51   :  { %v4104_v4 = vadd.f32 %v4103_v42, %v4024_v14 }
 0xb52   :  { %4766 = vmatmul.f32.gmra.mxu1 %v4533_v9  ;;  %v9093_v8 = vpop.f32.mrf.mxu2  ;;  %v4454_v13 = vpop.permute.xlu2 %4453 }
 0xb53   :  { %4731 = vmatmul.f32.gmra.mxu0 %v4541_v15 }
 0xb57   :  { %v4194_v2 = vpop.f32.mrf.mxu1 }
 0xb58   :  { %v4111_v17 = vpop.f32.mrf.mxu0  ;;  %v9101_v7 = vpop.f32.mrf.mxu3  ;;  %v4195_v23 = vadd.f32 %v4194_v2, %v4104_v4 }
 0xb59   :  { %v4112_v58 = vadd.f32 %v4111_v17, %v4029_v16 }
 0xb5a   :  { %4770 = vmatmul.f32.gmra.mxu1 %v4541_v15  ;;  %v4380_v40 = vpop.f32.mrf.mxu2  ;;  %v4019_v47 = vpop.permute.xlu2 %4018 }
 0xb5b   :  { %v4096_v26 = vadd.f32 %v9073_v19, %v4019_v47 }
 0xb5f   :  { %v4198_v1 = vpop.f32.mrf.mxu1 }
 0xb60   :  { %v9077_v25 = vpop.f32.mrf.mxu0  ;;  %v4431_v43 = vpop.f32.mrf.mxu3  ;;  %v4199_v60 = vadd.f32 %v4198_v1, %v4112_v58 }
 0xb61   :  { %v4009_v1 = vpop.permute.xlu1 %4008 }
 0xb62   :  { %v4384_v0 = vpop.f32.mrf.mxu2  ;;  %v4080_v58 = vadd.f32 %v9062_v51, %v4009_v1 }
 0xb67   :  { %v9079_v29 = vpop.f32.mrf.mxu1 }
 0xb68   :  { %v9081_v30 = vpop.f32.mrf.mxu0  ;;  %v9109_v48 = vpop.f32.mrf.mxu3 }
 0xb69   :  { %10004 = vst [vmem:[#allocation30_spill] sm:$0xff] %v9109_v48  ;;  %v4088_v48 = vadd.f32 %v9068_v12, %v4014_v44  ;;  %v4183_v12 = vadd.f32 %v9066_v28, %v4080_v58 }
 0xb6a   :  { %v9107_v20 = vpop.f32.mrf.mxu2 }
 0xb6f   :  { %v9083_v18 = vpop.f32.mrf.mxu1 }
 0xb70   :  { %v4250_v33 = vpop.f32.mrf.mxu0  ;;  %v9113_v22 = vpop.f32.mrf.mxu3  ;;  %v10011_v44 = vld [vmem:[#allocation30_spill] sm:$0xff] }
 0xb71   :  { %10006 = vst [vmem:[#allocation14_spill] sm:$0xff] %v9113_v22 }
 0xb72   :  { %v4625_v24 = vpop.f32.mrf.mxu2 }
 0xb77   :  { %v4305_v35 = vpop.f32.mrf.mxu1 }
 0xb78   :  { %v4255_v45 = vpop.f32.mrf.mxu0  ;;  %v4677_v6 = vpop.f32.mrf.mxu3 }
 0xb79   :  { %v4256_v17 = vadd.f32 %v4255_v45, %v4195_v23 }
 0xb7a   :  { %v4630_v59 = vpop.f32.mrf.mxu2 }
 0xb7f   :  { %v4311_v46 = vpop.f32.mrf.mxu1 }
 0xb80   :  { %v4260_v53 = vpop.f32.mrf.mxu0 }
 0xb81   :  { %v4261_v50 = vadd.f32 %v4260_v53, %v4199_v60  ;;  %v4312_v53 = vadd.f32 %v4311_v46, %v4256_v17 }
 0xb87   :  { %v4317_v3 = vpop.f32.mrf.mxu1 }
 0xb88   :  { %v9095_v63 = vpop.f32.mrf.mxu0 }
 0xb8f   :  { %v9099_v36 = vpop.f32.mrf.mxu1 }
 0xb90   :  { %v4523_v21 = vpop.f32.mrf.mxu0 }
 0xb97   :  { %v9103_v56 = vpop.f32.mrf.mxu1 }
 0xb98   :  { %v4531_v37 = vpop.f32.mrf.mxu0 }
 0xb9f   :  { %v4586_v57 = vpop.f32.mrf.mxu1 }
 0xba0   :  { %v4539_v61 = vpop.f32.mrf.mxu0 }
 0xba1   :  { %v4540_v2 = vadd.f32 %v4539_v61, %v4469_v41 }
 0xba7   :  { %v4590_v27 = vpop.f32.mrf.mxu1 }
 0xba8   :  { %v4547_v62 = vpop.f32.mrf.mxu0  ;;  %v4591_v45 = vadd.f32 %v4590_v27, %v4540_v2 }
 0xbaf   :  { %v4594_v9 = vpop.f32.mrf.mxu1 }
 0xbb0   :  { %v9111_v10 = vpop.f32.mrf.mxu0 }
 0xbb1   :  { %10005 = vst [vmem:[#allocation27_spill] sm:$0xff] %v9111_v10  ;;  %v4318_v10 = vadd.f32 %v4317_v3, %v4261_v50  ;;  %v4635_v3 = vpop.f32.mrf.mxu2  ;;  %v4381_v50 = vadd.f32 %v4380_v40, %v4312_v53  ;;  %v4516_v40 = vadd.f32 %v9095_v63, %v4454_v13 }
 0xbb2   :  { %v4636_v61 = vadd.f32 %v4635_v3, %v4591_v45 }
 0xbb3   :  { %v4385_v14 = vadd.f32 %v4384_v0, %v4318_v10  ;;  %v4683_v0 = vpop.f32.mrf.mxu3 }
 0xbb4   :  { %v4684_v27 = vadd.f32 %v4683_v0, %v4636_v61 }
 0xbb5   :  { %v4432_v47 = vadd.f32 %v4431_v43, %v4385_v14 }
 0xbb7   :  { %v9115_v15 = vpop.f32.mrf.mxu1  ;;  %6076 = vtanh.f32 %v4432_v47 }
 0xbb8   :  { %10007 = vst [vmem:[#allocation25_spill] sm:$0xff] %v9115_v15  ;;  %v9117_v54 = vpop.f32.mrf.mxu0  ;;  %v4191_v15 = vadd.f32 %v9075_v34, %v4096_v26  ;;  %v4532_v34 = vadd.f32 %v4531_v37, %v4464_v38  ;;  %v4428_v37 = vadd.f32 %v9101_v7, %v4381_v50 }
 0xbb9   :  { %10008 = vst [vmem:[#allocation28_spill] sm:$0xff] %v9117_v54  ;;  %v4187_v54 = vadd.f32 %v9071_v52, %v4088_v48  ;;  %v4241_v52 = vadd.f32 %v9077_v25, %v4183_v12  ;;  %v4548_v25 = vadd.f32 %v4547_v62, %v9105_v5 }
 0xbba   :  { %v4251_v42 = vadd.f32 %v4250_v33, %v4191_v15  ;;  %v4524_v33 = vadd.f32 %v4523_v21, %v4459_v31  ;;  %v4587_v46 = vadd.f32 %v4586_v57, %v4532_v34  ;;  %6078 = vtanh.f32 %v4428_v37 }
 0xbbb   :  { %v4246_v19 = vadd.f32 %v9081_v30, %v4187_v54  ;;  %v4294_v30 = vadd.f32 %v9079_v29, %v4241_v52  ;;  %v4595_v57 = vadd.f32 %v4594_v9, %v4548_v25  ;;  %v4689_v10 = vpop.f32.mrf.mxu3 }
 0xbbc   :  { %v4306_v60 = vadd.f32 %v4305_v35, %v4251_v42  ;;  %v4583_v28 = vadd.f32 %v9103_v56, %v4524_v33  ;;  %v4631_v21 = vadd.f32 %v4630_v59, %v4587_v46  ;;  %v4640_v56 = vpop.f32.mrf.mxu2  ;;  %v10012_v42 = vld [vmem:[#allocation27_spill] sm:$0xff] }
 0xbbd   :  { %v4300_v4 = vadd.f32 %v9083_v18, %v4246_v19  ;;  %v4369_v29 = vadd.f32 %v9085_v11, %v4294_v30  ;;  %v6077_v31 = vpop.eup %6076  ;;  %v4641_v62 = vadd.f32 %v4640_v56, %v4595_v57 }
 0xbbe   :  { %v4377_v51 = vadd.f32 %v9093_v8, %v4306_v60  ;;  %v4579_v8 = vadd.f32 %v9099_v36, %v4516_v40  ;;  %v4678_v7 = vadd.f32 %v4677_v6, %v4631_v21  ;;  %v10009_v36 = vld [vmem:[#allocation14_spill] sm:$0xff]  ;;  %v9147_v13 = vand.u32 4294901760, %v6077_v31  ;;  %v4783_v40 = vld [vmem:[%s9642_s18 + $0x8] sm:$0xff] }
 0xbbf   :  { %v9121_v22 = vpop.f32.mrf.mxu1  ;;  %v4373_v35 = vadd.f32 %v9089_v39, %v4300_v4  ;;  %v4626_v39 = vadd.f32 %v4625_v24, %v4583_v28  ;;  %v4690_v26 = vadd.f32 %v4689_v10, %v4641_v62  ;;  %v10013_v12 = vld [vmem:[#allocation25_spill] sm:$0xff] }
 0xbc0   :  { %v4724_v16 = vpop.f32.mrf.mxu0  ;;  %v4424_v43 = vadd.f32 %v9097_v55, %v4377_v51  ;;  %v4621_v5 = vadd.f32 %v9107_v20, %v4579_v8  ;;  %v4416_v55 = vadd.f32 %v9087_v49, %v4369_v29  ;;  %v10010_v15 = vld [vmem:[#allocation28_spill] sm:$0xff]  ;;  %v6079_v6 = vpop.eup %6078  ;;  %v9159_v19 = vsub.f32 %v6077_v31, %v9147_v13 }
 0xbc1   :  { %v4420_v41 = vadd.f32 %v9091_v32, %v4373_v35  ;;  %v4672_v9 = vadd.f32 %v10009_v36, %v4626_v39  ;;  %v4725_v11 = vadd.f32 %v4724_v16, %v4678_v7  ;;  %v4782_v32 = vld [vmem:[%s9642_s18] sm:$0xff]  ;;  %v9156_v58 = vand.u32 4294901760, %v6079_v6 }
 0xbc2   :  { %6080 = vtanh.f32 %v4424_v43  ;;  %v4666_v49 = vadd.f32 %v10011_v44, %v4621_v5  ;;  %v4792_v16 = vsel %vm4790_vm5, %v4782_v32, 0 }
 0xbc3   :  { %6082 = vtanh.f32 %v4420_v41  ;;  %v4721_v54 = vadd.f32 %v10010_v15, %v4672_v9  ;;  %v9164_v34 = vand.u32 4294901760, %v4792_v16  ;;  %v9182_v51 = vsub.f32 %v6079_v6, %v9156_v58 }
 0xbc4   :  { %6084 = vtanh.f32 %v4416_v55  ;;  %v4717_v53 = vadd.f32 %v10012_v42, %v4666_v49  ;;  %v4795_v41 = vsel %vm4790_vm5, %v4783_v40, 0 }
 0xbc5   :  { %v4760_v23 = vadd.f32 %v9121_v22, %v4721_v54  ;;  %v9190_v28 = vsub.f32 %v4792_v16, %v9164_v34  ;;  %v5359_v8 = vand.u32 4294901760, %v9182_v51  ;;  %v9236_v9 = vand.u32 4294901760, %v4795_v41 }
 0xbc6   :  { %v4756_v4 = vadd.f32 %v10013_v12, %v4717_v53 }
 0xbc7   :  { %v4763_v48 = vpop.f32.mrf.mxu1  ;;  %v9168_v50 = vand.u32 4294901760, %v4760_v23  ;;  %v4838_v56 = vand.u32 4294901760, %v9190_v28  ;;  %v5360_v62 = vsub.f32 %v9182_v51, %v5359_v8 }
 0xbc8   :  { %v4728_v18 = vpop.f32.mrf.mxu0  ;;  %v4764_v59 = vadd.f32 %v4763_v48, %v4725_v11  ;;  %v6081_v1 = vpop.eup %6080  ;;  %v5353_v48 = vand.u32 4294901760, %v9159_v19  ;;  %v9184_v30 = vand.u32 4294901760, %v4756_v4 }
 0xbc9   :  { %v4729_v38 = vadd.f32 %v4728_v18, %v4684_v27  ;;  %v6083_v60 = vpop.eup %6082  ;;  %v9166_v45 = vand.u32 4294901760, %v6081_v1  ;;  %v9193_v61 = vsub.f32 %v4760_v23, %v9168_v50  ;;  %v4839_v11 = vsub.f32 %v9190_v28, %v4838_v56 }
 0xbca   :  { %v9161_v2 = vand.u32 4294901760, %v4764_v59  ;;  %v6085_v33 = vpop.eup %6084  ;;  %v9175_v46 = vand.u32 4294901760, %v6083_v60  ;;  %v5354_v43 = vsub.f32 %v9159_v19, %v5353_v48  ;;  %v9215_v39 = vsub.f32 %v4756_v4, %v9184_v30 }
 0xbcb   :  { %v9197_v37 = vsub.f32 %v6081_v1, %v9166_v45  ;;  %v9202_v25 = vand.u32 4294901760, %v6085_v33  ;;  %v5361_v6 = vand.u32 4294901760, %v5360_v62  ;;  %v4840_v23 = vand.u32 4294901760, %v4839_v11 }
 0xbcc   :  { %v9178_v0 = vsub.f32 %v4764_v59, %v9161_v2  ;;  %v9212_v29 = vsub.f32 %v6083_v60, %v9175_v46  ;;  %v5355_v10 = vand.u32 4294901760, %v5354_v43  ;;  %v4784_v59 = vld [vmem:[%s9642_s18 + $0x10] sm:$0xff] }
 0xbcd   :  { %v9228_v5 = vsub.f32 %v6085_v33, %v9202_v25  ;;  %v4798_v1 = vsel %vm4790_vm5, %v4784_v59, 0 }
 0xbce   :  { %v4926_v57 = vand.u32 4294901760, %v9178_v0  ;;  %v5371_v36 = vand.u32 4294901760, %v9212_v29  ;;  %v9268_v12 = vand.u32 4294901760, %v4798_v1 }
 0xbcf   :  { %v4767_v63 = vpop.f32.mrf.mxu1 }
 0xbd0   :  { %v4768_v24 = vadd.f32 %v4767_v63, %v4729_v38  ;;  %v4732_v20 = vpop.f32.mrf.mxu0  ;;  %v5365_v38 = vand.u32 4294901760, %v9197_v37  ;;  %v4932_v63 = vand.u32 4294901760, %v9193_v61  ;;  %v4927_v55 = vsub.f32 %v9178_v0, %v4926_v57 }
 0xbd1   :  { %v4733_v14 = vadd.f32 %v4732_v20, %v4690_v26  ;;  %v5377_v20 = vand.u32 4294901760, %v9228_v5  ;;  %v5372_v49 = vsub.f32 %v9212_v29, %v5371_v36  ;;  %v9258_v26 = vsub.f32 %v4795_v41, %v9236_v9 }
 0xbd2   :  { %v9152_v17 = vand.u32 4294901760, %v4768_v24  ;;  %v5366_v15 = vsub.f32 %v9197_v37, %v5365_v38  ;;  %v4933_v54 = vsub.f32 %v9193_v61, %v4932_v63  ;;  %v4928_v44 = vand.u32 4294901760, %v4927_v55 }
 0xbd3   :  { %v4846_v60 = vand.u32 4294901760, %v9258_v26 }
 0xbd4   :  { %v9171_v47 = vsub.f32 %v4768_v24, %v9152_v17  ;;  %v4938_v24 = vand.u32 4294901760, %v9215_v39  ;;  %v5367_v42 = vand.u32 4294901760, %v5366_v15  ;;  %v4934_v53 = vand.u32 4294901760, %v4933_v54  ;;  %v4775_v54 = vld [vmem:[%s9643_s17 + $0x8] sm:$0xff] }
 0xbd5   :  { %v4847_v33 = vsub.f32 %v9258_v26, %v4846_v60 }
 0xbd6   :  { %v4920_v18 = vand.u32 4294901760, %v9171_v47  ;;  %v4939_v16 = vsub.f32 %v9215_v39, %v4938_v24 }
 0xbd7   :  { %v4771_v3 = vpop.f32.mrf.mxu1 }
 0xbd8   :  { %v4772_v22 = vadd.f32 %v4771_v3, %v4733_v14  ;;  %v4921_v7 = vsub.f32 %v9171_v47, %v4920_v18  ;;  %v5378_v14 = vsub.f32 %v9228_v5, %v5377_v20  ;;  %v5373_v3 = vand.u32 4294901760, %v5372_v49  ;;  %v4776_v49 = vld [vmem:[%s9643_s17 + $0x10] sm:$0xff] }
 0xbd9   :  { %v4940_v4 = vand.u32 4294901760, %v4939_v16  ;;  %v5237_v16 = vsel %vm4790_vm5, %v4776_v49, 0 }
 0xbda   :  { %v9173_v52 = vand.u32 4294901760, %v4772_v22  ;;  %v4922_v32 = vand.u32 4294901760, %v4921_v7 }
 0xbdc   :  { %v4913_v35 = vsub.f32 %v4772_v22, %v9173_v52  ;;  %4827 = vmatpush.msrb.mxu2 %v9173_v52  ;;  %5054 = vmatpush.msrb.mxu1 %v9173_v52  ;;  %v4785_v22 = vld [vmem:[%s9642_s18 + $0x18] sm:$0xff] }
 0xbde   :  { %v4914_v21 = vand.u32 4294901760, %v4913_v35  ;;  %4829 = vmatpush.msrb.mxu2 %v9152_v17  ;;  %4988 = vmatpush.msrb.mxu0 %v4913_v35 }
 0xbdf   :  { %5056 = vmatpush.msrb.mxu1 %v9152_v17 }
 0xbe0   :  { %4831 = vmatpush.msrb.mxu2 %v9161_v2  ;;  %4991 = vmatpush.msrb.mxu0 %v9171_v47  ;;  %v4915_v27 = vsub.f32 %v4913_v35, %v4914_v21  ;;  %v5379_v47 = vand.u32 4294901760, %v5378_v14  ;;  %v4801_v35 = vsel %vm4790_vm5, %v4785_v22, 0  ;;  %v4777_v14 = vld [vmem:[%s9643_s17 + $0x18] sm:$0xff] }
 0xbe1   :  { %5058 = vmatpush.msrb.mxu1 %v9161_v2  ;;  %v9287_v40 = vand.u32 4294901760, %v4801_v35 }
 0xbe2   :  { %4833 = vmatpush.msrb.mxu2 %v9168_v50  ;;  %4994 = vmatpush.msrb.mxu0 %v9178_v0  ;;  %v4916_v31 = vand.u32 4294901760, %v4915_v27  ;;  %v4853_v0 = vsub.f32 %v4798_v1, %v9268_v12 }
 0xbe3   :  { %5060 = vmatpush.msrb.mxu1 %v9168_v50 }
 0xbe4   :  { %4835 = vmatpush.msrb.mxu2 %v9184_v30  ;;  %4917 = vmatpush.msrb.mxu3 %v4916_v31 }
 0xbe5   :  { %4997 = vmatpush.msrb.mxu0 %v9193_v61  ;;  %5062 = vmatpush.msrb.mxu1 %v9184_v30  ;;  %v4848_v61 = vand.u32 4294901760, %v4847_v33  ;;  %v4778_v33 = vld [vmem:[%s9643_s17 + $0x20] sm:$0xff] }
 0xbe6   :  { %5126 = vmatpush.msra.mxu2 %v4914_v21  ;;  %4923 = vmatpush.msrb.mxu3 %v4922_v32 }
 0xbe7   :  { %5356 = vmatpush.msra.mxu1 %v5355_v10  ;;  %5000 = vmatpush.msrb.mxu0 %v9215_v39  ;;  %v4774_v10 = vld [vmem:[%s9643_s17] sm:$0xff] }
 0xbe8   :  { %5130 = vmatpush.msra.mxu2 %v4920_v18  ;;  %4929 = vmatpush.msrb.mxu3 %v4928_v44  ;;  %v4854_v18 = vand.u32 4294901760, %v4853_v0 }
 0xbe9   :  { %5266 = vmatpush.msra.mxu0 %v9147_v13  ;;  %5362 = vmatpush.msra.mxu1 %v5361_v6 }
 0xbea   :  { %5134 = vmatpush.msra.mxu2 %v4926_v57  ;;  %4935 = vmatpush.msrb.mxu3 %v4934_v53  ;;  %v9380_v53 = vand.u32 4294901760, %v5237_v16 }
 0xbeb   :  { %5268 = vmatpush.msra.mxu0 %v9156_v58  ;;  %5368 = vmatpush.msra.mxu1 %v5367_v42 }
 0xbec   :  { %4841 = vmatmul.f32.vlgmr.msrb.gmra.mxu2 %v4840_v23  ;;  %4941 = vmatpush.msrb.mxu3 %v4940_v4  ;;  %v5240_v4 = vsel %vm4790_vm5, %v4777_v14, 0 }
 0xbed   :  { %5270 = vmatpush.msra.mxu0 %v9166_v45  ;;  %5138 = vmatpush.msra.mxu2 %v4932_v63 }
 0xbee   :  { %5374 = vmatpush.msra.mxu1 %v5373_v3  ;;  %4943 = vmatmul.f32.vlgmr.msrb.gmra.mxu3 %v9164_v34 }
 0xbef   :  { %5272 = vmatpush.msra.mxu0 %v9175_v46  ;;  %5142 = vmatpush.msra.mxu2 %v4938_v24  ;;  %v5231_v24 = vsel %vm4790_vm5, %v4774_v10, 0 }
 0xbf0   :  { %5188 = vmatpush.msra.mxu3 %v9173_v52  ;;  %5380 = vmatpush.msra.mxu1 %v5379_v47  ;;  %v4855_v52 = vsub.f32 %v4853_v0, %v4854_v18  ;;  %v9354_v32 = vand.u32 4294901760, %v5231_v24  ;;  %v9396_v47 = vand.u32 4294901760, %v5240_v4 }
 0xbf1   :  { %5066 = vmatmul.f32.vlgmr.msrb.gmra.mxu1 %v4838_v56  ;;  %5427 = vmatpush.msrb.mxu2 %v9159_v19 }
 0xbf2   :  { %5627 = vmatpush.msrb.mxu1 %v9147_v13  ;;  %5190 = vmatpush.msra.mxu3 %v9152_v17  ;;  %v4786_v17 = vld [vmem:[%s9642_s18 + $0x20] sm:$0xff]  ;;  %v9361_v59 = vsub.f32 %v5231_v24, %v9354_v32 }
 0xbf3   :  { %5274 = vmatpush.msra.mxu0 %v9202_v25  ;;  %5430 = vmatpush.msrb.mxu2 %v9182_v51  ;;  %v4804_v19 = vsel %vm4790_vm5, %v4786_v17, 0  ;;  %v4787_v51 = vld [vmem:[%s9642_s18 + $0x28] sm:$0xff] }
 0xbf4   :  { %5003 = vmatmul.f32.vlgmr.msrb.gmra.mxu0 %v9190_v28  ;;  %5629 = vmatpush.msrb.mxu1 %v9156_v58  ;;  %v4861_v28 = vsub.f32 %v4801_v35, %v9287_v40  ;;  %v5277_v6 = vand.u32 4294901760, %v9361_v59  ;;  %v9407_v35 = vsub.f32 %v5240_v4, %v9396_v47 }
 0xbf5   :  { %5565 = vmatpush.msrb.mxu0 %v5353_v48  ;;  %5192 = vmatpush.msra.mxu3 %v9161_v2  ;;  %v4856_v2 = vand.u32 4294901760, %v4855_v52  ;;  %v9313_v48 = vand.u32 4294901760, %v4804_v19  ;;  %v4779_v52 = vld [vmem:[%s9643_s17 + $0x28] sm:$0xff] }
 0xbf6   :  { %5433 = vmatpush.msrb.mxu2 %v9197_v37  ;;  %5631 = vmatpush.msrb.mxu1 %v9166_v45 }
 0xbf7   :  { %5569 = vmatpush.msrb.mxu0 %v5359_v8  ;;  %4849 = vmatmul.f32.gmra.mxu2 %v4848_v61  ;;  %v4869_v37 = vsub.f32 %v4804_v19, %v9313_v48  ;;  %v5243_v61 = vsel %vm4790_vm5, %v4778_v33, 0 }
 0xbf8   :  { %5194 = vmatpush.msra.mxu3 %v9168_v50  ;;  %5436 = vmatpush.msrb.mxu2 %v9212_v29  ;;  %v4862_v50 = vand.u32 4294901760, %v4861_v28  ;;  %v9412_v17 = vand.u32 4294901760, %v5243_v61 }
 0xbf9   :  { %5573 = vmatpush.msrb.mxu0 %v5365_v38  ;;  %5633 = vmatpush.msrb.mxu1 %v9175_v46  ;;  %v4870_v43 = vand.u32 4294901760, %v4869_v37 }
 0xbfa   :  { %4947 = vmatmul.f32.gmra.mxu3 %v9236_v9  ;;  %5439 = vmatpush.msrb.mxu2 %v9228_v5  ;;  %v9423_v19 = vsub.f32 %v5243_v61, %v9412_v17 }
 0xbfb   :  { %5196 = vmatpush.msra.mxu3 %v9184_v30  ;;  %5577 = vmatpush.msrb.mxu0 %v5371_v36  ;;  %v4863_v30 = vsub.f32 %v4861_v28, %v4862_v50 }
 0xbfc   :  { %5635 = vmatpush.msrb.mxu1 %v9202_v25  ;;  %5008 = vmatmul.f32.gmra.mxu0 %v9258_v26  ;;  %v5278_v26 = vsub.f32 %v9361_v59, %v5277_v6 }
 0xbfd   :  { %5493 = vmatpush.msrb.mxu3 %v9147_v13  ;;  %5581 = vmatpush.msrb.mxu0 %v5377_v20  ;;  %v4807_v13 = vsel %vm4790_vm5, %v4787_v51, 0  ;;  %v4864_v21 = vand.u32 4294901760, %v4863_v30  ;;  %v5234_v20 = vsel %vm4790_vm5, %v4775_v54, 0  ;;  %v4780_v30 = vld [vmem:[%s9643_s17 + $0x30] sm:$0xff] }
 0xbfe   :  { %5072 = vmatmul.f32.gmra.mxu1 %v4846_v60  ;;  %v9329_v8 = vand.u32 4294901760, %v4807_v13  ;;  %v9365_v44 = vand.u32 4294901760, %v5234_v20  ;;  %v5279_v1 = vand.u32 4294901760, %v5278_v26  ;;  %v9391_v60 = vsub.f32 %v5237_v16, %v9380_v53 }
 0xbff   :  { %5495 = vmatpush.msrb.mxu3 %v9156_v58  ;;  %4857 = vmatmul.f32.gmra.mxu2 %v4856_v2  ;;  %v4788_v58 = vld [vmem:[%s9642_s18 + $0x30] sm:$0xff]  ;;  %v5246_v2 = vsel %vm4790_vm5, %v4779_v52, 0 }
 0xc00   :  { %v4877_v57 = vsub.f32 %v4807_v13, %v9329_v8  ;;  %v9375_v23 = vsub.f32 %v5234_v20, %v9365_v44  ;;  %v9428_v51 = vand.u32 4294901760, %v5246_v2 }
 0xc01   :  { %5497 = vmatpush.msrb.mxu3 %v9166_v45  ;;  %v4871_v45 = vsub.f32 %v4869_v37, %v4870_v43 }
 0xc02   :  { %4951 = vmatmul.f32.gmra.mxu3 %v9268_v12  ;;  %v4878_v39 = vand.u32 4294901760, %v4877_v57  ;;  %v5285_v42 = vand.u32 4294901760, %v9375_v23  ;;  %v9439_v13 = vsub.f32 %v5246_v2, %v9428_v51 }
 0xc03   :  { %5499 = vmatpush.msrb.mxu3 %v9175_v46  ;;  %v4810_v46 = vsel %vm4790_vm5, %v4788_v58, 0  ;;  %v4872_v29 = vand.u32 4294901760, %v4871_v45  ;;  %v4781_v45 = vld [vmem:[%s9643_s17 + $0x38] sm:$0xff] }
 0xc04   :  { %5013 = vmatmul.f32.gmra.mxu0 %v4853_v0  ;;  %v9338_v27 = vand.u32 4294901760, %v4810_v46  ;;  %v4879_v56 = vsub.f32 %v4877_v57, %v4878_v39  ;;  %v5286_v3 = vsub.f32 %v9375_v23, %v5285_v42 }
 0xc05   :  { %5501 = vmatpush.msrb.mxu3 %v9202_v25  ;;  %v4789_v25 = vld [vmem:[%s9642_s18 + $0x38] sm:$0xff] }
 0xc06   :  { %5078 = vmatmul.f32.gmra.mxu1 %v4854_v18  ;;  %v4885_v41 = vsub.f32 %v4810_v46, %v9338_v27  ;;  %v4813_v7 = vsel %vm4790_vm5, %v4789_v25, 0  ;;  %v4880_v38 = vand.u32 4294901760, %v4879_v56  ;;  %v5287_v22 = vand.u32 4294901760, %v5286_v3 }
 0xc07   :  { %4865 = vmatmul.f32.gmra.mxu2 %v4864_v21  ;;  %v9346_v31 = vand.u32 4294901760, %v4813_v7  ;;  %v5249_v21 = vsel %vm4790_vm5, %v4780_v30, 0 }
 0xc08   :  { %v4886_v63 = vand.u32 4294901760, %v4885_v41  ;;  %v9444_v58 = vand.u32 4294901760, %v5249_v21 }
 0xc09   :  { %v4893_v62 = vsub.f32 %v4813_v7, %v9346_v31 }
 0xc0a   :  { %4955 = vmatmul.f32.gmra.mxu3 %v9287_v40  ;;  %v4887_v5 = vsub.f32 %v4885_v41, %v4886_v63  ;;  %v9455_v46 = vsub.f32 %v5249_v21, %v9444_v58 }
 0xc0b   :  { %v4894_v36 = vand.u32 4294901760, %v4893_v62 }
 0xc0c   :  { %5018 = vmatmul.f32.gmra.mxu0 %v4861_v28  ;;  %v4888_v55 = vand.u32 4294901760, %v4887_v5 }
 0xc0d   :  { %v4895_v11 = vsub.f32 %v4893_v62, %v4894_v36 }
 0xc0e   :  { %5084 = vmatmul.f32.gmra.mxu1 %v4862_v50 }
 0xc0f   :  { %4873 = vmatmul.f32.gmra.mxu2 %v4872_v29  ;;  %v4896_v15 = vand.u32 4294901760, %v4895_v11  ;;  %v5252_v29 = vsel %vm4790_vm5, %v4781_v45, 0 }
 0xc10   :  { %v9460_v25 = vand.u32 4294901760, %v5252_v29 }
 0xc12   :  { %4959 = vmatmul.f32.gmra.mxu3 %v9313_v48 }
 0xc14   :  { %5023 = vmatmul.f32.gmra.mxu0 %v4869_v37 }
 0xc16   :  { %5090 = vmatmul.f32.gmra.mxu1 %v4870_v43 }
 0xc17   :  { %4881 = vmatmul.f32.gmra.mxu2 %v4880_v38 }
 0xc1a   :  { %4963 = vmatmul.f32.gmra.mxu3 %v9329_v8 }
 0xc1c   :  { %5028 = vmatmul.f32.gmra.mxu0 %v4877_v57 }
 0xc1e   :  { %5096 = vmatmul.f32.gmra.mxu1 %v4878_v39 }
 0xc1f   :  { %4889 = vmatmul.f32.gmra.mxu2 %v4888_v55 }
 0xc22   :  { %4967 = vmatmul.f32.gmra.mxu3 %v9338_v27 }
 0xc24   :  { %5033 = vmatmul.f32.gmra.mxu0 %v4885_v41  ;;  %v9468_v41 = vsub.f32 %v5252_v29, %v9460_v25 }
 0xc26   :  { %5102 = vmatmul.f32.gmra.mxu1 %v4886_v63  ;;  %v5333_v38 = vand.u32 4294901760, %v9468_v41 }
 0xc27   :  { %4897 = vmatmul.f32.gmra.mxu2 %v4896_v15 }
 0xc2a   :  { %4971 = vmatmul.f32.gmra.mxu3 %v9346_v31 }
 0xc2c   :  { %5038 = vmatmul.f32.gmra.mxu0 %v4893_v62 }
 0xc2e   :  { %5108 = vmatmul.f32.gmra.mxu1 %v4894_v36 }
 0xc2f   :  { %5144 = vmatmul.f32.vlgmr.msra.gmra.mxu2 %v9164_v34 }
 0xc32   :  { %5198 = vmatmul.f32.vlgmr.msra.gmra.mxu3 %v9164_v34  ;;  %v5293_v34 = vand.u32 4294901760, %v9391_v60 }
 0xc34   :  { %5280 = vmatmul.f32.vlgmr.msra.gmra.mxu0 %v5279_v1  ;;  %v5294_v0 = vsub.f32 %v9391_v60, %v5293_v34 }
 0xc36   :  { %5382 = vmatmul.f32.vlgmr.msra.gmra.mxu1 %v9354_v32  ;;  %v5295_v18 = vand.u32 4294901760, %v5294_v0 }
 0xc37   :  { %5148 = vmatmul.f32.gmra.mxu2 %v9236_v9 }
 0xc3a   :  { %5202 = vmatmul.f32.gmra.mxu3 %v9236_v9  ;;  %v5301_v9 = vand.u32 4294901760, %v9407_v35 }
 0xc3c   :  { %5288 = vmatmul.f32.gmra.mxu0 %v5287_v22  ;;  %v5302_v28 = vsub.f32 %v9407_v35, %v5301_v9 }
 0xc3e   :  { %5386 = vmatmul.f32.gmra.mxu1 %v9365_v44  ;;  %v5303_v50 = vand.u32 4294901760, %v5302_v28 }
 0xc3f   :  { %5152 = vmatmul.f32.gmra.mxu2 %v9268_v12 }
 0xc42   :  { %5206 = vmatmul.f32.gmra.mxu3 %v9268_v12  ;;  %v5309_v12 = vand.u32 4294901760, %v9423_v19 }
 0xc44   :  { %5296 = vmatmul.f32.gmra.mxu0 %v5295_v18  ;;  %v5310_v37 = vsub.f32 %v9423_v19, %v5309_v12 }
 0xc46   :  { %5390 = vmatmul.f32.gmra.mxu1 %v9380_v53  ;;  %v5311_v43 = vand.u32 4294901760, %v5310_v37 }
 0xc47   :  { %5156 = vmatmul.f32.gmra.mxu2 %v9287_v40 }
 0xc4a   :  { %5210 = vmatmul.f32.gmra.mxu3 %v9287_v40  ;;  %v5317_v40 = vand.u32 4294901760, %v9439_v13 }
 0xc4c   :  { %5304 = vmatmul.f32.gmra.mxu0 %v5303_v50  ;;  %v5318_v57 = vsub.f32 %v9439_v13, %v5317_v40 }
 0xc4e   :  { %5394 = vmatmul.f32.gmra.mxu1 %v9396_v47  ;;  %v5319_v39 = vand.u32 4294901760, %v5318_v57 }
 0xc4f   :  { %5160 = vmatmul.f32.gmra.mxu2 %v9313_v48 }
 0xc52   :  { %5214 = vmatmul.f32.gmra.mxu3 %v9313_v48  ;;  %v5325_v48 = vand.u32 4294901760, %v9455_v46 }
 0xc54   :  { %5312 = vmatmul.f32.gmra.mxu0 %v5311_v43  ;;  %v5326_v56 = vsub.f32 %v9455_v46, %v5325_v48 }
 0xc56   :  { %5398 = vmatmul.f32.gmra.mxu1 %v9412_v17  ;;  %v5327_v7 = vand.u32 4294901760, %v5326_v56 }
 0xc57   :  { %5164 = vmatmul.f32.gmra.mxu2 %v9329_v8 }
 0xc5a   :  { %5218 = vmatmul.f32.gmra.mxu3 %v9329_v8  ;;  %v5334_v8 = vsub.f32 %v9468_v41, %v5333_v38 }
 0xc5c   :  { %5320 = vmatmul.f32.gmra.mxu0 %v5319_v39  ;;  %v5335_v63 = vand.u32 4294901760, %v5334_v8 }
 0xc5e   :  { %5402 = vmatmul.f32.gmra.mxu1 %v9428_v51 }
 0xc5f   :  { %5168 = vmatmul.f32.gmra.mxu2 %v9338_v27 }
 0xc62   :  { %5222 = vmatmul.f32.gmra.mxu3 %v9338_v27 }
 0xc64   :  { %5328 = vmatmul.f32.gmra.mxu0 %v5327_v7 }
 0xc66   :  { %5406 = vmatmul.f32.gmra.mxu1 %v9444_v58 }
 0xc67   :  { %5172 = vmatmul.f32.gmra.mxu2 %v9346_v31 }
 0xc6a   :  { %5226 = vmatmul.f32.gmra.mxu3 %v9346_v31 }
 0xc6c   :  { %5336 = vmatmul.f32.gmra.mxu0 %v5335_v63 }
 0xc6e   :  { %5410 = vmatmul.f32.gmra.mxu1 %v9460_v25  ;;  %v5067_v62 = vpop.f32.mrf.mxu1 }
 0xc6f   :  { %5442 = vmatmul.f32.vlgmr.msrb.gmra.mxu2 %v9361_v59  ;;  %v4842_v5 = vpop.f32.mrf.mxu2 }
 0xc71   :  { %v5004_v27 = vpop.f32.mrf.mxu0  ;;  %v4944_v55 = vpop.f32.mrf.mxu3 }
 0xc72   :  { %5505 = vmatmul.f32.vlgmr.msrb.gmra.mxu3 %v5277_v6  ;;  %v4945_v36 = vadd.f32 %v4944_v55, %v4842_v5 }
 0xc74   :  { %v5005_v10 = vadd.f32 %v5004_v27, %v4945_v36  ;;  %5583 = vmatmul.f32.vlgmr.msrb.gmra.mxu0 %v9354_v32 }
 0xc76   :  { %5637 = vmatmul.f32.vlgmr.msrb.gmra.mxu1 %v9354_v32  ;;  %v9486_v31 = vadd.f32 %v5067_v62, %v5005_v10 }
 0xc77   :  { %5447 = vmatmul.f32.gmra.mxu2 %v9375_v23 }
 0xc79   :  { %v5009_v15 = vpop.f32.mrf.mxu0 }
 0xc7a   :  { %v4850_v11 = vpop.f32.mrf.mxu2  ;;  %5511 = vmatmul.f32.gmra.mxu3 %v5285_v42 }
 0xc7b   :  { %v5073_v24 = vpop.f32.mrf.mxu1 }
 0xc7c   :  { %5587 = vmatmul.f32.gmra.mxu0 %v9365_v44 }
 0xc7d   :  { %v4948_v54 = vpop.f32.mrf.mxu3 }
 0xc7e   :  { %5641 = vmatmul.f32.gmra.mxu1 %v9365_v44  ;;  %v4949_v59 = vadd.f32 %v4948_v54, %v4850_v11 }
 0xc7f   :  { %5452 = vmatmul.f32.gmra.mxu2 %v9391_v60 }
 0xc80   :  { %v5010_v20 = vadd.f32 %v5009_v15, %v4949_v59 }
 0xc81   :  { %v5014_v26 = vpop.f32.mrf.mxu0 }
 0xc82   :  { %v9493_v32 = vadd.f32 %v5073_v24, %v5010_v20  ;;  %v4858_v6 = vpop.f32.mrf.mxu2  ;;  %5517 = vmatmul.f32.gmra.mxu3 %v5293_v34 }
 0xc83   :  { %v5079_v49 = vpop.f32.mrf.mxu1 }
 0xc84   :  { %5591 = vmatmul.f32.gmra.mxu0 %v9380_v53 }
 0xc85   :  { %v4952_v23 = vpop.f32.mrf.mxu3 }
 0xc86   :  { %5645 = vmatmul.f32.gmra.mxu1 %v9380_v53  ;;  %v4953_v16 = vadd.f32 %v4952_v23, %v4858_v6 }
 0xc87   :  { %5457 = vmatmul.f32.gmra.mxu2 %v9407_v35 }
 0xc88   :  { %v5015_v44 = vadd.f32 %v5014_v26, %v4953_v16 }
 0xc89   :  { %v5019_v3 = vpop.f32.mrf.mxu0 }
 0xc8a   :  { %v4866_v1 = vpop.f32.mrf.mxu2  ;;  %v9500_v14 = vadd.f32 %v5079_v49, %v5015_v44  ;;  %5523 = vmatmul.f32.gmra.mxu3 %v5301_v9 }
 0xc8b   :  { %v5085_v42 = vpop.f32.mrf.mxu1 }
 0xc8c   :  { %5595 = vmatmul.f32.gmra.mxu0 %v9396_v47 }
 0xc8d   :  { %v4956_v60 = vpop.f32.mrf.mxu3 }
 0xc8e   :  { %5649 = vmatmul.f32.gmra.mxu1 %v9396_v47  ;;  %v4957_v4 = vadd.f32 %v4956_v60, %v4866_v1 }
 0xc8f   :  { %5462 = vmatmul.f32.gmra.mxu2 %v9423_v19 }
 0xc90   :  { %v5020_v53 = vadd.f32 %v5019_v3, %v4957_v4 }
 0xc91   :  { %v5024_v0 = vpop.f32.mrf.mxu0 }
 0xc92   :  { %v4874_v22 = vpop.f32.mrf.mxu2  ;;  %v9507_v33 = vadd.f32 %v5085_v42, %v5020_v53  ;;  %5529 = vmatmul.f32.gmra.mxu3 %v5309_v12 }
 0xc93   :  { %v5091_v34 = vpop.f32.mrf.mxu1 }
 0xc94   :  { %5599 = vmatmul.f32.gmra.mxu0 %v9412_v17 }
 0xc95   :  { %v4960_v35 = vpop.f32.mrf.mxu3 }
 0xc96   :  { %5653 = vmatmul.f32.gmra.mxu1 %v9412_v17  ;;  %v4961_v61 = vadd.f32 %v4960_v35, %v4874_v22 }
 0xc97   :  { %5467 = vmatmul.f32.gmra.mxu2 %v9439_v13 }
 0xc98   :  { %v5025_v47 = vadd.f32 %v5024_v0, %v4961_v61 }
 0xc99   :  { %v5029_v28 = vpop.f32.mrf.mxu0 }
 0xc9a   :  { %v4882_v18 = vpop.f32.mrf.mxu2  ;;  %v9514_v52 = vadd.f32 %v5091_v34, %v5025_v47  ;;  %5535 = vmatmul.f32.gmra.mxu3 %v5317_v40 }
 0xc9b   :  { %v5097_v9 = vpop.f32.mrf.mxu1 }
 0xc9c   :  { %5603 = vmatmul.f32.gmra.mxu0 %v9428_v51 }
 0xc9d   :  { %v4964_v19 = vpop.f32.mrf.mxu3 }
 0xc9e   :  { %5657 = vmatmul.f32.gmra.mxu1 %v9428_v51  ;;  %v4965_v2 = vadd.f32 %v4964_v19, %v4882_v18 }
 0xc9f   :  { %5472 = vmatmul.f32.gmra.mxu2 %v9455_v46 }
 0xca0   :  { %v5030_v17 = vadd.f32 %v5029_v28, %v4965_v2 }
 0xca1   :  { %v5034_v37 = vpop.f32.mrf.mxu0 }
 0xca2   :  { %v4890_v50 = vpop.f32.mrf.mxu2  ;;  %v9521_v30 = vadd.f32 %v5097_v9, %v5030_v17  ;;  %5541 = vmatmul.f32.gmra.mxu3 %v5325_v48 }
 0xca3   :  { %v5103_v12 = vpop.f32.mrf.mxu1 }
 0xca4   :  { %5607 = vmatmul.f32.gmra.mxu0 %v9444_v58 }
 0xca5   :  { %v4968_v13 = vpop.f32.mrf.mxu3 }
 0xca6   :  { %5661 = vmatmul.f32.gmra.mxu1 %v9444_v58  ;;  %v4969_v21 = vadd.f32 %v4968_v13, %v4890_v50 }
 0xca7   :  { %5477 = vmatmul.f32.gmra.mxu2 %v9468_v41 }
 0xca8   :  { %v5035_v51 = vadd.f32 %v5034_v37, %v4969_v21 }
 0xca9   :  { %v5039_v57 = vpop.f32.mrf.mxu0 }
 0xcaa   :  { %v4898_v43 = vpop.f32.mrf.mxu2  ;;  %v9528_v45 = vadd.f32 %v5103_v12, %v5035_v51  ;;  %5547 = vmatmul.f32.gmra.mxu3 %v5333_v38 }
 0xcab   :  { %v5109_v40 = vpop.f32.mrf.mxu1 }
 0xcac   :  { %5611 = vmatmul.f32.gmra.mxu0 %v9460_v25 }
 0xcad   :  { %v4972_v46 = vpop.f32.mrf.mxu3 }
 0xcae   :  { %5665 = vmatmul.f32.gmra.mxu1 %v9460_v25  ;;  %v4973_v29 = vadd.f32 %v4972_v46, %v4898_v43 }
 0xcb0   :  { %v5040_v39 = vadd.f32 %v5039_v57, %v4973_v29  ;;  %v5680_v57 = vpop.permute.xlu2 %5679 }
 0xcb1   :  { %v5281_v7 = vpop.f32.mrf.mxu0 }
 0xcb2   :  { %v5145_v58 = vpop.f32.mrf.mxu2  ;;  %v9534_v56 = vadd.f32 %v5109_v40, %v5040_v39 }
 0xcb3   :  { %v5383_v48 = vpop.f32.mrf.mxu1  ;;  %v5146_v3 = vadd.f32 %v5145_v58, %v9486_v31 }
 0xcb5   :  { %v5199_v8 = vpop.f32.mrf.mxu3 }
 0xcb6   :  { %v5200_v53 = vadd.f32 %v5199_v8, %v5146_v3 }
 0xcb8   :  { %v5282_v0 = vadd.f32 %v5281_v7, %v5200_v53 }
 0xcb9   :  { %v5289_v62 = vpop.f32.mrf.mxu0 }
 0xcba   :  { %v5149_v63 = vpop.f32.mrf.mxu2  ;;  %v5384_v18 = vadd.f32 %v5383_v48, %v5282_v0 }
 0xcbb   :  { %v5387_v5 = vpop.f32.mrf.mxu1  ;;  %v5150_v35 = vadd.f32 %v5149_v63, %v9493_v32 }
 0xcbd   :  { %v5203_v27 = vpop.f32.mrf.mxu3 }
 0xcbe   :  { %v5204_v9 = vadd.f32 %v5203_v27, %v5150_v35 }
 0xcc0   :  { %v5290_v31 = vadd.f32 %v5289_v62, %v5204_v9 }
 0xcc1   :  { %v5297_v55 = vpop.f32.mrf.mxu0 }
 0xcc2   :  { %v5153_v41 = vpop.f32.mrf.mxu2  ;;  %v5388_v21 = vadd.f32 %v5387_v5, %v5290_v31  ;;  %v5685_v5 = vpop.permute.xlu0 %5684 }
 0xcc3   :  { %v5391_v38 = vpop.f32.mrf.mxu1  ;;  %v5154_v50 = vadd.f32 %v5153_v41, %v9500_v14 }
 0xcc5   :  { %v5207_v36 = vpop.f32.mrf.mxu3 }
 0xcc6   :  { %v5208_v51 = vadd.f32 %v5207_v36, %v5154_v50 }
 0xcc8   :  { %v5298_v39 = vadd.f32 %v5297_v55, %v5208_v51  ;;  %v5695_v51 = vpop.permute.xlu2 %5694 }
 0xcc9   :  { %v5305_v25 = vpop.f32.mrf.mxu0 }
 0xcca   :  { %v5157_v10 = vpop.f32.mrf.mxu2  ;;  %v5392_v14 = vadd.f32 %v5391_v38, %v5298_v39 }
 0xccb   :  { %v9536_v11 = vpop.f32.mrf.mxu1  ;;  %v5158_v48 = vadd.f32 %v5157_v10, %v9507_v33 }
 0xccd   :  { %v5211_v24 = vpop.f32.mrf.mxu3 }
 0xcce   :  { %v5212_v62 = vadd.f32 %v5211_v24, %v5158_v48  ;;  %v5700_v48 = vpop.permute.xlu0 %5699 }
 0xcd0   :  { %v5306_v0 = vadd.f32 %v5305_v25, %v5212_v62 }
 0xcd1   :  { %v9540_v59 = vpop.f32.mrf.mxu0 }
 0xcd2   :  { %v5161_v15 = vpop.f32.mrf.mxu2 }
 0xcd3   :  { %v9538_v54 = vpop.f32.mrf.mxu1  ;;  %v5162_v10 = vadd.f32 %v5161_v15, %v9514_v52 }
 0xcd5   :  { %v9542_v20 = vpop.f32.mrf.mxu3 }
 0xcd9   :  { %v9548_v26 = vpop.f32.mrf.mxu0 }
 0xcda   :  { %v9544_v6 = vpop.f32.mrf.mxu2 }
 0xcdb   :  { %v9546_v49 = vpop.f32.mrf.mxu1 }
 0xcdd   :  { %v9550_v23 = vpop.f32.mrf.mxu3 }
 0xce1   :  { %v9556_v1 = vpop.f32.mrf.mxu0 }
 0xce2   :  { %v9552_v16 = vpop.f32.mrf.mxu2 }
 0xce3   :  { %v9554_v44 = vpop.f32.mrf.mxu1 }
 0xce5   :  { %v9558_v42 = vpop.f32.mrf.mxu3 }
 0xce9   :  { %v9565_v22 = vpop.f32.mrf.mxu0 }
 0xcea   :  { %v9561_v60 = vpop.f32.mrf.mxu2 }
 0xceb   :  { %v9563_v4 = vpop.f32.mrf.mxu1 }
 0xced   :  { %v9567_v34 = vpop.f32.mrf.mxu3 }
 0xcf1   :  { %v5584_v28 = vpop.f32.mrf.mxu0 }
 0xcf2   :  { %v5443_v61 = vpop.f32.mrf.mxu2 }
 0xcf3   :  { %v5638_v47 = vpop.f32.mrf.mxu1  ;;  %v5444_v19 = vadd.f32 %v5443_v61, %v5384_v18  ;;  %v5396_v61 = vadd.f32 %v9536_v11, %v5306_v0  ;;  %v5166_v11 = vadd.f32 %v9544_v6, %v9521_v30 }
 0xcf5   :  { %v5506_v2 = vpop.f32.mrf.mxu3 }
 0xcf6   :  { %v5507_v17 = vadd.f32 %v5506_v2, %v5444_v19 }
 0xcf8   :  { %v5585_v12 = vadd.f32 %v5584_v28, %v5507_v17  ;;  %v5690_v28 = vpop.permute.xlu1 %5689 }
 0xcf9   :  { %v5588_v40 = vpop.f32.mrf.mxu0 }
 0xcfa   :  { %v5448_v37 = vpop.f32.mrf.mxu2  ;;  %v5639_v43 = vadd.f32 %v5638_v47, %v5585_v12  ;;  %v5216_v47 = vadd.f32 %v9542_v20, %v5162_v10 }
 0xcfb   :  { %v5642_v13 = vpop.f32.mrf.mxu1  ;;  %v5449_v46 = vadd.f32 %v5448_v37, %v5388_v21  ;;  %v5220_v37 = vadd.f32 %v9550_v23, %v5166_v11 }
 0xcfc   :  { %v5717_v32 = vadd.f32 %v5680_v57, %v5639_v43  ;;  %v5314_v52 = vadd.f32 %v9540_v59, %v5216_v47 }
 0xcfd   :  { %v5512_v29 = vpop.f32.mrf.mxu3  ;;  %v5322_v30 = vadd.f32 %v9548_v26, %v5220_v37 }
 0xcfe   :  { %6086 = vtanh.f32 %v5717_v32  ;;  %v5513_v58 = vadd.f32 %v5512_v29, %v5449_v46  ;;  %v5400_v12 = vadd.f32 %v9538_v54, %v5314_v52  ;;  %v5170_v54 = vadd.f32 %v9552_v16, %v9528_v45 }
 0xcff   :  { %v5404_v46 = vadd.f32 %v9546_v49, %v5322_v30  ;;  %v5174_v49 = vadd.f32 %v9561_v60, %v9534_v56 }
 0xd00   :  { %v5589_v7 = vadd.f32 %v5588_v40, %v5513_v58  ;;  %v5224_v29 = vadd.f32 %v9558_v42, %v5170_v54 }
 0xd01   :  { %v5592_v41 = vpop.f32.mrf.mxu0 }
 0xd02   :  { %v5453_v8 = vpop.f32.mrf.mxu2  ;;  %v5643_v27 = vadd.f32 %v5642_v13, %v5589_v7  ;;  %v5330_v45 = vadd.f32 %v9556_v1, %v5224_v29 }
 0xd03   :  { %v5646_v63 = vpop.f32.mrf.mxu1  ;;  %v5454_v53 = vadd.f32 %v5453_v8, %v5392_v14 }
 0xd04   :  { %v6087_v36 = vpop.eup %6086  ;;  %v5718_v3 = vadd.f32 %v5685_v5, %v5643_v27  ;;  %v5408_v27 = vadd.f32 %v9554_v44, %v5330_v45 }
 0xd05   :  { %5733 = vst.msk [vmem:[%s9644_s20] sm:$0xff] %vm307_vm2, %v6087_v36  ;;  %v5518_v55 = vpop.f32.mrf.mxu3  ;;  %v5705_v36 = vpop.permute.xlu1 %5704 }
 0xd06   :  { %6088 = vtanh.f32 %v5718_v3  ;;  %v5519_v33 = vadd.f32 %v5518_v55, %v5454_v53 }
 0xd08   :  { %v5593_v35 = vadd.f32 %v5592_v41, %v5519_v33  ;;  %v5228_v41 = vadd.f32 %v9567_v34, %v5174_v49 }
 0xd09   :  { %v5596_v9 = vpop.f32.mrf.mxu0 }
 0xd0a   :  { %v5458_v38 = vpop.f32.mrf.mxu2  ;;  %v5647_v18 = vadd.f32 %v5646_v63, %v5593_v35  ;;  %v5338_v56 = vadd.f32 %v9565_v22, %v5228_v41 }
 0xd0b   :  { %v5650_v24 = vpop.f32.mrf.mxu1  ;;  %v5459_v31 = vadd.f32 %v5458_v38, %v5396_v61  ;;  %v5710_v38 = vpop.permute.xlu2 %5709 }
 0xd0c   :  { %v6089_v19 = vpop.eup %6088  ;;  %v5719_v2 = vadd.f32 %v5690_v28, %v5647_v18  ;;  %v5412_v34 = vadd.f32 %v9563_v4, %v5338_v56 }
 0xd0d   :  { %5734 = vst.msk [vmem:[%s9644_s20 + $0x8] sm:$0xff] %vm307_vm2, %v6089_v19  ;;  %v5524_v25 = vpop.f32.mrf.mxu3 }
 0xd0e   :  { %6090 = vtanh.f32 %v5719_v2  ;;  %v5525_v15 = vadd.f32 %v5524_v25, %v5459_v31  ;;  %v5715_v31 = vpop.permute.xlu0 %5714 }
 0xd10   :  { %v5597_v20 = vadd.f32 %v5596_v9, %v5525_v15 }
 0xd11   :  { %v5600_v21 = vpop.f32.mrf.mxu0 }
 0xd12   :  { %v5463_v17 = vpop.f32.mrf.mxu2  ;;  %v5651_v13 = vadd.f32 %v5650_v24, %v5597_v20 }
 0xd13   :  { %v5654_v50 = vpop.f32.mrf.mxu1  ;;  %v5464_v57 = vadd.f32 %v5463_v17, %v5400_v12 }
 0xd14   :  { %v6091_v43 = vpop.eup %6090  ;;  %v5720_v40 = vadd.f32 %v5695_v51, %v5651_v13 }
 0xd15   :  { %5735 = vst.msk [vmem:[%s9644_s20 + $0x10] sm:$0xff] %vm307_vm2, %v6091_v43  ;;  %v5530_v59 = vpop.f32.mrf.mxu3 }
 0xd16   :  { %6092 = vtanh.f32 %v5720_v40  ;;  %v5531_v6 = vadd.f32 %v5530_v59, %v5464_v57 }
 0xd18   :  { %v5601_v23 = vadd.f32 %v5600_v21, %v5531_v6 }
 0xd19   :  { %v5604_v58 = vpop.f32.mrf.mxu0 }
 0xd1a   :  { %v5468_v32 = vpop.f32.mrf.mxu2  ;;  %v5655_v39 = vadd.f32 %v5654_v50, %v5601_v23 }
 0xd1b   :  { %v5658_v7 = vpop.f32.mrf.mxu1  ;;  %v5469_v14 = vadd.f32 %v5468_v32, %v5404_v46 }
 0xd1c   :  { %v6093_v8 = vpop.eup %6092  ;;  %v5721_v63 = vadd.f32 %v5700_v48, %v5655_v39 }
 0xd1d   :  { %5736 = vst.msk [vmem:[%s9644_s20 + $0x18] sm:$0xff] %vm307_vm2, %v6093_v8  ;;  %v5536_v26 = vpop.f32.mrf.mxu3 }
 0xd1e   :  { %6094 = vtanh.f32 %v5721_v63  ;;  %v5537_v16 = vadd.f32 %v5536_v26, %v5469_v14 }
 0xd20   :  { %v5605_v42 = vadd.f32 %v5604_v58, %v5537_v16 }
 0xd21   :  { %v5608_v3 = vpop.f32.mrf.mxu0 }
 0xd22   :  { %v5473_v62 = vpop.f32.mrf.mxu2  ;;  %v5659_v5 = vadd.f32 %v5658_v7, %v5605_v42 }
 0xd23   :  { %v5474_v0 = vadd.f32 %v5473_v62, %v5408_v27  ;;  %v5662_v33 = vpop.f32.mrf.mxu1 }
 0xd24   :  { %v6095_v53 = vpop.eup %6094  ;;  %v5722_v55 = vadd.f32 %v5705_v36, %v5659_v5 }
 0xd25   :  { %5737 = vst.msk [vmem:[%s9644_s20 + $0x20] sm:$0xff] %vm307_vm2, %v6095_v53  ;;  %v5542_v1 = vpop.f32.mrf.mxu3 }
 0xd26   :  { %6096 = vtanh.f32 %v5722_v55  ;;  %v5543_v60 = vadd.f32 %v5542_v1, %v5474_v0 }
 0xd28   :  { %v5609_v44 = vadd.f32 %v5608_v3, %v5543_v60 }
 0xd29   :  { %v5612_v9 = vpop.f32.mrf.mxu0 }
 0xd2a   :  { %v5478_v10 = vpop.f32.mrf.mxu2  ;;  %v5663_v35 = vadd.f32 %v5662_v33, %v5609_v44 }
 0xd2b   :  { %v5479_v47 = vadd.f32 %v5478_v10, %v5412_v34  ;;  %v5666_v28 = vpop.f32.mrf.mxu1 }
 0xd2c   :  { %v6097_v24 = vpop.eup %6096  ;;  %v5723_v61 = vadd.f32 %v5710_v38, %v5663_v35 }
 0xd2d   :  { %5738 = vst.msk [vmem:[%s9644_s20 + $0x28] sm:$0xff] %vm307_vm2, %v6097_v24  ;;  %v5548_v18 = vpop.f32.mrf.mxu3 }
 0xd2e   :  { %6098 = vtanh.f32 %v5723_v61  ;;  %v5549_v22 = vadd.f32 %v5548_v18, %v5479_v47 }
 0xd30   :  { %v5613_v19 = vadd.f32 %v5612_v9, %v5549_v22 }
 0xd32   :  { %v5667_v2 = vadd.f32 %v5666_v28, %v5613_v19 }
 0xd34   :  { %v6099_v25 = vpop.eup %6098  ;;  %v5724_v4 = vadd.f32 %v5715_v31, %v5667_v2 }
 0xd35   :  { %5739 = vst.msk [vmem:[%s9644_s20 + $0x30] sm:$0xff] %vm307_vm2, %v6099_v25 }
 0xd36   :  { %6100 = vtanh.f32 %v5724_v4 }
 0xd3c   :  { %v6101_v52 = vpop.eup %6100 }
 0xd3d   :  { %5740 = vst.msk [vmem:[%s9644_s20 + $0x38] sm:$0xff] %vm307_vm2, %v6101_v52 }

</bundles_post_ra>
